<compile_context>
chip_gen: v7x
topology: tpu7x:2x2x1
jax: 0.10.0
libtpu: 0.0.40
codegen_flags: <defaults>
</compile_context>

<pallas_src>
import functools

import jax
import jax.numpy as jnp
from jax.experimental import pallas as pl
from jax.experimental.pallas import tpu as pltpu


# ------------------------------ Pallas kernel ------------------------------ #

def fused_dqn_kernel(p1_ref, w1_ref, b1_ref, w2_ref, b2_ref,
                     wf1_ref, bf1_ref, wf2_ref, bf2_ref, wf3_ref, bf3_ref,
                     o_ref, y1_s, *, ow1, oh2, ow2):
    """Whole DQNetwork forward for one batch block, resident in VMEM.

    p1_ref : (P1, NB, 4*C)   bf16  conv1 im2col patches, position-major rows
    w1_ref : (4*C, 128)      bf16  conv1 weights (BN1 scale folded), taps merged
    w2_ref : (512, 256)      bf16  conv2 weights (BN2 scale folded), taps merged
    wf1_ref: (P2, 256, 512)  bf16  fc1 weights, split per conv2 output position
    wf3_ref: (256, 128)      bf16  fc3 weights zero-padded to 128 output lanes
    y1_s   : (P1, NB, 128)   bf16  conv1 activation scratch
    """
    P1, NB, _ = p1_ref.shape
    f32, bf16 = jnp.float32, jnp.bfloat16

    # ---- conv1 + BN1 + ReLU: one (NB, 4C) x (4C, 128) dot per output position
    w1 = w1_ref[...]
    b1 = b1_ref[...]
    for p in range(P1):
        v = jnp.dot(p1_ref[p], w1, preferred_element_type=f32)     # (NB, 128)
        y1_s[p] = jnp.maximum(v + b1, 0.0).astype(bf16)

    # ---- conv2 + BN2 + ReLU fused with the fc1 partial-K accumulation --------
    # For each conv2 output position, the 2x2 taps are lane-concatenated into a
    # (NB, 512) LHS; the resulting (NB, 256) activation is immediately
    # contracted against that position's fc1 weight slab (NHWC flatten order),
    # so no flatten buffer / per-position stores are needed.
    b2 = b2_ref[...]
    h1 = jnp.zeros((NB, wf1_ref.shape[2]), f32)
    for p in range(oh2 * ow2):
        hh, ww = p // ow2, p % ow2
        lhs = jnp.concatenate(
            [y1_s[(hh + dh) * ow1 + (ww + dw)]
             for dh in (0, 1) for dw in (0, 1)],
            axis=-1)                                                # (NB, 512) bf16
        y2p = jnp.dot(lhs, w2_ref[...], preferred_element_type=f32)
        y2p = jnp.maximum(y2p + b2, 0.0)                            # (NB, 256) f32
        h1 = h1 + jnp.dot(y2p.astype(bf16), wf1_ref[p],
                          preferred_element_type=f32)               # (NB, 512) f32

    # ---- fc1 bias/ReLU -> dropout(eval: identity) -> fc2 -> ReLU -> fc3 ------
    h1 = jnp.maximum(h1 + bf1_ref[...], 0.0)
    h2 = jnp.dot(h1.astype(bf16), wf2_ref[...], preferred_element_type=f32)
    h2 = jnp.maximum(h2 + bf2_ref[...], 0.0)
    o_ref[...] = (jnp.dot(h2.astype(bf16), wf3_ref[...],
                          preferred_element_type=f32) + bf3_ref[...])


def _const_spec(shape):
    """Whole-array block with a constant index map (weight stays VMEM-resident)."""
    zeros = (0,) * len(shape)
    return pl.BlockSpec(tuple(shape), lambda i, _z=zeros: _z)


def _pick_block_batch(n):
    """Largest MXU-friendly batch block that divides n; prefer >= 2 grid steps
    so the 'parallel' batch axis can shard across both v7x TensorCores."""
    for cand in (128, 64, 32, 16, 8):
        if n % cand == 0 and n // cand >= 2:
            return cand
    return n


@functools.partial(jax.jit, static_argnames=("action_size",))
def dqnetwork_forward(x_nchw, packed, action_size):
    # External API is NCHW (PyTorch convention); compute runs in NHWC order.
    x = jnp.transpose(x_nchw, (0, 2, 3, 1)).astype(jnp.float32)    # (N, H, W, C)
    N, H, W, C = x.shape
    OH1, OW1 = H - 1, W - 1            # conv1 output (2x2 kernel, stride 1)
    OH2, OW2 = H - 2, W - 2            # conv2 output
    P1, K1 = OH1 * OW1, 4 * C

    # conv1 im2col, lane-dense, position-major rows: (P1, N, 4*C), bf16 for MXU.
    taps = [x[:, dh:dh + OH1, dw:dw + OW1, :] for dh in (0, 1) for dw in (0, 1)]
    p1 = jnp.concatenate(taps, axis=-1).reshape(N, P1, K1)
    p1 = jnp.transpose(p1, (1, 0, 2)).astype(jnp.bfloat16)

    NB = _pick_block_batch(N)
    assert N % NB == 0 and (NB == N or NB % 8 == 0), (N, NB)

    C1 = packed["w_conv1"].shape[-1]   # 128 conv1 output channels
    OPAD = packed["w_fc3"].shape[-1]   # 128 lane-padded action dim

    kernel = functools.partial(fused_dqn_kernel, ow1=OW1, oh2=OH2, ow2=OW2)

    out = pl.pallas_call(
        kernel,
        out_shape=jax.ShapeDtypeStruct((N, OPAD), jnp.float32),
        grid_spec=pltpu.PrefetchScalarGridSpec(
            num_scalar_prefetch=0,
            grid=(N // NB,),
            in_specs=[
                pl.BlockSpec((P1, NB, K1), lambda i: (0, i, 0)),
                _const_spec(packed["w_conv1"].shape),
                _const_spec(packed["b_conv1"].shape),
                _const_spec(packed["w_conv2"].shape),
                _const_spec(packed["b_conv2"].shape),
                _const_spec(packed["w_fc1"].shape),
                _const_spec(packed["b_fc1"].shape),
                _const_spec(packed["w_fc2"].shape),
                _const_spec(packed["b_fc2"].shape),
                _const_spec(packed["w_fc3"].shape),
                _const_spec(packed["b_fc3"].shape),
            ],
            out_specs=pl.BlockSpec((NB, OPAD), lambda i: (i, 0)),
            scratch_shapes=[
                pltpu.VMEM((P1, NB, C1), jnp.bfloat16),   # conv1 activations
            ],
        ),
        compiler_params=pltpu.CompilerParams(
            dimension_semantics=("parallel",)),
    )(p1,
      packed["w_conv1"], packed["b_conv1"],
      packed["w_conv2"], packed["b_conv2"],
      packed["w_fc1"], packed["b_fc1"],
      packed["w_fc2"], packed["b_fc2"],
      packed["w_fc3"], packed["b_fc3"])
    return out[:, :action_size]


# ---------------------------- parameter handling ---------------------------- #

def init_params(key, in_channels, action_size, feature_size):
    """Parameters in a torch-like layout (conv rows = (dh, dw, c); fc1 rows =
    NCHW-flatten order; fc weights stored (in, out))."""
    ks = jax.random.split(key, 14)
    s = 0.05

    def rnd(k, shape):
        return (s * jax.random.normal(k, shape)).astype(jnp.float32)

    p = {}
    p["w_conv1"] = rnd(ks[0], (2 * 2 * in_channels, 128))
    p["b_conv1"] = rnd(ks[1], (128,))
    p["w_conv2"] = rnd(ks[2], (2 * 2 * 128, 256))
    p["b_conv2"] = rnd(ks[3], (256,))
    p["bn1_gamma"] = 1.0 + rnd(ks[4], (128,))
    p["bn1_beta"] = rnd(ks[5], (128,))
    p["bn2_gamma"] = 1.0 + rnd(ks[6], (256,))
    p["bn2_beta"] = rnd(ks[7], (256,))
    p["w_fc1"] = rnd(ks[8], (feature_size, 512))
    p["b_fc1"] = rnd(ks[9], (512,))
    p["w_fc2"] = rnd(ks[10], (512, 256))
    p["b_fc2"] = rnd(ks[11], (256,))
    p["w_fc3"] = rnd(ks[12], (256, action_size))
    p["b_fc3"] = rnd(ks[13], (action_size,))
    return p


def pack_params(params, *, eps=1e-5, out_pad=128):
    """One-time packing: fold BN scale into conv weights, split fc1 per conv2
    output position (NHWC order), pad fc3 to 128 output lanes, cast to bf16.

    TODO(synk): a real trained checkpoint must also fold bn running_mean/var
    here (this assumes freshly-initialized running stats), and true torch
    Conv2d weights ((out,in,kh,kw), channel-major rows) would need a row
    permutation to the (dh, dw, c) order used by this script's params.
    """
    f32, bf16 = jnp.float32, jnp.bfloat16
    s1 = params["bn1_gamma"] / jnp.sqrt(1.0 + eps)   # running_var=1, mean=0
    s2 = params["bn2_gamma"] / jnp.sqrt(1.0 + eps)

    w1 = (params["w_conv1"] * s1[None, :]).astype(bf16)            # (4*C, 128)
    w2 = (params["w_conv2"] * s2[None, :]).astype(bf16)            # (512, 256)
    b1 = (s1 * params["b_conv1"] + params["bn1_beta"]).reshape(1, -1).astype(f32)
    b2 = (s2 * params["b_conv2"] + params["bn2_beta"]).reshape(1, -1).astype(f32)

    # fc1: torch flatten is NCHW (row index = c*P2 + p); the kernel contracts
    # one conv2 output position p at a time -> regroup rows to (P2, C2, 512).
    F, H1 = params["w_fc1"].shape
    c2 = params["w_conv2"].shape[1]                                # 256
    p2 = F // c2
    wf1 = (params["w_fc1"].reshape(c2, p2, H1)
           .transpose(1, 0, 2).astype(bf16))                       # (P2, 256, 512)

    a = params["w_fc3"].shape[1]
    wf3 = jnp.zeros((params["w_fc3"].shape[0], out_pad), f32)
    wf3 = wf3.at[:, :a].set(params["w_fc3"]).astype(bf16)
    bf3 = jnp.zeros((1, out_pad), f32).at[0, :a].set(params["b_fc3"])

    return {
        "w_conv1": w1, "b_conv1": b1,
        "w_conv2": w2, "b_conv2": b2,
        "w_fc1": wf1, "b_fc1": params["b_fc1"].reshape(1, -1).astype(f32),
        "w_fc2": params["w_fc2"].astype(bf16),
        "b_fc2": params["b_fc2"].reshape(1, -1).astype(f32),
        "w_fc3": wf3, "b_fc3": bf3,
    }


# ------------------------------ pure-JAX check ------------------------------ #

def im2col(x_nhwc, kh, kw):
    N, H, W, C = x_nhwc.shape
    OH, OW = H - kh + 1, W - kw + 1
    cols = []
    for dh in range(kh):
        for dw in range(kw):
            cols.append(x_nhwc[:, dh:dh + OH, dw:dw + OW, :])
    p = jnp.concatenate(cols, axis=-1)
    return p.reshape(N * OH * OW, kh * kw * C), (N, OH, OW)


def reference_forward(x_nchw, params, eps=1e-5):
    """Torch-semantics reference on the ORIGINAL (torch-layout) params: NCHW
    flatten, torch-ordered fc1 rows, unpadded fc3.  Mirrors the kernel's
    bf16-at-MXU rounding so the comparison isolates layout/packing bugs."""
    f32 = jnp.float32
    bf = lambda a: a.astype(jnp.bfloat16).astype(f32)

    x = jnp.transpose(x_nchw, (0, 2, 3, 1)).astype(f32)            # NHWC
    N = x.shape[0]
    s1 = params["bn1_gamma"] / jnp.sqrt(1.0 + eps)
    s2 = params["bn2_gamma"] / jnp.sqrt(1.0 + eps)

    w1_eff = bf(params["w_conv1"] * s1[None, :])
    b1_eff = s1 * params["b_conv1"] + params["bn1_beta"]
    p1, (_, OH1, OW1) = im2col(bf(x), 2, 2)
    y1 = jnp.maximum(p1 @ w1_eff + b1_eff, 0.0).reshape(N, OH1, OW1, 128)

    w2_eff = bf(params["w_conv2"] * s2[None, :])
    b2_eff = s2 * params["b_conv2"] + params["bn2_beta"]
    p2, (_, OH2, OW2) = im2col(bf(y1), 2, 2)
    y2 = jnp.maximum(p2 @ w2_eff + b2_eff, 0.0).reshape(N, OH2, OW2, 256)

    flat = bf(jnp.transpose(y2, (0, 3, 1, 2)).reshape(N, -1))      # NCHW flatten
    h1 = jnp.maximum(flat @ bf(params["w_fc1"]) + params["b_fc1"], 0.0)
    h2 = jnp.maximum(bf(h1) @ bf(params["w_fc2"]) + params["b_fc2"], 0.0)
    return bf(h2) @ bf(params["w_fc3"]) + params["b_fc3"]


# ----------------------------------- main ----------------------------------- #

if __name__ == "__main__":
    key = jax.random.PRNGKey(0)

    # Small shapes: input_shape = (4, 6, 6), batch = 2, action_size = 8.
    N, C, H, W = 2, 4, 6, 6
    action_size = 8
    # conv1 (2x2/s1) -> 5x5, conv2 (2x2/s1) -> 4x4, feature_size = 256*4*4
    feature_size = 256 * (H - 2) * (W - 2)

    k_x, k_p = jax.random.split(key)
    x = jax.random.normal(k_x, (N, C, H, W), dtype=jnp.float32)    # NCHW like torch
    params = init_params(k_p, C, action_size, feature_size)
    packed = pack_params(params)   # BN fold + fc1 regroup + fc3 pad + bf16 cast

    out = dqnetwork_forward(x, packed, action_size)
    out = jax.block_until_ready(out)

    ref = jax.block_until_ready(reference_forward(x, params))
    assert out.shape == (N, action_size), out.shape
    assert jnp.allclose(out, ref, atol=2e-3, rtol=2e-3), (
        "mismatch vs reference, max abs err = %g"
        % float(jnp.max(jnp.abs(out - ref))))

    print("KERNEL_OK")
</pallas_src>

<mosaic_0001>
module attributes {stable_mosaic.version = 11 : i64} {
  func.func @fused_dqn_kernel(%arg0: i32, %arg1: memref<25x2x16xbf16, #tpu.memory_space<vmem>>, %arg2: memref<16x128xbf16, #tpu.memory_space<vmem>>, %arg3: memref<1x128xf32, #tpu.memory_space<vmem>>, %arg4: memref<512x256xbf16, #tpu.memory_space<vmem>>, %arg5: memref<1x256xf32, #tpu.memory_space<vmem>>, %arg6: memref<16x256x512xbf16, #tpu.memory_space<vmem>>, %arg7: memref<1x512xf32, #tpu.memory_space<vmem>>, %arg8: memref<512x256xbf16, #tpu.memory_space<vmem>>, %arg9: memref<1x256xf32, #tpu.memory_space<vmem>>, %arg10: memref<256x128xbf16, #tpu.memory_space<vmem>>, %arg11: memref<1x128xf32, #tpu.memory_space<vmem>>, %arg12: memref<2x128xf32, #tpu.memory_space<vmem>>, %arg13: memref<25x2x128xbf16, #tpu.memory_space<vmem>>) attributes {dimension_semantics = [#tpu.dimension_semantics<parallel>], iteration_bounds = array<i64: 1>, scalar_prefetch = 0 : i64, scratch_operands = 1 : i64, tpu.core_type = #tpu.core_type<tc>, window_params = [{transform_indices = @transform_0, window_bounds = array<i64: 25, 2, 16>}, {pipeline_mode = #tpu.pipeline_mode<synchronous>, transform_indices = @transform_1, window_bounds = array<i64: 16, 128>}, {pipeline_mode = #tpu.pipeline_mode<synchronous>, transform_indices = @transform_2, window_bounds = array<i64: 1, 128>}, {pipeline_mode = #tpu.pipeline_mode<synchronous>, transform_indices = @transform_3, window_bounds = array<i64: 512, 256>}, {pipeline_mode = #tpu.pipeline_mode<synchronous>, transform_indices = @transform_4, window_bounds = array<i64: 1, 256>}, {pipeline_mode = #tpu.pipeline_mode<synchronous>, transform_indices = @transform_5, window_bounds = array<i64: 16, 256, 512>}, {pipeline_mode = #tpu.pipeline_mode<synchronous>, transform_indices = @transform_6, window_bounds = array<i64: 1, 512>}, {pipeline_mode = #tpu.pipeline_mode<synchronous>, transform_indices = @transform_7, window_bounds = array<i64: 512, 256>}, {pipeline_mode = #tpu.pipeline_mode<synchronous>, transform_indices = @transform_8, window_bounds = array<i64: 1, 256>}, {pipeline_mode = #tpu.pipeline_mode<synchronous>, transform_indices = @transform_9, window_bounds = array<i64: 256, 128>}, {pipeline_mode = #tpu.pipeline_mode<synchronous>, transform_indices = @transform_10, window_bounds = array<i64: 1, 128>}, {transform_indices = @transform_11, window_bounds = array<i64: 2, 128>}]} {
    %c0 = arith.constant 0 : index
    %c0_0 = arith.constant 0 : index
    %0 = vector.load %arg2[%c0, %c0_0] : memref<16x128xbf16, #tpu.memory_space<vmem>>, vector<16x128xbf16>
    %c0_1 = arith.constant 0 : index
    %c0_2 = arith.constant 0 : index
    %1 = vector.load %arg3[%c0_1, %c0_2] : memref<1x128xf32, #tpu.memory_space<vmem>>, vector<1x128xf32>
    %c0_3 = arith.constant 0 : index
    %c0_4 = arith.constant 0 : index
    %c0_5 = arith.constant 0 : index
    %2 = vector.load %arg1[%c0_3, %c0_4, %c0_5] : memref<25x2x16xbf16, #tpu.memory_space<vmem>>, vector<1x2x16xbf16>
    %3 = vector.shape_cast %2 : vector<1x2x16xbf16> to vector<2x16xbf16>
    %cst = arith.constant dense<0.000000e+00> : vector<2x128xf32>
    %4 = tpu.matmul %3, %0, %cst {dimension_numbers = #tpu.dot_dimension_numbers<[1], [0], [0], [1], [0, 0, 1, 1], [], []>} : vector<2x16xbf16>, vector<16x128xbf16>, vector<2x128xf32> -> vector<2x128xf32>
    %5 = vector.broadcast %1 : vector<1x128xf32> to vector<2x128xf32>
    %6 = arith.addf %4, %5 : vector<2x128xf32>
    %cst_6 = arith.constant 0.000000e+00 : f32
    %7 = vector.broadcast %cst_6 : f32 to vector<2x128xf32>
    %8 = arith.maximumf %6, %7 : vector<2x128xf32>
    %9 = arith.truncf %8 : vector<2x128xf32> to vector<2x128xbf16>
    %c0_7 = arith.constant 0 : index
    %c0_8 = arith.constant 0 : index
    %c0_9 = arith.constant 0 : index
    %10 = vector.load %arg13[%c0_7, %c0_8, %c0_9] : memref<25x2x128xbf16, #tpu.memory_space<vmem>>, vector<1x2x128xbf16>
    %11 = vector.shape_cast %10 : vector<1x2x128xbf16> to vector<2x128xbf16>
    %12 = vector.shape_cast %9 : vector<2x128xbf16> to vector<1x2x128xbf16>
    tpu.vector_store %arg13[%c0_7, %c0_8, %c0_9], %12 {strides = array<i32>} : memref<25x2x128xbf16, #tpu.memory_space<vmem>>, vector<1x2x128xbf16>,
    %c1 = arith.constant 1 : index
    %c0_10 = arith.constant 0 : index
    %c0_11 = arith.constant 0 : index
    %13 = vector.load %arg1[%c1, %c0_10, %c0_11] : memref<25x2x16xbf16, #tpu.memory_space<vmem>>, vector<1x2x16xbf16>
    %14 = vector.shape_cast %13 : vector<1x2x16xbf16> to vector<2x16xbf16>
    %cst_12 = arith.constant dense<0.000000e+00> : vector<2x128xf32>
    %15 = tpu.matmul %14, %0, %cst_12 {dimension_numbers = #tpu.dot_dimension_numbers<[1], [0], [0], [1], [0, 0, 1, 1], [], []>} : vector<2x16xbf16>, vector<16x128xbf16>, vector<2x128xf32> -> vector<2x128xf32>
    %16 = vector.broadcast %1 : vector<1x128xf32> to vector<2x128xf32>
    %17 = arith.addf %15, %16 : vector<2x128xf32>
    %cst_13 = arith.constant 0.000000e+00 : f32
    %18 = vector.broadcast %cst_13 : f32 to vector<2x128xf32>
    %19 = arith.maximumf %17, %18 : vector<2x128xf32>
    %20 = arith.truncf %19 : vector<2x128xf32> to vector<2x128xbf16>
    %c1_14 = arith.constant 1 : index
    %c0_15 = arith.constant 0 : index
    %c0_16 = arith.constant 0 : index
    %21 = vector.load %arg13[%c1_14, %c0_15, %c0_16] : memref<25x2x128xbf16, #tpu.memory_space<vmem>>, vector<1x2x128xbf16>
    %22 = vector.shape_cast %21 : vector<1x2x128xbf16> to vector<2x128xbf16>
    %23 = vector.shape_cast %20 : vector<2x128xbf16> to vector<1x2x128xbf16>
    tpu.vector_store %arg13[%c1_14, %c0_15, %c0_16], %23 {strides = array<i32>} : memref<25x2x128xbf16, #tpu.memory_space<vmem>>, vector<1x2x128xbf16>,
    %c2 = arith.constant 2 : index
    %c0_17 = arith.constant 0 : index
    %c0_18 = arith.constant 0 : index
    %24 = vector.load %arg1[%c2, %c0_17, %c0_18] : memref<25x2x16xbf16, #tpu.memory_space<vmem>>, vector<1x2x16xbf16>
    %25 = vector.shape_cast %24 : vector<1x2x16xbf16> to vector<2x16xbf16>
    %cst_19 = arith.constant dense<0.000000e+00> : vector<2x128xf32>
    %26 = tpu.matmul %25, %0, %cst_19 {dimension_numbers = #tpu.dot_dimension_numbers<[1], [0], [0], [1], [0, 0, 1, 1], [], []>} : vector<2x16xbf16>, vector<16x128xbf16>, vector<2x128xf32> -> vector<2x128xf32>
    %27 = vector.broadcast %1 : vector<1x128xf32> to vector<2x128xf32>
    %28 = arith.addf %26, %27 : vector<2x128xf32>
    %cst_20 = arith.constant 0.000000e+00 : f32
    %29 = vector.broadcast %cst_20 : f32 to vector<2x128xf32>
    %30 = arith.maximumf %28, %29 : vector<2x128xf32>
    %31 = arith.truncf %30 : vector<2x128xf32> to vector<2x128xbf16>
    %c2_21 = arith.constant 2 : index
    %c0_22 = arith.constant 0 : index
    %c0_23 = arith.constant 0 : index
    %32 = vector.load %arg13[%c2_21, %c0_22, %c0_23] : memref<25x2x128xbf16, #tpu.memory_space<vmem>>, vector<1x2x128xbf16>
    %33 = vector.shape_cast %32 : vector<1x2x128xbf16> to vector<2x128xbf16>
    %34 = vector.shape_cast %31 : vector<2x128xbf16> to vector<1x2x128xbf16>
    tpu.vector_store %arg13[%c2_21, %c0_22, %c0_23], %34 {strides = array<i32>} : memref<25x2x128xbf16, #tpu.memory_space<vmem>>, vector<1x2x128xbf16>,
    %c3 = arith.constant 3 : index
    %c0_24 = arith.constant 0 : index
    %c0_25 = arith.constant 0 : index
    %35 = vector.load %arg1[%c3, %c0_24, %c0_25] : memref<25x2x16xbf16, #tpu.memory_space<vmem>>, vector<1x2x16xbf16>
    %36 = vector.shape_cast %35 : vector<1x2x16xbf16> to vector<2x16xbf16>
    %cst_26 = arith.constant dense<0.000000e+00> : vector<2x128xf32>
    %37 = tpu.matmul %36, %0, %cst_26 {dimension_numbers = #tpu.dot_dimension_numbers<[1], [0], [0], [1], [0, 0, 1, 1], [], []>} : vector<2x16xbf16>, vector<16x128xbf16>, vector<2x128xf32> -> vector<2x128xf32>
    %38 = vector.broadcast %1 : vector<1x128xf32> to vector<2x128xf32>
    %39 = arith.addf %37, %38 : vector<2x128xf32>
    %cst_27 = arith.constant 0.000000e+00 : f32
    %40 = vector.broadcast %cst_27 : f32 to vector<2x128xf32>
    %41 = arith.maximumf %39, %40 : vector<2x128xf32>
    %42 = arith.truncf %41 : vector<2x128xf32> to vector<2x128xbf16>
    %c3_28 = arith.constant 3 : index
    %c0_29 = arith.constant 0 : index
    %c0_30 = arith.constant 0 : index
    %43 = vector.load %arg13[%c3_28, %c0_29, %c0_30] : memref<25x2x128xbf16, #tpu.memory_space<vmem>>, vector<1x2x128xbf16>
    %44 = vector.shape_cast %43 : vector<1x2x128xbf16> to vector<2x128xbf16>
    %45 = vector.shape_cast %42 : vector<2x128xbf16> to vector<1x2x128xbf16>
    tpu.vector_store %arg13[%c3_28, %c0_29, %c0_30], %45 {strides = array<i32>} : memref<25x2x128xbf16, #tpu.memory_space<vmem>>, vector<1x2x128xbf16>,
    %c4 = arith.constant 4 : index
    %c0_31 = arith.constant 0 : index
    %c0_32 = arith.constant 0 : index
    %46 = vector.load %arg1[%c4, %c0_31, %c0_32] : memref<25x2x16xbf16, #tpu.memory_space<vmem>>, vector<1x2x16xbf16>
    %47 = vector.shape_cast %46 : vector<1x2x16xbf16> to vector<2x16xbf16>
    %cst_33 = arith.constant dense<0.000000e+00> : vector<2x128xf32>
    %48 = tpu.matmul %47, %0, %cst_33 {dimension_numbers = #tpu.dot_dimension_numbers<[1], [0], [0], [1], [0, 0, 1, 1], [], []>} : vector<2x16xbf16>, vector<16x128xbf16>, vector<2x128xf32> -> vector<2x128xf32>
    %49 = vector.broadcast %1 : vector<1x128xf32> to vector<2x128xf32>
    %50 = arith.addf %48, %49 : vector<2x128xf32>
    %cst_34 = arith.constant 0.000000e+00 : f32
    %51 = vector.broadcast %cst_34 : f32 to vector<2x128xf32>
    %52 = arith.maximumf %50, %51 : vector<2x128xf32>
    %53 = arith.truncf %52 : vector<2x128xf32> to vector<2x128xbf16>
    %c4_35 = arith.constant 4 : index
    %c0_36 = arith.constant 0 : index
    %c0_37 = arith.constant 0 : index
    %54 = vector.load %arg13[%c4_35, %c0_36, %c0_37] : memref<25x2x128xbf16, #tpu.memory_space<vmem>>, vector<1x2x128xbf16>
    %55 = vector.shape_cast %54 : vector<1x2x128xbf16> to vector<2x128xbf16>
    %56 = vector.shape_cast %53 : vector<2x128xbf16> to vector<1x2x128xbf16>
    tpu.vector_store %arg13[%c4_35, %c0_36, %c0_37], %56 {strides = array<i32>} : memref<25x2x128xbf16, #tpu.memory_space<vmem>>, vector<1x2x128xbf16>,
    %c5 = arith.constant 5 : index
    %c0_38 = arith.constant 0 : index
    %c0_39 = arith.constant 0 : index
    %57 = vector.load %arg1[%c5, %c0_38, %c0_39] : memref<25x2x16xbf16, #tpu.memory_space<vmem>>, vector<1x2x16xbf16>
    %58 = vector.shape_cast %57 : vector<1x2x16xbf16> to vector<2x16xbf16>
    %cst_40 = arith.constant dense<0.000000e+00> : vector<2x128xf32>
    %59 = tpu.matmul %58, %0, %cst_40 {dimension_numbers = #tpu.dot_dimension_numbers<[1], [0], [0], [1], [0, 0, 1, 1], [], []>} : vector<2x16xbf16>, vector<16x128xbf16>, vector<2x128xf32> -> vector<2x128xf32>
    %60 = vector.broadcast %1 : vector<1x128xf32> to vector<2x128xf32>
    %61 = arith.addf %59, %60 : vector<2x128xf32>
    %cst_41 = arith.constant 0.000000e+00 : f32
    %62 = vector.broadcast %cst_41 : f32 to vector<2x128xf32>
    %63 = arith.maximumf %61, %62 : vector<2x128xf32>
    %64 = arith.truncf %63 : vector<2x128xf32> to vector<2x128xbf16>
    %c5_42 = arith.constant 5 : index
    %c0_43 = arith.constant 0 : index
    %c0_44 = arith.constant 0 : index
    %65 = vector.load %arg13[%c5_42, %c0_43, %c0_44] : memref<25x2x128xbf16, #tpu.memory_space<vmem>>, vector<1x2x128xbf16>
    %66 = vector.shape_cast %65 : vector<1x2x128xbf16> to vector<2x128xbf16>
    %67 = vector.shape_cast %64 : vector<2x128xbf16> to vector<1x2x128xbf16>
    tpu.vector_store %arg13[%c5_42, %c0_43, %c0_44], %67 {strides = array<i32>} : memref<25x2x128xbf16, #tpu.memory_space<vmem>>, vector<1x2x128xbf16>,
    %c6 = arith.constant 6 : index
    %c0_45 = arith.constant 0 : index
    %c0_46 = arith.constant 0 : index
    %68 = vector.load %arg1[%c6, %c0_45, %c0_46] : memref<25x2x16xbf16, #tpu.memory_space<vmem>>, vector<1x2x16xbf16>
    %69 = vector.shape_cast %68 : vector<1x2x16xbf16> to vector<2x16xbf16>
    %cst_47 = arith.constant dense<0.000000e+00> : vector<2x128xf32>
    %70 = tpu.matmul %69, %0, %cst_47 {dimension_numbers = #tpu.dot_dimension_numbers<[1], [0], [0], [1], [0, 0, 1, 1], [], []>} : vector<2x16xbf16>, vector<16x128xbf16>, vector<2x128xf32> -> vector<2x128xf32>
    %71 = vector.broadcast %1 : vector<1x128xf32> to vector<2x128xf32>
    %72 = arith.addf %70, %71 : vector<2x128xf32>
    %cst_48 = arith.constant 0.000000e+00 : f32
    %73 = vector.broadcast %cst_48 : f32 to vector<2x128xf32>
    %74 = arith.maximumf %72, %73 : vector<2x128xf32>
    %75 = arith.truncf %74 : vector<2x128xf32> to vector<2x128xbf16>
    %c6_49 = arith.constant 6 : index
    %c0_50 = arith.constant 0 : index
    %c0_51 = arith.constant 0 : index
    %76 = vector.load %arg13[%c6_49, %c0_50, %c0_51] : memref<25x2x128xbf16, #tpu.memory_space<vmem>>, vector<1x2x128xbf16>
    %77 = vector.shape_cast %76 : vector<1x2x128xbf16> to vector<2x128xbf16>
    %78 = vector.shape_cast %75 : vector<2x128xbf16> to vector<1x2x128xbf16>
    tpu.vector_store %arg13[%c6_49, %c0_50, %c0_51], %78 {strides = array<i32>} : memref<25x2x128xbf16, #tpu.memory_space<vmem>>, vector<1x2x128xbf16>,
    %c7 = arith.constant 7 : index
    %c0_52 = arith.constant 0 : index
    %c0_53 = arith.constant 0 : index
    %79 = vector.load %arg1[%c7, %c0_52, %c0_53] : memref<25x2x16xbf16, #tpu.memory_space<vmem>>, vector<1x2x16xbf16>
    %80 = vector.shape_cast %79 : vector<1x2x16xbf16> to vector<2x16xbf16>
    %cst_54 = arith.constant dense<0.000000e+00> : vector<2x128xf32>
    %81 = tpu.matmul %80, %0, %cst_54 {dimension_numbers = #tpu.dot_dimension_numbers<[1], [0], [0], [1], [0, 0, 1, 1], [], []>} : vector<2x16xbf16>, vector<16x128xbf16>, vector<2x128xf32> -> vector<2x128xf32>
    %82 = vector.broadcast %1 : vector<1x128xf32> to vector<2x128xf32>
    %83 = arith.addf %81, %82 : vector<2x128xf32>
    %cst_55 = arith.constant 0.000000e+00 : f32
    %84 = vector.broadcast %cst_55 : f32 to vector<2x128xf32>
    %85 = arith.maximumf %83, %84 : vector<2x128xf32>
    %86 = arith.truncf %85 : vector<2x128xf32> to vector<2x128xbf16>
    %c7_56 = arith.constant 7 : index
    %c0_57 = arith.constant 0 : index
    %c0_58 = arith.constant 0 : index
    %87 = vector.load %arg13[%c7_56, %c0_57, %c0_58] : memref<25x2x128xbf16, #tpu.memory_space<vmem>>, vector<1x2x128xbf16>
    %88 = vector.shape_cast %87 : vector<1x2x128xbf16> to vector<2x128xbf16>
    %89 = vector.shape_cast %86 : vector<2x128xbf16> to vector<1x2x128xbf16>
    tpu.vector_store %arg13[%c7_56, %c0_57, %c0_58], %89 {strides = array<i32>} : memref<25x2x128xbf16, #tpu.memory_space<vmem>>, vector<1x2x128xbf16>,
    %c8 = arith.constant 8 : index
    %c0_59 = arith.constant 0 : index
    %c0_60 = arith.constant 0 : index
    %90 = vector.load %arg1[%c8, %c0_59, %c0_60] : memref<25x2x16xbf16, #tpu.memory_space<vmem>>, vector<1x2x16xbf16>
    %91 = vector.shape_cast %90 : vector<1x2x16xbf16> to vector<2x16xbf16>
    %cst_61 = arith.constant dense<0.000000e+00> : vector<2x128xf32>
    %92 = tpu.matmul %91, %0, %cst_61 {dimension_numbers = #tpu.dot_dimension_numbers<[1], [0], [0], [1], [0, 0, 1, 1], [], []>} : vector<2x16xbf16>, vector<16x128xbf16>, vector<2x128xf32> -> vector<2x128xf32>
    %93 = vector.broadcast %1 : vector<1x128xf32> to vector<2x128xf32>
    %94 = arith.addf %92, %93 : vector<2x128xf32>
    %cst_62 = arith.constant 0.000000e+00 : f32
    %95 = vector.broadcast %cst_62 : f32 to vector<2x128xf32>
    %96 = arith.maximumf %94, %95 : vector<2x128xf32>
    %97 = arith.truncf %96 : vector<2x128xf32> to vector<2x128xbf16>
    %c8_63 = arith.constant 8 : index
    %c0_64 = arith.constant 0 : index
    %c0_65 = arith.constant 0 : index
    %98 = vector.load %arg13[%c8_63, %c0_64, %c0_65] : memref<25x2x128xbf16, #tpu.memory_space<vmem>>, vector<1x2x128xbf16>
    %99 = vector.shape_cast %98 : vector<1x2x128xbf16> to vector<2x128xbf16>
    %100 = vector.shape_cast %97 : vector<2x128xbf16> to vector<1x2x128xbf16>
    tpu.vector_store %arg13[%c8_63, %c0_64, %c0_65], %100 {strides = array<i32>} : memref<25x2x128xbf16, #tpu.memory_space<vmem>>, vector<1x2x128xbf16>,
    %c9 = arith.constant 9 : index
    %c0_66 = arith.constant 0 : index
    %c0_67 = arith.constant 0 : index
    %101 = vector.load %arg1[%c9, %c0_66, %c0_67] : memref<25x2x16xbf16, #tpu.memory_space<vmem>>, vector<1x2x16xbf16>
    %102 = vector.shape_cast %101 : vector<1x2x16xbf16> to vector<2x16xbf16>
    %cst_68 = arith.constant dense<0.000000e+00> : vector<2x128xf32>
    %103 = tpu.matmul %102, %0, %cst_68 {dimension_numbers = #tpu.dot_dimension_numbers<[1], [0], [0], [1], [0, 0, 1, 1], [], []>} : vector<2x16xbf16>, vector<16x128xbf16>, vector<2x128xf32> -> vector<2x128xf32>
    %104 = vector.broadcast %1 : vector<1x128xf32> to vector<2x128xf32>
    %105 = arith.addf %103, %104 : vector<2x128xf32>
    %cst_69 = arith.constant 0.000000e+00 : f32
    %106 = vector.broadcast %cst_69 : f32 to vector<2x128xf32>
    %107 = arith.maximumf %105, %106 : vector<2x128xf32>
    %108 = arith.truncf %107 : vector<2x128xf32> to vector<2x128xbf16>
    %c9_70 = arith.constant 9 : index
    %c0_71 = arith.constant 0 : index
    %c0_72 = arith.constant 0 : index
    %109 = vector.load %arg13[%c9_70, %c0_71, %c0_72] : memref<25x2x128xbf16, #tpu.memory_space<vmem>>, vector<1x2x128xbf16>
    %110 = vector.shape_cast %109 : vector<1x2x128xbf16> to vector<2x128xbf16>
    %111 = vector.shape_cast %108 : vector<2x128xbf16> to vector<1x2x128xbf16>
    tpu.vector_store %arg13[%c9_70, %c0_71, %c0_72], %111 {strides = array<i32>} : memref<25x2x128xbf16, #tpu.memory_space<vmem>>, vector<1x2x128xbf16>,
    %c10 = arith.constant 10 : index
    %c0_73 = arith.constant 0 : index
    %c0_74 = arith.constant 0 : index
    %112 = vector.load %arg1[%c10, %c0_73, %c0_74] : memref<25x2x16xbf16, #tpu.memory_space<vmem>>, vector<1x2x16xbf16>
    %113 = vector.shape_cast %112 : vector<1x2x16xbf16> to vector<2x16xbf16>
    %cst_75 = arith.constant dense<0.000000e+00> : vector<2x128xf32>
    %114 = tpu.matmul %113, %0, %cst_75 {dimension_numbers = #tpu.dot_dimension_numbers<[1], [0], [0], [1], [0, 0, 1, 1], [], []>} : vector<2x16xbf16>, vector<16x128xbf16>, vector<2x128xf32> -> vector<2x128xf32>
    %115 = vector.broadcast %1 : vector<1x128xf32> to vector<2x128xf32>
    %116 = arith.addf %114, %115 : vector<2x128xf32>
    %cst_76 = arith.constant 0.000000e+00 : f32
    %117 = vector.broadcast %cst_76 : f32 to vector<2x128xf32>
    %118 = arith.maximumf %116, %117 : vector<2x128xf32>
    %119 = arith.truncf %118 : vector<2x128xf32> to vector<2x128xbf16>
    %c10_77 = arith.constant 10 : index
    %c0_78 = arith.constant 0 : index
    %c0_79 = arith.constant 0 : index
    %120 = vector.load %arg13[%c10_77, %c0_78, %c0_79] : memref<25x2x128xbf16, #tpu.memory_space<vmem>>, vector<1x2x128xbf16>
    %121 = vector.shape_cast %120 : vector<1x2x128xbf16> to vector<2x128xbf16>
    %122 = vector.shape_cast %119 : vector<2x128xbf16> to vector<1x2x128xbf16>
    tpu.vector_store %arg13[%c10_77, %c0_78, %c0_79], %122 {strides = array<i32>} : memref<25x2x128xbf16, #tpu.memory_space<vmem>>, vector<1x2x128xbf16>,
    %c11 = arith.constant 11 : index
    %c0_80 = arith.constant 0 : index
    %c0_81 = arith.constant 0 : index
    %123 = vector.load %arg1[%c11, %c0_80, %c0_81] : memref<25x2x16xbf16, #tpu.memory_space<vmem>>, vector<1x2x16xbf16>
    %124 = vector.shape_cast %123 : vector<1x2x16xbf16> to vector<2x16xbf16>
    %cst_82 = arith.constant dense<0.000000e+00> : vector<2x128xf32>
    %125 = tpu.matmul %124, %0, %cst_82 {dimension_numbers = #tpu.dot_dimension_numbers<[1], [0], [0], [1], [0, 0, 1, 1], [], []>} : vector<2x16xbf16>, vector<16x128xbf16>, vector<2x128xf32> -> vector<2x128xf32>
    %126 = vector.broadcast %1 : vector<1x128xf32> to vector<2x128xf32>
    %127 = arith.addf %125, %126 : vector<2x128xf32>
    %cst_83 = arith.constant 0.000000e+00 : f32
    %128 = vector.broadcast %cst_83 : f32 to vector<2x128xf32>
    %129 = arith.maximumf %127, %128 : vector<2x128xf32>
    %130 = arith.truncf %129 : vector<2x128xf32> to vector<2x128xbf16>
    %c11_84 = arith.constant 11 : index
    %c0_85 = arith.constant 0 : index
    %c0_86 = arith.constant 0 : index
    %131 = vector.load %arg13[%c11_84, %c0_85, %c0_86] : memref<25x2x128xbf16, #tpu.memory_space<vmem>>, vector<1x2x128xbf16>
    %132 = vector.shape_cast %131 : vector<1x2x128xbf16> to vector<2x128xbf16>
    %133 = vector.shape_cast %130 : vector<2x128xbf16> to vector<1x2x128xbf16>
    tpu.vector_store %arg13[%c11_84, %c0_85, %c0_86], %133 {strides = array<i32>} : memref<25x2x128xbf16, #tpu.memory_space<vmem>>, vector<1x2x128xbf16>,
    %c12 = arith.constant 12 : index
    %c0_87 = arith.constant 0 : index
    %c0_88 = arith.constant 0 : index
    %134 = vector.load %arg1[%c12, %c0_87, %c0_88] : memref<25x2x16xbf16, #tpu.memory_space<vmem>>, vector<1x2x16xbf16>
    %135 = vector.shape_cast %134 : vector<1x2x16xbf16> to vector<2x16xbf16>
    %cst_89 = arith.constant dense<0.000000e+00> : vector<2x128xf32>
    %136 = tpu.matmul %135, %0, %cst_89 {dimension_numbers = #tpu.dot_dimension_numbers<[1], [0], [0], [1], [0, 0, 1, 1], [], []>} : vector<2x16xbf16>, vector<16x128xbf16>, vector<2x128xf32> -> vector<2x128xf32>
    %137 = vector.broadcast %1 : vector<1x128xf32> to vector<2x128xf32>
    %138 = arith.addf %136, %137 : vector<2x128xf32>
    %cst_90 = arith.constant 0.000000e+00 : f32
    %139 = vector.broadcast %cst_90 : f32 to vector<2x128xf32>
    %140 = arith.maximumf %138, %139 : vector<2x128xf32>
    %141 = arith.truncf %140 : vector<2x128xf32> to vector<2x128xbf16>
    %c12_91 = arith.constant 12 : index
    %c0_92 = arith.constant 0 : index
    %c0_93 = arith.constant 0 : index
    %142 = vector.load %arg13[%c12_91, %c0_92, %c0_93] : memref<25x2x128xbf16, #tpu.memory_space<vmem>>, vector<1x2x128xbf16>
    %143 = vector.shape_cast %142 : vector<1x2x128xbf16> to vector<2x128xbf16>
    %144 = vector.shape_cast %141 : vector<2x128xbf16> to vector<1x2x128xbf16>
    tpu.vector_store %arg13[%c12_91, %c0_92, %c0_93], %144 {strides = array<i32>} : memref<25x2x128xbf16, #tpu.memory_space<vmem>>, vector<1x2x128xbf16>,
    %c13 = arith.constant 13 : index
    %c0_94 = arith.constant 0 : index
    %c0_95 = arith.constant 0 : index
    %145 = vector.load %arg1[%c13, %c0_94, %c0_95] : memref<25x2x16xbf16, #tpu.memory_space<vmem>>, vector<1x2x16xbf16>
    %146 = vector.shape_cast %145 : vector<1x2x16xbf16> to vector<2x16xbf16>
    %cst_96 = arith.constant dense<0.000000e+00> : vector<2x128xf32>
    %147 = tpu.matmul %146, %0, %cst_96 {dimension_numbers = #tpu.dot_dimension_numbers<[1], [0], [0], [1], [0, 0, 1, 1], [], []>} : vector<2x16xbf16>, vector<16x128xbf16>, vector<2x128xf32> -> vector<2x128xf32>
    %148 = vector.broadcast %1 : vector<1x128xf32> to vector<2x128xf32>
    %149 = arith.addf %147, %148 : vector<2x128xf32>
    %cst_97 = arith.constant 0.000000e+00 : f32
    %150 = vector.broadcast %cst_97 : f32 to vector<2x128xf32>
    %151 = arith.maximumf %149, %150 : vector<2x128xf32>
    %152 = arith.truncf %151 : vector<2x128xf32> to vector<2x128xbf16>
    %c13_98 = arith.constant 13 : index
    %c0_99 = arith.constant 0 : index
    %c0_100 = arith.constant 0 : index
    %153 = vector.load %arg13[%c13_98, %c0_99, %c0_100] : memref<25x2x128xbf16, #tpu.memory_space<vmem>>, vector<1x2x128xbf16>
    %154 = vector.shape_cast %153 : vector<1x2x128xbf16> to vector<2x128xbf16>
    %155 = vector.shape_cast %152 : vector<2x128xbf16> to vector<1x2x128xbf16>
    tpu.vector_store %arg13[%c13_98, %c0_99, %c0_100], %155 {strides = array<i32>} : memref<25x2x128xbf16, #tpu.memory_space<vmem>>, vector<1x2x128xbf16>,
    %c14 = arith.constant 14 : index
    %c0_101 = arith.constant 0 : index
    %c0_102 = arith.constant 0 : index
    %156 = vector.load %arg1[%c14, %c0_101, %c0_102] : memref<25x2x16xbf16, #tpu.memory_space<vmem>>, vector<1x2x16xbf16>
    %157 = vector.shape_cast %156 : vector<1x2x16xbf16> to vector<2x16xbf16>
    %cst_103 = arith.constant dense<0.000000e+00> : vector<2x128xf32>
    %158 = tpu.matmul %157, %0, %cst_103 {dimension_numbers = #tpu.dot_dimension_numbers<[1], [0], [0], [1], [0, 0, 1, 1], [], []>} : vector<2x16xbf16>, vector<16x128xbf16>, vector<2x128xf32> -> vector<2x128xf32>
    %159 = vector.broadcast %1 : vector<1x128xf32> to vector<2x128xf32>
    %160 = arith.addf %158, %159 : vector<2x128xf32>
    %cst_104 = arith.constant 0.000000e+00 : f32
    %161 = vector.broadcast %cst_104 : f32 to vector<2x128xf32>
    %162 = arith.maximumf %160, %161 : vector<2x128xf32>
    %163 = arith.truncf %162 : vector<2x128xf32> to vector<2x128xbf16>
    %c14_105 = arith.constant 14 : index
    %c0_106 = arith.constant 0 : index
    %c0_107 = arith.constant 0 : index
    %164 = vector.load %arg13[%c14_105, %c0_106, %c0_107] : memref<25x2x128xbf16, #tpu.memory_space<vmem>>, vector<1x2x128xbf16>
    %165 = vector.shape_cast %164 : vector<1x2x128xbf16> to vector<2x128xbf16>
    %166 = vector.shape_cast %163 : vector<2x128xbf16> to vector<1x2x128xbf16>
    tpu.vector_store %arg13[%c14_105, %c0_106, %c0_107], %166 {strides = array<i32>} : memref<25x2x128xbf16, #tpu.memory_space<vmem>>, vector<1x2x128xbf16>,
    %c15 = arith.constant 15 : index
    %c0_108 = arith.constant 0 : index
    %c0_109 = arith.constant 0 : index
    %167 = vector.load %arg1[%c15, %c0_108, %c0_109] : memref<25x2x16xbf16, #tpu.memory_space<vmem>>, vector<1x2x16xbf16>
    %168 = vector.shape_cast %167 : vector<1x2x16xbf16> to vector<2x16xbf16>
    %cst_110 = arith.constant dense<0.000000e+00> : vector<2x128xf32>
    %169 = tpu.matmul %168, %0, %cst_110 {dimension_numbers = #tpu.dot_dimension_numbers<[1], [0], [0], [1], [0, 0, 1, 1], [], []>} : vector<2x16xbf16>, vector<16x128xbf16>, vector<2x128xf32> -> vector<2x128xf32>
    %170 = vector.broadcast %1 : vector<1x128xf32> to vector<2x128xf32>
    %171 = arith.addf %169, %170 : vector<2x128xf32>
    %cst_111 = arith.constant 0.000000e+00 : f32
    %172 = vector.broadcast %cst_111 : f32 to vector<2x128xf32>
    %173 = arith.maximumf %171, %172 : vector<2x128xf32>
    %174 = arith.truncf %173 : vector<2x128xf32> to vector<2x128xbf16>
    %c15_112 = arith.constant 15 : index
    %c0_113 = arith.constant 0 : index
    %c0_114 = arith.constant 0 : index
    %175 = vector.load %arg13[%c15_112, %c0_113, %c0_114] : memref<25x2x128xbf16, #tpu.memory_space<vmem>>, vector<1x2x128xbf16>
    %176 = vector.shape_cast %175 : vector<1x2x128xbf16> to vector<2x128xbf16>
    %177 = vector.shape_cast %174 : vector<2x128xbf16> to vector<1x2x128xbf16>
    tpu.vector_store %arg13[%c15_112, %c0_113, %c0_114], %177 {strides = array<i32>} : memref<25x2x128xbf16, #tpu.memory_space<vmem>>, vector<1x2x128xbf16>,
    %c16 = arith.constant 16 : index
    %c0_115 = arith.constant 0 : index
    %c0_116 = arith.constant 0 : index
    %178 = vector.load %arg1[%c16, %c0_115, %c0_116] : memref<25x2x16xbf16, #tpu.memory_space<vmem>>, vector<1x2x16xbf16>
    %179 = vector.shape_cast %178 : vector<1x2x16xbf16> to vector<2x16xbf16>
    %cst_117 = arith.constant dense<0.000000e+00> : vector<2x128xf32>
    %180 = tpu.matmul %179, %0, %cst_117 {dimension_numbers = #tpu.dot_dimension_numbers<[1], [0], [0], [1], [0, 0, 1, 1], [], []>} : vector<2x16xbf16>, vector<16x128xbf16>, vector<2x128xf32> -> vector<2x128xf32>
    %181 = vector.broadcast %1 : vector<1x128xf32> to vector<2x128xf32>
    %182 = arith.addf %180, %181 : vector<2x128xf32>
    %cst_118 = arith.constant 0.000000e+00 : f32
    %183 = vector.broadcast %cst_118 : f32 to vector<2x128xf32>
    %184 = arith.maximumf %182, %183 : vector<2x128xf32>
    %185 = arith.truncf %184 : vector<2x128xf32> to vector<2x128xbf16>
    %c16_119 = arith.constant 16 : index
    %c0_120 = arith.constant 0 : index
    %c0_121 = arith.constant 0 : index
    %186 = vector.load %arg13[%c16_119, %c0_120, %c0_121] : memref<25x2x128xbf16, #tpu.memory_space<vmem>>, vector<1x2x128xbf16>
    %187 = vector.shape_cast %186 : vector<1x2x128xbf16> to vector<2x128xbf16>
    %188 = vector.shape_cast %185 : vector<2x128xbf16> to vector<1x2x128xbf16>
    tpu.vector_store %arg13[%c16_119, %c0_120, %c0_121], %188 {strides = array<i32>} : memref<25x2x128xbf16, #tpu.memory_space<vmem>>, vector<1x2x128xbf16>,
    %c17 = arith.constant 17 : index
    %c0_122 = arith.constant 0 : index
    %c0_123 = arith.constant 0 : index
    %189 = vector.load %arg1[%c17, %c0_122, %c0_123] : memref<25x2x16xbf16, #tpu.memory_space<vmem>>, vector<1x2x16xbf16>
    %190 = vector.shape_cast %189 : vector<1x2x16xbf16> to vector<2x16xbf16>
    %cst_124 = arith.constant dense<0.000000e+00> : vector<2x128xf32>
    %191 = tpu.matmul %190, %0, %cst_124 {dimension_numbers = #tpu.dot_dimension_numbers<[1], [0], [0], [1], [0, 0, 1, 1], [], []>} : vector<2x16xbf16>, vector<16x128xbf16>, vector<2x128xf32> -> vector<2x128xf32>
    %192 = vector.broadcast %1 : vector<1x128xf32> to vector<2x128xf32>
    %193 = arith.addf %191, %192 : vector<2x128xf32>
    %cst_125 = arith.constant 0.000000e+00 : f32
    %194 = vector.broadcast %cst_125 : f32 to vector<2x128xf32>
    %195 = arith.maximumf %193, %194 : vector<2x128xf32>
    %196 = arith.truncf %195 : vector<2x128xf32> to vector<2x128xbf16>
    %c17_126 = arith.constant 17 : index
    %c0_127 = arith.constant 0 : index
    %c0_128 = arith.constant 0 : index
    %197 = vector.load %arg13[%c17_126, %c0_127, %c0_128] : memref<25x2x128xbf16, #tpu.memory_space<vmem>>, vector<1x2x128xbf16>
    %198 = vector.shape_cast %197 : vector<1x2x128xbf16> to vector<2x128xbf16>
    %199 = vector.shape_cast %196 : vector<2x128xbf16> to vector<1x2x128xbf16>
    tpu.vector_store %arg13[%c17_126, %c0_127, %c0_128], %199 {strides = array<i32>} : memref<25x2x128xbf16, #tpu.memory_space<vmem>>, vector<1x2x128xbf16>,
    %c18 = arith.constant 18 : index
    %c0_129 = arith.constant 0 : index
    %c0_130 = arith.constant 0 : index
    %200 = vector.load %arg1[%c18, %c0_129, %c0_130] : memref<25x2x16xbf16, #tpu.memory_space<vmem>>, vector<1x2x16xbf16>
    %201 = vector.shape_cast %200 : vector<1x2x16xbf16> to vector<2x16xbf16>
    %cst_131 = arith.constant dense<0.000000e+00> : vector<2x128xf32>
    %202 = tpu.matmul %201, %0, %cst_131 {dimension_numbers = #tpu.dot_dimension_numbers<[1], [0], [0], [1], [0, 0, 1, 1], [], []>} : vector<2x16xbf16>, vector<16x128xbf16>, vector<2x128xf32> -> vector<2x128xf32>
    %203 = vector.broadcast %1 : vector<1x128xf32> to vector<2x128xf32>
    %204 = arith.addf %202, %203 : vector<2x128xf32>
    %cst_132 = arith.constant 0.000000e+00 : f32
    %205 = vector.broadcast %cst_132 : f32 to vector<2x128xf32>
    %206 = arith.maximumf %204, %205 : vector<2x128xf32>
    %207 = arith.truncf %206 : vector<2x128xf32> to vector<2x128xbf16>
    %c18_133 = arith.constant 18 : index
    %c0_134 = arith.constant 0 : index
    %c0_135 = arith.constant 0 : index
    %208 = vector.load %arg13[%c18_133, %c0_134, %c0_135] : memref<25x2x128xbf16, #tpu.memory_space<vmem>>, vector<1x2x128xbf16>
    %209 = vector.shape_cast %208 : vector<1x2x128xbf16> to vector<2x128xbf16>
    %210 = vector.shape_cast %207 : vector<2x128xbf16> to vector<1x2x128xbf16>
    tpu.vector_store %arg13[%c18_133, %c0_134, %c0_135], %210 {strides = array<i32>} : memref<25x2x128xbf16, #tpu.memory_space<vmem>>, vector<1x2x128xbf16>,
    %c19 = arith.constant 19 : index
    %c0_136 = arith.constant 0 : index
    %c0_137 = arith.constant 0 : index
    %211 = vector.load %arg1[%c19, %c0_136, %c0_137] : memref<25x2x16xbf16, #tpu.memory_space<vmem>>, vector<1x2x16xbf16>
    %212 = vector.shape_cast %211 : vector<1x2x16xbf16> to vector<2x16xbf16>
    %cst_138 = arith.constant dense<0.000000e+00> : vector<2x128xf32>
    %213 = tpu.matmul %212, %0, %cst_138 {dimension_numbers = #tpu.dot_dimension_numbers<[1], [0], [0], [1], [0, 0, 1, 1], [], []>} : vector<2x16xbf16>, vector<16x128xbf16>, vector<2x128xf32> -> vector<2x128xf32>
    %214 = vector.broadcast %1 : vector<1x128xf32> to vector<2x128xf32>
    %215 = arith.addf %213, %214 : vector<2x128xf32>
    %cst_139 = arith.constant 0.000000e+00 : f32
    %216 = vector.broadcast %cst_139 : f32 to vector<2x128xf32>
    %217 = arith.maximumf %215, %216 : vector<2x128xf32>
    %218 = arith.truncf %217 : vector<2x128xf32> to vector<2x128xbf16>
    %c19_140 = arith.constant 19 : index
    %c0_141 = arith.constant 0 : index
    %c0_142 = arith.constant 0 : index
    %219 = vector.load %arg13[%c19_140, %c0_141, %c0_142] : memref<25x2x128xbf16, #tpu.memory_space<vmem>>, vector<1x2x128xbf16>
    %220 = vector.shape_cast %219 : vector<1x2x128xbf16> to vector<2x128xbf16>
    %221 = vector.shape_cast %218 : vector<2x128xbf16> to vector<1x2x128xbf16>
    tpu.vector_store %arg13[%c19_140, %c0_141, %c0_142], %221 {strides = array<i32>} : memref<25x2x128xbf16, #tpu.memory_space<vmem>>, vector<1x2x128xbf16>,
    %c20 = arith.constant 20 : index
    %c0_143 = arith.constant 0 : index
    %c0_144 = arith.constant 0 : index
    %222 = vector.load %arg1[%c20, %c0_143, %c0_144] : memref<25x2x16xbf16, #tpu.memory_space<vmem>>, vector<1x2x16xbf16>
    %223 = vector.shape_cast %222 : vector<1x2x16xbf16> to vector<2x16xbf16>
    %cst_145 = arith.constant dense<0.000000e+00> : vector<2x128xf32>
    %224 = tpu.matmul %223, %0, %cst_145 {dimension_numbers = #tpu.dot_dimension_numbers<[1], [0], [0], [1], [0, 0, 1, 1], [], []>} : vector<2x16xbf16>, vector<16x128xbf16>, vector<2x128xf32> -> vector<2x128xf32>
    %225 = vector.broadcast %1 : vector<1x128xf32> to vector<2x128xf32>
    %226 = arith.addf %224, %225 : vector<2x128xf32>
    %cst_146 = arith.constant 0.000000e+00 : f32
    %227 = vector.broadcast %cst_146 : f32 to vector<2x128xf32>
    %228 = arith.maximumf %226, %227 : vector<2x128xf32>
    %229 = arith.truncf %228 : vector<2x128xf32> to vector<2x128xbf16>
    %c20_147 = arith.constant 20 : index
    %c0_148 = arith.constant 0 : index
    %c0_149 = arith.constant 0 : index
    %230 = vector.load %arg13[%c20_147, %c0_148, %c0_149] : memref<25x2x128xbf16, #tpu.memory_space<vmem>>, vector<1x2x128xbf16>
    %231 = vector.shape_cast %230 : vector<1x2x128xbf16> to vector<2x128xbf16>
    %232 = vector.shape_cast %229 : vector<2x128xbf16> to vector<1x2x128xbf16>
    tpu.vector_store %arg13[%c20_147, %c0_148, %c0_149], %232 {strides = array<i32>} : memref<25x2x128xbf16, #tpu.memory_space<vmem>>, vector<1x2x128xbf16>,
    %c21 = arith.constant 21 : index
    %c0_150 = arith.constant 0 : index
    %c0_151 = arith.constant 0 : index
    %233 = vector.load %arg1[%c21, %c0_150, %c0_151] : memref<25x2x16xbf16, #tpu.memory_space<vmem>>, vector<1x2x16xbf16>
    %234 = vector.shape_cast %233 : vector<1x2x16xbf16> to vector<2x16xbf16>
    %cst_152 = arith.constant dense<0.000000e+00> : vector<2x128xf32>
    %235 = tpu.matmul %234, %0, %cst_152 {dimension_numbers = #tpu.dot_dimension_numbers<[1], [0], [0], [1], [0, 0, 1, 1], [], []>} : vector<2x16xbf16>, vector<16x128xbf16>, vector<2x128xf32> -> vector<2x128xf32>
    %236 = vector.broadcast %1 : vector<1x128xf32> to vector<2x128xf32>
    %237 = arith.addf %235, %236 : vector<2x128xf32>
    %cst_153 = arith.constant 0.000000e+00 : f32
    %238 = vector.broadcast %cst_153 : f32 to vector<2x128xf32>
    %239 = arith.maximumf %237, %238 : vector<2x128xf32>
    %240 = arith.truncf %239 : vector<2x128xf32> to vector<2x128xbf16>
    %c21_154 = arith.constant 21 : index
    %c0_155 = arith.constant 0 : index
    %c0_156 = arith.constant 0 : index
    %241 = vector.load %arg13[%c21_154, %c0_155, %c0_156] : memref<25x2x128xbf16, #tpu.memory_space<vmem>>, vector<1x2x128xbf16>
    %242 = vector.shape_cast %241 : vector<1x2x128xbf16> to vector<2x128xbf16>
    %243 = vector.shape_cast %240 : vector<2x128xbf16> to vector<1x2x128xbf16>
    tpu.vector_store %arg13[%c21_154, %c0_155, %c0_156], %243 {strides = array<i32>} : memref<25x2x128xbf16, #tpu.memory_space<vmem>>, vector<1x2x128xbf16>,
    %c22 = arith.constant 22 : index
    %c0_157 = arith.constant 0 : index
    %c0_158 = arith.constant 0 : index
    %244 = vector.load %arg1[%c22, %c0_157, %c0_158] : memref<25x2x16xbf16, #tpu.memory_space<vmem>>, vector<1x2x16xbf16>
    %245 = vector.shape_cast %244 : vector<1x2x16xbf16> to vector<2x16xbf16>
    %cst_159 = arith.constant dense<0.000000e+00> : vector<2x128xf32>
    %246 = tpu.matmul %245, %0, %cst_159 {dimension_numbers = #tpu.dot_dimension_numbers<[1], [0], [0], [1], [0, 0, 1, 1], [], []>} : vector<2x16xbf16>, vector<16x128xbf16>, vector<2x128xf32> -> vector<2x128xf32>
    %247 = vector.broadcast %1 : vector<1x128xf32> to vector<2x128xf32>
    %248 = arith.addf %246, %247 : vector<2x128xf32>
    %cst_160 = arith.constant 0.000000e+00 : f32
    %249 = vector.broadcast %cst_160 : f32 to vector<2x128xf32>
    %250 = arith.maximumf %248, %249 : vector<2x128xf32>
    %251 = arith.truncf %250 : vector<2x128xf32> to vector<2x128xbf16>
    %c22_161 = arith.constant 22 : index
    %c0_162 = arith.constant 0 : index
    %c0_163 = arith.constant 0 : index
    %252 = vector.load %arg13[%c22_161, %c0_162, %c0_163] : memref<25x2x128xbf16, #tpu.memory_space<vmem>>, vector<1x2x128xbf16>
    %253 = vector.shape_cast %252 : vector<1x2x128xbf16> to vector<2x128xbf16>
    %254 = vector.shape_cast %251 : vector<2x128xbf16> to vector<1x2x128xbf16>
    tpu.vector_store %arg13[%c22_161, %c0_162, %c0_163], %254 {strides = array<i32>} : memref<25x2x128xbf16, #tpu.memory_space<vmem>>, vector<1x2x128xbf16>,
    %c23 = arith.constant 23 : index
    %c0_164 = arith.constant 0 : index
    %c0_165 = arith.constant 0 : index
    %255 = vector.load %arg1[%c23, %c0_164, %c0_165] : memref<25x2x16xbf16, #tpu.memory_space<vmem>>, vector<1x2x16xbf16>
    %256 = vector.shape_cast %255 : vector<1x2x16xbf16> to vector<2x16xbf16>
    %cst_166 = arith.constant dense<0.000000e+00> : vector<2x128xf32>
    %257 = tpu.matmul %256, %0, %cst_166 {dimension_numbers = #tpu.dot_dimension_numbers<[1], [0], [0], [1], [0, 0, 1, 1], [], []>} : vector<2x16xbf16>, vector<16x128xbf16>, vector<2x128xf32> -> vector<2x128xf32>
    %258 = vector.broadcast %1 : vector<1x128xf32> to vector<2x128xf32>
    %259 = arith.addf %257, %258 : vector<2x128xf32>
    %cst_167 = arith.constant 0.000000e+00 : f32
    %260 = vector.broadcast %cst_167 : f32 to vector<2x128xf32>
    %261 = arith.maximumf %259, %260 : vector<2x128xf32>
    %262 = arith.truncf %261 : vector<2x128xf32> to vector<2x128xbf16>
    %c23_168 = arith.constant 23 : index
    %c0_169 = arith.constant 0 : index
    %c0_170 = arith.constant 0 : index
    %263 = vector.load %arg13[%c23_168, %c0_169, %c0_170] : memref<25x2x128xbf16, #tpu.memory_space<vmem>>, vector<1x2x128xbf16>
    %264 = vector.shape_cast %263 : vector<1x2x128xbf16> to vector<2x128xbf16>
    %265 = vector.shape_cast %262 : vector<2x128xbf16> to vector<1x2x128xbf16>
    tpu.vector_store %arg13[%c23_168, %c0_169, %c0_170], %265 {strides = array<i32>} : memref<25x2x128xbf16, #tpu.memory_space<vmem>>, vector<1x2x128xbf16>,
    %c24 = arith.constant 24 : index
    %c0_171 = arith.constant 0 : index
    %c0_172 = arith.constant 0 : index
    %266 = vector.load %arg1[%c24, %c0_171, %c0_172] : memref<25x2x16xbf16, #tpu.memory_space<vmem>>, vector<1x2x16xbf16>
    %267 = vector.shape_cast %266 : vector<1x2x16xbf16> to vector<2x16xbf16>
    %cst_173 = arith.constant dense<0.000000e+00> : vector<2x128xf32>
    %268 = tpu.matmul %267, %0, %cst_173 {dimension_numbers = #tpu.dot_dimension_numbers<[1], [0], [0], [1], [0, 0, 1, 1], [], []>} : vector<2x16xbf16>, vector<16x128xbf16>, vector<2x128xf32> -> vector<2x128xf32>
    %269 = vector.broadcast %1 : vector<1x128xf32> to vector<2x128xf32>
    %270 = arith.addf %268, %269 : vector<2x128xf32>
    %cst_174 = arith.constant 0.000000e+00 : f32
    %271 = vector.broadcast %cst_174 : f32 to vector<2x128xf32>
    %272 = arith.maximumf %270, %271 : vector<2x128xf32>
    %273 = arith.truncf %272 : vector<2x128xf32> to vector<2x128xbf16>
    %c24_175 = arith.constant 24 : index
    %c0_176 = arith.constant 0 : index
    %c0_177 = arith.constant 0 : index
    %274 = vector.load %arg13[%c24_175, %c0_176, %c0_177] : memref<25x2x128xbf16, #tpu.memory_space<vmem>>, vector<1x2x128xbf16>
    %275 = vector.shape_cast %274 : vector<1x2x128xbf16> to vector<2x128xbf16>
    %276 = vector.shape_cast %273 : vector<2x128xbf16> to vector<1x2x128xbf16>
    tpu.vector_store %arg13[%c24_175, %c0_176, %c0_177], %276 {strides = array<i32>} : memref<25x2x128xbf16, #tpu.memory_space<vmem>>, vector<1x2x128xbf16>,
    %c0_178 = arith.constant 0 : index
    %c0_179 = arith.constant 0 : index
    %277 = vector.load %arg5[%c0_178, %c0_179] : memref<1x256xf32, #tpu.memory_space<vmem>>, vector<1x256xf32>
    %cst_180 = arith.constant 0.000000e+00 : f32
    %278 = vector.broadcast %cst_180 : f32 to vector<2x512xf32>
    %c0_181 = arith.constant 0 : index
    %c0_182 = arith.constant 0 : index
    %c0_183 = arith.constant 0 : index
    %279 = vector.load %arg13[%c0_181, %c0_182, %c0_183] : memref<25x2x128xbf16, #tpu.memory_space<vmem>>, vector<1x2x128xbf16>
    %280 = vector.shape_cast %279 : vector<1x2x128xbf16> to vector<2x128xbf16>
    %c1_184 = arith.constant 1 : index
    %c0_185 = arith.constant 0 : index
    %c0_186 = arith.constant 0 : index
    %281 = vector.load %arg13[%c1_184, %c0_185, %c0_186] : memref<25x2x128xbf16, #tpu.memory_space<vmem>>, vector<1x2x128xbf16>
    %282 = vector.shape_cast %281 : vector<1x2x128xbf16> to vector<2x128xbf16>
    %c5_187 = arith.constant 5 : index
    %c0_188 = arith.constant 0 : index
    %c0_189 = arith.constant 0 : index
    %283 = vector.load %arg13[%c5_187, %c0_188, %c0_189] : memref<25x2x128xbf16, #tpu.memory_space<vmem>>, vector<1x2x128xbf16>
    %284 = vector.shape_cast %283 : vector<1x2x128xbf16> to vector<2x128xbf16>
    %c6_190 = arith.constant 6 : index
    %c0_191 = arith.constant 0 : index
    %c0_192 = arith.constant 0 : index
    %285 = vector.load %arg13[%c6_190, %c0_191, %c0_192] : memref<25x2x128xbf16, #tpu.memory_space<vmem>>, vector<1x2x128xbf16>
    %286 = vector.shape_cast %285 : vector<1x2x128xbf16> to vector<2x128xbf16>
    %287 = tpu.concatenate %280, %282, %284, %286 in 1 : vector<2x128xbf16>, vector<2x128xbf16>, vector<2x128xbf16>, vector<2x128xbf16> -> vector<2x512xbf16>
    %c0_193 = arith.constant 0 : index
    %c0_194 = arith.constant 0 : index
    %288 = vector.load %arg4[%c0_193, %c0_194] : memref<512x256xbf16, #tpu.memory_space<vmem>>, vector<512x256xbf16>
    %cst_195 = arith.constant dense<0.000000e+00> : vector<2x256xf32>
    %289 = tpu.matmul %287, %288, %cst_195 {dimension_numbers = #tpu.dot_dimension_numbers<[1], [0], [0], [1], [0, 0, 1, 1], [], []>} : vector<2x512xbf16>, vector<512x256xbf16>, vector<2x256xf32> -> vector<2x256xf32>
    %290 = vector.broadcast %277 : vector<1x256xf32> to vector<2x256xf32>
    %291 = arith.addf %289, %290 : vector<2x256xf32>
    %cst_196 = arith.constant 0.000000e+00 : f32
    %292 = vector.broadcast %cst_196 : f32 to vector<2x256xf32>
    %293 = arith.maximumf %291, %292 : vector<2x256xf32>
    %294 = arith.truncf %293 : vector<2x256xf32> to vector<2x256xbf16>
    %c0_197 = arith.constant 0 : index
    %c0_198 = arith.constant 0 : index
    %c0_199 = arith.constant 0 : index
    %295 = vector.load %arg6[%c0_197, %c0_198, %c0_199] : memref<16x256x512xbf16, #tpu.memory_space<vmem>>, vector<1x256x512xbf16>
    %296 = vector.shape_cast %295 : vector<1x256x512xbf16> to vector<256x512xbf16>
    %cst_200 = arith.constant dense<0.000000e+00> : vector<2x512xf32>
    %297 = tpu.matmul %294, %296, %cst_200 {dimension_numbers = #tpu.dot_dimension_numbers<[1], [0], [0], [1], [0, 0, 1, 1], [], []>} : vector<2x256xbf16>, vector<256x512xbf16>, vector<2x512xf32> -> vector<2x512xf32>
    %298 = arith.addf %278, %297 : vector<2x512xf32>
    %c1_201 = arith.constant 1 : index
    %c0_202 = arith.constant 0 : index
    %c0_203 = arith.constant 0 : index
    %299 = vector.load %arg13[%c1_201, %c0_202, %c0_203] : memref<25x2x128xbf16, #tpu.memory_space<vmem>>, vector<1x2x128xbf16>
    %300 = vector.shape_cast %299 : vector<1x2x128xbf16> to vector<2x128xbf16>
    %c2_204 = arith.constant 2 : index
    %c0_205 = arith.constant 0 : index
    %c0_206 = arith.constant 0 : index
    %301 = vector.load %arg13[%c2_204, %c0_205, %c0_206] : memref<25x2x128xbf16, #tpu.memory_space<vmem>>, vector<1x2x128xbf16>
    %302 = vector.shape_cast %301 : vector<1x2x128xbf16> to vector<2x128xbf16>
    %c6_207 = arith.constant 6 : index
    %c0_208 = arith.constant 0 : index
    %c0_209 = arith.constant 0 : index
    %303 = vector.load %arg13[%c6_207, %c0_208, %c0_209] : memref<25x2x128xbf16, #tpu.memory_space<vmem>>, vector<1x2x128xbf16>
    %304 = vector.shape_cast %303 : vector<1x2x128xbf16> to vector<2x128xbf16>
    %c7_210 = arith.constant 7 : index
    %c0_211 = arith.constant 0 : index
    %c0_212 = arith.constant 0 : index
    %305 = vector.load %arg13[%c7_210, %c0_211, %c0_212] : memref<25x2x128xbf16, #tpu.memory_space<vmem>>, vector<1x2x128xbf16>
    %306 = vector.shape_cast %305 : vector<1x2x128xbf16> to vector<2x128xbf16>
    %307 = tpu.concatenate %300, %302, %304, %306 in 1 : vector<2x128xbf16>, vector<2x128xbf16>, vector<2x128xbf16>, vector<2x128xbf16> -> vector<2x512xbf16>
    %c0_213 = arith.constant 0 : index
    %c0_214 = arith.constant 0 : index
    %308 = vector.load %arg4[%c0_213, %c0_214] : memref<512x256xbf16, #tpu.memory_space<vmem>>, vector<512x256xbf16>
    %cst_215 = arith.constant dense<0.000000e+00> : vector<2x256xf32>
    %309 = tpu.matmul %307, %308, %cst_215 {dimension_numbers = #tpu.dot_dimension_numbers<[1], [0], [0], [1], [0, 0, 1, 1], [], []>} : vector<2x512xbf16>, vector<512x256xbf16>, vector<2x256xf32> -> vector<2x256xf32>
    %310 = vector.broadcast %277 : vector<1x256xf32> to vector<2x256xf32>
    %311 = arith.addf %309, %310 : vector<2x256xf32>
    %cst_216 = arith.constant 0.000000e+00 : f32
    %312 = vector.broadcast %cst_216 : f32 to vector<2x256xf32>
    %313 = arith.maximumf %311, %312 : vector<2x256xf32>
    %314 = arith.truncf %313 : vector<2x256xf32> to vector<2x256xbf16>
    %c1_217 = arith.constant 1 : index
    %c0_218 = arith.constant 0 : index
    %c0_219 = arith.constant 0 : index
    %315 = vector.load %arg6[%c1_217, %c0_218, %c0_219] : memref<16x256x512xbf16, #tpu.memory_space<vmem>>, vector<1x256x512xbf16>
    %316 = vector.shape_cast %315 : vector<1x256x512xbf16> to vector<256x512xbf16>
    %cst_220 = arith.constant dense<0.000000e+00> : vector<2x512xf32>
    %317 = tpu.matmul %314, %316, %cst_220 {dimension_numbers = #tpu.dot_dimension_numbers<[1], [0], [0], [1], [0, 0, 1, 1], [], []>} : vector<2x256xbf16>, vector<256x512xbf16>, vector<2x512xf32> -> vector<2x512xf32>
    %318 = arith.addf %298, %317 : vector<2x512xf32>
    %c2_221 = arith.constant 2 : index
    %c0_222 = arith.constant 0 : index
    %c0_223 = arith.constant 0 : index
    %319 = vector.load %arg13[%c2_221, %c0_222, %c0_223] : memref<25x2x128xbf16, #tpu.memory_space<vmem>>, vector<1x2x128xbf16>
    %320 = vector.shape_cast %319 : vector<1x2x128xbf16> to vector<2x128xbf16>
    %c3_224 = arith.constant 3 : index
    %c0_225 = arith.constant 0 : index
    %c0_226 = arith.constant 0 : index
    %321 = vector.load %arg13[%c3_224, %c0_225, %c0_226] : memref<25x2x128xbf16, #tpu.memory_space<vmem>>, vector<1x2x128xbf16>
    %322 = vector.shape_cast %321 : vector<1x2x128xbf16> to vector<2x128xbf16>
    %c7_227 = arith.constant 7 : index
    %c0_228 = arith.constant 0 : index
    %c0_229 = arith.constant 0 : index
    %323 = vector.load %arg13[%c7_227, %c0_228, %c0_229] : memref<25x2x128xbf16, #tpu.memory_space<vmem>>, vector<1x2x128xbf16>
    %324 = vector.shape_cast %323 : vector<1x2x128xbf16> to vector<2x128xbf16>
    %c8_230 = arith.constant 8 : index
    %c0_231 = arith.constant 0 : index
    %c0_232 = arith.constant 0 : index
    %325 = vector.load %arg13[%c8_230, %c0_231, %c0_232] : memref<25x2x128xbf16, #tpu.memory_space<vmem>>, vector<1x2x128xbf16>
    %326 = vector.shape_cast %325 : vector<1x2x128xbf16> to vector<2x128xbf16>
    %327 = tpu.concatenate %320, %322, %324, %326 in 1 : vector<2x128xbf16>, vector<2x128xbf16>, vector<2x128xbf16>, vector<2x128xbf16> -> vector<2x512xbf16>
    %c0_233 = arith.constant 0 : index
    %c0_234 = arith.constant 0 : index
    %328 = vector.load %arg4[%c0_233, %c0_234] : memref<512x256xbf16, #tpu.memory_space<vmem>>, vector<512x256xbf16>
    %cst_235 = arith.constant dense<0.000000e+00> : vector<2x256xf32>
    %329 = tpu.matmul %327, %328, %cst_235 {dimension_numbers = #tpu.dot_dimension_numbers<[1], [0], [0], [1], [0, 0, 1, 1], [], []>} : vector<2x512xbf16>, vector<512x256xbf16>, vector<2x256xf32> -> vector<2x256xf32>
    %330 = vector.broadcast %277 : vector<1x256xf32> to vector<2x256xf32>
    %331 = arith.addf %329, %330 : vector<2x256xf32>
    %cst_236 = arith.constant 0.000000e+00 : f32
    %332 = vector.broadcast %cst_236 : f32 to vector<2x256xf32>
    %333 = arith.maximumf %331, %332 : vector<2x256xf32>
    %334 = arith.truncf %333 : vector<2x256xf32> to vector<2x256xbf16>
    %c2_237 = arith.constant 2 : index
    %c0_238 = arith.constant 0 : index
    %c0_239 = arith.constant 0 : index
    %335 = vector.load %arg6[%c2_237, %c0_238, %c0_239] : memref<16x256x512xbf16, #tpu.memory_space<vmem>>, vector<1x256x512xbf16>
    %336 = vector.shape_cast %335 : vector<1x256x512xbf16> to vector<256x512xbf16>
    %cst_240 = arith.constant dense<0.000000e+00> : vector<2x512xf32>
    %337 = tpu.matmul %334, %336, %cst_240 {dimension_numbers = #tpu.dot_dimension_numbers<[1], [0], [0], [1], [0, 0, 1, 1], [], []>} : vector<2x256xbf16>, vector<256x512xbf16>, vector<2x512xf32> -> vector<2x512xf32>
    %338 = arith.addf %318, %337 : vector<2x512xf32>
    %c3_241 = arith.constant 3 : index
    %c0_242 = arith.constant 0 : index
    %c0_243 = arith.constant 0 : index
    %339 = vector.load %arg13[%c3_241, %c0_242, %c0_243] : memref<25x2x128xbf16, #tpu.memory_space<vmem>>, vector<1x2x128xbf16>
    %340 = vector.shape_cast %339 : vector<1x2x128xbf16> to vector<2x128xbf16>
    %c4_244 = arith.constant 4 : index
    %c0_245 = arith.constant 0 : index
    %c0_246 = arith.constant 0 : index
    %341 = vector.load %arg13[%c4_244, %c0_245, %c0_246] : memref<25x2x128xbf16, #tpu.memory_space<vmem>>, vector<1x2x128xbf16>
    %342 = vector.shape_cast %341 : vector<1x2x128xbf16> to vector<2x128xbf16>
    %c8_247 = arith.constant 8 : index
    %c0_248 = arith.constant 0 : index
    %c0_249 = arith.constant 0 : index
    %343 = vector.load %arg13[%c8_247, %c0_248, %c0_249] : memref<25x2x128xbf16, #tpu.memory_space<vmem>>, vector<1x2x128xbf16>
    %344 = vector.shape_cast %343 : vector<1x2x128xbf16> to vector<2x128xbf16>
    %c9_250 = arith.constant 9 : index
    %c0_251 = arith.constant 0 : index
    %c0_252 = arith.constant 0 : index
    %345 = vector.load %arg13[%c9_250, %c0_251, %c0_252] : memref<25x2x128xbf16, #tpu.memory_space<vmem>>, vector<1x2x128xbf16>
    %346 = vector.shape_cast %345 : vector<1x2x128xbf16> to vector<2x128xbf16>
    %347 = tpu.concatenate %340, %342, %344, %346 in 1 : vector<2x128xbf16>, vector<2x128xbf16>, vector<2x128xbf16>, vector<2x128xbf16> -> vector<2x512xbf16>
    %c0_253 = arith.constant 0 : index
    %c0_254 = arith.constant 0 : index
    %348 = vector.load %arg4[%c0_253, %c0_254] : memref<512x256xbf16, #tpu.memory_space<vmem>>, vector<512x256xbf16>
    %cst_255 = arith.constant dense<0.000000e+00> : vector<2x256xf32>
    %349 = tpu.matmul %347, %348, %cst_255 {dimension_numbers = #tpu.dot_dimension_numbers<[1], [0], [0], [1], [0, 0, 1, 1], [], []>} : vector<2x512xbf16>, vector<512x256xbf16>, vector<2x256xf32> -> vector<2x256xf32>
    %350 = vector.broadcast %277 : vector<1x256xf32> to vector<2x256xf32>
    %351 = arith.addf %349, %350 : vector<2x256xf32>
    %cst_256 = arith.constant 0.000000e+00 : f32
    %352 = vector.broadcast %cst_256 : f32 to vector<2x256xf32>
    %353 = arith.maximumf %351, %352 : vector<2x256xf32>
    %354 = arith.truncf %353 : vector<2x256xf32> to vector<2x256xbf16>
    %c3_257 = arith.constant 3 : index
    %c0_258 = arith.constant 0 : index
    %c0_259 = arith.constant 0 : index
    %355 = vector.load %arg6[%c3_257, %c0_258, %c0_259] : memref<16x256x512xbf16, #tpu.memory_space<vmem>>, vector<1x256x512xbf16>
    %356 = vector.shape_cast %355 : vector<1x256x512xbf16> to vector<256x512xbf16>
    %cst_260 = arith.constant dense<0.000000e+00> : vector<2x512xf32>
    %357 = tpu.matmul %354, %356, %cst_260 {dimension_numbers = #tpu.dot_dimension_numbers<[1], [0], [0], [1], [0, 0, 1, 1], [], []>} : vector<2x256xbf16>, vector<256x512xbf16>, vector<2x512xf32> -> vector<2x512xf32>
    %358 = arith.addf %338, %357 : vector<2x512xf32>
    %c5_261 = arith.constant 5 : index
    %c0_262 = arith.constant 0 : index
    %c0_263 = arith.constant 0 : index
    %359 = vector.load %arg13[%c5_261, %c0_262, %c0_263] : memref<25x2x128xbf16, #tpu.memory_space<vmem>>, vector<1x2x128xbf16>
    %360 = vector.shape_cast %359 : vector<1x2x128xbf16> to vector<2x128xbf16>
    %c6_264 = arith.constant 6 : index
    %c0_265 = arith.constant 0 : index
    %c0_266 = arith.constant 0 : index
    %361 = vector.load %arg13[%c6_264, %c0_265, %c0_266] : memref<25x2x128xbf16, #tpu.memory_space<vmem>>, vector<1x2x128xbf16>
    %362 = vector.shape_cast %361 : vector<1x2x128xbf16> to vector<2x128xbf16>
    %c10_267 = arith.constant 10 : index
    %c0_268 = arith.constant 0 : index
    %c0_269 = arith.constant 0 : index
    %363 = vector.load %arg13[%c10_267, %c0_268, %c0_269] : memref<25x2x128xbf16, #tpu.memory_space<vmem>>, vector<1x2x128xbf16>
    %364 = vector.shape_cast %363 : vector<1x2x128xbf16> to vector<2x128xbf16>
    %c11_270 = arith.constant 11 : index
    %c0_271 = arith.constant 0 : index
    %c0_272 = arith.constant 0 : index
    %365 = vector.load %arg13[%c11_270, %c0_271, %c0_272] : memref<25x2x128xbf16, #tpu.memory_space<vmem>>, vector<1x2x128xbf16>
    %366 = vector.shape_cast %365 : vector<1x2x128xbf16> to vector<2x128xbf16>
    %367 = tpu.concatenate %360, %362, %364, %366 in 1 : vector<2x128xbf16>, vector<2x128xbf16>, vector<2x128xbf16>, vector<2x128xbf16> -> vector<2x512xbf16>
    %c0_273 = arith.constant 0 : index
    %c0_274 = arith.constant 0 : index
    %368 = vector.load %arg4[%c0_273, %c0_274] : memref<512x256xbf16, #tpu.memory_space<vmem>>, vector<512x256xbf16>
    %cst_275 = arith.constant dense<0.000000e+00> : vector<2x256xf32>
    %369 = tpu.matmul %367, %368, %cst_275 {dimension_numbers = #tpu.dot_dimension_numbers<[1], [0], [0], [1], [0, 0, 1, 1], [], []>} : vector<2x512xbf16>, vector<512x256xbf16>, vector<2x256xf32> -> vector<2x256xf32>
    %370 = vector.broadcast %277 : vector<1x256xf32> to vector<2x256xf32>
    %371 = arith.addf %369, %370 : vector<2x256xf32>
    %cst_276 = arith.constant 0.000000e+00 : f32
    %372 = vector.broadcast %cst_276 : f32 to vector<2x256xf32>
    %373 = arith.maximumf %371, %372 : vector<2x256xf32>
    %374 = arith.truncf %373 : vector<2x256xf32> to vector<2x256xbf16>
    %c4_277 = arith.constant 4 : index
    %c0_278 = arith.constant 0 : index
    %c0_279 = arith.constant 0 : index
    %375 = vector.load %arg6[%c4_277, %c0_278, %c0_279] : memref<16x256x512xbf16, #tpu.memory_space<vmem>>, vector<1x256x512xbf16>
    %376 = vector.shape_cast %375 : vector<1x256x512xbf16> to vector<256x512xbf16>
    %cst_280 = arith.constant dense<0.000000e+00> : vector<2x512xf32>
    %377 = tpu.matmul %374, %376, %cst_280 {dimension_numbers = #tpu.dot_dimension_numbers<[1], [0], [0], [1], [0, 0, 1, 1], [], []>} : vector<2x256xbf16>, vector<256x512xbf16>, vector<2x512xf32> -> vector<2x512xf32>
    %378 = arith.addf %358, %377 : vector<2x512xf32>
    %c6_281 = arith.constant 6 : index
    %c0_282 = arith.constant 0 : index
    %c0_283 = arith.constant 0 : index
    %379 = vector.load %arg13[%c6_281, %c0_282, %c0_283] : memref<25x2x128xbf16, #tpu.memory_space<vmem>>, vector<1x2x128xbf16>
    %380 = vector.shape_cast %379 : vector<1x2x128xbf16> to vector<2x128xbf16>
    %c7_284 = arith.constant 7 : index
    %c0_285 = arith.constant 0 : index
    %c0_286 = arith.constant 0 : index
    %381 = vector.load %arg13[%c7_284, %c0_285, %c0_286] : memref<25x2x128xbf16, #tpu.memory_space<vmem>>, vector<1x2x128xbf16>
    %382 = vector.shape_cast %381 : vector<1x2x128xbf16> to vector<2x128xbf16>
    %c11_287 = arith.constant 11 : index
    %c0_288 = arith.constant 0 : index
    %c0_289 = arith.constant 0 : index
    %383 = vector.load %arg13[%c11_287, %c0_288, %c0_289] : memref<25x2x128xbf16, #tpu.memory_space<vmem>>, vector<1x2x128xbf16>
    %384 = vector.shape_cast %383 : vector<1x2x128xbf16> to vector<2x128xbf16>
    %c12_290 = arith.constant 12 : index
    %c0_291 = arith.constant 0 : index
    %c0_292 = arith.constant 0 : index
    %385 = vector.load %arg13[%c12_290, %c0_291, %c0_292] : memref<25x2x128xbf16, #tpu.memory_space<vmem>>, vector<1x2x128xbf16>
    %386 = vector.shape_cast %385 : vector<1x2x128xbf16> to vector<2x128xbf16>
    %387 = tpu.concatenate %380, %382, %384, %386 in 1 : vector<2x128xbf16>, vector<2x128xbf16>, vector<2x128xbf16>, vector<2x128xbf16> -> vector<2x512xbf16>
    %c0_293 = arith.constant 0 : index
    %c0_294 = arith.constant 0 : index
    %388 = vector.load %arg4[%c0_293, %c0_294] : memref<512x256xbf16, #tpu.memory_space<vmem>>, vector<512x256xbf16>
    %cst_295 = arith.constant dense<0.000000e+00> : vector<2x256xf32>
    %389 = tpu.matmul %387, %388, %cst_295 {dimension_numbers = #tpu.dot_dimension_numbers<[1], [0], [0], [1], [0, 0, 1, 1], [], []>} : vector<2x512xbf16>, vector<512x256xbf16>, vector<2x256xf32> -> vector<2x256xf32>
    %390 = vector.broadcast %277 : vector<1x256xf32> to vector<2x256xf32>
    %391 = arith.addf %389, %390 : vector<2x256xf32>
    %cst_296 = arith.constant 0.000000e+00 : f32
    %392 = vector.broadcast %cst_296 : f32 to vector<2x256xf32>
    %393 = arith.maximumf %391, %392 : vector<2x256xf32>
    %394 = arith.truncf %393 : vector<2x256xf32> to vector<2x256xbf16>
    %c5_297 = arith.constant 5 : index
    %c0_298 = arith.constant 0 : index
    %c0_299 = arith.constant 0 : index
    %395 = vector.load %arg6[%c5_297, %c0_298, %c0_299] : memref<16x256x512xbf16, #tpu.memory_space<vmem>>, vector<1x256x512xbf16>
    %396 = vector.shape_cast %395 : vector<1x256x512xbf16> to vector<256x512xbf16>
    %cst_300 = arith.constant dense<0.000000e+00> : vector<2x512xf32>
    %397 = tpu.matmul %394, %396, %cst_300 {dimension_numbers = #tpu.dot_dimension_numbers<[1], [0], [0], [1], [0, 0, 1, 1], [], []>} : vector<2x256xbf16>, vector<256x512xbf16>, vector<2x512xf32> -> vector<2x512xf32>
    %398 = arith.addf %378, %397 : vector<2x512xf32>
    %c7_301 = arith.constant 7 : index
    %c0_302 = arith.constant 0 : index
    %c0_303 = arith.constant 0 : index
    %399 = vector.load %arg13[%c7_301, %c0_302, %c0_303] : memref<25x2x128xbf16, #tpu.memory_space<vmem>>, vector<1x2x128xbf16>
    %400 = vector.shape_cast %399 : vector<1x2x128xbf16> to vector<2x128xbf16>
    %c8_304 = arith.constant 8 : index
    %c0_305 = arith.constant 0 : index
    %c0_306 = arith.constant 0 : index
    %401 = vector.load %arg13[%c8_304, %c0_305, %c0_306] : memref<25x2x128xbf16, #tpu.memory_space<vmem>>, vector<1x2x128xbf16>
    %402 = vector.shape_cast %401 : vector<1x2x128xbf16> to vector<2x128xbf16>
    %c12_307 = arith.constant 12 : index
    %c0_308 = arith.constant 0 : index
    %c0_309 = arith.constant 0 : index
    %403 = vector.load %arg13[%c12_307, %c0_308, %c0_309] : memref<25x2x128xbf16, #tpu.memory_space<vmem>>, vector<1x2x128xbf16>
    %404 = vector.shape_cast %403 : vector<1x2x128xbf16> to vector<2x128xbf16>
    %c13_310 = arith.constant 13 : index
    %c0_311 = arith.constant 0 : index
    %c0_312 = arith.constant 0 : index
    %405 = vector.load %arg13[%c13_310, %c0_311, %c0_312] : memref<25x2x128xbf16, #tpu.memory_space<vmem>>, vector<1x2x128xbf16>
    %406 = vector.shape_cast %405 : vector<1x2x128xbf16> to vector<2x128xbf16>
    %407 = tpu.concatenate %400, %402, %404, %406 in 1 : vector<2x128xbf16>, vector<2x128xbf16>, vector<2x128xbf16>, vector<2x128xbf16> -> vector<2x512xbf16>
    %c0_313 = arith.constant 0 : index
    %c0_314 = arith.constant 0 : index
    %408 = vector.load %arg4[%c0_313, %c0_314] : memref<512x256xbf16, #tpu.memory_space<vmem>>, vector<512x256xbf16>
    %cst_315 = arith.constant dense<0.000000e+00> : vector<2x256xf32>
    %409 = tpu.matmul %407, %408, %cst_315 {dimension_numbers = #tpu.dot_dimension_numbers<[1], [0], [0], [1], [0, 0, 1, 1], [], []>} : vector<2x512xbf16>, vector<512x256xbf16>, vector<2x256xf32> -> vector<2x256xf32>
    %410 = vector.broadcast %277 : vector<1x256xf32> to vector<2x256xf32>
    %411 = arith.addf %409, %410 : vector<2x256xf32>
    %cst_316 = arith.constant 0.000000e+00 : f32
    %412 = vector.broadcast %cst_316 : f32 to vector<2x256xf32>
    %413 = arith.maximumf %411, %412 : vector<2x256xf32>
    %414 = arith.truncf %413 : vector<2x256xf32> to vector<2x256xbf16>
    %c6_317 = arith.constant 6 : index
    %c0_318 = arith.constant 0 : index
    %c0_319 = arith.constant 0 : index
    %415 = vector.load %arg6[%c6_317, %c0_318, %c0_319] : memref<16x256x512xbf16, #tpu.memory_space<vmem>>, vector<1x256x512xbf16>
    %416 = vector.shape_cast %415 : vector<1x256x512xbf16> to vector<256x512xbf16>
    %cst_320 = arith.constant dense<0.000000e+00> : vector<2x512xf32>
    %417 = tpu.matmul %414, %416, %cst_320 {dimension_numbers = #tpu.dot_dimension_numbers<[1], [0], [0], [1], [0, 0, 1, 1], [], []>} : vector<2x256xbf16>, vector<256x512xbf16>, vector<2x512xf32> -> vector<2x512xf32>
    %418 = arith.addf %398, %417 : vector<2x512xf32>
    %c8_321 = arith.constant 8 : index
    %c0_322 = arith.constant 0 : index
    %c0_323 = arith.constant 0 : index
    %419 = vector.load %arg13[%c8_321, %c0_322, %c0_323] : memref<25x2x128xbf16, #tpu.memory_space<vmem>>, vector<1x2x128xbf16>
    %420 = vector.shape_cast %419 : vector<1x2x128xbf16> to vector<2x128xbf16>
    %c9_324 = arith.constant 9 : index
    %c0_325 = arith.constant 0 : index
    %c0_326 = arith.constant 0 : index
    %421 = vector.load %arg13[%c9_324, %c0_325, %c0_326] : memref<25x2x128xbf16, #tpu.memory_space<vmem>>, vector<1x2x128xbf16>
    %422 = vector.shape_cast %421 : vector<1x2x128xbf16> to vector<2x128xbf16>
    %c13_327 = arith.constant 13 : index
    %c0_328 = arith.constant 0 : index
    %c0_329 = arith.constant 0 : index
    %423 = vector.load %arg13[%c13_327, %c0_328, %c0_329] : memref<25x2x128xbf16, #tpu.memory_space<vmem>>, vector<1x2x128xbf16>
    %424 = vector.shape_cast %423 : vector<1x2x128xbf16> to vector<2x128xbf16>
    %c14_330 = arith.constant 14 : index
    %c0_331 = arith.constant 0 : index
    %c0_332 = arith.constant 0 : index
    %425 = vector.load %arg13[%c14_330, %c0_331, %c0_332] : memref<25x2x128xbf16, #tpu.memory_space<vmem>>, vector<1x2x128xbf16>
    %426 = vector.shape_cast %425 : vector<1x2x128xbf16> to vector<2x128xbf16>
    %427 = tpu.concatenate %420, %422, %424, %426 in 1 : vector<2x128xbf16>, vector<2x128xbf16>, vector<2x128xbf16>, vector<2x128xbf16> -> vector<2x512xbf16>
    %c0_333 = arith.constant 0 : index
    %c0_334 = arith.constant 0 : index
    %428 = vector.load %arg4[%c0_333, %c0_334] : memref<512x256xbf16, #tpu.memory_space<vmem>>, vector<512x256xbf16>
    %cst_335 = arith.constant dense<0.000000e+00> : vector<2x256xf32>
    %429 = tpu.matmul %427, %428, %cst_335 {dimension_numbers = #tpu.dot_dimension_numbers<[1], [0], [0], [1], [0, 0, 1, 1], [], []>} : vector<2x512xbf16>, vector<512x256xbf16>, vector<2x256xf32> -> vector<2x256xf32>
    %430 = vector.broadcast %277 : vector<1x256xf32> to vector<2x256xf32>
    %431 = arith.addf %429, %430 : vector<2x256xf32>
    %cst_336 = arith.constant 0.000000e+00 : f32
    %432 = vector.broadcast %cst_336 : f32 to vector<2x256xf32>
    %433 = arith.maximumf %431, %432 : vector<2x256xf32>
    %434 = arith.truncf %433 : vector<2x256xf32> to vector<2x256xbf16>
    %c7_337 = arith.constant 7 : index
    %c0_338 = arith.constant 0 : index
    %c0_339 = arith.constant 0 : index
    %435 = vector.load %arg6[%c7_337, %c0_338, %c0_339] : memref<16x256x512xbf16, #tpu.memory_space<vmem>>, vector<1x256x512xbf16>
    %436 = vector.shape_cast %435 : vector<1x256x512xbf16> to vector<256x512xbf16>
    %cst_340 = arith.constant dense<0.000000e+00> : vector<2x512xf32>
    %437 = tpu.matmul %434, %436, %cst_340 {dimension_numbers = #tpu.dot_dimension_numbers<[1], [0], [0], [1], [0, 0, 1, 1], [], []>} : vector<2x256xbf16>, vector<256x512xbf16>, vector<2x512xf32> -> vector<2x512xf32>
    %438 = arith.addf %418, %437 : vector<2x512xf32>
    %c10_341 = arith.constant 10 : index
    %c0_342 = arith.constant 0 : index
    %c0_343 = arith.constant 0 : index
    %439 = vector.load %arg13[%c10_341, %c0_342, %c0_343] : memref<25x2x128xbf16, #tpu.memory_space<vmem>>, vector<1x2x128xbf16>
    %440 = vector.shape_cast %439 : vector<1x2x128xbf16> to vector<2x128xbf16>
    %c11_344 = arith.constant 11 : index
    %c0_345 = arith.constant 0 : index
    %c0_346 = arith.constant 0 : index
    %441 = vector.load %arg13[%c11_344, %c0_345, %c0_346] : memref<25x2x128xbf16, #tpu.memory_space<vmem>>, vector<1x2x128xbf16>
    %442 = vector.shape_cast %441 : vector<1x2x128xbf16> to vector<2x128xbf16>
    %c15_347 = arith.constant 15 : index
    %c0_348 = arith.constant 0 : index
    %c0_349 = arith.constant 0 : index
    %443 = vector.load %arg13[%c15_347, %c0_348, %c0_349] : memref<25x2x128xbf16, #tpu.memory_space<vmem>>, vector<1x2x128xbf16>
    %444 = vector.shape_cast %443 : vector<1x2x128xbf16> to vector<2x128xbf16>
    %c16_350 = arith.constant 16 : index
    %c0_351 = arith.constant 0 : index
    %c0_352 = arith.constant 0 : index
    %445 = vector.load %arg13[%c16_350, %c0_351, %c0_352] : memref<25x2x128xbf16, #tpu.memory_space<vmem>>, vector<1x2x128xbf16>
    %446 = vector.shape_cast %445 : vector<1x2x128xbf16> to vector<2x128xbf16>
    %447 = tpu.concatenate %440, %442, %444, %446 in 1 : vector<2x128xbf16>, vector<2x128xbf16>, vector<2x128xbf16>, vector<2x128xbf16> -> vector<2x512xbf16>
    %c0_353 = arith.constant 0 : index
    %c0_354 = arith.constant 0 : index
    %448 = vector.load %arg4[%c0_353, %c0_354] : memref<512x256xbf16, #tpu.memory_space<vmem>>, vector<512x256xbf16>
    %cst_355 = arith.constant dense<0.000000e+00> : vector<2x256xf32>
    %449 = tpu.matmul %447, %448, %cst_355 {dimension_numbers = #tpu.dot_dimension_numbers<[1], [0], [0], [1], [0, 0, 1, 1], [], []>} : vector<2x512xbf16>, vector<512x256xbf16>, vector<2x256xf32> -> vector<2x256xf32>
    %450 = vector.broadcast %277 : vector<1x256xf32> to vector<2x256xf32>
    %451 = arith.addf %449, %450 : vector<2x256xf32>
    %cst_356 = arith.constant 0.000000e+00 : f32
    %452 = vector.broadcast %cst_356 : f32 to vector<2x256xf32>
    %453 = arith.maximumf %451, %452 : vector<2x256xf32>
    %454 = arith.truncf %453 : vector<2x256xf32> to vector<2x256xbf16>
    %c8_357 = arith.constant 8 : index
    %c0_358 = arith.constant 0 : index
    %c0_359 = arith.constant 0 : index
    %455 = vector.load %arg6[%c8_357, %c0_358, %c0_359] : memref<16x256x512xbf16, #tpu.memory_space<vmem>>, vector<1x256x512xbf16>
    %456 = vector.shape_cast %455 : vector<1x256x512xbf16> to vector<256x512xbf16>
    %cst_360 = arith.constant dense<0.000000e+00> : vector<2x512xf32>
    %457 = tpu.matmul %454, %456, %cst_360 {dimension_numbers = #tpu.dot_dimension_numbers<[1], [0], [0], [1], [0, 0, 1, 1], [], []>} : vector<2x256xbf16>, vector<256x512xbf16>, vector<2x512xf32> -> vector<2x512xf32>
    %458 = arith.addf %438, %457 : vector<2x512xf32>
    %c11_361 = arith.constant 11 : index
    %c0_362 = arith.constant 0 : index
    %c0_363 = arith.constant 0 : index
    %459 = vector.load %arg13[%c11_361, %c0_362, %c0_363] : memref<25x2x128xbf16, #tpu.memory_space<vmem>>, vector<1x2x128xbf16>
    %460 = vector.shape_cast %459 : vector<1x2x128xbf16> to vector<2x128xbf16>
    %c12_364 = arith.constant 12 : index
    %c0_365 = arith.constant 0 : index
    %c0_366 = arith.constant 0 : index
    %461 = vector.load %arg13[%c12_364, %c0_365, %c0_366] : memref<25x2x128xbf16, #tpu.memory_space<vmem>>, vector<1x2x128xbf16>
    %462 = vector.shape_cast %461 : vector<1x2x128xbf16> to vector<2x128xbf16>
    %c16_367 = arith.constant 16 : index
    %c0_368 = arith.constant 0 : index
    %c0_369 = arith.constant 0 : index
    %463 = vector.load %arg13[%c16_367, %c0_368, %c0_369] : memref<25x2x128xbf16, #tpu.memory_space<vmem>>, vector<1x2x128xbf16>
    %464 = vector.shape_cast %463 : vector<1x2x128xbf16> to vector<2x128xbf16>
    %c17_370 = arith.constant 17 : index
    %c0_371 = arith.constant 0 : index
    %c0_372 = arith.constant 0 : index
    %465 = vector.load %arg13[%c17_370, %c0_371, %c0_372] : memref<25x2x128xbf16, #tpu.memory_space<vmem>>, vector<1x2x128xbf16>
    %466 = vector.shape_cast %465 : vector<1x2x128xbf16> to vector<2x128xbf16>
    %467 = tpu.concatenate %460, %462, %464, %466 in 1 : vector<2x128xbf16>, vector<2x128xbf16>, vector<2x128xbf16>, vector<2x128xbf16> -> vector<2x512xbf16>
    %c0_373 = arith.constant 0 : index
    %c0_374 = arith.constant 0 : index
    %468 = vector.load %arg4[%c0_373, %c0_374] : memref<512x256xbf16, #tpu.memory_space<vmem>>, vector<512x256xbf16>
    %cst_375 = arith.constant dense<0.000000e+00> : vector<2x256xf32>
    %469 = tpu.matmul %467, %468, %cst_375 {dimension_numbers = #tpu.dot_dimension_numbers<[1], [0], [0], [1], [0, 0, 1, 1], [], []>} : vector<2x512xbf16>, vector<512x256xbf16>, vector<2x256xf32> -> vector<2x256xf32>
    %470 = vector.broadcast %277 : vector<1x256xf32> to vector<2x256xf32>
    %471 = arith.addf %469, %470 : vector<2x256xf32>
    %cst_376 = arith.constant 0.000000e+00 : f32
    %472 = vector.broadcast %cst_376 : f32 to vector<2x256xf32>
    %473 = arith.maximumf %471, %472 : vector<2x256xf32>
    %474 = arith.truncf %473 : vector<2x256xf32> to vector<2x256xbf16>
    %c9_377 = arith.constant 9 : index
    %c0_378 = arith.constant 0 : index
    %c0_379 = arith.constant 0 : index
    %475 = vector.load %arg6[%c9_377, %c0_378, %c0_379] : memref<16x256x512xbf16, #tpu.memory_space<vmem>>, vector<1x256x512xbf16>
    %476 = vector.shape_cast %475 : vector<1x256x512xbf16> to vector<256x512xbf16>
    %cst_380 = arith.constant dense<0.000000e+00> : vector<2x512xf32>
    %477 = tpu.matmul %474, %476, %cst_380 {dimension_numbers = #tpu.dot_dimension_numbers<[1], [0], [0], [1], [0, 0, 1, 1], [], []>} : vector<2x256xbf16>, vector<256x512xbf16>, vector<2x512xf32> -> vector<2x512xf32>
    %478 = arith.addf %458, %477 : vector<2x512xf32>
    %c12_381 = arith.constant 12 : index
    %c0_382 = arith.constant 0 : index
    %c0_383 = arith.constant 0 : index
    %479 = vector.load %arg13[%c12_381, %c0_382, %c0_383] : memref<25x2x128xbf16, #tpu.memory_space<vmem>>, vector<1x2x128xbf16>
    %480 = vector.shape_cast %479 : vector<1x2x128xbf16> to vector<2x128xbf16>
    %c13_384 = arith.constant 13 : index
    %c0_385 = arith.constant 0 : index
    %c0_386 = arith.constant 0 : index
    %481 = vector.load %arg13[%c13_384, %c0_385, %c0_386] : memref<25x2x128xbf16, #tpu.memory_space<vmem>>, vector<1x2x128xbf16>
    %482 = vector.shape_cast %481 : vector<1x2x128xbf16> to vector<2x128xbf16>
    %c17_387 = arith.constant 17 : index
    %c0_388 = arith.constant 0 : index
    %c0_389 = arith.constant 0 : index
    %483 = vector.load %arg13[%c17_387, %c0_388, %c0_389] : memref<25x2x128xbf16, #tpu.memory_space<vmem>>, vector<1x2x128xbf16>
    %484 = vector.shape_cast %483 : vector<1x2x128xbf16> to vector<2x128xbf16>
    %c18_390 = arith.constant 18 : index
    %c0_391 = arith.constant 0 : index
    %c0_392 = arith.constant 0 : index
    %485 = vector.load %arg13[%c18_390, %c0_391, %c0_392] : memref<25x2x128xbf16, #tpu.memory_space<vmem>>, vector<1x2x128xbf16>
    %486 = vector.shape_cast %485 : vector<1x2x128xbf16> to vector<2x128xbf16>
    %487 = tpu.concatenate %480, %482, %484, %486 in 1 : vector<2x128xbf16>, vector<2x128xbf16>, vector<2x128xbf16>, vector<2x128xbf16> -> vector<2x512xbf16>
    %c0_393 = arith.constant 0 : index
    %c0_394 = arith.constant 0 : index
    %488 = vector.load %arg4[%c0_393, %c0_394] : memref<512x256xbf16, #tpu.memory_space<vmem>>, vector<512x256xbf16>
    %cst_395 = arith.constant dense<0.000000e+00> : vector<2x256xf32>
    %489 = tpu.matmul %487, %488, %cst_395 {dimension_numbers = #tpu.dot_dimension_numbers<[1], [0], [0], [1], [0, 0, 1, 1], [], []>} : vector<2x512xbf16>, vector<512x256xbf16>, vector<2x256xf32> -> vector<2x256xf32>
    %490 = vector.broadcast %277 : vector<1x256xf32> to vector<2x256xf32>
    %491 = arith.addf %489, %490 : vector<2x256xf32>
    %cst_396 = arith.constant 0.000000e+00 : f32
    %492 = vector.broadcast %cst_396 : f32 to vector<2x256xf32>
    %493 = arith.maximumf %491, %492 : vector<2x256xf32>
    %494 = arith.truncf %493 : vector<2x256xf32> to vector<2x256xbf16>
    %c10_397 = arith.constant 10 : index
    %c0_398 = arith.constant 0 : index
    %c0_399 = arith.constant 0 : index
    %495 = vector.load %arg6[%c10_397, %c0_398, %c0_399] : memref<16x256x512xbf16, #tpu.memory_space<vmem>>, vector<1x256x512xbf16>
    %496 = vector.shape_cast %495 : vector<1x256x512xbf16> to vector<256x512xbf16>
    %cst_400 = arith.constant dense<0.000000e+00> : vector<2x512xf32>
    %497 = tpu.matmul %494, %496, %cst_400 {dimension_numbers = #tpu.dot_dimension_numbers<[1], [0], [0], [1], [0, 0, 1, 1], [], []>} : vector<2x256xbf16>, vector<256x512xbf16>, vector<2x512xf32> -> vector<2x512xf32>
    %498 = arith.addf %478, %497 : vector<2x512xf32>
    %c13_401 = arith.constant 13 : index
    %c0_402 = arith.constant 0 : index
    %c0_403 = arith.constant 0 : index
    %499 = vector.load %arg13[%c13_401, %c0_402, %c0_403] : memref<25x2x128xbf16, #tpu.memory_space<vmem>>, vector<1x2x128xbf16>
    %500 = vector.shape_cast %499 : vector<1x2x128xbf16> to vector<2x128xbf16>
    %c14_404 = arith.constant 14 : index
    %c0_405 = arith.constant 0 : index
    %c0_406 = arith.constant 0 : index
    %501 = vector.load %arg13[%c14_404, %c0_405, %c0_406] : memref<25x2x128xbf16, #tpu.memory_space<vmem>>, vector<1x2x128xbf16>
    %502 = vector.shape_cast %501 : vector<1x2x128xbf16> to vector<2x128xbf16>
    %c18_407 = arith.constant 18 : index
    %c0_408 = arith.constant 0 : index
    %c0_409 = arith.constant 0 : index
    %503 = vector.load %arg13[%c18_407, %c0_408, %c0_409] : memref<25x2x128xbf16, #tpu.memory_space<vmem>>, vector<1x2x128xbf16>
    %504 = vector.shape_cast %503 : vector<1x2x128xbf16> to vector<2x128xbf16>
    %c19_410 = arith.constant 19 : index
    %c0_411 = arith.constant 0 : index
    %c0_412 = arith.constant 0 : index
    %505 = vector.load %arg13[%c19_410, %c0_411, %c0_412] : memref<25x2x128xbf16, #tpu.memory_space<vmem>>, vector<1x2x128xbf16>
    %506 = vector.shape_cast %505 : vector<1x2x128xbf16> to vector<2x128xbf16>
    %507 = tpu.concatenate %500, %502, %504, %506 in 1 : vector<2x128xbf16>, vector<2x128xbf16>, vector<2x128xbf16>, vector<2x128xbf16> -> vector<2x512xbf16>
    %c0_413 = arith.constant 0 : index
    %c0_414 = arith.constant 0 : index
    %508 = vector.load %arg4[%c0_413, %c0_414] : memref<512x256xbf16, #tpu.memory_space<vmem>>, vector<512x256xbf16>
    %cst_415 = arith.constant dense<0.000000e+00> : vector<2x256xf32>
    %509 = tpu.matmul %507, %508, %cst_415 {dimension_numbers = #tpu.dot_dimension_numbers<[1], [0], [0], [1], [0, 0, 1, 1], [], []>} : vector<2x512xbf16>, vector<512x256xbf16>, vector<2x256xf32> -> vector<2x256xf32>
    %510 = vector.broadcast %277 : vector<1x256xf32> to vector<2x256xf32>
    %511 = arith.addf %509, %510 : vector<2x256xf32>
    %cst_416 = arith.constant 0.000000e+00 : f32
    %512 = vector.broadcast %cst_416 : f32 to vector<2x256xf32>
    %513 = arith.maximumf %511, %512 : vector<2x256xf32>
    %514 = arith.truncf %513 : vector<2x256xf32> to vector<2x256xbf16>
    %c11_417 = arith.constant 11 : index
    %c0_418 = arith.constant 0 : index
    %c0_419 = arith.constant 0 : index
    %515 = vector.load %arg6[%c11_417, %c0_418, %c0_419] : memref<16x256x512xbf16, #tpu.memory_space<vmem>>, vector<1x256x512xbf16>
    %516 = vector.shape_cast %515 : vector<1x256x512xbf16> to vector<256x512xbf16>
    %cst_420 = arith.constant dense<0.000000e+00> : vector<2x512xf32>
    %517 = tpu.matmul %514, %516, %cst_420 {dimension_numbers = #tpu.dot_dimension_numbers<[1], [0], [0], [1], [0, 0, 1, 1], [], []>} : vector<2x256xbf16>, vector<256x512xbf16>, vector<2x512xf32> -> vector<2x512xf32>
    %518 = arith.addf %498, %517 : vector<2x512xf32>
    %c15_421 = arith.constant 15 : index
    %c0_422 = arith.constant 0 : index
    %c0_423 = arith.constant 0 : index
    %519 = vector.load %arg13[%c15_421, %c0_422, %c0_423] : memref<25x2x128xbf16, #tpu.memory_space<vmem>>, vector<1x2x128xbf16>
    %520 = vector.shape_cast %519 : vector<1x2x128xbf16> to vector<2x128xbf16>
    %c16_424 = arith.constant 16 : index
    %c0_425 = arith.constant 0 : index
    %c0_426 = arith.constant 0 : index
    %521 = vector.load %arg13[%c16_424, %c0_425, %c0_426] : memref<25x2x128xbf16, #tpu.memory_space<vmem>>, vector<1x2x128xbf16>
    %522 = vector.shape_cast %521 : vector<1x2x128xbf16> to vector<2x128xbf16>
    %c20_427 = arith.constant 20 : index
    %c0_428 = arith.constant 0 : index
    %c0_429 = arith.constant 0 : index
    %523 = vector.load %arg13[%c20_427, %c0_428, %c0_429] : memref<25x2x128xbf16, #tpu.memory_space<vmem>>, vector<1x2x128xbf16>
    %524 = vector.shape_cast %523 : vector<1x2x128xbf16> to vector<2x128xbf16>
    %c21_430 = arith.constant 21 : index
    %c0_431 = arith.constant 0 : index
    %c0_432 = arith.constant 0 : index
    %525 = vector.load %arg13[%c21_430, %c0_431, %c0_432] : memref<25x2x128xbf16, #tpu.memory_space<vmem>>, vector<1x2x128xbf16>
    %526 = vector.shape_cast %525 : vector<1x2x128xbf16> to vector<2x128xbf16>
    %527 = tpu.concatenate %520, %522, %524, %526 in 1 : vector<2x128xbf16>, vector<2x128xbf16>, vector<2x128xbf16>, vector<2x128xbf16> -> vector<2x512xbf16>
    %c0_433 = arith.constant 0 : index
    %c0_434 = arith.constant 0 : index
    %528 = vector.load %arg4[%c0_433, %c0_434] : memref<512x256xbf16, #tpu.memory_space<vmem>>, vector<512x256xbf16>
    %cst_435 = arith.constant dense<0.000000e+00> : vector<2x256xf32>
    %529 = tpu.matmul %527, %528, %cst_435 {dimension_numbers = #tpu.dot_dimension_numbers<[1], [0], [0], [1], [0, 0, 1, 1], [], []>} : vector<2x512xbf16>, vector<512x256xbf16>, vector<2x256xf32> -> vector<2x256xf32>
    %530 = vector.broadcast %277 : vector<1x256xf32> to vector<2x256xf32>
    %531 = arith.addf %529, %530 : vector<2x256xf32>
    %cst_436 = arith.constant 0.000000e+00 : f32
    %532 = vector.broadcast %cst_436 : f32 to vector<2x256xf32>
    %533 = arith.maximumf %531, %532 : vector<2x256xf32>
    %534 = arith.truncf %533 : vector<2x256xf32> to vector<2x256xbf16>
    %c12_437 = arith.constant 12 : index
    %c0_438 = arith.constant 0 : index
    %c0_439 = arith.constant 0 : index
    %535 = vector.load %arg6[%c12_437, %c0_438, %c0_439] : memref<16x256x512xbf16, #tpu.memory_space<vmem>>, vector<1x256x512xbf16>
    %536 = vector.shape_cast %535 : vector<1x256x512xbf16> to vector<256x512xbf16>
    %cst_440 = arith.constant dense<0.000000e+00> : vector<2x512xf32>
    %537 = tpu.matmul %534, %536, %cst_440 {dimension_numbers = #tpu.dot_dimension_numbers<[1], [0], [0], [1], [0, 0, 1, 1], [], []>} : vector<2x256xbf16>, vector<256x512xbf16>, vector<2x512xf32> -> vector<2x512xf32>
    %538 = arith.addf %518, %537 : vector<2x512xf32>
    %c16_441 = arith.constant 16 : index
    %c0_442 = arith.constant 0 : index
    %c0_443 = arith.constant 0 : index
    %539 = vector.load %arg13[%c16_441, %c0_442, %c0_443] : memref<25x2x128xbf16, #tpu.memory_space<vmem>>, vector<1x2x128xbf16>
    %540 = vector.shape_cast %539 : vector<1x2x128xbf16> to vector<2x128xbf16>
    %c17_444 = arith.constant 17 : index
    %c0_445 = arith.constant 0 : index
    %c0_446 = arith.constant 0 : index
    %541 = vector.load %arg13[%c17_444, %c0_445, %c0_446] : memref<25x2x128xbf16, #tpu.memory_space<vmem>>, vector<1x2x128xbf16>
    %542 = vector.shape_cast %541 : vector<1x2x128xbf16> to vector<2x128xbf16>
    %c21_447 = arith.constant 21 : index
    %c0_448 = arith.constant 0 : index
    %c0_449 = arith.constant 0 : index
    %543 = vector.load %arg13[%c21_447, %c0_448, %c0_449] : memref<25x2x128xbf16, #tpu.memory_space<vmem>>, vector<1x2x128xbf16>
    %544 = vector.shape_cast %543 : vector<1x2x128xbf16> to vector<2x128xbf16>
    %c22_450 = arith.constant 22 : index
    %c0_451 = arith.constant 0 : index
    %c0_452 = arith.constant 0 : index
    %545 = vector.load %arg13[%c22_450, %c0_451, %c0_452] : memref<25x2x128xbf16, #tpu.memory_space<vmem>>, vector<1x2x128xbf16>
    %546 = vector.shape_cast %545 : vector<1x2x128xbf16> to vector<2x128xbf16>
    %547 = tpu.concatenate %540, %542, %544, %546 in 1 : vector<2x128xbf16>, vector<2x128xbf16>, vector<2x128xbf16>, vector<2x128xbf16> -> vector<2x512xbf16>
    %c0_453 = arith.constant 0 : index
    %c0_454 = arith.constant 0 : index
    %548 = vector.load %arg4[%c0_453, %c0_454] : memref<512x256xbf16, #tpu.memory_space<vmem>>, vector<512x256xbf16>
    %cst_455 = arith.constant dense<0.000000e+00> : vector<2x256xf32>
    %549 = tpu.matmul %547, %548, %cst_455 {dimension_numbers = #tpu.dot_dimension_numbers<[1], [0], [0], [1], [0, 0, 1, 1], [], []>} : vector<2x512xbf16>, vector<512x256xbf16>, vector<2x256xf32> -> vector<2x256xf32>
    %550 = vector.broadcast %277 : vector<1x256xf32> to vector<2x256xf32>
    %551 = arith.addf %549, %550 : vector<2x256xf32>
    %cst_456 = arith.constant 0.000000e+00 : f32
    %552 = vector.broadcast %cst_456 : f32 to vector<2x256xf32>
    %553 = arith.maximumf %551, %552 : vector<2x256xf32>
    %554 = arith.truncf %553 : vector<2x256xf32> to vector<2x256xbf16>
    %c13_457 = arith.constant 13 : index
    %c0_458 = arith.constant 0 : index
    %c0_459 = arith.constant 0 : index
    %555 = vector.load %arg6[%c13_457, %c0_458, %c0_459] : memref<16x256x512xbf16, #tpu.memory_space<vmem>>, vector<1x256x512xbf16>
    %556 = vector.shape_cast %555 : vector<1x256x512xbf16> to vector<256x512xbf16>
    %cst_460 = arith.constant dense<0.000000e+00> : vector<2x512xf32>
    %557 = tpu.matmul %554, %556, %cst_460 {dimension_numbers = #tpu.dot_dimension_numbers<[1], [0], [0], [1], [0, 0, 1, 1], [], []>} : vector<2x256xbf16>, vector<256x512xbf16>, vector<2x512xf32> -> vector<2x512xf32>
    %558 = arith.addf %538, %557 : vector<2x512xf32>
    %c17_461 = arith.constant 17 : index
    %c0_462 = arith.constant 0 : index
    %c0_463 = arith.constant 0 : index
    %559 = vector.load %arg13[%c17_461, %c0_462, %c0_463] : memref<25x2x128xbf16, #tpu.memory_space<vmem>>, vector<1x2x128xbf16>
    %560 = vector.shape_cast %559 : vector<1x2x128xbf16> to vector<2x128xbf16>
    %c18_464 = arith.constant 18 : index
    %c0_465 = arith.constant 0 : index
    %c0_466 = arith.constant 0 : index
    %561 = vector.load %arg13[%c18_464, %c0_465, %c0_466] : memref<25x2x128xbf16, #tpu.memory_space<vmem>>, vector<1x2x128xbf16>
    %562 = vector.shape_cast %561 : vector<1x2x128xbf16> to vector<2x128xbf16>
    %c22_467 = arith.constant 22 : index
    %c0_468 = arith.constant 0 : index
    %c0_469 = arith.constant 0 : index
    %563 = vector.load %arg13[%c22_467, %c0_468, %c0_469] : memref<25x2x128xbf16, #tpu.memory_space<vmem>>, vector<1x2x128xbf16>
    %564 = vector.shape_cast %563 : vector<1x2x128xbf16> to vector<2x128xbf16>
    %c23_470 = arith.constant 23 : index
    %c0_471 = arith.constant 0 : index
    %c0_472 = arith.constant 0 : index
    %565 = vector.load %arg13[%c23_470, %c0_471, %c0_472] : memref<25x2x128xbf16, #tpu.memory_space<vmem>>, vector<1x2x128xbf16>
    %566 = vector.shape_cast %565 : vector<1x2x128xbf16> to vector<2x128xbf16>
    %567 = tpu.concatenate %560, %562, %564, %566 in 1 : vector<2x128xbf16>, vector<2x128xbf16>, vector<2x128xbf16>, vector<2x128xbf16> -> vector<2x512xbf16>
    %c0_473 = arith.constant 0 : index
    %c0_474 = arith.constant 0 : index
    %568 = vector.load %arg4[%c0_473, %c0_474] : memref<512x256xbf16, #tpu.memory_space<vmem>>, vector<512x256xbf16>
    %cst_475 = arith.constant dense<0.000000e+00> : vector<2x256xf32>
    %569 = tpu.matmul %567, %568, %cst_475 {dimension_numbers = #tpu.dot_dimension_numbers<[1], [0], [0], [1], [0, 0, 1, 1], [], []>} : vector<2x512xbf16>, vector<512x256xbf16>, vector<2x256xf32> -> vector<2x256xf32>
    %570 = vector.broadcast %277 : vector<1x256xf32> to vector<2x256xf32>
    %571 = arith.addf %569, %570 : vector<2x256xf32>
    %cst_476 = arith.constant 0.000000e+00 : f32
    %572 = vector.broadcast %cst_476 : f32 to vector<2x256xf32>
    %573 = arith.maximumf %571, %572 : vector<2x256xf32>
    %574 = arith.truncf %573 : vector<2x256xf32> to vector<2x256xbf16>
    %c14_477 = arith.constant 14 : index
    %c0_478 = arith.constant 0 : index
    %c0_479 = arith.constant 0 : index
    %575 = vector.load %arg6[%c14_477, %c0_478, %c0_479] : memref<16x256x512xbf16, #tpu.memory_space<vmem>>, vector<1x256x512xbf16>
    %576 = vector.shape_cast %575 : vector<1x256x512xbf16> to vector<256x512xbf16>
    %cst_480 = arith.constant dense<0.000000e+00> : vector<2x512xf32>
    %577 = tpu.matmul %574, %576, %cst_480 {dimension_numbers = #tpu.dot_dimension_numbers<[1], [0], [0], [1], [0, 0, 1, 1], [], []>} : vector<2x256xbf16>, vector<256x512xbf16>, vector<2x512xf32> -> vector<2x512xf32>
    %578 = arith.addf %558, %577 : vector<2x512xf32>
    %c18_481 = arith.constant 18 : index
    %c0_482 = arith.constant 0 : index
    %c0_483 = arith.constant 0 : index
    %579 = vector.load %arg13[%c18_481, %c0_482, %c0_483] : memref<25x2x128xbf16, #tpu.memory_space<vmem>>, vector<1x2x128xbf16>
    %580 = vector.shape_cast %579 : vector<1x2x128xbf16> to vector<2x128xbf16>
    %c19_484 = arith.constant 19 : index
    %c0_485 = arith.constant 0 : index
    %c0_486 = arith.constant 0 : index
    %581 = vector.load %arg13[%c19_484, %c0_485, %c0_486] : memref<25x2x128xbf16, #tpu.memory_space<vmem>>, vector<1x2x128xbf16>
    %582 = vector.shape_cast %581 : vector<1x2x128xbf16> to vector<2x128xbf16>
    %c23_487 = arith.constant 23 : index
    %c0_488 = arith.constant 0 : index
    %c0_489 = arith.constant 0 : index
    %583 = vector.load %arg13[%c23_487, %c0_488, %c0_489] : memref<25x2x128xbf16, #tpu.memory_space<vmem>>, vector<1x2x128xbf16>
    %584 = vector.shape_cast %583 : vector<1x2x128xbf16> to vector<2x128xbf16>
    %c24_490 = arith.constant 24 : index
    %c0_491 = arith.constant 0 : index
    %c0_492 = arith.constant 0 : index
    %585 = vector.load %arg13[%c24_490, %c0_491, %c0_492] : memref<25x2x128xbf16, #tpu.memory_space<vmem>>, vector<1x2x128xbf16>
    %586 = vector.shape_cast %585 : vector<1x2x128xbf16> to vector<2x128xbf16>
    %587 = tpu.concatenate %580, %582, %584, %586 in 1 : vector<2x128xbf16>, vector<2x128xbf16>, vector<2x128xbf16>, vector<2x128xbf16> -> vector<2x512xbf16>
    %c0_493 = arith.constant 0 : index
    %c0_494 = arith.constant 0 : index
    %588 = vector.load %arg4[%c0_493, %c0_494] : memref<512x256xbf16, #tpu.memory_space<vmem>>, vector<512x256xbf16>
    %cst_495 = arith.constant dense<0.000000e+00> : vector<2x256xf32>
    %589 = tpu.matmul %587, %588, %cst_495 {dimension_numbers = #tpu.dot_dimension_numbers<[1], [0], [0], [1], [0, 0, 1, 1], [], []>} : vector<2x512xbf16>, vector<512x256xbf16>, vector<2x256xf32> -> vector<2x256xf32>
    %590 = vector.broadcast %277 : vector<1x256xf32> to vector<2x256xf32>
    %591 = arith.addf %589, %590 : vector<2x256xf32>
    %cst_496 = arith.constant 0.000000e+00 : f32
    %592 = vector.broadcast %cst_496 : f32 to vector<2x256xf32>
    %593 = arith.maximumf %591, %592 : vector<2x256xf32>
    %594 = arith.truncf %593 : vector<2x256xf32> to vector<2x256xbf16>
    %c15_497 = arith.constant 15 : index
    %c0_498 = arith.constant 0 : index
    %c0_499 = arith.constant 0 : index
    %595 = vector.load %arg6[%c15_497, %c0_498, %c0_499] : memref<16x256x512xbf16, #tpu.memory_space<vmem>>, vector<1x256x512xbf16>
    %596 = vector.shape_cast %595 : vector<1x256x512xbf16> to vector<256x512xbf16>
    %cst_500 = arith.constant dense<0.000000e+00> : vector<2x512xf32>
    %597 = tpu.matmul %594, %596, %cst_500 {dimension_numbers = #tpu.dot_dimension_numbers<[1], [0], [0], [1], [0, 0, 1, 1], [], []>} : vector<2x256xbf16>, vector<256x512xbf16>, vector<2x512xf32> -> vector<2x512xf32>
    %598 = arith.addf %578, %597 : vector<2x512xf32>
    %c0_501 = arith.constant 0 : index
    %c0_502 = arith.constant 0 : index
    %599 = vector.load %arg7[%c0_501, %c0_502] : memref<1x512xf32, #tpu.memory_space<vmem>>, vector<1x512xf32>
    %600 = vector.broadcast %599 : vector<1x512xf32> to vector<2x512xf32>
    %601 = arith.addf %598, %600 : vector<2x512xf32>
    %cst_503 = arith.constant 0.000000e+00 : f32
    %602 = vector.broadcast %cst_503 : f32 to vector<2x512xf32>
    %603 = arith.maximumf %601, %602 : vector<2x512xf32>
    %604 = arith.truncf %603 : vector<2x512xf32> to vector<2x512xbf16>
    %c0_504 = arith.constant 0 : index
    %c0_505 = arith.constant 0 : index
    %605 = vector.load %arg8[%c0_504, %c0_505] : memref<512x256xbf16, #tpu.memory_space<vmem>>, vector<512x256xbf16>
    %cst_506 = arith.constant dense<0.000000e+00> : vector<2x256xf32>
    %606 = tpu.matmul %604, %605, %cst_506 {dimension_numbers = #tpu.dot_dimension_numbers<[1], [0], [0], [1], [0, 0, 1, 1], [], []>} : vector<2x512xbf16>, vector<512x256xbf16>, vector<2x256xf32> -> vector<2x256xf32>
    %c0_507 = arith.constant 0 : index
    %c0_508 = arith.constant 0 : index
    %607 = vector.load %arg9[%c0_507, %c0_508] : memref<1x256xf32, #tpu.memory_space<vmem>>, vector<1x256xf32>
    %608 = vector.broadcast %607 : vector<1x256xf32> to vector<2x256xf32>
    %609 = arith.addf %606, %608 : vector<2x256xf32>
    %cst_509 = arith.constant 0.000000e+00 : f32
    %610 = vector.broadcast %cst_509 : f32 to vector<2x256xf32>
    %611 = arith.maximumf %609, %610 : vector<2x256xf32>
    %612 = arith.truncf %611 : vector<2x256xf32> to vector<2x256xbf16>
    %c0_510 = arith.constant 0 : index
    %c0_511 = arith.constant 0 : index
    %613 = vector.load %arg10[%c0_510, %c0_511] : memref<256x128xbf16, #tpu.memory_space<vmem>>, vector<256x128xbf16>
    %cst_512 = arith.constant dense<0.000000e+00> : vector<2x128xf32>
    %614 = tpu.matmul %612, %613, %cst_512 {dimension_numbers = #tpu.dot_dimension_numbers<[1], [0], [0], [1], [0, 0, 1, 1], [], []>} : vector<2x256xbf16>, vector<256x128xbf16>, vector<2x128xf32> -> vector<2x128xf32>
    %c0_513 = arith.constant 0 : index
    %c0_514 = arith.constant 0 : index
    %615 = vector.load %arg11[%c0_513, %c0_514] : memref<1x128xf32, #tpu.memory_space<vmem>>, vector<1x128xf32>
    %616 = vector.broadcast %615 : vector<1x128xf32> to vector<2x128xf32>
    %617 = arith.addf %614, %616 : vector<2x128xf32>
    %c0_515 = arith.constant 0 : index
    %c0_516 = arith.constant 0 : index
    %618 = vector.load %arg12[%c0_515, %c0_516] : memref<2x128xf32, #tpu.memory_space<vmem>>, vector<2x128xf32>
    tpu.vector_store %arg12[%c0_515, %c0_516], %617 {strides = array<i32>} : memref<2x128xf32, #tpu.memory_space<vmem>>, vector<2x128xf32>,
    return
  }
  func.func @transform_0(%arg0: i32) -> (i32, i32, i32) {
    %c0_i32 = arith.constant 0 : i32
    %c0_i32_0 = arith.constant 0 : i32
    %c0_i32_1 = arith.constant 0 : i32
    return %c0_i32, %arg0, %c0_i32_0 : i32, i32, i32
  }
  func.func @transform_1(%arg0: i32) -> (i32, i32) {
    %c0_i32 = arith.constant 0 : i32
    %c0_i32_0 = arith.constant 0 : i32
    %c0_i32_1 = arith.constant 0 : i32
    return %c0_i32, %c0_i32_0 : i32, i32
  }
  func.func @transform_2(%arg0: i32) -> (i32, i32) {
    %c0_i32 = arith.constant 0 : i32
    %c0_i32_0 = arith.constant 0 : i32
    %c0_i32_1 = arith.constant 0 : i32
    return %c0_i32, %c0_i32_0 : i32, i32
  }
  func.func @transform_3(%arg0: i32) -> (i32, i32) {
    %c0_i32 = arith.constant 0 : i32
    %c0_i32_0 = arith.constant 0 : i32
    %c0_i32_1 = arith.constant 0 : i32
    return %c0_i32, %c0_i32_0 : i32, i32
  }
  func.func @transform_4(%arg0: i32) -> (i32, i32) {
    %c0_i32 = arith.constant 0 : i32
    %c0_i32_0 = arith.constant 0 : i32
    %c0_i32_1 = arith.constant 0 : i32
    return %c0_i32, %c0_i32_0 : i32, i32
  }
  func.func @transform_5(%arg0: i32) -> (i32, i32, i32) {
    %c0_i32 = arith.constant 0 : i32
    %c0_i32_0 = arith.constant 0 : i32
    %c0_i32_1 = arith.constant 0 : i32
    %c0_i32_2 = arith.constant 0 : i32
    return %c0_i32, %c0_i32_0, %c0_i32_1 : i32, i32, i32
  }
  func.func @transform_6(%arg0: i32) -> (i32, i32) {
    %c0_i32 = arith.constant 0 : i32
    %c0_i32_0 = arith.constant 0 : i32
    %c0_i32_1 = arith.constant 0 : i32
    return %c0_i32, %c0_i32_0 : i32, i32
  }
  func.func @transform_7(%arg0: i32) -> (i32, i32) {
    %c0_i32 = arith.constant 0 : i32
    %c0_i32_0 = arith.constant 0 : i32
    %c0_i32_1 = arith.constant 0 : i32
    return %c0_i32, %c0_i32_0 : i32, i32
  }
  func.func @transform_8(%arg0: i32) -> (i32, i32) {
    %c0_i32 = arith.constant 0 : i32
    %c0_i32_0 = arith.constant 0 : i32
    %c0_i32_1 = arith.constant 0 : i32
    return %c0_i32, %c0_i32_0 : i32, i32
  }
  func.func @transform_9(%arg0: i32) -> (i32, i32) {
    %c0_i32 = arith.constant 0 : i32
    %c0_i32_0 = arith.constant 0 : i32
    %c0_i32_1 = arith.constant 0 : i32
    return %c0_i32, %c0_i32_0 : i32, i32
  }
  func.func @transform_10(%arg0: i32) -> (i32, i32) {
    %c0_i32 = arith.constant 0 : i32
    %c0_i32_0 = arith.constant 0 : i32
    %c0_i32_1 = arith.constant 0 : i32
    return %c0_i32, %c0_i32_0 : i32, i32
  }
  func.func @transform_11(%arg0: i32) -> (i32, i32) {
    %c0_i32 = arith.constant 0 : i32
    %c0_i32_0 = arith.constant 0 : i32
    return %arg0, %c0_i32 : i32, i32
  }
}

</mosaic_0001>

<bundles_post_ra>
// kernel: dqnetwork_forward.1
= control target key start
LH: loop header
LB: loop body
LE: loop exit
PB: predicated region body
PF: predicated region fallthrough
CT: control target
= control target key end

     0   :  { %16 = vsyncpa [#allocation4], 0  ;;  %s17575_s0 = inlined_call_operand.vmem [shape: bf16[25,2,16], index: 0, kind: input, shape index: {}]   ;;  %s17576_s1 = inlined_call_operand.hbm [shape: bf16[16,128], index: 1, kind: input, shape index: {}]   ;;  %s17577_s2 = inlined_call_operand.hbm [shape: f32[1,128], index: 2, kind: input, shape index: {}]   ;;  %s17578_s3 = inlined_call_operand.hbm [shape: bf16[512,256], index: 3, kind: input, shape index: {}]   ;;  %s17579_s4 = inlined_call_operand.hbm [shape: f32[1,256], index: 4, kind: input, shape index: {}]   ;;  %s17580_s5 = inlined_call_operand.hbm [shape: bf16[16,256,512], index: 5, kind: input, shape index: {}]   ;;  %s17581_s6 = inlined_call_operand.hbm [shape: f32[1,512], index: 6, kind: input, shape index: {}]   ;;  %s17582_s7 = inlined_call_operand.hbm [shape: bf16[512,256], index: 7, kind: input, shape index: {}]   ;;  %s17583_s8 = inlined_call_operand.hbm [shape: f32[1,256], index: 8, kind: input, shape index: {}]   ;;  %s17584_s9 = inlined_call_operand.hbm [shape: bf16[256,128], index: 9, kind: input, shape index: {}]   ;;  %s17585_s10 = inlined_call_operand.hbm [shape: f32[1,128], index: 10, kind: input, shape index: {}]   ;;  %s17586_s11 = inlined_call_operand.hbm [shape: f32[2,128], index: 11, kind: output, shape index: {}]  }
   0x1   :  { %17 = vsyncpa [#allocation7], 0 }
   0x2   :  { %18 = vsyncpa [#allocation10], 0 }
   0x3   :  { %19 = vsyncpa [#allocation13], 0 }
   0x4   :  { %20 = vsyncpa [#allocation16], 0 }
   0x5   :  { %21 = vsyncpa [#allocation19], 0 }
   0x6   :  { %22 = vsyncpa [#allocation5], 0  ;;  %s15405_s17 = smov [#allocation6]   ;;  %s15406_s19 = smov [#allocation9]  }
   0x7   :  { %s43_s18 = sshll.u32 %s15405_s17, 4  ;;  %s65_s20 = sshll.u32 %s15406_s19, 4  ;;  %s44_s18 = int_to_ptr.vmem [resolvable:$true] %s43_s18  ;;  %s66_s20 = int_to_ptr.vmem [resolvable:$true] %s65_s20 }
   0x8   :  { %s15149_s23 = scalar_lea.hbm %s17577_s2, 16 }
   0x9   :  { %p15150_p0 = scmp.ne.s32.totalorder %s17577_s2, %s15149_s23  ;;  %p15153_p1 = scmp.lt.u32.totalorder %s15149_s23, %s17577_s2 }
   0xb   :  { %p15155_p2 = pnand %p15153_p1, %p15150_p0 }
   0xd   :  { %15158 = shalt.err (!%p15155_p2)
}
   0xe   :  { %s15159_s28 = scalar_lea.vmem %s44_s18, 16  ;;  %s15163_s29 = scalar_lea.vmem %s44_s18, 32 }
   0xf   :  { %p15160_p3 = scmp.ne.s32.totalorder %s44_s18, %s15159_s28  ;;  %p15164_p4 = scmp.lt.s32.totalorder %s44_s18, %s44_s18 }
  0x10   :  { %p15165_p5 = scmp.lt.s32.totalorder %s15163_s29, %s15159_s28 }
  0x12   :  { %p15166_p6 = por %p15165_p5, %p15164_p4 }
  0x14   :  { %p15167_p7 = pnand %p15166_p6, %p15160_p3 }
  0x16   :  { %15170 = shalt.err (!%p15167_p7)
}
  0x17   :  { %46 = dma.hbm_to_vmem [thread:$0]  %s17577_s2, 16, %s44_s18, [#allocation7]  }
  0x18   :  { %s15171_s15 = scalar_lea.hbm %s17579_s4, 32 }
  0x19   :  { %p15172_p8 = scmp.ne.s32.totalorder %s17579_s4, %s15171_s15  ;;  %p15175_p9 = scmp.lt.u32.totalorder %s15171_s15, %s17579_s4 }
  0x1b   :  { %p15177_p10 = pnand %p15175_p9, %p15172_p8 }
  0x1d   :  { %15180 = shalt.err (!%p15177_p10)
}
  0x1e   :  { %s15181_s22 = scalar_lea.vmem %s66_s20, 32  ;;  %p15186_p12 = scmp.lt.s32.totalorder %s66_s20, %s66_s20 }
  0x1f   :  { %p15182_p11 = scmp.ne.s32.totalorder %s66_s20, %s15181_s22  ;;  %p15187_p13 = scmp.lt.s32.totalorder %s15181_s22, %s15181_s22 }
  0x21   :  { %p15188_p0 = por %p15187_p13, %p15186_p12 }
  0x23   :  { %p15189_p1 = pnand %p15188_p0, %p15182_p11 }
  0x25   :  { %15192 = shalt.err (!%p15189_p1)
}
  0x26   :  { %68 = dma.hbm_to_vmem [thread:$0]  %s17579_s4, 32, %s66_s20, [#allocation10]  }
  0x27   :  { %s15407_s23 = smov [#allocation12]   ;;  %s15408_s25 = smov [#allocation15]  }
  0x28   :  { %s87_s24 = sshll.u32 %s15407_s23, 4  ;;  %s109_s26 = sshll.u32 %s15408_s25, 4  ;;  %s88_s24 = int_to_ptr.vmem [resolvable:$true] %s87_s24  ;;  %s110_s26 = int_to_ptr.vmem [resolvable:$true] %s109_s26 }
  0x29   :  { %s15193_s29 = scalar_lea.hbm %s17581_s6, 64 }
  0x2a   :  { %p15194_p2 = scmp.ne.s32.totalorder %s17581_s6, %s15193_s29  ;;  %p15197_p3 = scmp.lt.u32.totalorder %s15193_s29, %s17581_s6 }
  0x2c   :  { %p15199_p4 = pnand %p15197_p3, %p15194_p2 }
  0x2e   :  { %15202 = shalt.err (!%p15199_p4)
}
  0x2f   :  { %s15203_s4 = scalar_lea.vmem %s88_s24, 64  ;;  %p15208_p6 = scmp.lt.s32.totalorder %s88_s24, %s88_s24 }
  0x30   :  { %p15204_p5 = scmp.ne.s32.totalorder %s88_s24, %s15203_s4  ;;  %p15209_p7 = scmp.lt.s32.totalorder %s15203_s4, %s15203_s4 }
  0x32   :  { %p15210_p8 = por %p15209_p7, %p15208_p6 }
  0x34   :  { %p15211_p9 = pnand %p15210_p8, %p15204_p5 }
  0x36   :  { %15214 = shalt.err (!%p15211_p9)
}
  0x37   :  { %90 = dma.hbm_to_vmem [thread:$0]  %s17581_s6, 64, %s88_s24, [#allocation13]  }
  0x38   :  { %s15215_s19 = scalar_lea.hbm %s17583_s8, 32 }
  0x39   :  { %p15216_p10 = scmp.ne.s32.totalorder %s17583_s8, %s15215_s19  ;;  %p15219_p11 = scmp.lt.u32.totalorder %s15215_s19, %s17583_s8 }
  0x3b   :  { %p15221_p12 = pnand %p15219_p11, %p15216_p10 }
  0x3d   :  { %15224 = shalt.err (!%p15221_p12)
}
  0x3e   :  { %s15225_s23 = scalar_lea.vmem %s110_s26, 32  ;;  %p15230_p0 = scmp.lt.s32.totalorder %s110_s26, %s110_s26 }
  0x3f   :  { %p15226_p13 = scmp.ne.s32.totalorder %s110_s26, %s15225_s23  ;;  %p15231_p1 = scmp.lt.s32.totalorder %s15225_s23, %s15225_s23 }
  0x41   :  { %p15232_p2 = por %p15231_p1, %p15230_p0 }
  0x43   :  { %p15233_p3 = pnand %p15232_p2, %p15226_p13 }
  0x45   :  { %15236 = shalt.err (!%p15233_p3)
}
  0x46   :  { %112 = dma.hbm_to_vmem [thread:$0]  %s17583_s8, 32, %s110_s26, [#allocation16]  }
  0x47   :  { %s15409_s25 = smov [#allocation3]   ;;  %s15237_s30 = scalar_lea.hbm %s17576_s1, 128 }
  0x48   :  { %s30_s27 = sshll.u32 %s15409_s25, 4  ;;  %p15238_p4 = scmp.ne.s32.totalorder %s17576_s1, %s15237_s30  ;;  %s31_s27 = int_to_ptr.vmem [resolvable:$true] %s30_s27 }
  0x49   :  { %p15241_p5 = scmp.lt.u32.totalorder %s15237_s30, %s17576_s1 }
  0x4b   :  { %p15243_p6 = pnand %p15241_p5, %p15238_p4 }
  0x4d   :  { %15246 = shalt.err (!%p15243_p6)
}
  0x4e   :  { %s15247_s20 = scalar_lea.vmem %s31_s27, 128  ;;  %p15252_p8 = scmp.lt.s32.totalorder %s31_s27, %s31_s27 }
  0x4f   :  { %p15248_p7 = scmp.ne.s32.totalorder %s31_s27, %s15247_s20  ;;  %p15253_p9 = scmp.lt.s32.totalorder %s15247_s20, %s15247_s20 }
  0x51   :  { %p15254_p10 = por %p15253_p9, %p15252_p8 }
  0x53   :  { %p15255_p11 = pnand %p15254_p10, %p15248_p7 }
  0x55   :  { %15258 = shalt.err (!%p15255_p11)
}
  0x56   :  { %s15410_s8 = smov 64   ;;  %s15411_s26 = smov 4  }
  0x57   :  { %36 = dma.hbm_to_vmem [thread:$0]  %s17576_s1, 128, %s31_s27, [#allocation4], %s15410_s8, %s15410_s8, %s15411_s26  }
  0x58   :  { %s15412_s17 = smov [#allocation8]   ;;  %s15259_s2 = scalar_lea.hbm %s17578_s3, 8192 }
  0x59   :  { %s52_s19 = sshll.u32 %s15412_s17, 4  ;;  %p15260_p12 = scmp.ne.s32.totalorder %s17578_s3, %s15259_s2  ;;  %s53_s19 = int_to_ptr.vmem [resolvable:$true] %s52_s19 }
  0x5a   :  { %p15263_p13 = scmp.lt.u32.totalorder %s15259_s2, %s17578_s3 }
  0x5c   :  { %p15265_p0 = pnand %p15263_p13, %p15260_p12 }
  0x5e   :  { %15268 = shalt.err (!%p15265_p0)
}
  0x5f   :  { %s15269_s25 = scalar_lea.vmem %s53_s19, 8192  ;;  %p15274_p2 = scmp.lt.s32.totalorder %s53_s19, %s53_s19 }
  0x60   :  { %p15270_p1 = scmp.ne.s32.totalorder %s53_s19, %s15269_s25  ;;  %p15275_p3 = scmp.lt.s32.totalorder %s15269_s25, %s15269_s25 }
  0x62   :  { %p15276_p4 = por %p15275_p3, %p15274_p2 }
  0x64   :  { %p15277_p5 = pnand %p15276_p4, %p15270_p1 }
  0x66   :  { %15280 = shalt.err (!%p15277_p5)
}
  0x67   :  { %s15413_s1 = smov 128   ;;  %s15414_s27 = smov 8  }
  0x68   :  { %58 = dma.hbm_to_vmem [thread:$0]  %s17578_s3, 8192, %s53_s19, [#allocation7], %s15413_s1, %s15413_s1, %s15414_s27  }
  0x69   :  { %s15415_s30 = smov [#allocation11]   ;;  %s15281_s4 = scalar_lea.hbm %s17580_s5, 131072 }
  0x6a   :  { %s74_s12 = sshll.u32 %s15415_s30, 4  ;;  %p15282_p6 = scmp.ne.s32.totalorder %s17580_s5, %s15281_s4  ;;  %s75_s12 = int_to_ptr.vmem [resolvable:$true] %s74_s12 }
  0x6b   :  { %p15285_p7 = scmp.lt.u32.totalorder %s15281_s4, %s17580_s5 }
  0x6d   :  { %p15287_p8 = pnand %p15285_p7, %p15282_p6 }
  0x6f   :  { %15290 = shalt.err (!%p15287_p8)
}
  0x70   :  { %s15291_s21 = scalar_lea.vmem %s75_s12, 131072  ;;  %p15296_p10 = scmp.lt.s32.totalorder %s75_s12, %s75_s12 }
  0x71   :  { %p15292_p9 = scmp.ne.s32.totalorder %s75_s12, %s15291_s21  ;;  %p15297_p11 = scmp.lt.s32.totalorder %s15291_s21, %s15291_s21 }
  0x73   :  { %p15298_p12 = por %p15297_p11, %p15296_p10 }
  0x75   :  { %p15299_p13 = pnand %p15298_p12, %p15292_p9 }
  0x77   :  { %15302 = shalt.err (!%p15299_p13)
}
  0x78   :  { %s15416_s3 = smov 256   ;;  %s15417_s19 = smov 16  }
  0x79   :  { %80 = dma.hbm_to_vmem [thread:$0]  %s17580_s5, 131072, %s75_s12, [#allocation10], %s15416_s3, %s15416_s3, %s15417_s19  }
  0x7a   :  { %s15418_s18 = smov [#allocation14]   ;;  %s15419_s6 = smov [#allocation17]  }
  0x7b   :  { %s96_s23 = sshll.u32 %s15418_s18, 4  ;;  %s118_s24 = sshll.u32 %s15419_s6, 4  ;;  %s97_s23 = int_to_ptr.vmem [resolvable:$true] %s96_s23  ;;  %s119_s24 = int_to_ptr.vmem [resolvable:$true] %s118_s24 }
  0x7c   :  { %s15303_s29 = scalar_lea.hbm %s17582_s7, 8192 }
  0x7d   :  { %p15304_p0 = scmp.ne.s32.totalorder %s17582_s7, %s15303_s29  ;;  %p15307_p1 = scmp.lt.u32.totalorder %s15303_s29, %s17582_s7 }
  0x7f   :  { %p15309_p2 = pnand %p15307_p1, %p15304_p0 }
  0x81   :  { %15312 = shalt.err (!%p15309_p2)
}
  0x82   :  { %s15313_s5 = scalar_lea.vmem %s97_s23, 8192  ;;  %p15318_p4 = scmp.lt.s32.totalorder %s97_s23, %s97_s23 }
  0x83   :  { %p15314_p3 = scmp.ne.s32.totalorder %s97_s23, %s15313_s5  ;;  %p15319_p5 = scmp.lt.s32.totalorder %s15313_s5, %s15313_s5 }
  0x85   :  { %p15320_p6 = por %p15319_p5, %p15318_p4 }
  0x87   :  { %p15321_p7 = pnand %p15320_p6, %p15314_p3 }
  0x89   :  { %15324 = shalt.err (!%p15321_p7)
}
  0x8a   :  { %102 = dma.hbm_to_vmem [thread:$0]  %s17582_s7, 8192, %s97_s23, [#allocation13], %s15413_s1, %s15413_s1, %s15414_s27  }
  0x8b   :  { %s15325_s17 = scalar_lea.hbm %s17584_s9, 2048 }
  0x8c   :  { %p15326_p8 = scmp.ne.s32.totalorder %s17584_s9, %s15325_s17  ;;  %p15329_p9 = scmp.lt.u32.totalorder %s15325_s17, %s17584_s9 }
  0x8e   :  { %p15331_p10 = pnand %p15329_p9, %p15326_p8 }
  0x90   :  { %15334 = shalt.err (!%p15331_p10)
}
  0x91   :  { %s15335_s2 = scalar_lea.vmem %s119_s24, 2048  ;;  %p15340_p12 = scmp.lt.s32.totalorder %s119_s24, %s119_s24 }
  0x92   :  { %p15336_p11 = scmp.ne.s32.totalorder %s119_s24, %s15335_s2  ;;  %p15341_p13 = scmp.lt.s32.totalorder %s15335_s2, %s15335_s2 }
  0x94   :  { %p15342_p0 = por %p15341_p13, %p15340_p12 }
  0x96   :  { %p15343_p1 = pnand %p15342_p0, %p15336_p11 }
  0x98   :  { %15346 = shalt.err (!%p15343_p1)
}
  0x99   :  { %124 = dma.hbm_to_vmem [thread:$0]  %s17584_s9, 2048, %s119_s24, [#allocation16], %s15410_s8, %s15410_s8, %s15411_s26  }
  0x9a   :  { %s15420_s27 = smov [#allocation18]   ;;  %s15347_s25 = scalar_lea.hbm %s17585_s10, 16 }
  0x9b   :  { %s131_s18 = sshll.u32 %s15420_s27, 4  ;;  %p15348_p2 = scmp.ne.s32.totalorder %s17585_s10, %s15347_s25  ;;  %s132_s18 = int_to_ptr.vmem [resolvable:$true] %s131_s18 }
  0x9c   :  { %p15351_p3 = scmp.lt.u32.totalorder %s15347_s25, %s17585_s10 }
  0x9e   :  { %p15353_p4 = pnand %p15351_p3, %p15348_p2 }
  0xa0   :  { %15356 = shalt.err (!%p15353_p4)
}
  0xa1   :  { %s15357_s14 = scalar_lea.vmem %s132_s18, 16  ;;  %s15361_s9 = scalar_lea.vmem %s132_s18, 32 }
  0xa2   :  { %p15358_p5 = scmp.ne.s32.totalorder %s132_s18, %s15357_s14  ;;  %p15362_p6 = scmp.lt.s32.totalorder %s132_s18, %s132_s18 }
  0xa3   :  { %p15363_p7 = scmp.lt.s32.totalorder %s15361_s9, %s15357_s14 }
  0xa5   :  { %p15364_p8 = por %p15363_p7, %p15362_p6 }
  0xa7   :  { %p15365_p9 = pnand %p15364_p8, %p15358_p5 }
  0xa9   :  { %15368 = shalt.err (!%p15365_p9)
}
  0xaa   :  { %134 = dma.hbm_to_vmem [thread:$0]  %s17585_s10, 16, %s132_s18, [#allocation19]  }
  0xab   :  { %15391 = dma.done.wait [#allocation4], 128  }
  0xac   :  { %15392 = vsyncadd [#allocation4], 4294967168 }
  0xad   :  { %15393 = dma.done.wait [#allocation7], 8208  }
  0xae   :  { %15394 = vsyncadd [#allocation7], 4294959088 }
  0xaf   :  { %15395 = dma.done.wait [#allocation10], 131104  }
  0xb0   :  { %15396 = vsyncadd [#allocation10], 4294836192 }
  0xb1   :  { %15397 = dma.done.wait [#allocation13], 8256  }
  0xb2   :  { %15398 = vsyncadd [#allocation13], 4294959040 }
  0xb3   :  { %15399 = dma.done.wait [#allocation16], 2080  }
  0xb4   :  { %15400 = vsyncadd [#allocation16], 4294965216 }
  0xb5   :  { %15401 = dma.done.wait [#allocation19], 16  }
  0xb6   :  { %15402 = vsyncadd [#allocation19], 4294967280  ;;  %v15421_v0 = vmov 0.0   ;;  %vm15422_vm0 = vmmov 0   ;;  %v15622_v1 = vld [vmem:[#allocation3] sm:$0xff]   ;;  %vm182_vm1 = vcmask 130048  }
  0xb7   :  { %12733 = vmatprep.subr.bf16.mxu1 %v15421_v0  ;;  %12735 = vmatprep.mubr.msk.bf16.mxu1 %vm15422_vm0, %v15421_v0  ;;  %v169_v2 = vld [vmem:[%s17575_s0] sm:$0x1]  ;;  %v11450_v3 = vld [vmem:[%s17575_s0 + $0x4] sm:$0x1]  ;;  %v11444_v4 = vld [vmem:[%s17575_s0 + $0x1] sm:$0x1] }
  0xb8   :  { %12757 = vmatprep.subr.bf16.mxu0 %v15421_v0  ;;  %12759 = vmatprep.mubr.msk.bf16.mxu0 %vm15422_vm0, %v15421_v0  ;;  %v11454_v5 = vld [vmem:[%s17575_s0 + $0x6] sm:$0x1]  ;;  %v11446_v6 = vld [vmem:[%s17575_s0 + $0x2] sm:$0x1]  ;;  %v11458_v7 = vld [vmem:[%s17575_s0 + $0x8] sm:$0x1] }
  0xb9   :  { %12734 = vmatpush3.bf16.msra.mxu1 %v15622_v1  ;;  %12758 = vmatpush3.bf16.msra.mxu0 %v15622_v1  ;;  %v11448_v8 = vld [vmem:[%s17575_s0 + $0x3] sm:$0x1]  ;;  %v11462_v9 = vld [vmem:[%s17575_s0 + $0xa] sm:$0x1]  ;;  %v11452_v10 = vld [vmem:[%s17575_s0 + $0x5] sm:$0x1] }
  0xba   :  { %12739 = vmatprep.subr.bf16.mxu1 %v15421_v0  ;;  %12769 = vmatprep.subr.bf16.mxu0 %v15421_v0  ;;  %v11466_v11 = vld [vmem:[%s17575_s0 + $0xc] sm:$0x1]  ;;  %v11470_v12 = vld [vmem:[%s17575_s0 + $0xe] sm:$0x1]  ;;  %v11456_v13 = vld [vmem:[%s17575_s0 + $0x7] sm:$0x1] }
  0xbb   :  { %v11474_v14 = vld [vmem:[%s17575_s0 + $0x10] sm:$0x1]  ;;  %v11460_v15 = vld [vmem:[%s17575_s0 + $0x9] sm:$0x1]  ;;  %v11478_v16 = vld [vmem:[%s17575_s0 + $0x12] sm:$0x1] }
  0xbc   :  { %12736 = vmatmul.mubr.msk.bf16.vlgmr.msra.gmra.mrb[0].mxu1 %vm182_vm1, %v169_v2  ;;  %12760 = vmatmul.mubr.msk.bf16.vlgmr.msra.gmra.mrb[0].mxu0 %vm182_vm1, %v11450_v3  ;;  %v11464_v17 = vld [vmem:[%s17575_s0 + $0xb] sm:$0x1]  ;;  %v11482_v18 = vld [vmem:[%s17575_s0 + $0x14] sm:$0x1]  ;;  %v11468_v19 = vld [vmem:[%s17575_s0 + $0xd] sm:$0x1] }
  0xbd   :  { %12740 = vmatpush3.bf16.msra.mxu1 %v15622_v1  ;;  %12741 = vmatprep.mubr.msk.bf16.mxu1 %vm15422_vm0, %v15421_v0  ;;  %v11486_v20 = vld [vmem:[%s17575_s0 + $0x16] sm:$0x1]  ;;  %v11472_v21 = vld [vmem:[%s17575_s0 + $0xf] sm:$0x1]  ;;  %v11490_v23 = vld [vmem:[%s17575_s0 + $0x18] sm:$0x1] }
  0xbe   :  { %12745 = vmatprep.subr.bf16.mxu1 %v15421_v0  ;;  %12770 = vmatpush3.bf16.msra.mxu0 %v15622_v1  ;;  %v15778_v22 = vld [vmem:[#allocation8 + $0x4] ss:$8 sps:$4 sm:$0xff]   ;;  %v13005_v25 = vld [vmem:[#allocation8] ss:$8 sps:$4 sm:$0xff]   ;;  %v13006_v26 = vld [vmem:[#allocation8 + $0x14] ss:$8 sps:$4 sm:$0xff]  }
  0xbf   :  { %12771 = vmatprep.mubr.msk.bf16.mxu0 %vm15422_vm0, %v15421_v0  ;;  %12781 = vmatprep.subr.bf16.mxu0 %v15421_v0  ;;  %v11476_v24 = vld [vmem:[%s17575_s0 + $0x11] sm:$0x1]  ;;  %v13008_v27 = vld [vmem:[#allocation8 + $0x10] ss:$8 sps:$4 sm:$0xff]   ;;  %v13011_v30 = vld [vmem:[#allocation8 + $0x20] ss:$8 sps:$4 sm:$0xff]  }
  0xc0   :  { %v13009_v28 = vld [vmem:[#allocation8 + $0x24] ss:$8 sps:$4 sm:$0xff]   ;;  %v11480_v29 = vld [vmem:[%s17575_s0 + $0x13] sm:$0x1]  ;;  %v13012_v31 = vld [vmem:[#allocation8 + $0x34] ss:$8 sps:$4 sm:$0xff]  }
  0xc1   :  { %v13014_v32 = vld [vmem:[#allocation8 + $0x30] ss:$8 sps:$4 sm:$0xff]   ;;  %v13015_v33 = vld [vmem:[#allocation8 + $0x44] ss:$8 sps:$4 sm:$0xff]   ;;  %v13017_v35 = vld [vmem:[#allocation8 + $0x40] ss:$8 sps:$4 sm:$0xff]  }
  0xc2   :  { %v11484_v34 = vld [vmem:[%s17575_s0 + $0x15] sm:$0x1]  ;;  %v13018_v36 = vld [vmem:[#allocation8 + $0x54] ss:$8 sps:$4 sm:$0xff]   ;;  %v13023_v37 = vld [vmem:[#allocation8 + $0x104] ss:$8 sps:$4 sm:$0xff]  }
  0xc3   :  { %v13020_v38 = vld [vmem:[#allocation8 + $0x50] ss:$8 sps:$4 sm:$0xff]   ;;  %v13021_v39 = vld [vmem:[#allocation8 + $0x64] ss:$8 sps:$4 sm:$0xff]   ;;  %v11488_v40 = vld [vmem:[%s17575_s0 + $0x17] sm:$0x1] }
  0xc4   :  { %12742 = vmatmul.mubr.msk.bf16.vlgmr.msra.gmra.mrb[4].mxu1 %vm182_vm1, %v11444_v4  ;;  %12772 = vmatmul.mubr.msk.bf16.vlgmr.msra.gmra.mrb[4].mxu0 %vm182_vm1, %v11454_v5  ;;  %v13025_v41 = vld [vmem:[#allocation8 + $0x60] ss:$8 sps:$4 sm:$0xff]   ;;  %v13027_v43 = vld [vmem:[#allocation8 + $0x74] ss:$8 sps:$4 sm:$0xff]   ;;  %v13031_v45 = vld [vmem:[#allocation8 + $0x70] ss:$8 sps:$4 sm:$0xff]  }
  0xc5   :  { %12746 = vmatpush3.bf16.msra.mxu1 %v15622_v1  ;;  %12747 = vmatprep.mubr.msk.bf16.mxu1 %vm15422_vm0, %v15421_v0  ;;  %v13026_v42 = vld [vmem:[#allocation8 + $0x100] ss:$8 sps:$4 sm:$0xff]   ;;  %v13029_v44 = vld [vmem:[#allocation8 + $0x114] ss:$8 sps:$4 sm:$0xff]   ;;  %v13032_v46 = vld [vmem:[#allocation8 + $0x110] ss:$8 sps:$4 sm:$0xff]  }
  0xc6   :  { %12751 = vmatprep.subr.bf16.mxu1 %v15421_v0  ;;  %12782 = vmatpush3.bf16.msra.mxu0 %v15622_v1  ;;  %v13033_v47 = vld [vmem:[#allocation8 + $0x84] ss:$8 sps:$4 sm:$0xff]   ;;  %v13037_v49 = vld [vmem:[#allocation8 + $0x80] ss:$8 sps:$4 sm:$0xff]   ;;  %v13039_v51 = vld [vmem:[#allocation8 + $0x94] ss:$8 sps:$4 sm:$0xff]  }
  0xc7   :  { %12783 = vmatprep.mubr.msk.bf16.mxu0 %vm15422_vm0, %v15421_v0  ;;  %12793 = vmatprep.subr.bf16.mxu0 %v15421_v0  ;;  %v13035_v48 = vld [vmem:[#allocation8 + $0x124] ss:$8 sps:$4 sm:$0xff]   ;;  %v13038_v50 = vld [vmem:[#allocation8 + $0x120] ss:$8 sps:$4 sm:$0xff]   ;;  %v13041_v52 = vld [vmem:[#allocation8 + $0x134] ss:$8 sps:$4 sm:$0xff]  }
  0xc8   :  { %v13043_v53 = vld [vmem:[#allocation8 + $0x90] ss:$8 sps:$4 sm:$0xff]   ;;  %v13045_v55 = vld [vmem:[#allocation8 + $0xa4] ss:$8 sps:$4 sm:$0xff]   ;;  %v13049_v57 = vld [vmem:[#allocation8 + $0xa0] ss:$8 sps:$4 sm:$0xff]  }
  0xc9   :  { %v13044_v54 = vld [vmem:[#allocation8 + $0x130] ss:$8 sps:$4 sm:$0xff]   ;;  %v13047_v56 = vld [vmem:[#allocation8 + $0x144] ss:$8 sps:$4 sm:$0xff]   ;;  %v13050_v58 = vld [vmem:[#allocation8 + $0x140] ss:$8 sps:$4 sm:$0xff]  }
  0xca   :  { %v13051_v59 = vld [vmem:[#allocation8 + $0xb4] ss:$8 sps:$4 sm:$0xff]   ;;  %v13055_v61 = vld [vmem:[#allocation8 + $0xb0] ss:$8 sps:$4 sm:$0xff]   ;;  %v13057_v63 = vld [vmem:[#allocation8 + $0xc4] ss:$8 sps:$4 sm:$0xff]  }
  0xcb   :  { %v13053_v60 = vld [vmem:[#allocation8 + $0x154] ss:$8 sps:$4 sm:$0xff]   ;;  %v13056_v62 = vld [vmem:[#allocation8 + $0x150] ss:$8 sps:$4 sm:$0xff]   ;;  %v13062_v2 = vld [vmem:[#allocation8 + $0x160] ss:$8 sps:$4 sm:$0xff]  }
  0xcc   :  { %12748 = vmatmul.mubr.msk.bf16.vlgmr.msra.gmra.mrb[8].mxu1 %vm182_vm1, %v11446_v6  ;;  %12784 = vmatmul.mubr.msk.bf16.vlgmr.msra.gmra.mrb[8].mxu0 %vm182_vm1, %v11458_v7  ;;  %v13063_v3 = vld [vmem:[#allocation8 + $0xd4] ss:$8 sps:$4 sm:$0xff]   ;;  %v13067_v5 = vld [vmem:[#allocation8 + $0xd0] ss:$8 sps:$4 sm:$0xff]   ;;  %v13069_v7 = vld [vmem:[#allocation8 + $0xe4] ss:$8 sps:$4 sm:$0xff]  }
  0xcd   :  { %12752 = vmatpush3.bf16.msra.mxu1 %v15622_v1  ;;  %12753 = vmatprep.mubr.msk.bf16.mxu1 %vm15422_vm0, %v15421_v0  ;;  %v13065_v4 = vld [vmem:[#allocation8 + $0x174] ss:$8 sps:$4 sm:$0xff]   ;;  %v13068_v6 = vld [vmem:[#allocation8 + $0x170] ss:$8 sps:$4 sm:$0xff]   ;;  %s15423_s0 = smov [#allocation20]  }
  0xce   :  { %12763 = vmatprep.subr.bf16.mxu1 %v15421_v0  ;;  %12794 = vmatpush3.bf16.msra.mxu0 %v15622_v1  ;;  %s11427_s28 = sshll.u32 %s15423_s0, 4  ;;  %s11428_s28 = int_to_ptr.vmem [resolvable:$true] %s11427_s28 }
  0xcf   :  { %12795 = vmatprep.mubr.msk.bf16.mxu0 %vm15422_vm0, %v15421_v0  ;;  %12805 = vmatprep.subr.bf16.mxu0 %v15421_v0  ;;  %s15369_s29 = scalar_lea.vmem %s11428_s28, 32  ;;  %p15374_p11 = scmp.lt.s32.totalorder %s11428_s28, %s11428_s28 }
  0xd0   :  { %p15370_p10 = scmp.ne.s32.totalorder %s11428_s28, %s15369_s29  ;;  %p15375_p12 = scmp.lt.s32.totalorder %s15369_s29, %s15369_s29 }
  0xd2   :  { %p15376_p13 = por %p15375_p12, %p15374_p11 }
  0xd4   :  { %12754 = vmatmul.mubr.msk.bf16.vlgmr.msra.gmra.mrb[12].mxu1 %vm182_vm1, %v11448_v8  ;;  %12796 = vmatmul.mubr.msk.bf16.vlgmr.msra.gmra.mrb[12].mxu0 %vm182_vm1, %v11462_v9  ;;  %v13071_v8 = vld [vmem:[#allocation8 + $0x184] ss:$8 sps:$4 sm:$0xff]   ;;  %v13073_v9 = vld [vmem:[#allocation8 + $0xe0] ss:$8 sps:$4 sm:$0xff]   ;;  %p15377_p0 = pnand %p15376_p13, %p15370_p10 }
  0xd5   :  { %12764 = vmatpush3.bf16.msra.mxu1 %v15622_v1  ;;  %12765 = vmatprep.mubr.msk.bf16.mxu1 %vm15422_vm0, %v15421_v0 }
  0xd6   :  { %12806 = vmatpush3.bf16.msra.mxu0 %v15622_v1  ;;  %12807 = vmatprep.mubr.msk.bf16.mxu0 %vm15422_vm0, %v15421_v0 }
  0xd7   :  { %12817 = vmatprep.subr.bf16.mxu0 %v15421_v0  ;;  %12775 = vmatprep.subr.bf16.mxu1 %v15421_v0 }
  0xdc   :  { %12766 = vmatmul.mubr.msk.bf16.vlgmr.msra.gmra.mrb[16].mxu1 %vm182_vm1, %v11452_v10  ;;  %12808 = vmatmul.mubr.msk.bf16.vlgmr.msra.gmra.mrb[16].mxu0 %vm182_vm1, %v11466_v11  ;;  %v13074_v10 = vld [vmem:[#allocation8 + $0x180] ss:$8 sps:$4 sm:$0xff]   ;;  %v13075_v11 = vld [vmem:[#allocation8 + $0xf4] ss:$8 sps:$4 sm:$0xff]  }
  0xdd   :  { %12818 = vmatpush3.bf16.msra.mxu0 %v15622_v1  ;;  %12776 = vmatpush3.bf16.msra.mxu1 %v15622_v1 }
  0xde   :  { %12819 = vmatprep.mubr.msk.bf16.mxu0 %vm15422_vm0, %v15421_v0  ;;  %12777 = vmatprep.mubr.msk.bf16.mxu1 %vm15422_vm0, %v15421_v0 }
  0xdf   :  { %12829 = vmatprep.subr.bf16.mxu0 %v15421_v0  ;;  %12787 = vmatprep.subr.bf16.mxu1 %v15421_v0 }
  0xe4   :  { %12820 = vmatmul.mubr.msk.bf16.vlgmr.msra.gmra.mrb[20].mxu0 %vm182_vm1, %v11470_v12  ;;  %12778 = vmatmul.mubr.msk.bf16.vlgmr.msra.gmra.mrb[20].mxu1 %vm182_vm1, %v11456_v13  ;;  %v13077_v12 = vld [vmem:[#allocation8 + $0x194] ss:$8 sps:$4 sm:$0xff]   ;;  %v13079_v13 = vld [vmem:[#allocation8 + $0xf0] ss:$8 sps:$4 sm:$0xff]  }
  0xe5   :  { %12830 = vmatpush3.bf16.msra.mxu0 %v15622_v1  ;;  %12788 = vmatpush3.bf16.msra.mxu1 %v15622_v1 }
  0xe6   :  { %12831 = vmatprep.mubr.msk.bf16.mxu0 %vm15422_vm0, %v15421_v0  ;;  %12789 = vmatprep.mubr.msk.bf16.mxu1 %vm15422_vm0, %v15421_v0 }
  0xe7   :  { %12841 = vmatprep.subr.bf16.mxu0 %v15421_v0  ;;  %12799 = vmatprep.subr.bf16.mxu1 %v15421_v0 }
  0xec   :  { %12832 = vmatmul.mubr.msk.bf16.vlgmr.msra.gmra.mrb[24].mxu0 %vm182_vm1, %v11474_v14  ;;  %12790 = vmatmul.mubr.msk.bf16.vlgmr.msra.gmra.mrb[24].mxu1 %vm182_vm1, %v11460_v15  ;;  %v13080_v14 = vld [vmem:[#allocation8 + $0x190] ss:$8 sps:$4 sm:$0xff]   ;;  %v13081_v15 = vld [vmem:[#allocation8 + $0x1a4] ss:$8 sps:$4 sm:$0xff]  }
  0xed   :  { %12842 = vmatpush3.bf16.msra.mxu0 %v15622_v1  ;;  %12800 = vmatpush3.bf16.msra.mxu1 %v15622_v1 }
  0xee   :  { %12843 = vmatprep.mubr.msk.bf16.mxu0 %vm15422_vm0, %v15421_v0  ;;  %12801 = vmatprep.mubr.msk.bf16.mxu1 %vm15422_vm0, %v15421_v0 }
  0xef   :  { %12853 = vmatprep.subr.bf16.mxu0 %v15421_v0  ;;  %12811 = vmatprep.subr.bf16.mxu1 %v15421_v0 }
  0xf4   :  { %12844 = vmatmul.mubr.msk.bf16.vlgmr.msra.gmra.mrb[28].mxu0 %vm182_vm1, %v11478_v16  ;;  %12802 = vmatmul.mubr.msk.bf16.vlgmr.msra.gmra.mrb[28].mxu1 %vm182_vm1, %v11464_v17  ;;  %v13083_v16 = vld [vmem:[#allocation8 + $0x1a0] ss:$8 sps:$4 sm:$0xff]   ;;  %v13084_v17 = vld [vmem:[#allocation8 + $0x1b4] ss:$8 sps:$4 sm:$0xff]  }
  0xf5   :  { %12854 = vmatpush3.bf16.msra.mxu0 %v15622_v1  ;;  %12812 = vmatpush3.bf16.msra.mxu1 %v15622_v1 }
  0xf6   :  { %12855 = vmatprep.mubr.msk.bf16.mxu0 %vm15422_vm0, %v15421_v0  ;;  %12813 = vmatprep.mubr.msk.bf16.mxu1 %vm15422_vm0, %v15421_v0 }
  0xf7   :  { %12865 = vmatprep.subr.bf16.mxu0 %v15421_v0  ;;  %12823 = vmatprep.subr.bf16.mxu1 %v15421_v0 }
  0xfc   :  { %12856 = vmatmul.mubr.msk.bf16.vlgmr.msra.gmra.mrb[32].mxu0 %vm182_vm1, %v11482_v18  ;;  %12814 = vmatmul.mubr.msk.bf16.vlgmr.msra.gmra.mrb[32].mxu1 %vm182_vm1, %v11468_v19  ;;  %v13086_v18 = vld [vmem:[#allocation8 + $0x1b0] ss:$8 sps:$4 sm:$0xff]   ;;  %v13087_v19 = vld [vmem:[#allocation8 + $0x1c4] ss:$8 sps:$4 sm:$0xff]  }
  0xfd   :  { %12866 = vmatpush3.bf16.msra.mxu0 %v15622_v1  ;;  %12824 = vmatpush3.bf16.msra.mxu1 %v15622_v1 }
  0xfe   :  { %12867 = vmatprep.mubr.msk.bf16.mxu0 %vm15422_vm0, %v15421_v0  ;;  %12825 = vmatprep.mubr.msk.bf16.mxu1 %vm15422_vm0, %v15421_v0 }
  0xff   :  { %12877 = vmatprep.subr.bf16.mxu0 %v15421_v0  ;;  %12835 = vmatprep.subr.bf16.mxu1 %v15421_v0 }
 0x104   :  { %12868 = vmatmul.mubr.msk.bf16.vlgmr.msra.gmra.mrb[36].mxu0 %vm182_vm1, %v11486_v20  ;;  %12826 = vmatmul.mubr.msk.bf16.vlgmr.msra.gmra.mrb[36].mxu1 %vm182_vm1, %v11472_v21  ;;  %v13089_v20 = vld [vmem:[#allocation8 + $0x1c0] ss:$8 sps:$4 sm:$0xff]   ;;  %v13090_v21 = vld [vmem:[#allocation8 + $0x1d4] ss:$8 sps:$4 sm:$0xff]  }
 0x105   :  { %12878 = vmatpush3.bf16.msra.mxu0 %v15622_v1  ;;  %12836 = vmatpush3.bf16.msra.mxu1 %v15622_v1 }
 0x106   :  { %12879 = vmatprep.mubr.msk.bf16.mxu0 %vm15422_vm0, %v15421_v0  ;;  %12837 = vmatprep.mubr.msk.bf16.mxu1 %vm15422_vm0, %v15421_v0 }
 0x107   :  { %1805 = vmatprep.subr.bf16.mxu0 %v15778_v22  ;;  %12847 = vmatprep.subr.bf16.mxu1 %v15421_v0 }
 0x10c   :  { %12880 = vmatmul.mubr.msk.bf16.vlgmr.msra.gmra.mrb[40].mxu0 %vm182_vm1, %v11490_v23  ;;  %12838 = vmatmul.mubr.msk.bf16.vlgmr.msra.gmra.mrb[40].mxu1 %vm182_vm1, %v11476_v24  ;;  %v13092_v23 = vld [vmem:[#allocation8 + $0x1d0] ss:$8 sps:$4 sm:$0xff]   ;;  %v13093_v24 = vld [vmem:[#allocation8 + $0x1e4] ss:$8 sps:$4 sm:$0xff]  }
 0x10d   :  { %1806 = vmatpush1.bf16.msra.mxu0 %v13005_v25  ;;  %12848 = vmatpush3.bf16.msra.mxu1 %v15622_v1  ;;  %v13095_v25 = vld [vmem:[#allocation8 + $0x1e0] ss:$8 sps:$4 sm:$0xff]  }
 0x10e   :  { %1807 = vmatprep.subr.bf16.mxu0 %v13006_v26  ;;  %12849 = vmatprep.mubr.msk.bf16.mxu1 %vm15422_vm0, %v15421_v0  ;;  %v13096_v26 = vld [vmem:[#allocation8 + $0x1f4] ss:$8 sps:$4 sm:$0xff]  }
 0x10f   :  { %12859 = vmatprep.subr.bf16.mxu1 %v15421_v0 }
 0x111   :  { %1808 = vmatpush1.bf16.msra.mxu0 %v13008_v27  ;;  %v13098_v27 = vld [vmem:[#allocation8 + $0x1f0] ss:$8 sps:$4 sm:$0xff]  }
 0x112   :  { %1809 = vmatprep.subr.bf16.mxu0 %v13009_v28 }
 0x114   :  { %12850 = vmatmul.mubr.msk.bf16.vlgmr.msra.gmra.mrb[44].mxu1 %vm182_vm1, %v11480_v29 }
 0x115   :  { %1810 = vmatpush1.bf16.msra.mxu0 %v13011_v30  ;;  %12860 = vmatpush3.bf16.msra.mxu1 %v15622_v1 }
 0x116   :  { %1811 = vmatprep.subr.bf16.mxu0 %v13012_v31  ;;  %12861 = vmatprep.mubr.msk.bf16.mxu1 %vm15422_vm0, %v15421_v0 }
 0x117   :  { %12871 = vmatprep.subr.bf16.mxu1 %v15421_v0 }
 0x119   :  { %1812 = vmatpush1.bf16.msra.mxu0 %v13014_v32 }
 0x11a   :  { %1813 = vmatprep.subr.bf16.mxu0 %v13015_v33 }
 0x11c   :  { %12862 = vmatmul.mubr.msk.bf16.vlgmr.msra.gmra.mrb[48].mxu1 %vm182_vm1, %v11484_v34 }
 0x11d   :  { %1814 = vmatpush1.bf16.msra.mxu0 %v13017_v35  ;;  %12872 = vmatpush3.bf16.msra.mxu1 %v15622_v1  ;;  %v13061_v1 = vld [vmem:[#allocation8 + $0xc0] ss:$8 sps:$4 sm:$0xff]  }
 0x11e   :  { %1815 = vmatprep.subr.bf16.mxu0 %v13018_v36  ;;  %12873 = vmatprep.mubr.msk.bf16.mxu1 %vm15422_vm0, %v15421_v0  ;;  %v13059_v0 = vld [vmem:[#allocation8 + $0x164] ss:$8 sps:$4 sm:$0xff]  }
 0x11f   :  { %1846 = vmatprep.subr.bf16.mxu1 %v13023_v37 }
 0x121   :  { %1816 = vmatpush1.bf16.msra.mxu0 %v13020_v38 }
 0x122   :  { %1817 = vmatprep.subr.bf16.mxu0 %v13021_v39 }
 0x124   :  { %12874 = vmatmul.mubr.msk.bf16.vlgmr.msra.gmra.mrb[52].mxu1 %vm182_vm1, %v11488_v40 }
 0x125   :  { %1818 = vmatpush1.bf16.msra.mxu0 %v13025_v41  ;;  %1847 = vmatpush1.bf16.msra.mxu1 %v13026_v42 }
 0x126   :  { %1819 = vmatprep.subr.bf16.mxu0 %v13027_v43  ;;  %1848 = vmatprep.subr.bf16.mxu1 %v13029_v44 }
 0x129   :  { %1820 = vmatpush1.bf16.msra.mxu0 %v13031_v45  ;;  %1849 = vmatpush1.bf16.msra.mxu1 %v13032_v46 }
 0x12a   :  { %1821 = vmatprep.subr.bf16.mxu0 %v13033_v47  ;;  %1850 = vmatprep.subr.bf16.mxu1 %v13035_v48 }
 0x12d   :  { %1822 = vmatpush1.bf16.msra.mxu0 %v13037_v49  ;;  %1851 = vmatpush1.bf16.msra.mxu1 %v13038_v50 }
 0x12e   :  { %1823 = vmatprep.subr.bf16.mxu0 %v13039_v51  ;;  %1852 = vmatprep.subr.bf16.mxu1 %v13041_v52 }
 0x131   :  { %1824 = vmatpush1.bf16.msra.mxu0 %v13043_v53  ;;  %1853 = vmatpush1.bf16.msra.mxu1 %v13044_v54 }
 0x132   :  { %1825 = vmatprep.subr.bf16.mxu0 %v13045_v55  ;;  %1854 = vmatprep.subr.bf16.mxu1 %v13047_v56 }
 0x135   :  { %1826 = vmatpush1.bf16.msra.mxu0 %v13049_v57  ;;  %1855 = vmatpush1.bf16.msra.mxu1 %v13050_v58 }
 0x136   :  { %1827 = vmatprep.subr.bf16.mxu0 %v13051_v59  ;;  %1856 = vmatprep.subr.bf16.mxu1 %v13053_v60 }
 0x139   :  { %1828 = vmatpush1.bf16.msra.mxu0 %v13055_v61  ;;  %1857 = vmatpush1.bf16.msra.mxu1 %v13056_v62 }
 0x13a   :  { %1829 = vmatprep.subr.bf16.mxu0 %v13057_v63  ;;  %1858 = vmatprep.subr.bf16.mxu1 %v13059_v0 }
 0x13d   :  { %1830 = vmatpush1.bf16.msra.mxu0 %v13061_v1  ;;  %1859 = vmatpush1.bf16.msra.mxu1 %v13062_v2 }
 0x13e   :  { %1831 = vmatprep.subr.bf16.mxu0 %v13063_v3  ;;  %1860 = vmatprep.subr.bf16.mxu1 %v13065_v4 }
 0x141   :  { %1832 = vmatpush1.bf16.msra.mxu0 %v13067_v5  ;;  %1861 = vmatpush1.bf16.msra.mxu1 %v13068_v6 }
 0x142   :  { %1833 = vmatprep.subr.bf16.mxu0 %v13069_v7  ;;  %1862 = vmatprep.subr.bf16.mxu1 %v13071_v8 }
 0x145   :  { %1834 = vmatpush1.bf16.msra.mxu0 %v13073_v9  ;;  %1863 = vmatpush1.bf16.msra.mxu1 %v13074_v10 }
 0x146   :  { %1835 = vmatprep.subr.bf16.mxu0 %v13075_v11  ;;  %1864 = vmatprep.subr.bf16.mxu1 %v13077_v12  ;;  %v14747_v11 = vld [vmem:[#allocation8] ss:$8 sps:$4 sm:$0xff]  }
 0x149   :  { %1836 = vmatpush1.bf16.msra.mxu0 %v13079_v13  ;;  %1865 = vmatpush1.bf16.msra.mxu1 %v13080_v14 }
 0x14a   :  { %1866 = vmatprep.subr.bf16.mxu1 %v13081_v15  ;;  %1957 = vmatprep.subr.bf16.mxu0 %v15778_v22  ;;  %v15822_v22 = vld [vmem:[#allocation6] ss:$0 sm:$0xff] }
 0x14d   :  { %1867 = vmatpush1.bf16.msra.mxu1 %v13083_v16  ;;  %v14748_v16 = vld [vmem:[#allocation8 + $0x14] ss:$8 sps:$4 sm:$0xff]  }
 0x14e   :  { %1868 = vmatprep.subr.bf16.mxu1 %v13084_v17 }
 0x151   :  { %1869 = vmatpush1.bf16.msra.mxu1 %v13086_v18 }
 0x152   :  { %1870 = vmatprep.subr.bf16.mxu1 %v13087_v19 }
 0x155   :  { %1871 = vmatpush1.bf16.msra.mxu1 %v13089_v20 }
 0x156   :  { %1872 = vmatprep.subr.bf16.mxu1 %v13090_v21 }
 0x159   :  { %1873 = vmatpush1.bf16.msra.mxu1 %v13092_v23 }
 0x15a   :  { %1874 = vmatprep.subr.bf16.mxu1 %v13093_v24 }
 0x15d   :  { %1875 = vmatpush1.bf16.msra.mxu1 %v13095_v25  ;;  %v14749_v25 = vld [vmem:[#allocation8 + $0x10] ss:$8 sps:$4 sm:$0xff]  }
 0x15e   :  { %1876 = vmatprep.subr.bf16.mxu1 %v13096_v26 }
 0x161   :  { %1877 = vmatpush1.bf16.msra.mxu1 %v13098_v27  ;;  %v14750_v27 = vld [vmem:[#allocation8 + $0x24] ss:$8 sps:$4 sm:$0xff]  }
 0x18f   :  { %v220_v28 = vpop.f32.mrb[0].mxu1  ;;  %v415_v29 = vpop.f32.mrb[0].mxu0 }
 0x190   :  { %v221_v30 = vadd.f32 %v15822_v22, %v220_v28  ;;  %v12737_v31 = vpop.f32.mrb[1].mxu1  ;;  %v416_v32 = vadd.f32 %v15822_v22, %v415_v29  ;;  %v12761_v33 = vpop.f32.mrb[1].mxu0 }
 0x191   :  { %v223_v34 = vpop.f32.mrb[2].mxu1  ;;  %v418_v35 = vpop.f32.mrb[2].mxu0 }
 0x192   :  { %v226_v36 = vmax.f32 %v221_v30, 0.0  ;;  %v12738_v37 = vpop.f32.mrb[3].mxu1  ;;  %v421_v38 = vmax.f32 %v416_v32, 0.0  ;;  %v12762_v39 = vpop.f32.mrb[3].mxu0  ;;  %v14751_v32 = vld [vmem:[#allocation8 + $0x20] ss:$8 sps:$4 sm:$0xff]  }
 0x194   :  { %v227_v40 = vpack.c.bf16 %v226_v36, %v226_v36  ;;  %v422_v41 = vpack.c.bf16 %v421_v38, %v421_v38  ;;  %v14752_v36 = vld [vmem:[#allocation8 + $0x34] ss:$8 sps:$4 sm:$0xff]  }
 0x196   :  { %228 = vst [vmem:[#allocation2] sm:$0x1] %v227_v40  ;;  %424 = vst [vmem:[#allocation2 + $0x4] sm:$0x1] %v422_v41 }
 0x197   :  { %v268_v42 = vpop.f32.mrb[4].mxu1  ;;  %v513_v43 = vpop.f32.mrb[4].mxu0 }
 0x198   :  { %v269_v44 = vadd.f32 %v15822_v22, %v268_v42  ;;  %v12743_v45 = vpop.f32.mrb[5].mxu1  ;;  %v514_v46 = vadd.f32 %v15822_v22, %v513_v43  ;;  %v12773_v47 = vpop.f32.mrb[5].mxu0 }
 0x199   :  { %v271_v48 = vpop.f32.mrb[6].mxu1  ;;  %v516_v49 = vpop.f32.mrb[6].mxu0 }
 0x19a   :  { %v274_v50 = vmax.f32 %v269_v44, 0.0  ;;  %v12744_v51 = vpop.f32.mrb[7].mxu1  ;;  %v519_v52 = vmax.f32 %v514_v46, 0.0  ;;  %v12774_v53 = vpop.f32.mrb[7].mxu0  ;;  %v14753_v44 = vld [vmem:[#allocation8 + $0x30] ss:$8 sps:$4 sm:$0xff]  }
 0x19b   :  { %v14754_v46 = vld [vmem:[#allocation8 + $0x44] ss:$8 sps:$4 sm:$0xff]   ;;  %v14755_v49 = vld [vmem:[#allocation8 + $0x40] ss:$8 sps:$4 sm:$0xff]  }
 0x19c   :  { %v275_v54 = vpack.c.bf16 %v274_v50, %v274_v50  ;;  %v520_v55 = vpack.c.bf16 %v519_v52, %v519_v52 }
 0x19d   :  { %v1406_v5 = vld [vmem:[#allocation2] sm:$0x1] }
 0x19e   :  { %277 = vst [vmem:[#allocation2 + $0x1] sm:$0x1] %v275_v54  ;;  %522 = vst [vmem:[#allocation2 + $0x6] sm:$0x1] %v520_v55  ;;  %v14756_v54 = vld [vmem:[#allocation8 + $0x54] ss:$8 sps:$4 sm:$0xff]  }
 0x19f   :  { %v317_v56 = vpop.f32.mrb[8].mxu1  ;;  %v611_v57 = vpop.f32.mrb[8].mxu0 }
 0x1a0   :  { %v318_v58 = vadd.f32 %v15822_v22, %v317_v56  ;;  %v12749_v59 = vpop.f32.mrb[9].mxu1  ;;  %v612_v60 = vadd.f32 %v15822_v22, %v611_v57  ;;  %v12785_v61 = vpop.f32.mrb[9].mxu0 }
 0x1a1   :  { %v320_v62 = vpop.f32.mrb[10].mxu1  ;;  %v614_v63 = vpop.f32.mrb[10].mxu0  ;;  %v14757_v61 = vld [vmem:[#allocation8 + $0x50] ss:$8 sps:$4 sm:$0xff]  }
 0x1a2   :  { %v323_v0 = vmax.f32 %v318_v58, 0.0  ;;  %v12750_v1 = vpop.f32.mrb[11].mxu1  ;;  %v617_v2 = vmax.f32 %v612_v60, 0.0  ;;  %v12786_v3 = vpop.f32.mrb[11].mxu0 }
 0x1a3   :  { %v14758_v1 = vld [vmem:[#allocation8 + $0x64] ss:$8 sps:$4 sm:$0xff]  }
 0x1a4   :  { %v324_v4 = vpack.c.bf16 %v323_v0, %v323_v0  ;;  %v618_v6 = vpack.c.bf16 %v617_v2, %v617_v2 }
 0x1a5   :  { %v15830_v7 = vld [vmem:[#allocation2 + $0x1] sm:$0x1]  ;;  %v1409_v8 = vld [vmem:[#allocation2 + $0x6] sm:$0x1] }
 0x1a6   :  { %1837 = vmatprep.mubr.bf16.mxu0 %v15830_v7  ;;  %326 = vst [vmem:[#allocation2 + $0x2] sm:$0x1] %v324_v4  ;;  %1878 = vmatprep.mubr.bf16.mxu1 %v1409_v8  ;;  %620 = vst [vmem:[#allocation2 + $0x8] sm:$0x1] %v618_v6  ;;  %v14759_v4 = vld [vmem:[#allocation8 + $0x60] ss:$8 sps:$4 sm:$0xff]  }
 0x1a7   :  { %1838 = vmatmul.mubr.bf16.vlgmr.msra.gmra.mrb[44].mxu0 %v1406_v5  ;;  %v366_v9 = vpop.f32.mrb[12].mxu1  ;;  %v709_v10 = vpop.f32.mrb[12].mxu0 }
 0x1a8   :  { %1958 = vmatpush1.bf16.msra.mxu0 %v14747_v11  ;;  %v367_v12 = vadd.f32 %v15822_v22, %v366_v9  ;;  %v12755_v13 = vpop.f32.mrb[13].mxu1  ;;  %v710_v14 = vadd.f32 %v15822_v22, %v709_v10  ;;  %v12797_v15 = vpop.f32.mrb[13].mxu0  ;;  %v14760_v10 = vld [vmem:[#allocation8 + $0x74] ss:$8 sps:$4 sm:$0xff]  }
 0x1a9   :  { %1959 = vmatprep.subr.bf16.mxu0 %v14748_v16  ;;  %v369_v17 = vpop.f32.mrb[14].mxu1  ;;  %v712_v18 = vpop.f32.mrb[14].mxu0 }
 0x1aa   :  { %v372_v19 = vmax.f32 %v367_v12, 0.0  ;;  %v12756_v20 = vpop.f32.mrb[15].mxu1  ;;  %v715_v21 = vmax.f32 %v710_v14, 0.0  ;;  %v12798_v23 = vpop.f32.mrb[15].mxu0  ;;  %v14761_v17 = vld [vmem:[#allocation8 + $0x70] ss:$8 sps:$4 sm:$0xff]  }
 0x1ab   :  { %v14762_v20 = vld [vmem:[#allocation8 + $0x84] ss:$8 sps:$4 sm:$0xff]  }
 0x1ac   :  { %v373_v24 = vpack.c.bf16 %v372_v19, %v372_v19  ;;  %1960 = vmatpush1.bf16.msra.mxu0 %v14749_v25  ;;  %v716_v26 = vpack.c.bf16 %v715_v21, %v715_v21 }
 0x1ad   :  { %1961 = vmatprep.subr.bf16.mxu0 %v14750_v27  ;;  %v1955_v28 = vld [vmem:[#allocation2 + $0x2] sm:$0x1] }
 0x1ae   :  { %375 = vst [vmem:[#allocation2 + $0x3] sm:$0x1] %v373_v24  ;;  %1989 = vmatprep.mubr.bf16.mxu0 %v1955_v28  ;;  %718 = vst [vmem:[#allocation2 + $0xa] sm:$0x1] %v716_v26  ;;  %v14763_v24 = vld [vmem:[#allocation8 + $0x80] ss:$8 sps:$4 sm:$0xff]  }
 0x1af   :  { %v464_v29 = vpop.f32.mrb[16].mxu1  ;;  %v807_v30 = vpop.f32.mrb[16].mxu0 }
 0x1b0   :  { %v465_v31 = vadd.f32 %v15822_v22, %v464_v29  ;;  %1962 = vmatpush1.bf16.msra.mxu0 %v14751_v32  ;;  %v808_v33 = vadd.f32 %v15822_v22, %v807_v30  ;;  %v12809_v34 = vpop.f32.mrb[17].mxu0  ;;  %v12767_v35 = vpop.f32.mrb[17].mxu1  ;;  %v14764_v29 = vld [vmem:[#allocation8 + $0x94] ss:$8 sps:$4 sm:$0xff]  }
 0x1b1   :  { %1963 = vmatprep.subr.bf16.mxu0 %v14752_v36  ;;  %v810_v37 = vpop.f32.mrb[18].mxu0  ;;  %v467_v38 = vpop.f32.mrb[18].mxu1  ;;  %v14765_v36 = vld [vmem:[#allocation8 + $0x90] ss:$8 sps:$4 sm:$0xff]  }
 0x1b2   :  { %v470_v39 = vmax.f32 %v465_v31, 0.0  ;;  %v813_v40 = vmax.f32 %v808_v33, 0.0  ;;  %v12810_v41 = vpop.f32.mrb[19].mxu0  ;;  %v12768_v42 = vpop.f32.mrb[19].mxu1 }
 0x1b3   :  { %v14767_v42 = vld [vmem:[#allocation8 + $0xa0] ss:$8 sps:$4 sm:$0xff]  }
 0x1b4   :  { %v471_v43 = vpack.c.bf16 %v470_v39, %v470_v39  ;;  %1964 = vmatpush1.bf16.msra.mxu0 %v14753_v44  ;;  %v814_v45 = vpack.c.bf16 %v813_v40, %v813_v40  ;;  %v14766_v39 = vld [vmem:[#allocation8 + $0xa4] ss:$8 sps:$4 sm:$0xff]  }
 0x1b5   :  { %1965 = vmatprep.subr.bf16.mxu0 %v14754_v46 }
 0x1b6   :  { %473 = vst [vmem:[#allocation2 + $0x5] sm:$0x1] %v471_v43  ;;  %816 = vst [vmem:[#allocation2 + $0xc] sm:$0x1] %v814_v45 }
 0x1b7   :  { %v905_v47 = vpop.f32.mrb[20].mxu0  ;;  %v562_v48 = vpop.f32.mrb[20].mxu1 }
 0x1b8   :  { %1966 = vmatpush1.bf16.msra.mxu0 %v14755_v49  ;;  %v906_v50 = vadd.f32 %v15822_v22, %v905_v47  ;;  %v12821_v51 = vpop.f32.mrb[21].mxu0  ;;  %v563_v52 = vadd.f32 %v15822_v22, %v562_v48  ;;  %v12779_v53 = vpop.f32.mrb[21].mxu1  ;;  %v14768_v47 = vld [vmem:[#allocation8 + $0xb4] ss:$8 sps:$4 sm:$0xff]  }
 0x1b9   :  { %1967 = vmatprep.subr.bf16.mxu0 %v14756_v54  ;;  %v908_v55 = vpop.f32.mrb[22].mxu0  ;;  %v565_v56 = vpop.f32.mrb[22].mxu1  ;;  %v14769_v54 = vld [vmem:[#allocation8 + $0xb0] ss:$8 sps:$4 sm:$0xff]  }
 0x1ba   :  { %v911_v57 = vmax.f32 %v906_v50, 0.0  ;;  %v12822_v58 = vpop.f32.mrb[23].mxu0  ;;  %v568_v59 = vmax.f32 %v563_v52, 0.0  ;;  %v12780_v60 = vpop.f32.mrb[23].mxu1 }
 0x1bc   :  { %1968 = vmatpush1.bf16.msra.mxu0 %v14757_v61  ;;  %v912_v62 = vpack.c.bf16 %v911_v57, %v911_v57  ;;  %v569_v63 = vpack.c.bf16 %v568_v59, %v568_v59  ;;  %v14770_v57 = vld [vmem:[#allocation8 + $0xc4] ss:$8 sps:$4 sm:$0xff]   ;;  %v14771_v59 = vld [vmem:[#allocation8 + $0xc0] ss:$8 sps:$4 sm:$0xff]  }
 0x1bd   :  { %v1408_v0 = vld [vmem:[#allocation2 + $0x5] sm:$0x1]  ;;  %1969 = vmatprep.subr.bf16.mxu0 %v14758_v1 }
 0x1be   :  { %1879 = vmatmul.mubr.bf16.vlgmr.msra.gmra.mrb[56].mxu1 %v1408_v0  ;;  %914 = vst [vmem:[#allocation2 + $0xe] sm:$0x1] %v912_v62  ;;  %571 = vst [vmem:[#allocation2 + $0x7] sm:$0x1] %v569_v63  ;;  %v14772_v62 = vld [vmem:[#allocation8 + $0xd4] ss:$8 sps:$4 sm:$0xff]  }
 0x1bf   :  { %v1003_v2 = vpop.f32.mrb[24].mxu0  ;;  %v660_v3 = vpop.f32.mrb[24].mxu1 }
 0x1c0   :  { %1970 = vmatpush1.bf16.msra.mxu0 %v14759_v4  ;;  %v1004_v5 = vadd.f32 %v15822_v22, %v1003_v2  ;;  %v12833_v6 = vpop.f32.mrb[25].mxu0  ;;  %v661_v8 = vadd.f32 %v15822_v22, %v660_v3  ;;  %v12791_v9 = vpop.f32.mrb[25].mxu1  ;;  %v14773_v2 = vld [vmem:[#allocation8 + $0xd0] ss:$8 sps:$4 sm:$0xff]   ;;  %v14774_v4 = vld [vmem:[#allocation8 + $0xe4] ss:$8 sps:$4 sm:$0xff]  }
 0x1c1   :  { %1971 = vmatprep.subr.bf16.mxu0 %v14760_v10  ;;  %v1006_v11 = vpop.f32.mrb[26].mxu0  ;;  %v663_v12 = vpop.f32.mrb[26].mxu1  ;;  %v14775_v6 = vld [vmem:[#allocation8 + $0xe0] ss:$8 sps:$4 sm:$0xff]   ;;  %v14776_v10 = vld [vmem:[#allocation8 + $0xf4] ss:$8 sps:$4 sm:$0xff]  }
 0x1c2   :  { %v1009_v13 = vmax.f32 %v1004_v5, 0.0  ;;  %v12834_v14 = vpop.f32.mrb[27].mxu0  ;;  %v666_v15 = vmax.f32 %v661_v8, 0.0  ;;  %v12792_v16 = vpop.f32.mrb[27].mxu1 }
 0x1c3   :  { %v14777_v14 = vld [vmem:[#allocation8 + $0xf0] ss:$8 sps:$4 sm:$0xff]   ;;  %v14778_v16 = vld [vmem:[#allocation8 + $0x104] ss:$8 sps:$4 sm:$0xff]  }
 0x1c4   :  { %1972 = vmatpush1.bf16.msra.mxu0 %v14761_v17  ;;  %v1010_v18 = vpack.c.bf16 %v1009_v13, %v1009_v13  ;;  %v667_v19 = vpack.c.bf16 %v666_v15, %v666_v15 }
 0x1c5   :  { %1973 = vmatprep.subr.bf16.mxu0 %v14762_v20  ;;  %v1956_v17 = vld [vmem:[#allocation2 + $0x7] sm:$0x1] }
 0x1c6   :  { %1012 = vst [vmem:[#allocation2 + $0x10] sm:$0x1] %v1010_v18  ;;  %669 = vst [vmem:[#allocation2 + $0x9] sm:$0x1] %v667_v19  ;;  %v14779_v18 = vld [vmem:[#allocation8 + $0x100] ss:$8 sps:$4 sm:$0xff]  }
 0x1c7   :  { %v1101_v21 = vpop.f32.mrb[28].mxu0  ;;  %v758_v23 = vpop.f32.mrb[28].mxu1  ;;  %v14780_v19 = vld [vmem:[#allocation8 + $0x114] ss:$8 sps:$4 sm:$0xff]   ;;  %v14782_v20 = vld [vmem:[#allocation8 + $0x124] ss:$8 sps:$4 sm:$0xff]  }
 0x1c8   :  { %1974 = vmatpush1.bf16.msra.mxu0 %v14763_v24  ;;  %v1102_v25 = vadd.f32 %v15822_v22, %v1101_v21  ;;  %v12845_v26 = vpop.f32.mrb[29].mxu0  ;;  %v759_v27 = vadd.f32 %v15822_v22, %v758_v23  ;;  %v12803_v28 = vpop.f32.mrb[29].mxu1  ;;  %v14783_v21 = vld [vmem:[#allocation8 + $0x120] ss:$8 sps:$4 sm:$0xff]   ;;  %v14784_v23 = vld [vmem:[#allocation8 + $0x134] ss:$8 sps:$4 sm:$0xff]  }
 0x1c9   :  { %1975 = vmatprep.subr.bf16.mxu0 %v14764_v29  ;;  %v1104_v30 = vpop.f32.mrb[30].mxu0  ;;  %v761_v31 = vpop.f32.mrb[30].mxu1  ;;  %v14785_v24 = vld [vmem:[#allocation8 + $0x130] ss:$8 sps:$4 sm:$0xff]   ;;  %v14787_v26 = vld [vmem:[#allocation8 + $0x140] ss:$8 sps:$4 sm:$0xff]  }
 0x1ca   :  { %v1107_v32 = vmax.f32 %v1102_v25, 0.0  ;;  %v12846_v33 = vpop.f32.mrb[31].mxu0  ;;  %v764_v34 = vmax.f32 %v759_v27, 0.0  ;;  %v12804_v35 = vpop.f32.mrb[31].mxu1  ;;  %v14786_v25 = vld [vmem:[#allocation8 + $0x144] ss:$8 sps:$4 sm:$0xff]  }
 0x1cb   :  { %v14789_v27 = vld [vmem:[#allocation8 + $0x150] ss:$8 sps:$4 sm:$0xff]   ;;  %v14790_v29 = vld [vmem:[#allocation8 + $0x164] ss:$8 sps:$4 sm:$0xff]   ;;  %v14791_v30 = vld [vmem:[#allocation6] ss:$0 sm:$0xff] }
 0x1cc   :  { %1976 = vmatpush1.bf16.msra.mxu0 %v14765_v36  ;;  %v1108_v37 = vpack.c.bf16 %v1107_v32, %v1107_v32  ;;  %v765_v38 = vpack.c.bf16 %v764_v34, %v764_v34  ;;  %v14792_v36 = vld [vmem:[#allocation8 + $0x160] ss:$8 sps:$4 sm:$0xff]  }
 0x1cd   :  { %1977 = vmatprep.subr.bf16.mxu0 %v14766_v39 }
 0x1ce   :  { %1110 = vst [vmem:[#allocation2 + $0x12] sm:$0x1] %v1108_v37  ;;  %767 = vst [vmem:[#allocation2 + $0xb] sm:$0x1] %v765_v38  ;;  %v14793_v38 = vld [vmem:[#allocation8 + $0x174] ss:$8 sps:$4 sm:$0xff]  }
 0x1cf   :  { %v1199_v40 = vpop.f32.mrb[32].mxu0  ;;  %v856_v41 = vpop.f32.mrb[32].mxu1 }
 0x1d0   :  { %1978 = vmatpush1.bf16.msra.mxu0 %v14767_v42  ;;  %v1200_v43 = vadd.f32 %v15822_v22, %v1199_v40  ;;  %v12857_v44 = vpop.f32.mrb[33].mxu0  ;;  %v857_v45 = vadd.f32 %v15822_v22, %v856_v41  ;;  %v12815_v46 = vpop.f32.mrb[33].mxu1 }
 0x1d1   :  { %1979 = vmatprep.subr.bf16.mxu0 %v14768_v47  ;;  %v1202_v48 = vpop.f32.mrb[34].mxu0  ;;  %v859_v49 = vpop.f32.mrb[34].mxu1  ;;  %v14795_v47 = vld [vmem:[#allocation8 + $0x184] ss:$8 sps:$4 sm:$0xff]  }
 0x1d2   :  { %v1205_v50 = vmax.f32 %v1200_v43, 0.0  ;;  %v12858_v51 = vpop.f32.mrb[35].mxu0  ;;  %v862_v52 = vmax.f32 %v857_v45, 0.0  ;;  %v12816_v53 = vpop.f32.mrb[35].mxu1  ;;  %v14794_v45 = vld [vmem:[#allocation8 + $0x170] ss:$8 sps:$4 sm:$0xff]  }
 0x1d4   :  { %1980 = vmatpush1.bf16.msra.mxu0 %v14769_v54  ;;  %v1206_v55 = vpack.c.bf16 %v1205_v50, %v1205_v50  ;;  %v863_v56 = vpack.c.bf16 %v862_v52, %v862_v52  ;;  %v14796_v54 = vld [vmem:[#allocation8 + $0x180] ss:$8 sps:$4 sm:$0xff]  }
 0x1d5   :  { %1981 = vmatprep.subr.bf16.mxu0 %v14770_v57 }
 0x1d6   :  { %1208 = vst [vmem:[#allocation2 + $0x14] sm:$0x1] %v1206_v55  ;;  %865 = vst [vmem:[#allocation2 + $0xd] sm:$0x1] %v863_v56  ;;  %v14797_v56 = vld [vmem:[#allocation8 + $0x194] ss:$8 sps:$4 sm:$0xff]  }
 0x1d7   :  { %v1297_v58 = vpop.f32.mrb[36].mxu0  ;;  %v954_v28 = vpop.f32.mrb[36].mxu1 }
 0x1d8   :  { %1982 = vmatpush1.bf16.msra.mxu0 %v14771_v59  ;;  %v1298_v60 = vadd.f32 %v15822_v22, %v1297_v58  ;;  %v12869_v61 = vpop.f32.mrb[37].mxu0  ;;  %v955_v31 = vadd.f32 %v14791_v30, %v954_v28  ;;  %v12827_v32 = vpop.f32.mrb[37].mxu1  ;;  %v13125_v28 = vld [vmem:[#allocation11 + $0x284] ss:$16 sps:$4 sm:$0xff]  }
 0x1d9   :  { %1983 = vmatprep.subr.bf16.mxu0 %v14772_v62  ;;  %v1300_v63 = vpop.f32.mrb[38].mxu0  ;;  %v957_v33 = vpop.f32.mrb[38].mxu1  ;;  %v13123_v32 = vld [vmem:[#allocation11 + $0x280] ss:$16 sps:$4 sm:$0xff]  }
 0x1da   :  { %v1303_v0 = vmax.f32 %v1298_v60, 0.0  ;;  %v12870_v1 = vpop.f32.mrb[39].mxu0  ;;  %v960_v34 = vmax.f32 %v955_v31, 0.0  ;;  %v12828_v35 = vpop.f32.mrb[39].mxu1  ;;  %v14798_v63 = vld [vmem:[#allocation8 + $0x190] ss:$8 sps:$4 sm:$0xff]  }
 0x1db   :  { %v14799_v1 = vld [vmem:[#allocation8 + $0x1a4] ss:$8 sps:$4 sm:$0xff]   ;;  %v14811_v33 = vld [vmem:[#allocation2 + $0x6] sm:$0x1] }
 0x1dc   :  { %1984 = vmatpush1.bf16.msra.mxu0 %v14773_v2  ;;  %v1304_v3 = vpack.c.bf16 %v1303_v0, %v1303_v0  ;;  %v961_v39 = vpack.c.bf16 %v960_v34, %v960_v34  ;;  %v13110_v31 = vld [vmem:[#allocation11 + $0x22c] ss:$16 sps:$4 sm:$0xff]   ;;  %v13131_v34 = vld [vmem:[#allocation11 + $0x2a4] ss:$16 sps:$4 sm:$0xff]   ;;  %v13108_v35 = vld [vmem:[#allocation11 + $0x228] ss:$16 sps:$4 sm:$0xff]  }
 0x1dd   :  { %1985 = vmatprep.subr.bf16.mxu0 %v14774_v4 }
 0x1de   :  { %1306 = vst [vmem:[#allocation2 + $0x16] sm:$0x1] %v1304_v3  ;;  %963 = vst [vmem:[#allocation2 + $0xf] sm:$0x1] %v961_v39  ;;  %v13114_v39 = vld [vmem:[#allocation11 + $0x248] ss:$16 sps:$4 sm:$0xff]  }
 0x1df   :  { %v1395_v5 = vpop.f32.mrb[40].mxu0  ;;  %v1052_v37 = vpop.f32.mrb[40].mxu1 }
 0x1e0   :  { %1986 = vmatpush1.bf16.msra.mxu0 %v14775_v6  ;;  %v1396_v8 = vadd.f32 %v15822_v22, %v1395_v5  ;;  %v12881_v9 = vpop.f32.mrb[41].mxu0  ;;  %v14781_v22 = vld [vmem:[#allocation8 + $0x110] ss:$8 sps:$4 sm:$0xff]   ;;  %v1053_v40 = vadd.f32 %v14791_v30, %v1052_v37  ;;  %v12839_v41 = vpop.f32.mrb[41].mxu1 }
 0x1e1   :  { %1987 = vmatprep.subr.bf16.mxu0 %v14776_v10  ;;  %v1398_v11 = vpop.f32.mrb[42].mxu0  ;;  %v1055_v42 = vpop.f32.mrb[42].mxu1  ;;  %v14800_v9 = vld [vmem:[#allocation8 + $0x1a0] ss:$8 sps:$4 sm:$0xff]   ;;  %v14801_v10 = vld [vmem:[#allocation8 + $0x1b4] ss:$8 sps:$4 sm:$0xff]  }
 0x1e2   :  { %v1401_v12 = vmax.f32 %v1396_v8, 0.0  ;;  %v12882_v13 = vpop.f32.mrb[43].mxu0  ;;  %v1058_v43 = vmax.f32 %v1053_v40, 0.0  ;;  %v12840_v44 = vpop.f32.mrb[43].mxu1  ;;  %v13129_v37 = vld [vmem:[#allocation11 + $0x2a0] ss:$16 sps:$4 sm:$0xff]  }
 0x1e3   :  { %v14803_v13 = vld [vmem:[#allocation8 + $0x1c4] ss:$8 sps:$4 sm:$0xff]  }
 0x1e4   :  { %1988 = vmatpush1.bf16.msra.mxu0 %v14777_v14  ;;  %v1402_v15 = vpack.c.bf16 %v1401_v12, %v1401_v12  ;;  %v1059_v48 = vpack.c.bf16 %v1058_v43, %v1058_v43  ;;  %v14802_v12 = vld [vmem:[#allocation8 + $0x1b0] ss:$8 sps:$4 sm:$0xff]  }
 0x1e5   :  { %1998 = vmatprep.subr.bf16.mxu0 %v14778_v16  ;;  %v13099_v14 = vld [vmem:[#allocation11 + $0x200] ss:$16 sps:$4 sm:$0xff]   ;;  %v13122_v40 = vld [vmem:[#allocation11 + $0x26c] ss:$16 sps:$4 sm:$0xff]   ;;  %v13143_v42 = vld [vmem:[#allocation11 + $0x2e4] ss:$16 sps:$4 sm:$0xff]  }
 0x1e6   :  { %1404 = vst [vmem:[#allocation2 + $0x18] sm:$0x1] %v1402_v15  ;;  %1061 = vst [vmem:[#allocation2 + $0x11] sm:$0x1] %v1059_v48  ;;  %v13101_v15 = vld [vmem:[#allocation11 + $0x204] ss:$16 sps:$4 sm:$0xff]  }
 0x1e7   :  { %1990 = vmatmul.mubr.bf16.vlgmr.msra.gmra.mrb[48].mxu0 %v15830_v7  ;;  %v14788_v7 = vld [vmem:[#allocation8 + $0x154] ss:$8 sps:$4 sm:$0xff]   ;;  %v1150_v46 = vpop.f32.mrb[44].mxu1  ;;  %v14804_v16 = vld [vmem:[#allocation8 + $0x1c0] ss:$8 sps:$4 sm:$0xff]   ;;  %2428 = vmatprep.subr.bf16.mxu1 %v13101_v15 }
 0x1e8   :  { %1999 = vmatpush1.bf16.msra.mxu0 %v14779_v18  ;;  %2030 = vmatprep.mubr.bf16.mxu0 %v1956_v17  ;;  %v1151_v49 = vadd.f32 %v14791_v30, %v1150_v46  ;;  %v12851_v50 = vpop.f32.mrb[45].mxu1  ;;  %v13107_v17 = vld [vmem:[#allocation11 + $0x224] ss:$16 sps:$4 sm:$0xff]   ;;  %v13135_v41 = vld [vmem:[#allocation11 + $0x2c0] ss:$16 sps:$4 sm:$0xff]  }
 0x1e9   :  { %2000 = vmatprep.subr.bf16.mxu0 %v14780_v19  ;;  %v1153_v51 = vpop.f32.mrb[46].mxu1  ;;  %v14805_v18 = vld [vmem:[#allocation8 + $0x1d4] ss:$8 sps:$4 sm:$0xff]   ;;  %2429 = vmatpush1.bf16.msra.mxu1 %v13099_v14 }
 0x1ea   :  { %v1156_v52 = vmax.f32 %v1151_v49, 0.0  ;;  %v12852_v53 = vpop.f32.mrb[47].mxu1  ;;  %v13105_v19 = vld [vmem:[#allocation11 + $0x220] ss:$16 sps:$4 sm:$0xff]   ;;  %2430 = vmatprep.subr.bf16.mxu1 %v13107_v17  ;;  %v13120_v43 = vld [vmem:[#allocation11 + $0x268] ss:$16 sps:$4 sm:$0xff]  }
 0x1eb   :  { %v13128_v44 = vld [vmem:[#allocation11 + $0x28c] ss:$16 sps:$4 sm:$0xff]   ;;  %v13149_v46 = vld [vmem:[#allocation11 + $0x304] ss:$16 sps:$4 sm:$0xff]   ;;  %v13147_v49 = vld [vmem:[#allocation11 + $0x300] ss:$16 sps:$4 sm:$0xff]  }
 0x1ec   :  { %2001 = vmatpush1.bf16.msra.mxu0 %v14781_v22  ;;  %v1157_v57 = vpack.c.bf16 %v1156_v52, %v1156_v52  ;;  %v13113_v22 = vld [vmem:[#allocation11 + $0x244] ss:$16 sps:$4 sm:$0xff]   ;;  %v13134_v48 = vld [vmem:[#allocation11 + $0x2ac] ss:$16 sps:$4 sm:$0xff]   ;;  %v13132_v51 = vld [vmem:[#allocation11 + $0x2a8] ss:$16 sps:$4 sm:$0xff]  }
 0x1ed   :  { %2002 = vmatprep.subr.bf16.mxu0 %v14782_v20  ;;  %v14806_v20 = vld [vmem:[#allocation8 + $0x1d0] ss:$8 sps:$4 sm:$0xff]   ;;  %2431 = vmatpush1.bf16.msra.mxu1 %v13105_v19 }
 0x1ee   :  { %1159 = vst [vmem:[#allocation2 + $0x13] sm:$0x1] %v1157_v57  ;;  %2432 = vmatprep.subr.bf16.mxu1 %v13113_v22  ;;  %v13155_v50 = vld [vmem:[#allocation11 + $0x324] ss:$16 sps:$4 sm:$0xff]   ;;  %v13140_v52 = vld [vmem:[#allocation11 + $0x2cc] ss:$16 sps:$4 sm:$0xff]  }
 0x1ef   :  { %v1248_v55 = vpop.f32.mrb[48].mxu1  ;;  %v13153_v53 = vld [vmem:[#allocation11 + $0x320] ss:$16 sps:$4 sm:$0xff]   ;;  %v13185_v14 = vld [vmem:[#allocation11 + $0x3c4] ss:$16 sps:$4 sm:$0xff]  }
 0x1f0   :  { %2003 = vmatpush1.bf16.msra.mxu0 %v14783_v21  ;;  %v1249_v58 = vadd.f32 %v14791_v30, %v1248_v55  ;;  %v12863_v59 = vpop.f32.mrb[49].mxu1  ;;  %v14807_v21 = vld [vmem:[#allocation8 + $0x1e4] ss:$8 sps:$4 sm:$0xff]  }
 0x1f1   :  { %2004 = vmatprep.subr.bf16.mxu0 %v14784_v23  ;;  %v1251_v60 = vpop.f32.mrb[50].mxu1  ;;  %v13111_v23 = vld [vmem:[#allocation11 + $0x240] ss:$16 sps:$4 sm:$0xff]   ;;  %v13138_v55 = vld [vmem:[#allocation11 + $0x2c8] ss:$16 sps:$4 sm:$0xff]  }
 0x1f2   :  { %v1254_v61 = vmax.f32 %v1249_v58, 0.0  ;;  %v12864_v62 = vpop.f32.mrb[51].mxu1  ;;  %2433 = vmatpush1.bf16.msra.mxu1 %v13111_v23  ;;  %v13159_v57 = vld [vmem:[#allocation11 + $0x340] ss:$16 sps:$4 sm:$0xff]   ;;  %v13167_v58 = vld [vmem:[#allocation11 + $0x364] ss:$16 sps:$4 sm:$0xff]  }
 0x1f3   :  { %v13144_v59 = vld [vmem:[#allocation11 + $0x2e8] ss:$16 sps:$4 sm:$0xff]   ;;  %v13152_v60 = vld [vmem:[#allocation11 + $0x30c] ss:$16 sps:$4 sm:$0xff]   ;;  %v13173_v62 = vld [vmem:[#allocation11 + $0x384] ss:$16 sps:$4 sm:$0xff]  }
 0x1f4   :  { %2005 = vmatpush1.bf16.msra.mxu0 %v14785_v24  ;;  %v1255_v2 = vpack.c.bf16 %v1254_v61, %v1254_v61  ;;  %v13119_v24 = vld [vmem:[#allocation11 + $0x264] ss:$16 sps:$4 sm:$0xff]   ;;  %v13165_v61 = vld [vmem:[#allocation11 + $0x360] ss:$16 sps:$4 sm:$0xff]   ;;  %v13188_v15 = vld [vmem:[#allocation11 + $0x3cc] ss:$16 sps:$4 sm:$0xff]  }
 0x1f5   :  { %2006 = vmatprep.subr.bf16.mxu0 %v14786_v25  ;;  %v14808_v25 = vld [vmem:[#allocation8 + $0x1e0] ss:$8 sps:$4 sm:$0xff]   ;;  %2434 = vmatprep.subr.bf16.mxu1 %v13119_v24 }
 0x1f6   :  { %1257 = vst [vmem:[#allocation2 + $0x15] sm:$0x1] %v1255_v2  ;;  %v13179_v2 = vld [vmem:[#allocation11 + $0x3a4] ss:$16 sps:$4 sm:$0xff]   ;;  %v13186_v17 = vld [vmem:[#allocation11 + $0x3c8] ss:$16 sps:$4 sm:$0xff]  }
 0x1f7   :  { %v1346_v0 = vpop.f32.mrb[52].mxu1  ;;  %v13189_v24 = vld [vmem:[#allocation11 + $0x3e0] ss:$16 sps:$4 sm:$0xff]  }
 0x1f8   :  { %2007 = vmatpush1.bf16.msra.mxu0 %v14787_v26  ;;  %v1347_v3 = vadd.f32 %v14791_v30, %v1346_v0  ;;  %v12875_v4 = vpop.f32.mrb[53].mxu1  ;;  %v14809_v26 = vld [vmem:[#allocation8 + $0x1f4] ss:$8 sps:$4 sm:$0xff]  }
 0x1f9   :  { %2008 = vmatprep.subr.bf16.mxu0 %v14788_v7  ;;  %v1349_v5 = vpop.f32.mrb[54].mxu1  ;;  %v13104_v7 = vld [vmem:[#allocation11 + $0x20c] ss:$16 sps:$4 sm:$0xff]   ;;  %v13102_v30 = vld [vmem:[#allocation11 + $0x208] ss:$16 sps:$4 sm:$0xff]  }
 0x1fa   :  { %v1352_v6 = vmax.f32 %v1347_v3, 0.0  ;;  %v12876_v8 = vpop.f32.mrb[55].mxu1  ;;  %v13158_v0 = vld [vmem:[#allocation11 + $0x32c] ss:$16 sps:$4 sm:$0xff]   ;;  %v13156_v3 = vld [vmem:[#allocation11 + $0x328] ss:$16 sps:$4 sm:$0xff]  }
 0x1fb   :  { %v13164_v4 = vld [vmem:[#allocation11 + $0x34c] ss:$16 sps:$4 sm:$0xff]   ;;  %v13177_v5 = vld [vmem:[#allocation11 + $0x3a0] ss:$16 sps:$4 sm:$0xff]  }
 0x1fc   :  { %2009 = vmatpush1.bf16.msra.mxu0 %v14789_v27  ;;  %v1353_v11 = vpack.c.bf16 %v1352_v6, %v1352_v6  ;;  %v13117_v27 = vld [vmem:[#allocation11 + $0x260] ss:$16 sps:$4 sm:$0xff]   ;;  %v13162_v6 = vld [vmem:[#allocation11 + $0x348] ss:$16 sps:$4 sm:$0xff]   ;;  %v13170_v8 = vld [vmem:[#allocation11 + $0x36c] ss:$16 sps:$4 sm:$0xff]  }
 0x1fd   :  { %2010 = vmatprep.subr.bf16.mxu0 %v14790_v29  ;;  %v14810_v29 = vld [vmem:[#allocation8 + $0x1f0] ss:$8 sps:$4 sm:$0xff]   ;;  %2435 = vmatpush1.bf16.msra.mxu1 %v13117_v27 }
 0x1fe   :  { %1355 = vst [vmem:[#allocation2 + $0x17] sm:$0x1] %v1353_v11  ;;  %2436 = vmatprep.subr.bf16.mxu1 %v13125_v28  ;;  %v13174_v11 = vld [vmem:[#allocation11 + $0x388] ss:$16 sps:$4 sm:$0xff]   ;;  %v13200_v27 = vld [vmem:[#allocation11 + $0xc] ss:$16 sps:$4 sm:$0xff]  }
 0x200   :  { %2011 = vmatpush1.bf16.msra.mxu0 %v14792_v36  ;;  %v13116_v36 = vld [vmem:[#allocation11 + $0x24c] ss:$16 sps:$4 sm:$0xff]  }
 0x201   :  { %2012 = vmatprep.subr.bf16.mxu0 %v14793_v38  ;;  %v13137_v38 = vld [vmem:[#allocation11 + $0x2c4] ss:$16 sps:$4 sm:$0xff]   ;;  %2437 = vmatpush1.bf16.msra.mxu1 %v13123_v32 }
 0x202   :  { %2438 = vmatprep.subr.bf16.mxu1 %v13131_v34 }
 0x204   :  { %2013 = vmatpush1.bf16.msra.mxu0 %v14794_v45  ;;  %v13141_v45 = vld [vmem:[#allocation11 + $0x2e0] ss:$16 sps:$4 sm:$0xff]  }
 0x205   :  { %2014 = vmatprep.subr.bf16.mxu0 %v14795_v47  ;;  %2439 = vmatpush1.bf16.msra.mxu1 %v13129_v37  ;;  %v13126_v47 = vld [vmem:[#allocation11 + $0x288] ss:$16 sps:$4 sm:$0xff]  }
 0x206   :  { %2440 = vmatprep.subr.bf16.mxu1 %v13137_v38 }
 0x208   :  { %2015 = vmatpush1.bf16.msra.mxu0 %v14796_v54  ;;  %v13161_v54 = vld [vmem:[#allocation11 + $0x344] ss:$16 sps:$4 sm:$0xff]  }
 0x209   :  { %2016 = vmatprep.subr.bf16.mxu0 %v14797_v56  ;;  %2441 = vmatpush1.bf16.msra.mxu1 %v13135_v41  ;;  %v13146_v56 = vld [vmem:[#allocation11 + $0x2ec] ss:$16 sps:$4 sm:$0xff]  }
 0x20a   :  { %2442 = vmatprep.subr.bf16.mxu1 %v13143_v42 }
 0x20c   :  { %2017 = vmatpush1.bf16.msra.mxu0 %v14798_v63  ;;  %v13150_v63 = vld [vmem:[#allocation11 + $0x308] ss:$16 sps:$4 sm:$0xff]  }
 0x20d   :  { %2018 = vmatprep.subr.bf16.mxu0 %v14799_v1  ;;  %2443 = vmatpush1.bf16.msra.mxu1 %v13141_v45  ;;  %v13171_v1 = vld [vmem:[#allocation11 + $0x380] ss:$16 sps:$4 sm:$0xff]  }
 0x20e   :  { %2444 = vmatprep.subr.bf16.mxu1 %v13149_v46 }
 0x210   :  { %2019 = vmatpush1.bf16.msra.mxu0 %v14800_v9  ;;  %v13168_v9 = vld [vmem:[#allocation11 + $0x368] ss:$16 sps:$4 sm:$0xff]  }
 0x211   :  { %2020 = vmatprep.subr.bf16.mxu0 %v14801_v10  ;;  %2445 = vmatpush1.bf16.msra.mxu1 %v13147_v49  ;;  %v13176_v10 = vld [vmem:[#allocation11 + $0x38c] ss:$16 sps:$4 sm:$0xff]  }
 0x212   :  { %2446 = vmatprep.subr.bf16.mxu1 %v13155_v50 }
 0x214   :  { %2021 = vmatpush1.bf16.msra.mxu0 %v14802_v12  ;;  %v13182_v12 = vld [vmem:[#allocation11 + $0x3ac] ss:$16 sps:$4 sm:$0xff]  }
 0x215   :  { %2022 = vmatprep.subr.bf16.mxu0 %v14803_v13  ;;  %2447 = vmatpush1.bf16.msra.mxu1 %v13153_v53  ;;  %v13180_v13 = vld [vmem:[#allocation11 + $0x3a8] ss:$16 sps:$4 sm:$0xff]  }
 0x216   :  { %2448 = vmatprep.subr.bf16.mxu1 %v13161_v54  ;;  %v13198_v53 = vld [vmem:[#allocation11 + $0x8] ss:$16 sps:$4 sm:$0xff]  }
 0x218   :  { %2023 = vmatpush1.bf16.msra.mxu0 %v14804_v16  ;;  %v13183_v16 = vld [vmem:[#allocation11 + $0x3c0] ss:$16 sps:$4 sm:$0xff]  }
 0x219   :  { %2024 = vmatprep.subr.bf16.mxu0 %v14805_v18  ;;  %2449 = vmatpush1.bf16.msra.mxu1 %v13159_v57 }
 0x21a   :  { %2450 = vmatprep.subr.bf16.mxu1 %v13167_v58  ;;  %v13201_v58 = vld [vmem:[#allocation11 + $0x20] ss:$16 sps:$4 sm:$0xff]  }
 0x21c   :  { %2025 = vmatpush1.bf16.msra.mxu0 %v14806_v20  ;;  %v13191_v20 = vld [vmem:[#allocation11 + $0x3e4] ss:$16 sps:$4 sm:$0xff]  }
 0x21d   :  { %2026 = vmatprep.subr.bf16.mxu0 %v14807_v21  ;;  %2451 = vmatpush1.bf16.msra.mxu1 %v13165_v61  ;;  %v13194_v21 = vld [vmem:[#allocation11 + $0x3ec] ss:$16 sps:$4 sm:$0xff]  }
 0x21e   :  { %2452 = vmatprep.subr.bf16.mxu1 %v13173_v62  ;;  %v13212_v61 = vld [vmem:[#allocation11 + $0x4c] ss:$16 sps:$4 sm:$0xff]   ;;  %v13207_v62 = vld [vmem:[#allocation11 + $0x40] ss:$16 sps:$4 sm:$0xff]  }
 0x220   :  { %2027 = vmatpush1.bf16.msra.mxu0 %v14808_v25  ;;  %v13192_v25 = vld [vmem:[#allocation11 + $0x3e8] ss:$16 sps:$4 sm:$0xff]  }
 0x221   :  { %2028 = vmatprep.subr.bf16.mxu0 %v14809_v26  ;;  %2453 = vmatpush1.bf16.msra.mxu1 %v13171_v1  ;;  %v1475_v26 = vlaneseq  ;;  %v13218_v1 = vld [vmem:[#allocation11 + $0x6c] ss:$16 sps:$4 sm:$0xff]  }
 0x222   :  { %2454 = vmatprep.subr.bf16.mxu1 %v13179_v2  ;;  %v13213_v2 = vld [vmem:[#allocation11 + $0x60] ss:$16 sps:$4 sm:$0xff]  }
 0x223   :  { %v15848_v28 = vshrl.u32 %v1475_v26, 7  ;;  %v13254_v26 = vld [vmem:[#allocation11 + $0x12c] ss:$16 sps:$4 sm:$0xff]  }
 0x224   :  { %2029 = vmatpush1.bf16.msra.mxu0 %v14810_v29 }
 0x225   :  { %2469 = vmatprep.subr.bf16.mxu0 %v13104_v7  ;;  %2455 = vmatpush1.bf16.msra.mxu1 %v13177_v5  ;;  %v13197_v7 = vld [vmem:[#allocation11 + $0x4] ss:$16 sps:$4 sm:$0xff]   ;;  %17767 = vst [vmem:[#allocation28_spill] sm:$0xff] %v15848_v28  ;;  %v15851_v29 = vsub.s32 0, %v15848_v28  ;;  %v13224_v5 = vld [vmem:[#allocation11 + $0x8c] ss:$16 sps:$4 sm:$0xff]  }
 0x226   :  { %2456 = vmatprep.subr.bf16.mxu1 %v13185_v14  ;;  %v13236_v14 = vld [vmem:[#allocation11 + $0xcc] ss:$16 sps:$4 sm:$0xff]  }
 0x227   :  { %2031 = vmatmul.mubr.bf16.vlgmr.msra.gmra.mrb[48].mxu0 %v14811_v33  ;;  %17768 = vst [vmem:[#allocation29_spill] sm:$0xff] %v15851_v29 }
 0x228   :  { %2470 = vmatpush1.bf16.msra.mxu0 %v13102_v30  ;;  %v1405_v30 = vld [vmem:[#allocation9] sm:$0x3] }
 0x229   :  { %2471 = vmatprep.subr.bf16.mxu0 %v13110_v31  ;;  %2457 = vmatpush1.bf16.msra.mxu1 %v13183_v16  ;;  %v15854_v31 = vsub.s32 1, %v15848_v28  ;;  %v15857_v32 = vrot.slane %v1405_v30, %v15851_v29  ;;  %v13234_v16 = vld [vmem:[#allocation11 + $0xc8] ss:$16 sps:$4 sm:$0xff]  }
 0x22a   :  { %2458 = vmatprep.subr.bf16.mxu1 %v13191_v20  ;;  %v13245_v20 = vld [vmem:[#allocation11 + $0x104] ss:$16 sps:$4 sm:$0xff]  }
 0x22b   :  { %17769 = vst [vmem:[#allocation30_spill] sm:$0xff] %v15854_v31  ;;  %17770 = vst [vmem:[#allocation31_spill] sm:$0xff] %v15857_v32  ;;  %v15860_v33 = vrot.slane %v1405_v30, %v15854_v31  ;;  %v13257_v30 = vld [vmem:[#allocation11 + $0x144] ss:$16 sps:$4 sm:$0xff]  }
 0x22c   :  { %2472 = vmatpush1.bf16.msra.mxu0 %v13108_v35  ;;  %v16046_v28 = vld [vmem:[#allocation8 + $0x1c0] ss:$8 sps:$4 sm:$0xff]   ;;  %v16049_v31 = vld [vmem:[#allocation8 + $0x1d4] ss:$8 sps:$4 sm:$0xff]   ;;  %v16052_v29 = vld [vmem:[#allocation8 + $0x1d0] ss:$8 sps:$4 sm:$0xff]  }
 0x22d   :  { %2473 = vmatprep.subr.bf16.mxu0 %v13116_v36  ;;  %2459 = vmatpush1.bf16.msra.mxu1 %v13189_v24  ;;  %17771 = vst [vmem:[#allocation32_spill] sm:$0xff] %v15860_v33  ;;  %v13246_v24 = vld [vmem:[#allocation11 + $0x108] ss:$16 sps:$4 sm:$0xff]   ;;  %17797 = vst [vmem:[#allocation58_spill] sm:$0xff] %v16046_v28 }
 0x22e   :  { %2830 = vmatprep.subr.bf16.mxu1 %v13197_v7  ;;  %v13249_v7 = vld [vmem:[#allocation11 + $0x120] ss:$16 sps:$4 sm:$0xff]   ;;  %17798 = vst [vmem:[#allocation59_spill] sm:$0xff] %v16049_v31  ;;  %17799 = vst [vmem:[#allocation60_spill] sm:$0xff] %v16052_v29 }
 0x230   :  { %2474 = vmatpush1.bf16.msra.mxu0 %v13114_v39 }
 0x231   :  { %2475 = vmatprep.subr.bf16.mxu0 %v13122_v40 }
 0x234   :  { %2476 = vmatpush1.bf16.msra.mxu0 %v13120_v43 }
 0x235   :  { %2477 = vmatprep.subr.bf16.mxu0 %v13128_v44 }
 0x238   :  { %2478 = vmatpush1.bf16.msra.mxu0 %v13126_v47 }
 0x239   :  { %2479 = vmatprep.subr.bf16.mxu0 %v13134_v48 }
 0x23c   :  { %2480 = vmatpush1.bf16.msra.mxu0 %v13132_v51 }
 0x23d   :  { %2481 = vmatprep.subr.bf16.mxu0 %v13140_v52  ;;  %v13195_v52 = vld [vmem:[#allocation11] ss:$16 sps:$4 sm:$0xff]  }
 0x240   :  { %2482 = vmatpush1.bf16.msra.mxu0 %v13138_v55  ;;  %v13203_v55 = vld [vmem:[#allocation11 + $0x24] ss:$16 sps:$4 sm:$0xff]  }
 0x241   :  { %2483 = vmatprep.subr.bf16.mxu0 %v13146_v56  ;;  %v13206_v56 = vld [vmem:[#allocation11 + $0x2c] ss:$16 sps:$4 sm:$0xff]  }
 0x244   :  { %2484 = vmatpush1.bf16.msra.mxu0 %v13144_v59  ;;  %v13204_v59 = vld [vmem:[#allocation11 + $0x28] ss:$16 sps:$4 sm:$0xff]  }
 0x245   :  { %2485 = vmatprep.subr.bf16.mxu0 %v13152_v60  ;;  %v13209_v60 = vld [vmem:[#allocation11 + $0x44] ss:$16 sps:$4 sm:$0xff]  }
 0x248   :  { %2486 = vmatpush1.bf16.msra.mxu0 %v13150_v63  ;;  %v13210_v63 = vld [vmem:[#allocation11 + $0x48] ss:$16 sps:$4 sm:$0xff]  }
 0x249   :  { %2487 = vmatprep.subr.bf16.mxu0 %v13158_v0  ;;  %v13215_v0 = vld [vmem:[#allocation11 + $0x64] ss:$16 sps:$4 sm:$0xff]  }
 0x24c   :  { %2488 = vmatpush1.bf16.msra.mxu0 %v13156_v3  ;;  %v13216_v3 = vld [vmem:[#allocation11 + $0x68] ss:$16 sps:$4 sm:$0xff]  }
 0x24d   :  { %2489 = vmatprep.subr.bf16.mxu0 %v13164_v4  ;;  %v13221_v4 = vld [vmem:[#allocation11 + $0x84] ss:$16 sps:$4 sm:$0xff]  }
 0x250   :  { %2490 = vmatpush1.bf16.msra.mxu0 %v13162_v6  ;;  %v13219_v6 = vld [vmem:[#allocation11 + $0x80] ss:$16 sps:$4 sm:$0xff]  }
 0x251   :  { %2491 = vmatprep.subr.bf16.mxu0 %v13170_v8  ;;  %v13222_v8 = vld [vmem:[#allocation11 + $0x88] ss:$16 sps:$4 sm:$0xff]  }
 0x254   :  { %2492 = vmatpush1.bf16.msra.mxu0 %v13168_v9  ;;  %v13227_v9 = vld [vmem:[#allocation11 + $0xa4] ss:$16 sps:$4 sm:$0xff]  }
 0x255   :  { %2493 = vmatprep.subr.bf16.mxu0 %v13176_v10  ;;  %v13230_v10 = vld [vmem:[#allocation11 + $0xac] ss:$16 sps:$4 sm:$0xff]  }
 0x258   :  { %2494 = vmatpush1.bf16.msra.mxu0 %v13174_v11  ;;  %v13225_v11 = vld [vmem:[#allocation11 + $0xa0] ss:$16 sps:$4 sm:$0xff]  }
 0x259   :  { %2495 = vmatprep.subr.bf16.mxu0 %v13182_v12  ;;  %v13228_v12 = vld [vmem:[#allocation11 + $0xa8] ss:$16 sps:$4 sm:$0xff]  }
 0x25c   :  { %2496 = vmatpush1.bf16.msra.mxu0 %v13180_v13  ;;  %v13233_v13 = vld [vmem:[#allocation11 + $0xc4] ss:$16 sps:$4 sm:$0xff]  }
 0x25d   :  { %2497 = vmatprep.subr.bf16.mxu0 %v13188_v15  ;;  %v13231_v15 = vld [vmem:[#allocation11 + $0xc0] ss:$16 sps:$4 sm:$0xff]  }
 0x260   :  { %2498 = vmatpush1.bf16.msra.mxu0 %v13186_v17  ;;  %v13239_v17 = vld [vmem:[#allocation11 + $0xe4] ss:$16 sps:$4 sm:$0xff]  }
 0x261   :  { %2499 = vmatprep.subr.bf16.mxu0 %v13194_v21  ;;  %v13248_v21 = vld [vmem:[#allocation11 + $0x10c] ss:$16 sps:$4 sm:$0xff]  }
 0x264   :  { %2500 = vmatpush1.bf16.msra.mxu0 %v13192_v25  ;;  %v13251_v25 = vld [vmem:[#allocation11 + $0x124] ss:$16 sps:$4 sm:$0xff]  }
 0x265   :  { %2871 = vmatprep.subr.bf16.mxu0 %v13200_v27  ;;  %v13252_v27 = vld [vmem:[#allocation11 + $0x128] ss:$16 sps:$4 sm:$0xff]  }
 0x27a   :  { %v1839_v18 = vpop.f32.mrb[44].mxu0 }
 0x27b   :  { %v1841_v19 = vpop.f32.mrb[45].mxu0  ;;  %v1840_v34 = vadd.f32 %v1839_v18, %v15857_v32  ;;  %v13242_v18 = vld [vmem:[#allocation11 + $0xec] ss:$16 sps:$4 sm:$0xff]  }
 0x27c   :  { %v1843_v22 = vpop.f32.mrb[46].mxu0  ;;  %v1842_v35 = vadd.f32 %v1841_v19, %v15860_v33  ;;  %v13237_v19 = vld [vmem:[#allocation11 + $0xe0] ss:$16 sps:$4 sm:$0xff]  }
 0x27d   :  { %v1844_v23 = vpop.f32.mrb[47].mxu0  ;;  %v13240_v22 = vld [vmem:[#allocation11 + $0xe8] ss:$16 sps:$4 sm:$0xff]  }
 0x27e   :  { %v13243_v23 = vld [vmem:[#allocation11 + $0x100] ss:$16 sps:$4 sm:$0xff]  }
 0x291   :  { %v1880_v36 = vpop.f32.mrb[56].mxu1 }
 0x292   :  { %v15864_v37 = vadd.f32 %v1880_v36, %v1840_v34  ;;  %v1882_v38 = vpop.f32.mrb[57].mxu1  ;;  %v13260_v34 = vld [vmem:[#allocation11 + $0x14c] ss:$16 sps:$4 sm:$0xff]   ;;  %v13258_v36 = vld [vmem:[#allocation11 + $0x148] ss:$16 sps:$4 sm:$0xff]  }
 0x293   :  { %v1883_v39 = vadd.f32 %v1882_v38, %v1842_v35  ;;  %v1884_v40 = vpop.f32.mrb[58].mxu1  ;;  %v13255_v35 = vld [vmem:[#allocation11 + $0x140] ss:$16 sps:$4 sm:$0xff]   ;;  %v13263_v38 = vld [vmem:[#allocation11 + $0x164] ss:$16 sps:$4 sm:$0xff]  }
 0x294   :  { %v1885_v41 = vpop.f32.mrb[59].mxu1  ;;  %v13261_v40 = vld [vmem:[#allocation11 + $0x160] ss:$16 sps:$4 sm:$0xff]  }
 0x295   :  { %v1888_v50 = vmax.f32 %v1883_v39, 0.0  ;;  %v13266_v39 = vld [vmem:[#allocation11 + $0x16c] ss:$16 sps:$4 sm:$0xff]   ;;  %v13264_v41 = vld [vmem:[#allocation11 + $0x168] ss:$16 sps:$4 sm:$0xff]  }
 0x297   :  { %v1890_v57 = vpack.c.bf16 %v1888_v50, %v1888_v50  ;;  %v13281_v50 = vld [vmem:[#allocation11 + $0x1c4] ss:$16 sps:$4 sm:$0xff]  }
 0x2fa   :  { %v2032_v42 = vpop.f32.mrb[48].mxu0 }
 0x2fb   :  { %v12887_v43 = vadd.f32 %v2032_v42, %v15857_v32  ;;  %v2034_v44 = vpop.f32.mrb[49].mxu0  ;;  %v13269_v42 = vld [vmem:[#allocation11 + $0x184] ss:$16 sps:$4 sm:$0xff]  }
 0x2fc   :  { %v12888_v45 = vadd.f32 %v2034_v44, %v15860_v33  ;;  %v2036_v46 = vpop.f32.mrb[50].mxu0  ;;  %v13267_v44 = vld [vmem:[#allocation11 + $0x180] ss:$16 sps:$4 sm:$0xff]  }
 0x2fd   :  { %v2039_v47 = vmax.f32 %v12887_v43, 0.0  ;;  %v2037_v48 = vpop.f32.mrb[51].mxu0  ;;  %v13272_v43 = vld [vmem:[#allocation11 + $0x18c] ss:$16 sps:$4 sm:$0xff]   ;;  %v13275_v46 = vld [vmem:[#allocation11 + $0x1a4] ss:$16 sps:$4 sm:$0xff]  }
 0x2fe   :  { %v2040_v49 = vmax.f32 %v12888_v45, 0.0  ;;  %v13270_v45 = vld [vmem:[#allocation11 + $0x188] ss:$16 sps:$4 sm:$0xff]   ;;  %v13273_v48 = vld [vmem:[#allocation11 + $0x1a0] ss:$16 sps:$4 sm:$0xff]  }
 0x2ff   :  { %v2041_v54 = vpack.c.bf16 %v2039_v47, %v2039_v47  ;;  %v13278_v47 = vld [vmem:[#allocation11 + $0x1ac] ss:$16 sps:$4 sm:$0xff]  }
 0x300   :  { %v2042_v51 = vpack.c.bf16 %v2040_v49, %v2040_v49  ;;  %v13276_v49 = vld [vmem:[#allocation11 + $0x1a8] ss:$16 sps:$4 sm:$0xff]  }
 0x301   :  { %v16055_v33 = vld [vmem:[#allocation8 + $0x1e4] ss:$8 sps:$4 sm:$0xff]   ;;  %v16058_v32 = vld [vmem:[#allocation8 + $0x1e0] ss:$8 sps:$4 sm:$0xff]  }
 0x302   :  { %2460 = vmatprep.mubr.bf16.mxu1 %v2042_v51  ;;  %2501 = vmatprep.mubr.bf16.mxu0 %v2042_v51  ;;  %v13284_v51 = vld [vmem:[#allocation11 + $0x1cc] ss:$16 sps:$4 sm:$0xff]  }
 0x303   :  { %2461 = vmatmul.mubr.bf16.vlgmr.msra.gmra.mrb[60].mxu1 %v2041_v54  ;;  %2502 = vmatmul.mubr.bf16.vlgmr.msra.gmra.mrb[52].mxu0 %v2041_v54  ;;  %v13287_v54 = vld [vmem:[#allocation11 + $0x1e4] ss:$16 sps:$4 sm:$0xff]  }
 0x304   :  { %2831 = vmatpush1.bf16.msra.mxu1 %v13195_v52  ;;  %2872 = vmatpush1.bf16.msra.mxu0 %v13198_v53  ;;  %v13279_v52 = vld [vmem:[#allocation11 + $0x1c0] ss:$16 sps:$4 sm:$0xff]   ;;  %v13282_v53 = vld [vmem:[#allocation11 + $0x1c8] ss:$16 sps:$4 sm:$0xff]  }
 0x305   :  { %2862 = vmatprep.mubr.bf16.mxu1 %v1890_v57  ;;  %2903 = vmatprep.mubr.bf16.mxu0 %v1890_v57  ;;  %v13288_v57 = vld [vmem:[#allocation11 + $0x1e8] ss:$16 sps:$4 sm:$0xff]  }
 0x306   :  { %2832 = vmatprep.subr.bf16.mxu1 %v13203_v55  ;;  %2873 = vmatprep.subr.bf16.mxu0 %v13206_v56  ;;  %v13290_v55 = vld [vmem:[#allocation11 + $0x1ec] ss:$16 sps:$4 sm:$0xff]   ;;  %v13285_v56 = vld [vmem:[#allocation11 + $0x1e0] ss:$16 sps:$4 sm:$0xff]  }
 0x308   :  { %2833 = vmatpush1.bf16.msra.mxu1 %v13201_v58  ;;  %2874 = vmatpush1.bf16.msra.mxu0 %v13204_v59  ;;  %v1887_v58 = vmax.f32 %v15864_v37, 0.0  ;;  %v15878_v37 = vld [vmem:[#allocation8 + $0x14] ss:$8 sps:$4 sm:$0xff]  }
 0x309   :  { %2834 = vmatprep.subr.bf16.mxu1 %v13209_v60  ;;  %2875 = vmatprep.subr.bf16.mxu0 %v13212_v61  ;;  %v15869_v60 = vld [vmem:[#allocation8 + $0x4] ss:$8 sps:$4 sm:$0xff]   ;;  %v15872_v61 = vld [vmem:[#allocation2 + $0x3] sm:$0x1]  ;;  %17773 = vst [vmem:[#allocation34_spill] sm:$0xff] %v15878_v37 }
 0x30a   :  { %v1889_v59 = vpack.c.bf16 %v1887_v58, %v1887_v58  ;;  %v16037_v58 = vld [vmem:[#allocation8 + $0x1b4] ss:$8 sps:$4 sm:$0xff]  }
 0x30c   :  { %2835 = vmatpush1.bf16.msra.mxu1 %v13207_v62  ;;  %2876 = vmatpush1.bf16.msra.mxu0 %v13210_v63  ;;  %v15874_v62 = vld [vmem:[#allocation8] ss:$8 sps:$4 sm:$0xff]   ;;  %v15881_v63 = vld [vmem:[#allocation8 + $0x10] ss:$8 sps:$4 sm:$0xff]  }
 0x30d   :  { %2836 = vmatprep.subr.bf16.mxu1 %v13215_v0  ;;  %2877 = vmatprep.subr.bf16.mxu0 %v13218_v1  ;;  %17772 = vst [vmem:[#allocation33_spill] sm:$0xff] %v15874_v62  ;;  %17774 = vst [vmem:[#allocation35_spill] sm:$0xff] %v15881_v63  ;;  %v15884_v0 = vld [vmem:[#allocation8 + $0x24] ss:$8 sps:$4 sm:$0xff]   ;;  %v15887_v1 = vld [vmem:[#allocation8 + $0x20] ss:$8 sps:$4 sm:$0xff]  }
 0x30e   :  { %17775 = vst [vmem:[#allocation36_spill] sm:$0xff] %v15884_v0  ;;  %17776 = vst [vmem:[#allocation37_spill] sm:$0xff] %v15887_v1 }
 0x310   :  { %2837 = vmatpush1.bf16.msra.mxu1 %v13213_v2  ;;  %2878 = vmatpush1.bf16.msra.mxu0 %v13216_v3  ;;  %v15890_v2 = vld [vmem:[#allocation8 + $0x34] ss:$8 sps:$4 sm:$0xff]   ;;  %v15893_v3 = vld [vmem:[#allocation8 + $0x30] ss:$8 sps:$4 sm:$0xff]  }
 0x311   :  { %2838 = vmatprep.subr.bf16.mxu1 %v13221_v4  ;;  %2879 = vmatprep.subr.bf16.mxu0 %v13224_v5  ;;  %17777 = vst [vmem:[#allocation38_spill] sm:$0xff] %v15890_v2  ;;  %17778 = vst [vmem:[#allocation39_spill] sm:$0xff] %v15893_v3  ;;  %v15896_v4 = vld [vmem:[#allocation8 + $0x44] ss:$8 sps:$4 sm:$0xff]   ;;  %v15899_v5 = vld [vmem:[#allocation8 + $0x40] ss:$8 sps:$4 sm:$0xff]  }
 0x312   :  { %17779 = vst [vmem:[#allocation40_spill] sm:$0xff] %v15896_v4  ;;  %17780 = vst [vmem:[#allocation41_spill] sm:$0xff] %v15899_v5 }
 0x314   :  { %2839 = vmatpush1.bf16.msra.mxu1 %v13219_v6  ;;  %2880 = vmatpush1.bf16.msra.mxu0 %v13222_v8  ;;  %v15902_v6 = vld [vmem:[#allocation8 + $0x54] ss:$8 sps:$4 sm:$0xff]   ;;  %v15905_v8 = vld [vmem:[#allocation8 + $0x50] ss:$8 sps:$4 sm:$0xff]  }
 0x315   :  { %2840 = vmatprep.subr.bf16.mxu1 %v13227_v9  ;;  %2881 = vmatprep.subr.bf16.mxu0 %v13230_v10  ;;  %17781 = vst [vmem:[#allocation42_spill] sm:$0xff] %v15902_v6  ;;  %v15908_v9 = vld [vmem:[#allocation8 + $0x64] ss:$8 sps:$4 sm:$0xff]   ;;  %v15911_v10 = vld [vmem:[#allocation8 + $0x60] ss:$8 sps:$4 sm:$0xff]  }
 0x318   :  { %2841 = vmatpush1.bf16.msra.mxu1 %v13225_v11  ;;  %2882 = vmatpush1.bf16.msra.mxu0 %v13228_v12  ;;  %v15914_v11 = vld [vmem:[#allocation8 + $0x74] ss:$8 sps:$4 sm:$0xff]   ;;  %v15917_v12 = vld [vmem:[#allocation8 + $0x70] ss:$8 sps:$4 sm:$0xff]  }
 0x319   :  { %2842 = vmatprep.subr.bf16.mxu1 %v13233_v13  ;;  %2883 = vmatprep.subr.bf16.mxu0 %v13236_v14  ;;  %v15920_v13 = vld [vmem:[#allocation8 + $0x84] ss:$8 sps:$4 sm:$0xff]   ;;  %v15923_v14 = vld [vmem:[#allocation8 + $0x80] ss:$8 sps:$4 sm:$0xff]  }
 0x31c   :  { %2843 = vmatpush1.bf16.msra.mxu1 %v13231_v15  ;;  %2884 = vmatpush1.bf16.msra.mxu0 %v13234_v16  ;;  %v15926_v15 = vld [vmem:[#allocation8 + $0x94] ss:$8 sps:$4 sm:$0xff]   ;;  %v15929_v16 = vld [vmem:[#allocation8 + $0x90] ss:$8 sps:$4 sm:$0xff]  }
 0x31d   :  { %2844 = vmatprep.subr.bf16.mxu1 %v13239_v17  ;;  %2885 = vmatprep.subr.bf16.mxu0 %v13242_v18  ;;  %v15932_v17 = vld [vmem:[#allocation8 + $0xa4] ss:$8 sps:$4 sm:$0xff]   ;;  %v15935_v18 = vld [vmem:[#allocation8 + $0xa0] ss:$8 sps:$4 sm:$0xff]  }
 0x320   :  { %2845 = vmatpush1.bf16.msra.mxu1 %v13237_v19  ;;  %2886 = vmatpush1.bf16.msra.mxu0 %v13240_v22  ;;  %v15938_v19 = vld [vmem:[#allocation8 + $0xb4] ss:$8 sps:$4 sm:$0xff]   ;;  %v15941_v22 = vld [vmem:[#allocation8 + $0xb0] ss:$8 sps:$4 sm:$0xff]  }
 0x321   :  { %2846 = vmatprep.subr.bf16.mxu1 %v13245_v20  ;;  %2887 = vmatprep.subr.bf16.mxu0 %v13248_v21  ;;  %v15944_v20 = vld [vmem:[#allocation8 + $0xc4] ss:$8 sps:$4 sm:$0xff]   ;;  %v15947_v21 = vld [vmem:[#allocation8 + $0xc0] ss:$8 sps:$4 sm:$0xff]  }
 0x324   :  { %2847 = vmatpush1.bf16.msra.mxu1 %v13243_v23  ;;  %2888 = vmatpush1.bf16.msra.mxu0 %v13246_v24  ;;  %v15950_v23 = vld [vmem:[#allocation8 + $0xd4] ss:$8 sps:$4 sm:$0xff]   ;;  %v15953_v24 = vld [vmem:[#allocation8 + $0xd0] ss:$8 sps:$4 sm:$0xff]  }
 0x325   :  { %2848 = vmatprep.subr.bf16.mxu1 %v13251_v25  ;;  %2889 = vmatprep.subr.bf16.mxu0 %v13254_v26  ;;  %v15956_v25 = vld [vmem:[#allocation8 + $0xe4] ss:$8 sps:$4 sm:$0xff]   ;;  %v15959_v26 = vld [vmem:[#allocation8 + $0xe0] ss:$8 sps:$4 sm:$0xff]  }
 0x326   :  { %17782 = vst [vmem:[#allocation43_spill] sm:$0xff] %v15959_v26 }
 0x328   :  { %2849 = vmatpush1.bf16.msra.mxu1 %v13249_v7  ;;  %2890 = vmatpush1.bf16.msra.mxu0 %v13252_v27  ;;  %v15962_v7 = vld [vmem:[#allocation8 + $0xf4] ss:$8 sps:$4 sm:$0xff]   ;;  %v15965_v27 = vld [vmem:[#allocation8 + $0xf0] ss:$8 sps:$4 sm:$0xff]  }
 0x329   :  { %2850 = vmatprep.subr.bf16.mxu1 %v13257_v30  ;;  %2891 = vmatprep.subr.bf16.mxu0 %v13260_v34  ;;  %17783 = vst [vmem:[#allocation44_spill] sm:$0xff] %v15962_v7  ;;  %17784 = vst [vmem:[#allocation45_spill] sm:$0xff] %v15965_v27  ;;  %v15968_v30 = vld [vmem:[#allocation8 + $0x104] ss:$8 sps:$4 sm:$0xff]   ;;  %v14845_v34 = vld [vmem:[#allocation2 + $0x2] sm:$0x1] }
 0x32a   :  { %17785 = vst [vmem:[#allocation46_spill] sm:$0xff] %v15968_v30 }
 0x32c   :  { %2851 = vmatpush1.bf16.msra.mxu1 %v13255_v35  ;;  %2892 = vmatpush1.bf16.msra.mxu0 %v13258_v36  ;;  %v15971_v35 = vld [vmem:[#allocation2 + $0x8] sm:$0x1]  ;;  %v15973_v36 = vld [vmem:[#allocation8 + $0x100] ss:$8 sps:$4 sm:$0xff]  }
 0x32d   :  { %2852 = vmatprep.subr.bf16.mxu1 %v13263_v38  ;;  %2893 = vmatprep.subr.bf16.mxu0 %v13266_v39  ;;  %17786 = vst [vmem:[#allocation47_spill] sm:$0xff] %v15971_v35  ;;  %17787 = vst [vmem:[#allocation48_spill] sm:$0xff] %v15973_v36  ;;  %v15977_v38 = vld [vmem:[#allocation8 + $0x114] ss:$8 sps:$4 sm:$0xff]   ;;  %v15980_v39 = vld [vmem:[#allocation8 + $0x110] ss:$8 sps:$4 sm:$0xff]  }
 0x32e   :  { %17788 = vst [vmem:[#allocation49_spill] sm:$0xff] %v15977_v38  ;;  %17789 = vst [vmem:[#allocation50_spill] sm:$0xff] %v15980_v39 }
 0x330   :  { %2853 = vmatpush1.bf16.msra.mxu1 %v13261_v40  ;;  %2894 = vmatpush1.bf16.msra.mxu0 %v13264_v41  ;;  %v15983_v40 = vld [vmem:[#allocation8 + $0x124] ss:$8 sps:$4 sm:$0xff]   ;;  %v15986_v41 = vld [vmem:[#allocation8 + $0x120] ss:$8 sps:$4 sm:$0xff]  }
 0x331   :  { %2854 = vmatprep.subr.bf16.mxu1 %v13269_v42  ;;  %2895 = vmatprep.subr.bf16.mxu0 %v13272_v43  ;;  %17790 = vst [vmem:[#allocation51_spill] sm:$0xff] %v15983_v40  ;;  %17791 = vst [vmem:[#allocation52_spill] sm:$0xff] %v15986_v41  ;;  %v15989_v42 = vld [vmem:[#allocation8 + $0x134] ss:$8 sps:$4 sm:$0xff]   ;;  %v15992_v43 = vld [vmem:[#allocation8 + $0x130] ss:$8 sps:$4 sm:$0xff]  }
 0x332   :  { %17792 = vst [vmem:[#allocation53_spill] sm:$0xff] %v15989_v42  ;;  %17793 = vst [vmem:[#allocation54_spill] sm:$0xff] %v15992_v43 }
 0x334   :  { %2855 = vmatpush1.bf16.msra.mxu1 %v13267_v44  ;;  %2896 = vmatpush1.bf16.msra.mxu0 %v13270_v45  ;;  %v15995_v44 = vld [vmem:[#allocation8 + $0x144] ss:$8 sps:$4 sm:$0xff]   ;;  %v15998_v45 = vld [vmem:[#allocation8 + $0x140] ss:$8 sps:$4 sm:$0xff]  }
 0x335   :  { %2856 = vmatprep.subr.bf16.mxu1 %v13275_v46  ;;  %2897 = vmatprep.subr.bf16.mxu0 %v13278_v47  ;;  %17794 = vst [vmem:[#allocation55_spill] sm:$0xff] %v15995_v44  ;;  %17795 = vst [vmem:[#allocation56_spill] sm:$0xff] %v15998_v45  ;;  %v16001_v46 = vld [vmem:[#allocation8 + $0x154] ss:$8 sps:$4 sm:$0xff]   ;;  %v16004_v47 = vld [vmem:[#allocation8 + $0x150] ss:$8 sps:$4 sm:$0xff]  }
 0x336   :  { %17796 = vst [vmem:[#allocation57_spill] sm:$0xff] %v16001_v46 }
 0x338   :  { %2857 = vmatpush1.bf16.msra.mxu1 %v13273_v48  ;;  %2898 = vmatpush1.bf16.msra.mxu0 %v13276_v49  ;;  %v16007_v48 = vld [vmem:[#allocation8 + $0x164] ss:$8 sps:$4 sm:$0xff]   ;;  %v16010_v49 = vld [vmem:[#allocation8 + $0x160] ss:$8 sps:$4 sm:$0xff]  }
 0x339   :  { %2858 = vmatprep.subr.bf16.mxu1 %v13281_v50  ;;  %2899 = vmatprep.subr.bf16.mxu0 %v13284_v51  ;;  %v16013_v50 = vld [vmem:[#allocation8 + $0x174] ss:$8 sps:$4 sm:$0xff]   ;;  %v16016_v51 = vld [vmem:[#allocation8 + $0x170] ss:$8 sps:$4 sm:$0xff]  }
 0x33c   :  { %2859 = vmatpush1.bf16.msra.mxu1 %v13279_v52  ;;  %2900 = vmatpush1.bf16.msra.mxu0 %v13282_v53  ;;  %v16019_v52 = vld [vmem:[#allocation8 + $0x184] ss:$8 sps:$4 sm:$0xff]   ;;  %v16022_v53 = vld [vmem:[#allocation8 + $0x180] ss:$8 sps:$4 sm:$0xff]  }
 0x33d   :  { %2860 = vmatprep.subr.bf16.mxu1 %v13287_v54  ;;  %2901 = vmatprep.subr.bf16.mxu0 %v13290_v55  ;;  %v16025_v54 = vld [vmem:[#allocation8 + $0x194] ss:$8 sps:$4 sm:$0xff]   ;;  %v16028_v55 = vld [vmem:[#allocation8 + $0x190] ss:$8 sps:$4 sm:$0xff]  }
 0x340   :  { %2861 = vmatpush1.bf16.msra.mxu1 %v13285_v56  ;;  %2902 = vmatpush1.bf16.msra.mxu0 %v13288_v57  ;;  %v16031_v56 = vld [vmem:[#allocation8 + $0x1a4] ss:$8 sps:$4 sm:$0xff]   ;;  %v16034_v57 = vld [vmem:[#allocation8 + $0x1a0] ss:$8 sps:$4 sm:$0xff]  }
 0x341   :  { %2914 = vmatprep.subr.bf16.mxu1 %v15869_v60 }
 0x343   :  { %2863 = vmatmul.mubr.bf16.vlgmr.msra.gmra.mrb[64].mxu1 %v1889_v59  ;;  %2904 = vmatmul.mubr.bf16.vlgmr.msra.gmra.mrb[56].mxu0 %v1889_v59  ;;  %v16040_v59 = vld [vmem:[#allocation8 + $0x1b0] ss:$8 sps:$4 sm:$0xff]  }
 0x344   :  { %2915 = vmatpush1.bf16.msra.mxu1 %v15874_v62  ;;  %2946 = vmatprep.mubr.bf16.mxu1 %v15872_v61 }
 0x345   :  { %2916 = vmatprep.subr.bf16.mxu1 %v15878_v37 }
 0x348   :  { %2917 = vmatpush1.bf16.msra.mxu1 %v15881_v63 }
 0x349   :  { %2918 = vmatprep.subr.bf16.mxu1 %v15884_v0 }
 0x34c   :  { %2919 = vmatpush1.bf16.msra.mxu1 %v15887_v1 }
 0x34d   :  { %2920 = vmatprep.subr.bf16.mxu1 %v15890_v2 }
 0x350   :  { %2921 = vmatpush1.bf16.msra.mxu1 %v15893_v3 }
 0x351   :  { %2922 = vmatprep.subr.bf16.mxu1 %v15896_v4 }
 0x354   :  { %2923 = vmatpush1.bf16.msra.mxu1 %v15899_v5 }
 0x355   :  { %2924 = vmatprep.subr.bf16.mxu1 %v15902_v6 }
 0x358   :  { %2925 = vmatpush1.bf16.msra.mxu1 %v15905_v8 }
 0x359   :  { %2926 = vmatprep.subr.bf16.mxu1 %v15908_v9 }
 0x35c   :  { %2927 = vmatpush1.bf16.msra.mxu1 %v15911_v10 }
 0x35d   :  { %2928 = vmatprep.subr.bf16.mxu1 %v15914_v11 }
 0x360   :  { %2929 = vmatpush1.bf16.msra.mxu1 %v15917_v12 }
 0x361   :  { %2930 = vmatprep.subr.bf16.mxu1 %v15920_v13 }
 0x364   :  { %2931 = vmatpush1.bf16.msra.mxu1 %v15923_v14 }
 0x365   :  { %2932 = vmatprep.subr.bf16.mxu1 %v15926_v15 }
 0x368   :  { %2933 = vmatpush1.bf16.msra.mxu1 %v15929_v16 }
 0x369   :  { %2934 = vmatprep.subr.bf16.mxu1 %v15932_v17 }
 0x36c   :  { %2935 = vmatpush1.bf16.msra.mxu1 %v15935_v18 }
 0x36d   :  { %2936 = vmatprep.subr.bf16.mxu1 %v15938_v19 }
 0x370   :  { %2937 = vmatpush1.bf16.msra.mxu1 %v15941_v22 }
 0x371   :  { %2938 = vmatprep.subr.bf16.mxu1 %v15944_v20 }
 0x374   :  { %2939 = vmatpush1.bf16.msra.mxu1 %v15947_v21 }
 0x375   :  { %2940 = vmatprep.subr.bf16.mxu1 %v15950_v23 }
 0x378   :  { %2941 = vmatpush1.bf16.msra.mxu1 %v15953_v24 }
 0x379   :  { %2942 = vmatprep.subr.bf16.mxu1 %v15956_v25 }
 0x37c   :  { %2943 = vmatpush1.bf16.msra.mxu1 %v15959_v26 }
 0x37d   :  { %2944 = vmatprep.subr.bf16.mxu1 %v15962_v7 }
 0x380   :  { %2945 = vmatpush1.bf16.msra.mxu1 %v15965_v27 }
 0x381   :  { %2955 = vmatprep.subr.bf16.mxu1 %v15968_v30 }
 0x383   :  { %2947 = vmatmul.mubr.bf16.vlgmr.msra.gmra.mrb[68].mxu1 %v14845_v34  ;;  %v16043_v34 = vld [vmem:[#allocation8 + $0x1c4] ss:$8 sps:$4 sm:$0xff]  }
 0x384   :  { %2956 = vmatpush1.bf16.msra.mxu1 %v15973_v36  ;;  %2987 = vmatprep.mubr.bf16.mxu1 %v15971_v35  ;;  %v16061_v35 = vld [vmem:[#allocation8 + $0x1f4] ss:$8 sps:$4 sm:$0xff]  }
 0x385   :  { %2957 = vmatprep.subr.bf16.mxu1 %v15977_v38 }
 0x388   :  { %2958 = vmatpush1.bf16.msra.mxu1 %v15980_v39 }
 0x389   :  { %2959 = vmatprep.subr.bf16.mxu1 %v15983_v40 }
 0x38c   :  { %2960 = vmatpush1.bf16.msra.mxu1 %v15986_v41 }
 0x38d   :  { %2961 = vmatprep.subr.bf16.mxu1 %v15989_v42 }
 0x390   :  { %2962 = vmatpush1.bf16.msra.mxu1 %v15992_v43 }
 0x391   :  { %2963 = vmatprep.subr.bf16.mxu1 %v15995_v44 }
 0x394   :  { %2964 = vmatpush1.bf16.msra.mxu1 %v15998_v45 }
 0x395   :  { %2965 = vmatprep.subr.bf16.mxu1 %v16001_v46 }
 0x398   :  { %2966 = vmatpush1.bf16.msra.mxu1 %v16004_v47 }
 0x399   :  { %2967 = vmatprep.subr.bf16.mxu1 %v16007_v48 }
 0x39c   :  { %2968 = vmatpush1.bf16.msra.mxu1 %v16010_v49 }
 0x39d   :  { %2969 = vmatprep.subr.bf16.mxu1 %v16013_v50 }
 0x3a0   :  { %2970 = vmatpush1.bf16.msra.mxu1 %v16016_v51 }
 0x3a1   :  { %2971 = vmatprep.subr.bf16.mxu1 %v16019_v52 }
 0x3a4   :  { %2972 = vmatpush1.bf16.msra.mxu1 %v16022_v53 }
 0x3a5   :  { %2973 = vmatprep.subr.bf16.mxu1 %v16025_v54 }
 0x3a8   :  { %2974 = vmatpush1.bf16.msra.mxu1 %v16028_v55 }
 0x3a9   :  { %2975 = vmatprep.subr.bf16.mxu1 %v16031_v56 }
 0x3ac   :  { %2976 = vmatpush1.bf16.msra.mxu1 %v16034_v57 }
 0x3ad   :  { %2977 = vmatprep.subr.bf16.mxu1 %v16037_v58 }
 0x3b0   :  { %2978 = vmatpush1.bf16.msra.mxu1 %v16040_v59 }
 0x3b1   :  { %2979 = vmatprep.subr.bf16.mxu1 %v16043_v34 }
 0x3b4   :  { %2980 = vmatpush1.bf16.msra.mxu1 %v16046_v28  ;;  %v16064_v28 = vld [vmem:[#allocation8 + $0x1f0] ss:$8 sps:$4 sm:$0xff]  }
 0x3b5   :  { %2981 = vmatprep.subr.bf16.mxu1 %v16049_v31  ;;  %v16068_v31 = vld [vmem:[#allocation2 + $0x7] sm:$0x1] }
 0x3b6   :  { %17800 = vst [vmem:[#allocation61_spill] sm:$0xff] %v16068_v31 }
 0x3b8   :  { %2982 = vmatpush1.bf16.msra.mxu1 %v16052_v29  ;;  %v3471_v29 = vld [vmem:[#allocation2 + $0x4] sm:$0x1] }
 0x3b9   :  { %2983 = vmatprep.subr.bf16.mxu1 %v16055_v33 }
 0x3bc   :  { %2984 = vmatpush1.bf16.msra.mxu1 %v16058_v32 }
 0x3bd   :  { %2985 = vmatprep.subr.bf16.mxu1 %v16061_v35 }
 0x3c0   :  { %2986 = vmatpush1.bf16.msra.mxu1 %v16064_v28 }
 0x3c1   :  { %3473 = vmatprep.subr.bf16.mxu1 %v15869_v60 }
 0x3c3   :  { %2988 = vmatmul.mubr.bf16.vlgmr.msra.gmra.mrb[68].mxu1 %v16068_v31 }
 0x3c4   :  { %3474 = vmatpush1.bf16.msra.mxu1 %v15874_v62  ;;  %3505 = vmatprep.mubr.bf16.mxu1 %v3471_v29  ;;  %v13296_v62 = vld [vmem:[#allocation11 + $0x424] ss:$16 sps:$4 sm:$0xff]  }
 0x3c5   :  { %3475 = vmatprep.subr.bf16.mxu1 %v15878_v37 }
 0x3c8   :  { %3476 = vmatpush1.bf16.msra.mxu1 %v15881_v63 }
 0x3c9   :  { %3477 = vmatprep.subr.bf16.mxu1 %v15884_v0 }
 0x3cc   :  { %3478 = vmatpush1.bf16.msra.mxu1 %v15887_v1 }
 0x3cd   :  { %3479 = vmatprep.subr.bf16.mxu1 %v15890_v2 }
 0x3d0   :  { %3480 = vmatpush1.bf16.msra.mxu1 %v15893_v3 }
 0x3d1   :  { %3481 = vmatprep.subr.bf16.mxu1 %v15896_v4  ;;  %v13294_v4 = vld [vmem:[#allocation11 + $0x420] ss:$16 sps:$4 sm:$0xff]  }
 0x3d4   :  { %3482 = vmatpush1.bf16.msra.mxu1 %v15899_v5  ;;  %v13291_v5 = vld [vmem:[#allocation11 + $0x400] ss:$16 sps:$4 sm:$0xff]  }
 0x3d5   :  { %3483 = vmatprep.subr.bf16.mxu1 %v15902_v6  ;;  %v13293_v6 = vld [vmem:[#allocation11 + $0x404] ss:$16 sps:$4 sm:$0xff]  }
 0x3d6   :  { %v16081_v31 = vpop.f32.mrb[60].mxu1  ;;  %v16083_v29 = vpop.f32.mrb[52].mxu0  ;;  %3385 = vmatprep.subr.bf16.mxu0 %v13293_v6  ;;  %v13308_v6 = vld [vmem:[#allocation11 + $0x4a4] ss:$16 sps:$4 sm:$0xff]  }
 0x3d7   :  { %v16085_v37 = vpop.f32.mrb[61].mxu1  ;;  %v16087_v63 = vpop.f32.mrb[53].mxu0  ;;  %3386 = vmatpush1.bf16.msra.mxu0 %v13291_v5  ;;  %v13306_v5 = vld [vmem:[#allocation11 + $0x4a0] ss:$16 sps:$4 sm:$0xff]  }
 0x3d8   :  { %3484 = vmatpush1.bf16.msra.mxu1 %v15905_v8  ;;  %v2466_v1 = vpop.f32.mrb[62].mxu1  ;;  %v2507_v2 = vpop.f32.mrb[54].mxu0  ;;  %3387 = vmatprep.subr.bf16.mxu0 %v13296_v62  ;;  %v13303_v62 = vld [vmem:[#allocation11 + $0x480] ss:$16 sps:$4 sm:$0xff]  }
 0x3d9   :  { %v2467_v0 = vpop.f32.mrb[63].mxu1  ;;  %v2508_v3 = vpop.f32.mrb[55].mxu0  ;;  %3485 = vmatprep.subr.bf16.mxu1 %v15908_v9  ;;  %v13299_v1 = vld [vmem:[#allocation11 + $0x444] ss:$16 sps:$4 sm:$0xff]   ;;  %v13300_v2 = vld [vmem:[#allocation11 + $0x460] ss:$16 sps:$4 sm:$0xff]  }
 0x3da   :  { %v13297_v0 = vld [vmem:[#allocation11 + $0x440] ss:$16 sps:$4 sm:$0xff]   ;;  %v13302_v3 = vld [vmem:[#allocation11 + $0x464] ss:$16 sps:$4 sm:$0xff]  }
 0x3db   :  { %3388 = vmatpush1.bf16.msra.mxu0 %v13294_v4  ;;  %v13305_v4 = vld [vmem:[#allocation11 + $0x484] ss:$16 sps:$4 sm:$0xff]  }
 0x3dc   :  { %3486 = vmatpush1.bf16.msra.mxu1 %v15911_v10  ;;  %3389 = vmatprep.subr.bf16.mxu0 %v13299_v1  ;;  %v13311_v1 = vld [vmem:[#allocation11 + $0x4c4] ss:$16 sps:$4 sm:$0xff]  }
 0x3dd   :  { %3487 = vmatprep.subr.bf16.mxu1 %v15914_v11 }
 0x3df   :  { %3390 = vmatpush1.bf16.msra.mxu0 %v13297_v0  ;;  %v13309_v0 = vld [vmem:[#allocation11 + $0x4c0] ss:$16 sps:$4 sm:$0xff]  }
 0x3e0   :  { %3488 = vmatpush1.bf16.msra.mxu1 %v15917_v12  ;;  %3391 = vmatprep.subr.bf16.mxu0 %v13302_v3  ;;  %v13314_v3 = vld [vmem:[#allocation11 + $0x4e4] ss:$16 sps:$4 sm:$0xff]  }
 0x3e1   :  { %3489 = vmatprep.subr.bf16.mxu1 %v15920_v13 }
 0x3e3   :  { %3392 = vmatpush1.bf16.msra.mxu0 %v13300_v2  ;;  %v13312_v2 = vld [vmem:[#allocation11 + $0x4e0] ss:$16 sps:$4 sm:$0xff]  }
 0x3e4   :  { %3490 = vmatpush1.bf16.msra.mxu1 %v15923_v14  ;;  %3393 = vmatprep.subr.bf16.mxu0 %v13305_v4  ;;  %v13317_v4 = vld [vmem:[#allocation11 + $0x504] ss:$16 sps:$4 sm:$0xff]  }
 0x3e5   :  { %3491 = vmatprep.subr.bf16.mxu1 %v15926_v15 }
 0x3e7   :  { %3394 = vmatpush1.bf16.msra.mxu0 %v13303_v62  ;;  %v13315_v62 = vld [vmem:[#allocation11 + $0x500] ss:$16 sps:$4 sm:$0xff]  }
 0x3e8   :  { %3492 = vmatpush1.bf16.msra.mxu1 %v15929_v16  ;;  %3395 = vmatprep.subr.bf16.mxu0 %v13308_v6  ;;  %v13320_v6 = vld [vmem:[#allocation11 + $0x524] ss:$16 sps:$4 sm:$0xff]  }
 0x3e9   :  { %3493 = vmatprep.subr.bf16.mxu1 %v15932_v17 }
 0x3eb   :  { %3396 = vmatpush1.bf16.msra.mxu0 %v13306_v5  ;;  %v13318_v5 = vld [vmem:[#allocation11 + $0x520] ss:$16 sps:$4 sm:$0xff]  }
 0x3ec   :  { %3494 = vmatpush1.bf16.msra.mxu1 %v15935_v18  ;;  %3397 = vmatprep.subr.bf16.mxu0 %v13311_v1  ;;  %v13321_v1 = vld [vmem:[#allocation11 + $0x540] ss:$16 sps:$4 sm:$0xff]  }
 0x3ed   :  { %3495 = vmatprep.subr.bf16.mxu1 %v15938_v19 }
 0x3ef   :  { %3398 = vmatpush1.bf16.msra.mxu0 %v13309_v0  ;;  %v3472_v0 = vld [vmem:[#allocation2 + $0x9] sm:$0x1] }
 0x3f0   :  { %3496 = vmatpush1.bf16.msra.mxu1 %v15941_v22  ;;  %3399 = vmatprep.subr.bf16.mxu0 %v13314_v3  ;;  %v13324_v3 = vld [vmem:[#allocation11 + $0x560] ss:$16 sps:$4 sm:$0xff]  }
 0x3f1   :  { %3497 = vmatprep.subr.bf16.mxu1 %v15944_v20 }
 0x3f3   :  { %3400 = vmatpush1.bf16.msra.mxu0 %v13312_v2  ;;  %v13323_v2 = vld [vmem:[#allocation11 + $0x544] ss:$16 sps:$4 sm:$0xff]  }
 0x3f4   :  { %3498 = vmatpush1.bf16.msra.mxu1 %v15947_v21  ;;  %3401 = vmatprep.subr.bf16.mxu0 %v13317_v4  ;;  %v13329_v4 = vld [vmem:[#allocation11 + $0x584] ss:$16 sps:$4 sm:$0xff]  }
 0x3f5   :  { %3499 = vmatprep.subr.bf16.mxu1 %v15950_v23 }
 0x3f7   :  { %3402 = vmatpush1.bf16.msra.mxu0 %v13315_v62  ;;  %v13326_v62 = vld [vmem:[#allocation11 + $0x564] ss:$16 sps:$4 sm:$0xff]  }
 0x3f8   :  { %3500 = vmatpush1.bf16.msra.mxu1 %v15953_v24  ;;  %3403 = vmatprep.subr.bf16.mxu0 %v13320_v6  ;;  %v13332_v6 = vld [vmem:[#allocation11 + $0x5a4] ss:$16 sps:$4 sm:$0xff]  }
 0x3f9   :  { %3501 = vmatprep.subr.bf16.mxu1 %v15956_v25 }
 0x3fb   :  { %3404 = vmatpush1.bf16.msra.mxu0 %v13318_v5  ;;  %v13330_v5 = vld [vmem:[#allocation11 + $0x5a0] ss:$16 sps:$4 sm:$0xff]  }
 0x3fc   :  { %3502 = vmatpush1.bf16.msra.mxu1 %v15959_v26  ;;  %3405 = vmatprep.subr.bf16.mxu0 %v13323_v2 }
 0x3fd   :  { %3503 = vmatprep.subr.bf16.mxu1 %v15962_v7 }
 0x3ff   :  { %3406 = vmatpush1.bf16.msra.mxu0 %v13321_v1  ;;  %v13333_v1 = vld [vmem:[#allocation11 + $0x5c0] ss:$16 sps:$4 sm:$0xff]  }
 0x400   :  { %3504 = vmatpush1.bf16.msra.mxu1 %v15965_v27  ;;  %3407 = vmatprep.subr.bf16.mxu0 %v13326_v62 }
 0x401   :  { %3514 = vmatprep.subr.bf16.mxu1 %v15968_v30 }
 0x403   :  { %3506 = vmatmul.mubr.bf16.vlgmr.msra.gmra.mrb[72].mxu1 %v15872_v61  ;;  %3408 = vmatpush1.bf16.msra.mxu0 %v13324_v3  ;;  %v13327_v61 = vld [vmem:[#allocation11 + $0x580] ss:$16 sps:$4 sm:$0xff]  }
 0x404   :  { %3515 = vmatpush1.bf16.msra.mxu1 %v15973_v36  ;;  %3546 = vmatprep.mubr.bf16.mxu1 %v3472_v0  ;;  %v13335_v0 = vld [vmem:[#allocation11 + $0x5c4] ss:$16 sps:$4 sm:$0xff]  }
 0x405   :  { %3516 = vmatprep.subr.bf16.mxu1 %v15977_v38  ;;  %3409 = vmatprep.subr.bf16.mxu0 %v13329_v4 }
 0x407   :  { %3410 = vmatpush1.bf16.msra.mxu0 %v13327_v61 }
 0x408   :  { %3517 = vmatpush1.bf16.msra.mxu1 %v15980_v39  ;;  %3411 = vmatprep.subr.bf16.mxu0 %v13332_v6 }
 0x409   :  { %3518 = vmatprep.subr.bf16.mxu1 %v15983_v40 }
 0x40b   :  { %3412 = vmatpush1.bf16.msra.mxu0 %v13330_v5 }
 0x40c   :  { %3519 = vmatpush1.bf16.msra.mxu1 %v15986_v41  ;;  %3413 = vmatprep.subr.bf16.mxu0 %v13335_v0  ;;  %v13338_v0 = vld [vmem:[#allocation11 + $0x5e4] ss:$16 sps:$4 sm:$0xff]  }
 0x40d   :  { %3520 = vmatprep.subr.bf16.mxu1 %v15989_v42 }
 0x40f   :  { %3414 = vmatpush1.bf16.msra.mxu0 %v13333_v1  ;;  %v13341_v1 = vld [vmem:[#allocation11 + $0x40c] ss:$16 sps:$4 sm:$0xff]  }
 0x410   :  { %3521 = vmatpush1.bf16.msra.mxu1 %v15992_v43  ;;  %3415 = vmatprep.subr.bf16.mxu0 %v13338_v0  ;;  %v17814_v0 = vld [vmem:[#allocation37_spill] sm:$0xff] }
 0x411   :  { %3522 = vmatprep.subr.bf16.mxu1 %v15995_v44 }
 0x414   :  { %3523 = vmatpush1.bf16.msra.mxu1 %v15998_v45 }
 0x415   :  { %3524 = vmatprep.subr.bf16.mxu1 %v16001_v46 }
 0x416   :  { %v2864_v2 = vpop.f32.mrb[64].mxu1  ;;  %v2905_v3 = vpop.f32.mrb[56].mxu0 }
 0x417   :  { %v16123_v62 = vadd.f32 %v2864_v2, %v16081_v31  ;;  %v16126_v61 = vadd.f32 %v2905_v3, %v16083_v29  ;;  %v2866_v4 = vpop.f32.mrb[65].mxu1  ;;  %v2907_v43 = vpop.f32.mrb[57].mxu0  ;;  %v13336_v29 = vld [vmem:[#allocation11 + $0x5e0] ss:$16 sps:$4 sm:$0xff]  }
 0x418   :  { %v16129_v5 = vadd.f32 %v2866_v4, %v16085_v37  ;;  %v16132_v6 = vadd.f32 %v2907_v43, %v16087_v63  ;;  %v2868_v46 = vpop.f32.mrb[66].mxu1  ;;  %v2909_v45 = vpop.f32.mrb[58].mxu0  ;;  %3525 = vmatpush1.bf16.msra.mxu1 %v16004_v47  ;;  %3416 = vmatpush1.bf16.msra.mxu0 %v13336_v29  ;;  %v17805_v37 = vld [vmem:[#allocation58_spill] sm:$0xff]  ;;  %v17806_v63 = vld [vmem:[#allocation59_spill] sm:$0xff]  ;;  %v17807_v43 = vld [vmem:[#allocation60_spill] sm:$0xff] }
 0x419   :  { %17801 = vst [vmem:[#allocation62_spill] sm:$0xff] %v16123_v62  ;;  %17802 = vst [vmem:[#allocation63_spill] sm:$0xff] %v16126_v61  ;;  %v2869_v44 = vpop.f32.mrb[67].mxu1  ;;  %v2910_v31 = vpop.f32.mrb[59].mxu0  ;;  %3526 = vmatprep.subr.bf16.mxu1 %v16007_v48  ;;  %3426 = vmatprep.subr.bf16.mxu0 %v13341_v1  ;;  %v17809_v45 = vld [vmem:[#allocation33_spill] sm:$0xff]  ;;  %v17811_v2 = vld [vmem:[#allocation34_spill] sm:$0xff] }
 0x41a   :  { %17803 = vst [vmem:[#allocation64_spill] sm:$0xff] %v16129_v5  ;;  %17804 = vst [vmem:[#allocation65_spill] sm:$0xff] %v16132_v6  ;;  %v17808_v44 = vld [vmem:[#allocation47_spill] sm:$0xff]  ;;  %v16158_v46 = vld [vmem:[#allocation2 + $0x6] sm:$0x1] }
 0x41b   :  { %17810 = vst [vmem:[#allocation58_spill] sm:$0xff] %v16158_v46  ;;  %v17812_v3 = vld [vmem:[#allocation35_spill] sm:$0xff]  ;;  %v17813_v4 = vld [vmem:[#allocation36_spill] sm:$0xff]  ;;  %v17815_v31 = vld [vmem:[#allocation38_spill] sm:$0xff] }
 0x41c   :  { %3527 = vmatpush1.bf16.msra.mxu1 %v16010_v49  ;;  %v17816_v29 = vld [vmem:[#allocation39_spill] sm:$0xff]  ;;  %v17817_v1 = vld [vmem:[#allocation40_spill] sm:$0xff]  ;;  %v17819_v6 = vld [vmem:[#allocation42_spill] sm:$0xff] }
 0x41d   :  { %3528 = vmatprep.subr.bf16.mxu1 %v16013_v50  ;;  %v14879_v61 = vld [vmem:[#allocation2 + $0x5] sm:$0x1]  ;;  %v16192_v5 = vld [vmem:[#allocation2 + $0xb] sm:$0x1] }
 0x41e   :  { %17820 = vst [vmem:[#allocation59_spill] sm:$0xff] %v16192_v5  ;;  %v17821_v62 = vld [vmem:[#allocation54_spill] sm:$0xff] }
 0x420   :  { %3529 = vmatpush1.bf16.msra.mxu1 %v16016_v51 }
 0x421   :  { %3530 = vmatprep.subr.bf16.mxu1 %v16019_v52 }
 0x424   :  { %3531 = vmatpush1.bf16.msra.mxu1 %v16022_v53 }
 0x425   :  { %3532 = vmatprep.subr.bf16.mxu1 %v16025_v54 }
 0x428   :  { %3533 = vmatpush1.bf16.msra.mxu1 %v16028_v55 }
 0x429   :  { %3534 = vmatprep.subr.bf16.mxu1 %v16031_v56 }
 0x42c   :  { %3535 = vmatpush1.bf16.msra.mxu1 %v16034_v57 }
 0x42d   :  { %3536 = vmatprep.subr.bf16.mxu1 %v16037_v58 }
 0x430   :  { %3537 = vmatpush1.bf16.msra.mxu1 %v16040_v59 }
 0x431   :  { %3538 = vmatprep.subr.bf16.mxu1 %v16043_v34 }
 0x434   :  { %3539 = vmatpush1.bf16.msra.mxu1 %v17805_v37 }
 0x435   :  { %3540 = vmatprep.subr.bf16.mxu1 %v17806_v63 }
 0x438   :  { %3541 = vmatpush1.bf16.msra.mxu1 %v17807_v43 }
 0x439   :  { %3542 = vmatprep.subr.bf16.mxu1 %v16055_v33 }
 0x43c   :  { %3543 = vmatpush1.bf16.msra.mxu1 %v16058_v32 }
 0x43d   :  { %3544 = vmatprep.subr.bf16.mxu1 %v16061_v35 }
 0x440   :  { %3545 = vmatpush1.bf16.msra.mxu1 %v16064_v28 }
 0x441   :  { %4032 = vmatprep.subr.bf16.mxu1 %v15869_v60 }
 0x443   :  { %3547 = vmatmul.mubr.bf16.vlgmr.msra.gmra.mrb[72].mxu1 %v17808_v44  ;;  %v17818_v44 = vld [vmem:[#allocation41_spill] sm:$0xff] }
 0x444   :  { %4033 = vmatpush1.bf16.msra.mxu1 %v17809_v45  ;;  %4064 = vmatprep.mubr.bf16.mxu1 %v16158_v46  ;;  %v17822_v46 = vld [vmem:[#allocation55_spill] sm:$0xff] }
 0x445   :  { %4034 = vmatprep.subr.bf16.mxu1 %v17811_v2 }
 0x448   :  { %4035 = vmatpush1.bf16.msra.mxu1 %v17812_v3 }
 0x449   :  { %4036 = vmatprep.subr.bf16.mxu1 %v17813_v4 }
 0x44c   :  { %4037 = vmatpush1.bf16.msra.mxu1 %v17814_v0 }
 0x44d   :  { %4038 = vmatprep.subr.bf16.mxu1 %v17815_v31 }
 0x450   :  { %4039 = vmatpush1.bf16.msra.mxu1 %v17816_v29 }
 0x451   :  { %4040 = vmatprep.subr.bf16.mxu1 %v17817_v1 }
 0x454   :  { %4041 = vmatpush1.bf16.msra.mxu1 %v17818_v44 }
 0x455   :  { %4042 = vmatprep.subr.bf16.mxu1 %v17819_v6 }
 0x458   :  { %4043 = vmatpush1.bf16.msra.mxu1 %v15905_v8 }
 0x459   :  { %4044 = vmatprep.subr.bf16.mxu1 %v15908_v9 }
 0x45c   :  { %4045 = vmatpush1.bf16.msra.mxu1 %v15911_v10 }
 0x45d   :  { %4046 = vmatprep.subr.bf16.mxu1 %v15914_v11 }
 0x460   :  { %4047 = vmatpush1.bf16.msra.mxu1 %v15917_v12 }
 0x461   :  { %4048 = vmatprep.subr.bf16.mxu1 %v15920_v13 }
 0x464   :  { %4049 = vmatpush1.bf16.msra.mxu1 %v15923_v14 }
 0x465   :  { %4050 = vmatprep.subr.bf16.mxu1 %v15926_v15 }
 0x468   :  { %4051 = vmatpush1.bf16.msra.mxu1 %v15929_v16 }
 0x469   :  { %4052 = vmatprep.subr.bf16.mxu1 %v15932_v17 }
 0x46c   :  { %4053 = vmatpush1.bf16.msra.mxu1 %v15935_v18 }
 0x46d   :  { %4054 = vmatprep.subr.bf16.mxu1 %v15938_v19 }
 0x470   :  { %4055 = vmatpush1.bf16.msra.mxu1 %v15941_v22 }
 0x471   :  { %4056 = vmatprep.subr.bf16.mxu1 %v15944_v20 }
 0x474   :  { %4057 = vmatpush1.bf16.msra.mxu1 %v15947_v21 }
 0x475   :  { %4058 = vmatprep.subr.bf16.mxu1 %v15950_v23 }
 0x478   :  { %4059 = vmatpush1.bf16.msra.mxu1 %v15953_v24 }
 0x479   :  { %4060 = vmatprep.subr.bf16.mxu1 %v15956_v25 }
 0x47c   :  { %4061 = vmatpush1.bf16.msra.mxu1 %v15959_v26 }
 0x47d   :  { %4062 = vmatprep.subr.bf16.mxu1 %v15962_v7  ;;  %v17826_v7 = vld [vmem:[#allocation32_spill] sm:$0xff] }
 0x480   :  { %4063 = vmatpush1.bf16.msra.mxu1 %v15965_v27 }
 0x481   :  { %4073 = vmatprep.subr.bf16.mxu1 %v15968_v30  ;;  %v17824_v30 = vld [vmem:[#allocation57_spill] sm:$0xff] }
 0x483   :  { %4065 = vmatmul.mubr.bf16.vlgmr.msra.gmra.mrb[76].mxu1 %v14879_v61  ;;  %v17823_v61 = vld [vmem:[#allocation56_spill] sm:$0xff] }
 0x484   :  { %4074 = vmatpush1.bf16.msra.mxu1 %v15973_v36  ;;  %4105 = vmatprep.mubr.bf16.mxu1 %v16192_v5  ;;  %v17825_v5 = vld [vmem:[#allocation31_spill] sm:$0xff] }
 0x485   :  { %4075 = vmatprep.subr.bf16.mxu1 %v15977_v38 }
 0x488   :  { %4076 = vmatpush1.bf16.msra.mxu1 %v15980_v39 }
 0x489   :  { %4077 = vmatprep.subr.bf16.mxu1 %v15983_v40 }
 0x48c   :  { %4078 = vmatpush1.bf16.msra.mxu1 %v15986_v41 }
 0x48d   :  { %4079 = vmatprep.subr.bf16.mxu1 %v15989_v42 }
 0x490   :  { %4080 = vmatpush1.bf16.msra.mxu1 %v17821_v62 }
 0x491   :  { %4081 = vmatprep.subr.bf16.mxu1 %v17822_v46 }
 0x494   :  { %4082 = vmatpush1.bf16.msra.mxu1 %v17823_v61  ;;  %v13339_v61 = vld [vmem:[#allocation11 + $0x408] ss:$16 sps:$4 sm:$0xff]  }
 0x495   :  { %4083 = vmatprep.subr.bf16.mxu1 %v17824_v30 }
 0x496   :  { %v2989_v36 = vpop.f32.mrb[68].mxu1 }
 0x497   :  { %v12889_v27 = vadd.f32 %v2989_v36, %v17825_v5  ;;  %v2991_v38 = vpop.f32.mrb[69].mxu1  ;;  %v13344_v36 = vld [vmem:[#allocation11 + $0x42c] ss:$16 sps:$4 sm:$0xff]  }
 0x498   :  { %v12890_v39 = vadd.f32 %v2991_v38, %v17826_v7  ;;  %v2993_v26 = vpop.f32.mrb[70].mxu1  ;;  %4084 = vmatpush1.bf16.msra.mxu1 %v16004_v47  ;;  %v13345_v38 = vld [vmem:[#allocation11 + $0x448] ss:$16 sps:$4 sm:$0xff]  }
 0x499   :  { %v2996_v41 = vmax.f32 %v12889_v27, 0.0  ;;  %v2994_v40 = vpop.f32.mrb[71].mxu1  ;;  %4085 = vmatprep.subr.bf16.mxu1 %v16007_v48  ;;  %v13342_v26 = vld [vmem:[#allocation11 + $0x428] ss:$16 sps:$4 sm:$0xff]   ;;  %v13347_v27 = vld [vmem:[#allocation11 + $0x44c] ss:$16 sps:$4 sm:$0xff]  }
 0x49a   :  { %v2997_v62 = vmax.f32 %v12890_v39, 0.0  ;;  %v13350_v39 = vld [vmem:[#allocation11 + $0x46c] ss:$16 sps:$4 sm:$0xff]   ;;  %v13348_v40 = vld [vmem:[#allocation11 + $0x468] ss:$16 sps:$4 sm:$0xff]  }
 0x49b   :  { %v16210_v46 = vpack.c.bf16 %v2996_v41, %v2996_v41  ;;  %v13353_v41 = vld [vmem:[#allocation11 + $0x48c] ss:$16 sps:$4 sm:$0xff]  }
 0x49c   :  { %v2999_v42 = vpack.c.bf16 %v2997_v62, %v2997_v62  ;;  %4086 = vmatpush1.bf16.msra.mxu1 %v16010_v49  ;;  %v13356_v62 = vld [vmem:[#allocation11 + $0x4ac] ss:$16 sps:$4 sm:$0xff]  }
 0x49d   :  { %4087 = vmatprep.subr.bf16.mxu1 %v16013_v50 }
 0x49e   :  { %3417 = vmatprep.mubr.bf16.mxu0 %v2999_v42 }
 0x49f   :  { %3418 = vmatmul.mubr.bf16.vlgmr.msra.gmra.mrb[60].mxu0 %v16210_v46 }
 0x4a0   :  { %3427 = vmatpush1.bf16.msra.mxu0 %v13339_v61  ;;  %3458 = vmatprep.mubr.bf16.mxu0 %v2999_v42  ;;  %v13351_v42 = vld [vmem:[#allocation11 + $0x488] ss:$16 sps:$4 sm:$0xff]  }
 0x4a1   :  { %4088 = vmatpush1.bf16.msra.mxu1 %v16016_v51  ;;  %3428 = vmatprep.subr.bf16.mxu0 %v13344_v36  ;;  %v13354_v61 = vld [vmem:[#allocation11 + $0x4a8] ss:$16 sps:$4 sm:$0xff]   ;;  %v13359_v36 = vld [vmem:[#allocation11 + $0x4cc] ss:$16 sps:$4 sm:$0xff]  }
 0x4a2   :  { %4089 = vmatprep.subr.bf16.mxu1 %v16019_v52 }
 0x4a4   :  { %3429 = vmatpush1.bf16.msra.mxu0 %v13342_v26  ;;  %v13357_v26 = vld [vmem:[#allocation11 + $0x4c8] ss:$16 sps:$4 sm:$0xff]  }
 0x4a5   :  { %4090 = vmatpush1.bf16.msra.mxu1 %v16022_v53  ;;  %3430 = vmatprep.subr.bf16.mxu0 %v13347_v27  ;;  %v13362_v27 = vld [vmem:[#allocation11 + $0x4ec] ss:$16 sps:$4 sm:$0xff]  }
 0x4a6   :  { %4091 = vmatprep.subr.bf16.mxu1 %v16025_v54 }
 0x4a8   :  { %3431 = vmatpush1.bf16.msra.mxu0 %v13345_v38  ;;  %v13360_v38 = vld [vmem:[#allocation11 + $0x4e8] ss:$16 sps:$4 sm:$0xff]  }
 0x4a9   :  { %4092 = vmatpush1.bf16.msra.mxu1 %v16028_v55  ;;  %3432 = vmatprep.subr.bf16.mxu0 %v13350_v39  ;;  %v13365_v39 = vld [vmem:[#allocation11 + $0x50c] ss:$16 sps:$4 sm:$0xff]  }
 0x4aa   :  { %4093 = vmatprep.subr.bf16.mxu1 %v16031_v56 }
 0x4ac   :  { %3433 = vmatpush1.bf16.msra.mxu0 %v13348_v40  ;;  %v13363_v40 = vld [vmem:[#allocation11 + $0x508] ss:$16 sps:$4 sm:$0xff]  }
 0x4ad   :  { %4094 = vmatpush1.bf16.msra.mxu1 %v16034_v57  ;;  %3434 = vmatprep.subr.bf16.mxu0 %v13353_v41  ;;  %v13368_v41 = vld [vmem:[#allocation11 + $0x52c] ss:$16 sps:$4 sm:$0xff]  }
 0x4ae   :  { %4095 = vmatprep.subr.bf16.mxu1 %v16037_v58 }
 0x4b0   :  { %3435 = vmatpush1.bf16.msra.mxu0 %v13351_v42  ;;  %v13366_v42 = vld [vmem:[#allocation11 + $0x528] ss:$16 sps:$4 sm:$0xff]  }
 0x4b1   :  { %4096 = vmatpush1.bf16.msra.mxu1 %v16040_v59  ;;  %3436 = vmatprep.subr.bf16.mxu0 %v13356_v62  ;;  %v13371_v62 = vld [vmem:[#allocation11 + $0x54c] ss:$16 sps:$4 sm:$0xff]  }
 0x4b2   :  { %4097 = vmatprep.subr.bf16.mxu1 %v16043_v34 }
 0x4b4   :  { %3437 = vmatpush1.bf16.msra.mxu0 %v13354_v61  ;;  %v4030_v61 = vld [vmem:[#allocation2 + $0xa] sm:$0x1] }
 0x4b5   :  { %4098 = vmatpush1.bf16.msra.mxu1 %v17805_v37  ;;  %3438 = vmatprep.subr.bf16.mxu0 %v13359_v36  ;;  %v13369_v36 = vld [vmem:[#allocation11 + $0x548] ss:$16 sps:$4 sm:$0xff]  }
 0x4b6   :  { %4099 = vmatprep.subr.bf16.mxu1 %v17806_v63 }
 0x4b8   :  { %3439 = vmatpush1.bf16.msra.mxu0 %v13357_v26  ;;  %v17827_v26 = vld [vmem:[#allocation61_spill] sm:$0xff] }
 0x4b9   :  { %4100 = vmatpush1.bf16.msra.mxu1 %v17807_v43  ;;  %3440 = vmatprep.subr.bf16.mxu0 %v13362_v27  ;;  %v13374_v27 = vld [vmem:[#allocation11 + $0x56c] ss:$16 sps:$4 sm:$0xff]  }
 0x4ba   :  { %4101 = vmatprep.subr.bf16.mxu1 %v16055_v33 }
 0x4bc   :  { %3441 = vmatpush1.bf16.msra.mxu0 %v13360_v38  ;;  %v13372_v38 = vld [vmem:[#allocation11 + $0x568] ss:$16 sps:$4 sm:$0xff]  }
 0x4bd   :  { %4102 = vmatpush1.bf16.msra.mxu1 %v16058_v32  ;;  %3442 = vmatprep.subr.bf16.mxu0 %v13365_v39  ;;  %v13377_v39 = vld [vmem:[#allocation11 + $0x58c] ss:$16 sps:$4 sm:$0xff]  }
 0x4be   :  { %4103 = vmatprep.subr.bf16.mxu1 %v16061_v35 }
 0x4c0   :  { %3443 = vmatpush1.bf16.msra.mxu0 %v13363_v40  ;;  %v13378_v40 = vld [vmem:[#allocation11 + $0x5a8] ss:$16 sps:$4 sm:$0xff]  }
 0x4c1   :  { %4104 = vmatpush1.bf16.msra.mxu1 %v16064_v28  ;;  %3444 = vmatprep.subr.bf16.mxu0 %v13368_v41  ;;  %v17829_v41 = vld [vmem:[#allocation44_spill] sm:$0xff] }
 0x4c2   :  { %4590 = vmatprep.subr.bf16.mxu1 %v15869_v60  ;;  %v13375_v60 = vld [vmem:[#allocation11 + $0x588] ss:$16 sps:$4 sm:$0xff]  }
 0x4c4   :  { %3445 = vmatpush1.bf16.msra.mxu0 %v13366_v42  ;;  %4106 = vmatmul.mubr.bf16.vlgmr.msra.gmra.mrb[76].mxu1 %v4030_v61  ;;  %v17830_v42 = vld [vmem:[#allocation45_spill] sm:$0xff] }
 0x4c5   :  { %4591 = vmatpush1.bf16.msra.mxu1 %v17809_v45  ;;  %4622 = vmatprep.mubr.bf16.mxu1 %v17827_v26  ;;  %v13380_v45 = vld [vmem:[#allocation11 + $0x5ac] ss:$16 sps:$4 sm:$0xff]   ;;  %v13417_v61 = vld [vmem:[#allocation11 + $0x740] ss:$16 sps:$4 sm:$0xff]   ;;  %v13422_v26 = vld [vmem:[#allocation11 + $0x764] ss:$16 sps:$4 sm:$0xff]  }
 0x4c6   :  { %3446 = vmatprep.subr.bf16.mxu0 %v13371_v62  ;;  %4592 = vmatprep.subr.bf16.mxu1 %v17811_v2  ;;  %v13383_v2 = vld [vmem:[#allocation11 + $0x5cc] ss:$16 sps:$4 sm:$0xff]  }
 0x4c7   :  { %v17832_v62 = vld [vmem:[#allocation58_spill] sm:$0xff] }
 0x4c8   :  { %3447 = vmatpush1.bf16.msra.mxu0 %v13369_v36  ;;  %v17833_v36 = vld [vmem:[#allocation48_spill] sm:$0xff] }
 0x4c9   :  { %4593 = vmatpush1.bf16.msra.mxu1 %v17812_v3  ;;  %3448 = vmatprep.subr.bf16.mxu0 %v13374_v27  ;;  %v13381_v3 = vld [vmem:[#allocation11 + $0x5c8] ss:$16 sps:$4 sm:$0xff]  }
 0x4ca   :  { %4594 = vmatprep.subr.bf16.mxu1 %v17813_v4  ;;  %v13386_v4 = vld [vmem:[#allocation11 + $0x5ec] ss:$16 sps:$4 sm:$0xff]   ;;  %v17834_v27 = vld [vmem:[#allocation49_spill] sm:$0xff] }
 0x4cc   :  { %3449 = vmatpush1.bf16.msra.mxu0 %v13372_v38  ;;  %v13420_v38 = vld [vmem:[#allocation11 + $0x760] ss:$16 sps:$4 sm:$0xff]  }
 0x4cd   :  { %4595 = vmatpush1.bf16.msra.mxu1 %v17814_v0  ;;  %3450 = vmatprep.subr.bf16.mxu0 %v13377_v39  ;;  %v13384_v0 = vld [vmem:[#allocation11 + $0x5e8] ss:$16 sps:$4 sm:$0xff]  }
 0x4ce   :  { %4596 = vmatprep.subr.bf16.mxu1 %v17815_v31  ;;  %v13389_v31 = vld [vmem:[#allocation11 + $0x604] ss:$16 sps:$4 sm:$0xff]   ;;  %v17835_v39 = vld [vmem:[#allocation50_spill] sm:$0xff] }
 0x4d0   :  { %3451 = vmatpush1.bf16.msra.mxu0 %v13375_v60  ;;  %v13425_v60 = vld [vmem:[#allocation11 + $0x784] ss:$16 sps:$4 sm:$0xff]  }
 0x4d1   :  { %4597 = vmatpush1.bf16.msra.mxu1 %v17816_v29  ;;  %3452 = vmatprep.subr.bf16.mxu0 %v13380_v45  ;;  %v13387_v29 = vld [vmem:[#allocation11 + $0x600] ss:$16 sps:$4 sm:$0xff]  }
 0x4d2   :  { %4598 = vmatprep.subr.bf16.mxu1 %v17817_v1  ;;  %v13392_v1 = vld [vmem:[#allocation11 + $0x624] ss:$16 sps:$4 sm:$0xff]  }
 0x4d3   :  { %v17836_v45 = vld [vmem:[#allocation51_spill] sm:$0xff] }
 0x4d4   :  { %3453 = vmatpush1.bf16.msra.mxu0 %v13378_v40  ;;  %v13423_v40 = vld [vmem:[#allocation11 + $0x780] ss:$16 sps:$4 sm:$0xff]  }
 0x4d5   :  { %4599 = vmatpush1.bf16.msra.mxu1 %v17818_v44  ;;  %3454 = vmatprep.subr.bf16.mxu0 %v13383_v2  ;;  %v17828_v44 = vld [vmem:[#allocation43_spill] sm:$0xff]  ;;  %v17837_v2 = vld [vmem:[#allocation52_spill] sm:$0xff] }
 0x4d6   :  { %4600 = vmatprep.subr.bf16.mxu1 %v17819_v6  ;;  %v13390_v6 = vld [vmem:[#allocation11 + $0x620] ss:$16 sps:$4 sm:$0xff]  }
 0x4d8   :  { %3455 = vmatpush1.bf16.msra.mxu0 %v13381_v3  ;;  %v13428_v3 = vld [vmem:[#allocation11 + $0x7a4] ss:$16 sps:$4 sm:$0xff]  }
 0x4d9   :  { %4601 = vmatpush1.bf16.msra.mxu1 %v15905_v8  ;;  %3456 = vmatprep.subr.bf16.mxu0 %v13386_v4  ;;  %v13395_v8 = vld [vmem:[#allocation11 + $0x644] ss:$16 sps:$4 sm:$0xff]  }
 0x4da   :  { %4602 = vmatprep.subr.bf16.mxu1 %v15908_v9  ;;  %v13393_v9 = vld [vmem:[#allocation11 + $0x640] ss:$16 sps:$4 sm:$0xff]  }
 0x4db   :  { %v17838_v4 = vld [vmem:[#allocation53_spill] sm:$0xff] }
 0x4dc   :  { %3457 = vmatpush1.bf16.msra.mxu0 %v13384_v0  ;;  %v13426_v0 = vld [vmem:[#allocation11 + $0x7a0] ss:$16 sps:$4 sm:$0xff]  }
 0x4dd   :  { %4603 = vmatpush1.bf16.msra.mxu1 %v15911_v10  ;;  %3944 = vmatprep.subr.bf16.mxu0 %v13389_v31  ;;  %v13398_v10 = vld [vmem:[#allocation11 + $0x664] ss:$16 sps:$4 sm:$0xff]   ;;  %v17839_v31 = vld [vmem:[#allocation54_spill] sm:$0xff] }
 0x4de   :  { %4604 = vmatprep.subr.bf16.mxu1 %v15914_v11  ;;  %v13396_v11 = vld [vmem:[#allocation11 + $0x660] ss:$16 sps:$4 sm:$0xff]  }
 0x4df   :  { %3459 = vmatmul.mubr.bf16.vlgmr.msra.gmra.mrb[64].mxu0 %v16210_v46  ;;  %v13401_v46 = vld [vmem:[#allocation11 + $0x684] ss:$16 sps:$4 sm:$0xff]  }
 0x4e0   :  { %3945 = vmatpush1.bf16.msra.mxu0 %v13387_v29  ;;  %v13431_v29 = vld [vmem:[#allocation11 + $0x7c4] ss:$16 sps:$4 sm:$0xff]  }
 0x4e1   :  { %4605 = vmatpush1.bf16.msra.mxu1 %v15917_v12  ;;  %3946 = vmatprep.subr.bf16.mxu0 %v13392_v1  ;;  %v13399_v12 = vld [vmem:[#allocation11 + $0x680] ss:$16 sps:$4 sm:$0xff]  }
 0x4e2   :  { %4606 = vmatprep.subr.bf16.mxu1 %v15920_v13  ;;  %v13404_v13 = vld [vmem:[#allocation11 + $0x6a4] ss:$16 sps:$4 sm:$0xff]  }
 0x4e3   :  { %v17840_v1 = vld [vmem:[#allocation55_spill] sm:$0xff] }
 0x4e4   :  { %3947 = vmatpush1.bf16.msra.mxu0 %v13390_v6  ;;  %v13429_v6 = vld [vmem:[#allocation11 + $0x7c0] ss:$16 sps:$4 sm:$0xff]  }
 0x4e5   :  { %4607 = vmatpush1.bf16.msra.mxu1 %v15923_v14  ;;  %3948 = vmatprep.subr.bf16.mxu0 %v13395_v8  ;;  %v13402_v14 = vld [vmem:[#allocation11 + $0x6a0] ss:$16 sps:$4 sm:$0xff]  }
 0x4e6   :  { %4608 = vmatprep.subr.bf16.mxu1 %v15926_v15  ;;  %v13407_v15 = vld [vmem:[#allocation11 + $0x6c4] ss:$16 sps:$4 sm:$0xff]   ;;  %v17841_v8 = vld [vmem:[#allocation56_spill] sm:$0xff] }
 0x4e8   :  { %3949 = vmatpush1.bf16.msra.mxu0 %v13393_v9  ;;  %v13434_v9 = vld [vmem:[#allocation11 + $0x7e4] ss:$16 sps:$4 sm:$0xff]  }
 0x4e9   :  { %4609 = vmatpush1.bf16.msra.mxu1 %v15929_v16  ;;  %3950 = vmatprep.subr.bf16.mxu0 %v13398_v10  ;;  %v13405_v16 = vld [vmem:[#allocation11 + $0x6c0] ss:$16 sps:$4 sm:$0xff]  }
 0x4ea   :  { %4610 = vmatprep.subr.bf16.mxu1 %v15932_v17  ;;  %v13410_v17 = vld [vmem:[#allocation11 + $0x6e4] ss:$16 sps:$4 sm:$0xff]  }
 0x4ec   :  { %3951 = vmatpush1.bf16.msra.mxu0 %v13396_v11 }
 0x4ed   :  { %4611 = vmatpush1.bf16.msra.mxu1 %v15935_v18  ;;  %3952 = vmatprep.subr.bf16.mxu0 %v13401_v46  ;;  %v13408_v18 = vld [vmem:[#allocation11 + $0x6e0] ss:$16 sps:$4 sm:$0xff]  }
 0x4ee   :  { %4612 = vmatprep.subr.bf16.mxu1 %v15938_v19  ;;  %v13413_v19 = vld [vmem:[#allocation11 + $0x704] ss:$16 sps:$4 sm:$0xff]  }
 0x4f0   :  { %3953 = vmatpush1.bf16.msra.mxu0 %v13399_v12 }
 0x4f1   :  { %4613 = vmatpush1.bf16.msra.mxu1 %v15941_v22  ;;  %3954 = vmatprep.subr.bf16.mxu0 %v13404_v13  ;;  %v13411_v22 = vld [vmem:[#allocation11 + $0x700] ss:$16 sps:$4 sm:$0xff]  }
 0x4f2   :  { %4614 = vmatprep.subr.bf16.mxu1 %v15944_v20  ;;  %v13416_v20 = vld [vmem:[#allocation11 + $0x724] ss:$16 sps:$4 sm:$0xff]  }
 0x4f4   :  { %3955 = vmatpush1.bf16.msra.mxu0 %v13402_v14  ;;  %v13432_v14 = vld [vmem:[#allocation11 + $0x7e0] ss:$16 sps:$4 sm:$0xff]  }
 0x4f5   :  { %4615 = vmatpush1.bf16.msra.mxu1 %v15947_v21  ;;  %3956 = vmatprep.subr.bf16.mxu0 %v13407_v15  ;;  %v13414_v21 = vld [vmem:[#allocation11 + $0x720] ss:$16 sps:$4 sm:$0xff]  }
 0x4f6   :  { %4616 = vmatprep.subr.bf16.mxu1 %v15950_v23  ;;  %v17831_v23 = vld [vmem:[#allocation46_spill] sm:$0xff] }
 0x4f8   :  { %3957 = vmatpush1.bf16.msra.mxu0 %v13405_v16 }
 0x4f9   :  { %4617 = vmatpush1.bf16.msra.mxu1 %v15953_v24  ;;  %3958 = vmatprep.subr.bf16.mxu0 %v13410_v17  ;;  %v13419_v24 = vld [vmem:[#allocation11 + $0x744] ss:$16 sps:$4 sm:$0xff]   ;;  %v13437_v17 = vld [vmem:[#allocation11 + $0x60c] ss:$16 sps:$4 sm:$0xff]  }
 0x4fa   :  { %4618 = vmatprep.subr.bf16.mxu1 %v15956_v25  ;;  %v16267_v25 = vld [vmem:[#allocation2 + $0xc] sm:$0x1] }
 0x4fc   :  { %3959 = vmatpush1.bf16.msra.mxu0 %v13408_v18 }
 0x4fd   :  { %4619 = vmatpush1.bf16.msra.mxu1 %v17828_v44  ;;  %3960 = vmatprep.subr.bf16.mxu0 %v13413_v19  ;;  %v13440_v44 = vld [vmem:[#allocation11 + $0x62c] ss:$16 sps:$4 sm:$0xff]  }
 0x4fe   :  { %4620 = vmatprep.subr.bf16.mxu1 %v17829_v41  ;;  %v13449_v41 = vld [vmem:[#allocation11 + $0x68c] ss:$16 sps:$4 sm:$0xff]  }
 0x500   :  { %3961 = vmatpush1.bf16.msra.mxu0 %v13411_v22 }
 0x501   :  { %4621 = vmatpush1.bf16.msra.mxu1 %v17830_v42  ;;  %3962 = vmatprep.subr.bf16.mxu0 %v13416_v20  ;;  %v13441_v20 = vld [vmem:[#allocation11 + $0x648] ss:$16 sps:$4 sm:$0xff]  }
 0x502   :  { %4631 = vmatprep.subr.bf16.mxu1 %v17831_v23  ;;  %v16310_v42 = vld [vmem:[#allocation8] ss:$8 sps:$4 sm:$0xff]  }
 0x503   :  { %v13468_v23 = vld [vmem:[#allocation11 + $0x768] ss:$16 sps:$4 sm:$0xff]  }
 0x504   :  { %3963 = vmatpush1.bf16.msra.mxu0 %v13414_v21  ;;  %4623 = vmatmul.mubr.bf16.vlgmr.msra.gmra.mrb[80].mxu1 %v17832_v62  ;;  %v13465_v21 = vld [vmem:[#allocation11 + $0x748] ss:$16 sps:$4 sm:$0xff]   ;;  %v13473_v62 = vld [vmem:[#allocation11 + $0x78c] ss:$16 sps:$4 sm:$0xff]  }
 0x505   :  { %4632 = vmatpush1.bf16.msra.mxu1 %v17833_v36  ;;  %4663 = vmatprep.mubr.bf16.mxu1 %v16267_v25  ;;  %v13471_v36 = vld [vmem:[#allocation11 + $0x788] ss:$16 sps:$4 sm:$0xff]  }
 0x506   :  { %3964 = vmatprep.subr.bf16.mxu0 %v13419_v24  ;;  %4633 = vmatprep.subr.bf16.mxu1 %v17834_v27  ;;  %v16319_v24 = vld [vmem:[#allocation8 + $0x10] ss:$8 sps:$4 sm:$0xff]  }
 0x507   :  { %v13476_v27 = vld [vmem:[#allocation11 + $0x7ac] ss:$16 sps:$4 sm:$0xff]  }
 0x508   :  { %3965 = vmatpush1.bf16.msra.mxu0 %v13417_v61  ;;  %v16322_v61 = vld [vmem:[#allocation8 + $0x24] ss:$8 sps:$4 sm:$0xff]  }
 0x509   :  { %4634 = vmatpush1.bf16.msra.mxu1 %v17835_v39  ;;  %3966 = vmatprep.subr.bf16.mxu0 %v13422_v26  ;;  %v16325_v26 = vld [vmem:[#allocation8 + $0x20] ss:$8 sps:$4 sm:$0xff]  }
 0x50a   :  { %4635 = vmatprep.subr.bf16.mxu1 %v17836_v45  ;;  %v13474_v39 = vld [vmem:[#allocation11 + $0x7a8] ss:$16 sps:$4 sm:$0xff]   ;;  %v13479_v45 = vld [vmem:[#allocation11 + $0x7cc] ss:$16 sps:$4 sm:$0xff]  }
 0x50c   :  { %3967 = vmatpush1.bf16.msra.mxu0 %v13420_v38  ;;  %v16328_v38 = vld [vmem:[#allocation8 + $0x34] ss:$8 sps:$4 sm:$0xff]  }
 0x50d   :  { %4636 = vmatpush1.bf16.msra.mxu1 %v17837_v2  ;;  %3968 = vmatprep.subr.bf16.mxu0 %v13425_v60  ;;  %v16331_v60 = vld [vmem:[#allocation8 + $0x30] ss:$8 sps:$4 sm:$0xff]  }
 0x50e   :  { %4637 = vmatprep.subr.bf16.mxu1 %v17838_v4  ;;  %v13477_v2 = vld [vmem:[#allocation11 + $0x7c8] ss:$16 sps:$4 sm:$0xff]   ;;  %v13482_v4 = vld [vmem:[#allocation11 + $0x7ec] ss:$16 sps:$4 sm:$0xff]  }
 0x510   :  { %3969 = vmatpush1.bf16.msra.mxu0 %v13423_v40  ;;  %v16334_v40 = vld [vmem:[#allocation8 + $0x44] ss:$8 sps:$4 sm:$0xff]  }
 0x511   :  { %4638 = vmatpush1.bf16.msra.mxu1 %v17839_v31  ;;  %3970 = vmatprep.subr.bf16.mxu0 %v13428_v3  ;;  %v16337_v3 = vld [vmem:[#allocation8 + $0x40] ss:$8 sps:$4 sm:$0xff]  }
 0x512   :  { %4639 = vmatprep.subr.bf16.mxu1 %v17840_v1  ;;  %v13480_v31 = vld [vmem:[#allocation11 + $0x7e8] ss:$16 sps:$4 sm:$0xff]   ;;  %v13485_v1 = vld [vmem:[#allocation11 + $0x804] ss:$16 sps:$4 sm:$0xff]  }
 0x514   :  { %3971 = vmatpush1.bf16.msra.mxu0 %v13426_v0  ;;  %v16340_v0 = vld [vmem:[#allocation8 + $0x54] ss:$8 sps:$4 sm:$0xff]  }
 0x515   :  { %4640 = vmatpush1.bf16.msra.mxu1 %v17841_v8  ;;  %3972 = vmatprep.subr.bf16.mxu0 %v13431_v29  ;;  %v16343_v29 = vld [vmem:[#allocation8 + $0x50] ss:$8 sps:$4 sm:$0xff]  }
 0x516   :  { %v3548_v10 = vpop.f32.mrb[72].mxu1  ;;  %4641 = vmatprep.subr.bf16.mxu1 %v17824_v30  ;;  %v13435_v30 = vld [vmem:[#allocation11 + $0x608] ss:$16 sps:$4 sm:$0xff]   ;;  %v13483_v8 = vld [vmem:[#allocation11 + $0x800] ss:$16 sps:$4 sm:$0xff]  }
 0x517   :  { %v12891_v11 = vadd.f32 %v3548_v10, %v17825_v5  ;;  %v3550_v46 = vpop.f32.mrb[73].mxu1  ;;  %v13488_v10 = vld [vmem:[#allocation11 + $0x824] ss:$16 sps:$4 sm:$0xff]  }
 0x518   :  { %v12892_v12 = vadd.f32 %v3550_v46, %v17826_v7  ;;  %3973 = vmatpush1.bf16.msra.mxu0 %v13429_v6  ;;  %v3552_v13 = vpop.f32.mrb[74].mxu1  ;;  %v16346_v6 = vld [vmem:[#allocation8 + $0x64] ss:$8 sps:$4 sm:$0xff]  }
 0x519   :  { %v3555_v15 = vmax.f32 %v12891_v11, 0.0  ;;  %4642 = vmatpush1.bf16.msra.mxu1 %v16004_v47  ;;  %v3553_v16 = vpop.f32.mrb[75].mxu1  ;;  %3974 = vmatprep.subr.bf16.mxu0 %v13434_v9  ;;  %v13438_v47 = vld [vmem:[#allocation11 + $0x628] ss:$16 sps:$4 sm:$0xff]   ;;  %v13486_v46 = vld [vmem:[#allocation11 + $0x820] ss:$16 sps:$4 sm:$0xff]  }
 0x51a   :  { %v3556_v18 = vmax.f32 %v12892_v12, 0.0  ;;  %4643 = vmatprep.subr.bf16.mxu1 %v16007_v48  ;;  %v13443_v48 = vld [vmem:[#allocation11 + $0x64c] ss:$16 sps:$4 sm:$0xff]   ;;  %v13491_v13 = vld [vmem:[#allocation11 + $0x844] ss:$16 sps:$4 sm:$0xff]  }
 0x51b   :  { %v16284_v22 = vpack.c.bf16 %v3555_v15, %v3555_v15  ;;  %v16349_v9 = vld [vmem:[#allocation8 + $0x60] ss:$8 sps:$4 sm:$0xff]   ;;  %v16352_v11 = vld [vmem:[#allocation8 + $0x74] ss:$8 sps:$4 sm:$0xff]   ;;  %v16356_v12 = vld [vmem:[#allocation8 + $0x70] ss:$8 sps:$4 sm:$0xff]  }
 0x51c   :  { %v3558_v19 = vpack.c.bf16 %v3556_v18, %v3556_v18  ;;  %3975 = vmatpush1.bf16.msra.mxu0 %v13432_v14  ;;  %v16359_v14 = vld [vmem:[#allocation8 + $0x84] ss:$8 sps:$4 sm:$0xff]   ;;  %v16362_v16 = vld [vmem:[#allocation8 + $0x80] ss:$8 sps:$4 sm:$0xff]   ;;  %v16365_v18 = vld [vmem:[#allocation8 + $0x94] ss:$8 sps:$4 sm:$0xff]  }
 0x51d   :  { %4644 = vmatpush1.bf16.msra.mxu1 %v16010_v49  ;;  %3985 = vmatprep.subr.bf16.mxu0 %v13437_v17  ;;  %v13446_v49 = vld [vmem:[#allocation11 + $0x66c] ss:$16 sps:$4 sm:$0xff]   ;;  %v13489_v15 = vld [vmem:[#allocation11 + $0x840] ss:$16 sps:$4 sm:$0xff]   ;;  %v13494_v17 = vld [vmem:[#allocation11 + $0x864] ss:$16 sps:$4 sm:$0xff]  }
 0x51e   :  { %3976 = vmatprep.mubr.bf16.mxu0 %v3558_v19  ;;  %4645 = vmatprep.subr.bf16.mxu1 %v16013_v50  ;;  %v13444_v50 = vld [vmem:[#allocation11 + $0x668] ss:$16 sps:$4 sm:$0xff]  }
 0x51f   :  { %3977 = vmatmul.mubr.bf16.vlgmr.msra.gmra.mrb[68].mxu0 %v16284_v22 }
 0x520   :  { %3986 = vmatpush1.bf16.msra.mxu0 %v13435_v30  ;;  %4017 = vmatprep.mubr.bf16.mxu0 %v3558_v19  ;;  %v13492_v19 = vld [vmem:[#allocation11 + $0x860] ss:$16 sps:$4 sm:$0xff]  }
 0x521   :  { %4646 = vmatpush1.bf16.msra.mxu1 %v16016_v51  ;;  %3987 = vmatprep.subr.bf16.mxu0 %v13440_v44  ;;  %v13447_v51 = vld [vmem:[#allocation11 + $0x688] ss:$16 sps:$4 sm:$0xff]  }
 0x522   :  { %4647 = vmatprep.subr.bf16.mxu1 %v16019_v52  ;;  %v13452_v52 = vld [vmem:[#allocation11 + $0x6ac] ss:$16 sps:$4 sm:$0xff]  }
 0x523   :  { %v16368_v30 = vld [vmem:[#allocation8 + $0x90] ss:$8 sps:$4 sm:$0xff]   ;;  %v16371_v44 = vld [vmem:[#allocation8 + $0xa4] ss:$8 sps:$4 sm:$0xff]  }
 0x524   :  { %3988 = vmatpush1.bf16.msra.mxu0 %v13438_v47  ;;  %v13495_v47 = vld [vmem:[#allocation11 + $0x880] ss:$16 sps:$4 sm:$0xff]  }
 0x525   :  { %4648 = vmatpush1.bf16.msra.mxu1 %v16022_v53  ;;  %3989 = vmatprep.subr.bf16.mxu0 %v13443_v48  ;;  %v13450_v53 = vld [vmem:[#allocation11 + $0x6a8] ss:$16 sps:$4 sm:$0xff]  }
 0x526   :  { %4649 = vmatprep.subr.bf16.mxu1 %v16025_v54  ;;  %v13455_v54 = vld [vmem:[#allocation11 + $0x6cc] ss:$16 sps:$4 sm:$0xff]  }
 0x527   :  { %v16374_v48 = vld [vmem:[#allocation8 + $0xa0] ss:$8 sps:$4 sm:$0xff]  }
 0x528   :  { %3990 = vmatpush1.bf16.msra.mxu0 %v13441_v20  ;;  %17843 = vst [vmem:[#allocation60_spill] sm:$0xff] %v16374_v48  ;;  %v13500_v20 = vld [vmem:[#allocation11 + $0x8a4] ss:$16 sps:$4 sm:$0xff]  }
 0x529   :  { %4650 = vmatpush1.bf16.msra.mxu1 %v16028_v55  ;;  %3991 = vmatprep.subr.bf16.mxu0 %v13446_v49  ;;  %v13453_v55 = vld [vmem:[#allocation11 + $0x6c8] ss:$16 sps:$4 sm:$0xff]  }
 0x52a   :  { %4651 = vmatprep.subr.bf16.mxu1 %v16031_v56  ;;  %v13458_v56 = vld [vmem:[#allocation11 + $0x6ec] ss:$16 sps:$4 sm:$0xff]  }
 0x52b   :  { %v16377_v49 = vld [vmem:[#allocation8 + $0xb4] ss:$8 sps:$4 sm:$0xff]  }
 0x52c   :  { %3992 = vmatpush1.bf16.msra.mxu0 %v13444_v50  ;;  %17844 = vst [vmem:[#allocation47_spill] sm:$0xff] %v16377_v49  ;;  %v13498_v50 = vld [vmem:[#allocation11 + $0x8a0] ss:$16 sps:$4 sm:$0xff]  }
 0x52d   :  { %4652 = vmatpush1.bf16.msra.mxu1 %v16034_v57  ;;  %3993 = vmatprep.subr.bf16.mxu0 %v13449_v41  ;;  %v13456_v57 = vld [vmem:[#allocation11 + $0x6e8] ss:$16 sps:$4 sm:$0xff]  }
 0x52e   :  { %4653 = vmatprep.subr.bf16.mxu1 %v16037_v58  ;;  %v13461_v58 = vld [vmem:[#allocation11 + $0x70c] ss:$16 sps:$4 sm:$0xff]  }
 0x52f   :  { %v16380_v41 = vld [vmem:[#allocation8 + $0xb0] ss:$8 sps:$4 sm:$0xff]  }
 0x530   :  { %3994 = vmatpush1.bf16.msra.mxu0 %v13447_v51  ;;  %v13503_v51 = vld [vmem:[#allocation11 + $0x8c4] ss:$16 sps:$4 sm:$0xff]  }
 0x531   :  { %4654 = vmatpush1.bf16.msra.mxu1 %v16040_v59  ;;  %3995 = vmatprep.subr.bf16.mxu0 %v13452_v52  ;;  %v13459_v59 = vld [vmem:[#allocation11 + $0x708] ss:$16 sps:$4 sm:$0xff]  }
 0x532   :  { %4655 = vmatprep.subr.bf16.mxu1 %v16043_v34  ;;  %v13464_v34 = vld [vmem:[#allocation11 + $0x72c] ss:$16 sps:$4 sm:$0xff]  }
 0x534   :  { %3996 = vmatpush1.bf16.msra.mxu0 %v13450_v53  ;;  %v16383_v53 = vld [vmem:[#allocation8 + $0xc4] ss:$8 sps:$4 sm:$0xff]  }
 0x535   :  { %4656 = vmatpush1.bf16.msra.mxu1 %v17805_v37  ;;  %3997 = vmatprep.subr.bf16.mxu0 %v13455_v54  ;;  %v13462_v37 = vld [vmem:[#allocation11 + $0x728] ss:$16 sps:$4 sm:$0xff]  }
 0x536   :  { %4657 = vmatprep.subr.bf16.mxu1 %v17806_v63  ;;  %v16306_v63 = vld [vmem:[#allocation8 + $0x4] ss:$8 sps:$4 sm:$0xff]   ;;  %v17845_v54 = vld [vmem:[#allocation62_spill] sm:$0xff] }
 0x538   :  { %3998 = vmatpush1.bf16.msra.mxu0 %v13453_v55 }
 0x539   :  { %4658 = vmatpush1.bf16.msra.mxu1 %v17807_v43  ;;  %3999 = vmatprep.subr.bf16.mxu0 %v13458_v56  ;;  %v13467_v43 = vld [vmem:[#allocation11 + $0x74c] ss:$16 sps:$4 sm:$0xff]  }
 0x53a   :  { %4659 = vmatprep.subr.bf16.mxu1 %v16055_v33  ;;  %v17842_v33 = vld [vmem:[#allocation59_spill] sm:$0xff] }
 0x53c   :  { %4000 = vmatpush1.bf16.msra.mxu0 %v13456_v57  ;;  %v17846_v57 = vld [vmem:[#allocation64_spill] sm:$0xff] }
 0x53d   :  { %4660 = vmatpush1.bf16.msra.mxu1 %v16058_v32  ;;  %4001 = vmatprep.subr.bf16.mxu0 %v13461_v58  ;;  %v16313_v32 = vld [vmem:[#allocation2 + $0x8] sm:$0x1] }
 0x53e   :  { %4661 = vmatprep.subr.bf16.mxu1 %v16061_v35  ;;  %v13470_v35 = vld [vmem:[#allocation11 + $0x76c] ss:$16 sps:$4 sm:$0xff]  }
 0x540   :  { %4002 = vmatpush1.bf16.msra.mxu0 %v13459_v59 }
 0x541   :  { %4662 = vmatpush1.bf16.msra.mxu1 %v16064_v28  ;;  %4003 = vmatprep.subr.bf16.mxu0 %v13464_v34  ;;  %v16316_v28 = vld [vmem:[#allocation8 + $0x14] ss:$8 sps:$4 sm:$0xff]  }
 0x542   :  { %5148 = vmatprep.subr.bf16.mxu1 %v16306_v63  ;;  %v13501_v34 = vld [vmem:[#allocation11 + $0x8c0] ss:$16 sps:$4 sm:$0xff]  }
 0x544   :  { %4004 = vmatpush1.bf16.msra.mxu0 %v13462_v37  ;;  %4664 = vmatmul.mubr.bf16.vlgmr.msra.gmra.mrb[80].mxu1 %v17842_v33  ;;  %v16392_v37 = vld [vmem:[#allocation8 + $0xc0] ss:$8 sps:$4 sm:$0xff]  }
 0x545   :  { %5149 = vmatpush1.bf16.msra.mxu1 %v16310_v42  ;;  %5180 = vmatprep.mubr.bf16.mxu1 %v16313_v32  ;;  %v13506_v33 = vld [vmem:[#allocation11 + $0x8e4] ss:$16 sps:$4 sm:$0xff]  }
 0x546   :  { %4005 = vmatprep.subr.bf16.mxu0 %v13467_v43  ;;  %5150 = vmatprep.subr.bf16.mxu1 %v16316_v28 }
 0x548   :  { %4006 = vmatpush1.bf16.msra.mxu0 %v13465_v21  ;;  %v16395_v21 = vld [vmem:[#allocation8 + $0xd4] ss:$8 sps:$4 sm:$0xff]  }
 0x549   :  { %5151 = vmatpush1.bf16.msra.mxu1 %v16319_v24  ;;  %4007 = vmatprep.subr.bf16.mxu0 %v13470_v35  ;;  %v13504_v35 = vld [vmem:[#allocation11 + $0x8e0] ss:$16 sps:$4 sm:$0xff]  }
 0x54a   :  { %5152 = vmatprep.subr.bf16.mxu1 %v16322_v61 }
 0x54c   :  { %4008 = vmatpush1.bf16.msra.mxu0 %v13468_v23  ;;  %v16398_v23 = vld [vmem:[#allocation8 + $0xd0] ss:$8 sps:$4 sm:$0xff]  }
 0x54d   :  { %5153 = vmatpush1.bf16.msra.mxu1 %v16325_v26  ;;  %4009 = vmatprep.subr.bf16.mxu0 %v13473_v62  ;;  %v13509_v62 = vld [vmem:[#allocation11 + $0x904] ss:$16 sps:$4 sm:$0xff]  }
 0x54e   :  { %5154 = vmatprep.subr.bf16.mxu1 %v16328_v38 }
 0x550   :  { %4010 = vmatpush1.bf16.msra.mxu0 %v13471_v36  ;;  %v16401_v36 = vld [vmem:[#allocation8 + $0xe4] ss:$8 sps:$4 sm:$0xff]  }
 0x551   :  { %5155 = vmatpush1.bf16.msra.mxu1 %v16331_v60  ;;  %4011 = vmatprep.subr.bf16.mxu0 %v13476_v27  ;;  %v13507_v27 = vld [vmem:[#allocation11 + $0x900] ss:$16 sps:$4 sm:$0xff]  }
 0x552   :  { %5156 = vmatprep.subr.bf16.mxu1 %v16334_v40 }
 0x554   :  { %4012 = vmatpush1.bf16.msra.mxu0 %v13474_v39  ;;  %v16404_v39 = vld [vmem:[#allocation8 + $0xe0] ss:$8 sps:$4 sm:$0xff]  }
 0x555   :  { %5157 = vmatpush1.bf16.msra.mxu1 %v16337_v3  ;;  %4013 = vmatprep.subr.bf16.mxu0 %v13479_v45  ;;  %v13512_v45 = vld [vmem:[#allocation11 + $0x924] ss:$16 sps:$4 sm:$0xff]  }
 0x556   :  { %5158 = vmatprep.subr.bf16.mxu1 %v16340_v0 }
 0x558   :  { %4014 = vmatpush1.bf16.msra.mxu0 %v13477_v2  ;;  %v16407_v2 = vld [vmem:[#allocation8 + $0xf4] ss:$8 sps:$4 sm:$0xff]  }
 0x559   :  { %5159 = vmatpush1.bf16.msra.mxu1 %v16343_v29  ;;  %4015 = vmatprep.subr.bf16.mxu0 %v13482_v4  ;;  %v13510_v4 = vld [vmem:[#allocation11 + $0x920] ss:$16 sps:$4 sm:$0xff]  }
 0x55a   :  { %5160 = vmatprep.subr.bf16.mxu1 %v16346_v6 }
 0x55c   :  { %4016 = vmatpush1.bf16.msra.mxu0 %v13480_v31  ;;  %v16410_v31 = vld [vmem:[#allocation8 + $0xf0] ss:$8 sps:$4 sm:$0xff]  }
 0x55d   :  { %5161 = vmatpush1.bf16.msra.mxu1 %v16349_v9  ;;  %4503 = vmatprep.subr.bf16.mxu0 %v13485_v1  ;;  %v16413_v1 = vld [vmem:[#allocation8 + $0x104] ss:$8 sps:$4 sm:$0xff]  }
 0x55e   :  { %5162 = vmatprep.subr.bf16.mxu1 %v16352_v11 }
 0x55f   :  { %4018 = vmatmul.mubr.bf16.vlgmr.msra.gmra.mrb[72].mxu0 %v16284_v22  ;;  %v13497_v22 = vld [vmem:[#allocation11 + $0x884] ss:$16 sps:$4 sm:$0xff]  }
 0x560   :  { %4504 = vmatpush1.bf16.msra.mxu0 %v13483_v8  ;;  %v13515_v8 = vld [vmem:[#allocation11 + $0x944] ss:$16 sps:$4 sm:$0xff]  }
 0x561   :  { %5163 = vmatpush1.bf16.msra.mxu1 %v16356_v12  ;;  %4505 = vmatprep.subr.bf16.mxu0 %v13488_v10  ;;  %v14914_v10 = vld [vmem:[#allocation2 + $0x7] sm:$0x1] }
 0x562   :  { %5164 = vmatprep.subr.bf16.mxu1 %v16359_v14 }
 0x564   :  { %4506 = vmatpush1.bf16.msra.mxu0 %v13486_v46  ;;  %v16416_v46 = vld [vmem:[#allocation2 + $0xd] sm:$0x1] }
 0x565   :  { %5165 = vmatpush1.bf16.msra.mxu1 %v16362_v16  ;;  %4507 = vmatprep.subr.bf16.mxu0 %v13491_v13  ;;  %17847 = vst [vmem:[#allocation33_spill] sm:$0xff] %v16416_v46  ;;  %v13513_v13 = vld [vmem:[#allocation11 + $0x940] ss:$16 sps:$4 sm:$0xff]  }
 0x566   :  { %5166 = vmatprep.subr.bf16.mxu1 %v16365_v18 }
 0x568   :  { %4508 = vmatpush1.bf16.msra.mxu0 %v13489_v15  ;;  %v16418_v15 = vld [vmem:[#allocation8 + $0x100] ss:$8 sps:$4 sm:$0xff]  }
 0x569   :  { %5167 = vmatpush1.bf16.msra.mxu1 %v16368_v30  ;;  %4509 = vmatprep.subr.bf16.mxu0 %v13494_v17  ;;  %v13518_v17 = vld [vmem:[#allocation11 + $0x964] ss:$16 sps:$4 sm:$0xff]  }
 0x56a   :  { %5168 = vmatprep.subr.bf16.mxu1 %v16371_v44 }
 0x56c   :  { %4510 = vmatpush1.bf16.msra.mxu0 %v13492_v19  ;;  %v16422_v19 = vld [vmem:[#allocation8 + $0x114] ss:$8 sps:$4 sm:$0xff]  }
 0x56d   :  { %5169 = vmatpush1.bf16.msra.mxu1 %v16374_v48  ;;  %4511 = vmatprep.subr.bf16.mxu0 %v13497_v22  ;;  %v13516_v22 = vld [vmem:[#allocation11 + $0x960] ss:$16 sps:$4 sm:$0xff]  }
 0x56e   :  { %5170 = vmatprep.subr.bf16.mxu1 %v16377_v49 }
 0x570   :  { %4512 = vmatpush1.bf16.msra.mxu0 %v13495_v47  ;;  %v16425_v47 = vld [vmem:[#allocation8 + $0x110] ss:$8 sps:$4 sm:$0xff]  }
 0x571   :  { %5171 = vmatpush1.bf16.msra.mxu1 %v16380_v41  ;;  %4513 = vmatprep.subr.bf16.mxu0 %v13500_v20  ;;  %v13521_v20 = vld [vmem:[#allocation11 + $0x984] ss:$16 sps:$4 sm:$0xff]  }
 0x572   :  { %v3419_v52 = vpop.f32.mrb[60].mxu0  ;;  %5172 = vmatprep.subr.bf16.mxu1 %v16383_v53 }
 0x573   :  { %v16387_v55 = vadd.f32 %v3419_v52, %v17845_v54  ;;  %v3421_v56 = vpop.f32.mrb[61].mxu0  ;;  %v16431_v52 = vld [vmem:[#allocation8 + $0x120] ss:$8 sps:$4 sm:$0xff]  }
 0x574   :  { %v16390_v58 = vadd.f32 %v3421_v56, %v17846_v57  ;;  %4514 = vmatpush1.bf16.msra.mxu0 %v13498_v50  ;;  %v3423_v59 = vpop.f32.mrb[62].mxu0  ;;  %v16428_v50 = vld [vmem:[#allocation8 + $0x124] ss:$8 sps:$4 sm:$0xff]   ;;  %17848 = vst [vmem:[#allocation34_spill] sm:$0xff] %v16431_v52  ;;  %v16434_v56 = vld [vmem:[#allocation8 + $0x134] ss:$8 sps:$4 sm:$0xff]  }
 0x575   :  { %5173 = vmatpush1.bf16.msra.mxu1 %v16392_v37  ;;  %v3424_v43 = vpop.f32.mrb[63].mxu0  ;;  %4515 = vmatprep.subr.bf16.mxu0 %v13503_v51  ;;  %v13519_v51 = vld [vmem:[#allocation11 + $0x980] ss:$16 sps:$4 sm:$0xff]   ;;  %v13524_v54 = vld [vmem:[#allocation11 + $0x9a4] ss:$16 sps:$4 sm:$0xff]   ;;  %17849 = vst [vmem:[#allocation35_spill] sm:$0xff] %v16434_v56 }
 0x576   :  { %5174 = vmatprep.subr.bf16.mxu1 %v16395_v21  ;;  %v13522_v57 = vld [vmem:[#allocation11 + $0x9a0] ss:$16 sps:$4 sm:$0xff]  }
 0x577   :  { %v16437_v59 = vld [vmem:[#allocation8 + $0x130] ss:$8 sps:$4 sm:$0xff]   ;;  %v16440_v43 = vld [vmem:[#allocation8 + $0x144] ss:$8 sps:$4 sm:$0xff]  }
 0x578   :  { %4516 = vmatpush1.bf16.msra.mxu0 %v13501_v34  ;;  %17850 = vst [vmem:[#allocation36_spill] sm:$0xff] %v16437_v59  ;;  %v13527_v34 = vld [vmem:[#allocation11 + $0x9c4] ss:$16 sps:$4 sm:$0xff]   ;;  %17851 = vst [vmem:[#allocation37_spill] sm:$0xff] %v16440_v43 }
 0x579   :  { %5175 = vmatpush1.bf16.msra.mxu1 %v16398_v23  ;;  %4517 = vmatprep.subr.bf16.mxu0 %v13506_v33  ;;  %v13525_v33 = vld [vmem:[#allocation11 + $0x9c0] ss:$16 sps:$4 sm:$0xff]  }
 0x57a   :  { %5176 = vmatprep.subr.bf16.mxu1 %v16401_v36 }
 0x57c   :  { %4518 = vmatpush1.bf16.msra.mxu0 %v13504_v35  ;;  %v16443_v35 = vld [vmem:[#allocation8 + $0x140] ss:$8 sps:$4 sm:$0xff]  }
 0x57d   :  { %5177 = vmatpush1.bf16.msra.mxu1 %v16404_v39  ;;  %4519 = vmatprep.subr.bf16.mxu0 %v13509_v62  ;;  %17852 = vst [vmem:[#allocation38_spill] sm:$0xff] %v16443_v35  ;;  %v13530_v62 = vld [vmem:[#allocation11 + $0x9e4] ss:$16 sps:$4 sm:$0xff]  }
 0x57e   :  { %5178 = vmatprep.subr.bf16.mxu1 %v16407_v2 }
 0x580   :  { %4520 = vmatpush1.bf16.msra.mxu0 %v13507_v27  ;;  %v16446_v27 = vld [vmem:[#allocation8 + $0x154] ss:$8 sps:$4 sm:$0xff]  }
 0x581   :  { %5179 = vmatpush1.bf16.msra.mxu1 %v16410_v31  ;;  %4521 = vmatprep.subr.bf16.mxu0 %v13512_v45  ;;  %17853 = vst [vmem:[#allocation39_spill] sm:$0xff] %v16446_v27 }
 0x582   :  { %5189 = vmatprep.subr.bf16.mxu1 %v16413_v1 }
 0x584   :  { %4522 = vmatpush1.bf16.msra.mxu0 %v13510_v4  ;;  %5181 = vmatmul.mubr.bf16.vlgmr.msra.gmra.mrb[84].mxu1 %v14914_v10  ;;  %v13528_v10 = vld [vmem:[#allocation11 + $0x9e0] ss:$16 sps:$4 sm:$0xff]  }
 0x585   :  { %5190 = vmatpush1.bf16.msra.mxu1 %v16418_v15  ;;  %5221 = vmatprep.mubr.bf16.mxu1 %v16416_v46  ;;  %v16462_v46 = vld [vmem:[#allocation8 + $0x174] ss:$8 sps:$4 sm:$0xff]  }
 0x586   :  { %4523 = vmatprep.subr.bf16.mxu0 %v13515_v8  ;;  %5191 = vmatprep.subr.bf16.mxu1 %v16422_v19  ;;  %17857 = vst [vmem:[#allocation57_spill] sm:$0xff] %v16462_v46 }
 0x588   :  { %4524 = vmatpush1.bf16.msra.mxu0 %v13513_v13 }
 0x589   :  { %5192 = vmatpush1.bf16.msra.mxu1 %v16425_v47  ;;  %4525 = vmatprep.subr.bf16.mxu0 %v13518_v17 }
 0x58a   :  { %5193 = vmatprep.subr.bf16.mxu1 %v16428_v50 }
 0x58c   :  { %4526 = vmatpush1.bf16.msra.mxu0 %v13516_v22  ;;  %v16451_v22 = vld [vmem:[#allocation8 + $0x150] ss:$8 sps:$4 sm:$0xff]  }
 0x58d   :  { %5194 = vmatpush1.bf16.msra.mxu1 %v16431_v52  ;;  %4527 = vmatprep.subr.bf16.mxu0 %v13521_v20  ;;  %17854 = vst [vmem:[#allocation40_spill] sm:$0xff] %v16451_v22  ;;  %v13533_v20 = vld [vmem:[#allocation11 + $0x80c] ss:$16 sps:$4 sm:$0xff]  }
 0x58e   :  { %5195 = vmatprep.subr.bf16.mxu1 %v16434_v56 }
 0x590   :  { %4528 = vmatpush1.bf16.msra.mxu0 %v13519_v51 }
 0x591   :  { %5196 = vmatpush1.bf16.msra.mxu1 %v16437_v59  ;;  %4529 = vmatprep.subr.bf16.mxu0 %v13524_v54 }
 0x592   :  { %5197 = vmatprep.subr.bf16.mxu1 %v16440_v43 }
 0x594   :  { %4530 = vmatpush1.bf16.msra.mxu0 %v13522_v57  ;;  %v16454_v57 = vld [vmem:[#allocation8 + $0x164] ss:$8 sps:$4 sm:$0xff]  }
 0x595   :  { %5198 = vmatpush1.bf16.msra.mxu1 %v16443_v35  ;;  %4531 = vmatprep.subr.bf16.mxu0 %v13527_v34  ;;  %17855 = vst [vmem:[#allocation41_spill] sm:$0xff] %v16454_v57 }
 0x596   :  { %5199 = vmatprep.subr.bf16.mxu1 %v16446_v27 }
 0x597   :  { %v4107_v45 = vpop.f32.mrb[76].mxu1 }
 0x598   :  { %v12893_v4 = vadd.f32 %v4107_v45, %v17825_v5  ;;  %v4109_v8 = vpop.f32.mrb[77].mxu1  ;;  %4532 = vmatpush1.bf16.msra.mxu0 %v13525_v33  ;;  %v16457_v33 = vld [vmem:[#allocation8 + $0x160] ss:$8 sps:$4 sm:$0xff]  }
 0x599   :  { %v12894_v13 = vadd.f32 %v4109_v8, %v17826_v7  ;;  %v4111_v17 = vpop.f32.mrb[78].mxu1  ;;  %5200 = vmatpush1.bf16.msra.mxu1 %v16451_v22  ;;  %4533 = vmatprep.subr.bf16.mxu0 %v13530_v62  ;;  %17856 = vst [vmem:[#allocation42_spill] sm:$0xff] %v16457_v33  ;;  %v13531_v8 = vld [vmem:[#allocation11 + $0x808] ss:$16 sps:$4 sm:$0xff]   ;;  %v13536_v62 = vld [vmem:[#allocation11 + $0x82c] ss:$16 sps:$4 sm:$0xff]  }
 0x59a   :  { %v4114_v51 = vmax.f32 %v12893_v4, 0.0  ;;  %v4112_v54 = vpop.f32.mrb[79].mxu1  ;;  %5201 = vmatprep.subr.bf16.mxu1 %v16454_v57  ;;  %v13534_v4 = vld [vmem:[#allocation11 + $0x828] ss:$16 sps:$4 sm:$0xff]  }
 0x59b   :  { %v4115_v34 = vmax.f32 %v12894_v13, 0.0  ;;  %v13539_v13 = vld [vmem:[#allocation11 + $0x84c] ss:$16 sps:$4 sm:$0xff]   ;;  %v13549_v22 = vld [vmem:[#allocation11 + $0x8c8] ss:$16 sps:$4 sm:$0xff]  }
 0x59c   :  { %4534 = vmatpush1.bf16.msra.mxu0 %v13528_v10  ;;  %v16460_v17 = vpack.c.bf16 %v4114_v51, %v4114_v51  ;;  %v16466_v10 = vld [vmem:[#allocation8 + $0x170] ss:$8 sps:$4 sm:$0xff]   ;;  %v16472_v54 = vld [vmem:[#allocation8 + $0x180] ss:$8 sps:$4 sm:$0xff]  }
 0x59d   :  { %v4117_v45 = vpack.c.bf16 %v4115_v34, %v4115_v34  ;;  %5202 = vmatpush1.bf16.msra.mxu1 %v16457_v33  ;;  %4544 = vmatprep.subr.bf16.mxu0 %v13533_v20  ;;  %17858 = vst [vmem:[#allocation61_spill] sm:$0xff] %v16466_v10  ;;  %v16469_v20 = vld [vmem:[#allocation8 + $0x184] ss:$8 sps:$4 sm:$0xff]   ;;  %17860 = vst [vmem:[#allocation44_spill] sm:$0xff] %v16472_v54  ;;  %v16502_v7 = vld [vmem:[#allocation8 + $0x1c0] ss:$8 sps:$4 sm:$0xff]  }
 0x59e   :  { %5203 = vmatprep.subr.bf16.mxu1 %v16462_v46  ;;  %17859 = vst [vmem:[#allocation43_spill] sm:$0xff] %v16469_v20  ;;  %v13537_v51 = vld [vmem:[#allocation11 + $0x848] ss:$16 sps:$4 sm:$0xff]   ;;  %v13542_v34 = vld [vmem:[#allocation11 + $0x86c] ss:$16 sps:$4 sm:$0xff]  }
 0x59f   :  { %4535 = vmatprep.mubr.bf16.mxu0 %v4117_v45 }
 0x5a0   :  { %4536 = vmatmul.mubr.bf16.vlgmr.msra.gmra.mrb[76].mxu0 %v16460_v17 }
 0x5a1   :  { %4545 = vmatpush1.bf16.msra.mxu0 %v13531_v8  ;;  %4576 = vmatprep.mubr.bf16.mxu0 %v4117_v45  ;;  %v16475_v45 = vld [vmem:[#allocation8 + $0x194] ss:$8 sps:$4 sm:$0xff]  }
 0x5a2   :  { %5204 = vmatpush1.bf16.msra.mxu1 %v16466_v10  ;;  %4546 = vmatprep.subr.bf16.mxu0 %v13536_v62  ;;  %17861 = vst [vmem:[#allocation45_spill] sm:$0xff] %v16475_v45  ;;  %v13540_v8 = vld [vmem:[#allocation11 + $0x868] ss:$16 sps:$4 sm:$0xff]  }
 0x5a3   :  { %5205 = vmatprep.subr.bf16.mxu1 %v16469_v20  ;;  %v16478_v62 = vld [vmem:[#allocation8 + $0x190] ss:$8 sps:$4 sm:$0xff]  }
 0x5a4   :  { %17862 = vst [vmem:[#allocation46_spill] sm:$0xff] %v16478_v62  ;;  %v13545_v20 = vld [vmem:[#allocation11 + $0x88c] ss:$16 sps:$4 sm:$0xff]  }
 0x5a5   :  { %4547 = vmatpush1.bf16.msra.mxu0 %v13534_v4  ;;  %v16481_v4 = vld [vmem:[#allocation8 + $0x1a4] ss:$8 sps:$4 sm:$0xff]  }
 0x5a6   :  { %5206 = vmatpush1.bf16.msra.mxu1 %v16472_v54  ;;  %4548 = vmatprep.subr.bf16.mxu0 %v13539_v13  ;;  %17863 = vst [vmem:[#allocation58_spill] sm:$0xff] %v16481_v4  ;;  %v13543_v54 = vld [vmem:[#allocation11 + $0x888] ss:$16 sps:$4 sm:$0xff]  }
 0x5a7   :  { %5207 = vmatprep.subr.bf16.mxu1 %v16475_v45  ;;  %v16484_v13 = vld [vmem:[#allocation8 + $0x1a0] ss:$8 sps:$4 sm:$0xff]  }
 0x5a8   :  { %17864 = vst [vmem:[#allocation48_spill] sm:$0xff] %v16484_v13  ;;  %v13548_v45 = vld [vmem:[#allocation11 + $0x8ac] ss:$16 sps:$4 sm:$0xff]  }
 0x5a9   :  { %4549 = vmatpush1.bf16.msra.mxu0 %v13537_v51  ;;  %v16487_v51 = vld [vmem:[#allocation8 + $0x1b4] ss:$8 sps:$4 sm:$0xff]  }
 0x5aa   :  { %5208 = vmatpush1.bf16.msra.mxu1 %v16478_v62  ;;  %4550 = vmatprep.subr.bf16.mxu0 %v13542_v34  ;;  %17865 = vst [vmem:[#allocation49_spill] sm:$0xff] %v16487_v51  ;;  %v13546_v62 = vld [vmem:[#allocation11 + $0x8a8] ss:$16 sps:$4 sm:$0xff]  }
 0x5ab   :  { %5209 = vmatprep.subr.bf16.mxu1 %v16481_v4  ;;  %v16490_v34 = vld [vmem:[#allocation8 + $0x1b0] ss:$8 sps:$4 sm:$0xff]   ;;  %v17866_v4 = vld [vmem:[#allocation63_spill] sm:$0xff] }
 0x5ad   :  { %4551 = vmatpush1.bf16.msra.mxu0 %v13540_v8  ;;  %v13551_v8 = vld [vmem:[#allocation11 + $0x8cc] ss:$16 sps:$4 sm:$0xff]  }
 0x5ae   :  { %5210 = vmatpush1.bf16.msra.mxu1 %v16484_v13  ;;  %4552 = vmatprep.subr.bf16.mxu0 %v13545_v20  ;;  %v16496_v13 = vld [vmem:[#allocation8 + $0x1c4] ss:$8 sps:$4 sm:$0xff]   ;;  %v17868_v20 = vld [vmem:[#allocation65_spill] sm:$0xff] }
 0x5af   :  { %5211 = vmatprep.subr.bf16.mxu1 %v16487_v51  ;;  %17867 = vst [vmem:[#allocation50_spill] sm:$0xff] %v16496_v13 }
 0x5b1   :  { %4553 = vmatpush1.bf16.msra.mxu0 %v13543_v54 }
 0x5b2   :  { %5212 = vmatpush1.bf16.msra.mxu1 %v16490_v34  ;;  %v3460_v10 = vpop.f32.mrb[64].mxu0  ;;  %4554 = vmatprep.subr.bf16.mxu0 %v13548_v45  ;;  %v13554_v45 = vld [vmem:[#allocation11 + $0x8ec] ss:$16 sps:$4 sm:$0xff]  }
 0x5b3   :  { %v16494_v46 = vadd.f32 %v3460_v10, %v17866_v4  ;;  %v3462_v33 = vpop.f32.mrb[65].mxu0  ;;  %5213 = vmatprep.subr.bf16.mxu1 %v16496_v13  ;;  %v16505_v10 = vld [vmem:[#allocation8 + $0x1d4] ss:$8 sps:$4 sm:$0xff]   ;;  %v16508_v13 = vld [vmem:[#allocation8 + $0x1d0] ss:$8 sps:$4 sm:$0xff]  }
 0x5b4   :  { %v16500_v57 = vadd.f32 %v3462_v33, %v17868_v20  ;;  %v3464_v54 = vpop.f32.mrb[66].mxu0  ;;  %v13552_v4 = vld [vmem:[#allocation11 + $0x8e8] ss:$16 sps:$4 sm:$0xff]   ;;  %v13557_v33 = vld [vmem:[#allocation11 + $0x90c] ss:$16 sps:$4 sm:$0xff]  }
 0x5b5   :  { %4555 = vmatpush1.bf16.msra.mxu0 %v13546_v62  ;;  %v3465_v51 = vpop.f32.mrb[67].mxu0  ;;  %v16511_v62 = vld [vmem:[#allocation8 + $0x1e4] ss:$8 sps:$4 sm:$0xff]  }
 0x5b6   :  { %5214 = vmatpush1.bf16.msra.mxu1 %v16502_v7  ;;  %4556 = vmatprep.subr.bf16.mxu0 %v13551_v8  ;;  %17869 = vst [vmem:[#allocation51_spill] sm:$0xff] %v16511_v62  ;;  %v13555_v51 = vld [vmem:[#allocation11 + $0x908] ss:$16 sps:$4 sm:$0xff]   ;;  %v13560_v20 = vld [vmem:[#allocation11 + $0x92c] ss:$16 sps:$4 sm:$0xff]  }
 0x5b7   :  { %5215 = vmatprep.subr.bf16.mxu1 %v16505_v10  ;;  %v16514_v8 = vld [vmem:[#allocation8 + $0x1e0] ss:$8 sps:$4 sm:$0xff]  }
 0x5b8   :  { %17870 = vst [vmem:[#allocation52_spill] sm:$0xff] %v16514_v8  ;;  %v13558_v54 = vld [vmem:[#allocation11 + $0x928] ss:$16 sps:$4 sm:$0xff]  }
 0x5b9   :  { %4557 = vmatpush1.bf16.msra.mxu0 %v13549_v22  ;;  %v16517_v22 = vld [vmem:[#allocation8 + $0x1f4] ss:$8 sps:$4 sm:$0xff]  }
 0x5ba   :  { %5216 = vmatpush1.bf16.msra.mxu1 %v16508_v13  ;;  %4558 = vmatprep.subr.bf16.mxu0 %v13554_v45  ;;  %v16520_v45 = vld [vmem:[#allocation8 + $0x1f0] ss:$8 sps:$4 sm:$0xff]  }
 0x5bb   :  { %5217 = vmatprep.subr.bf16.mxu1 %v16511_v62  ;;  %v13566_v62 = vld [vmem:[#allocation11 + $0x96c] ss:$16 sps:$4 sm:$0xff]  }
 0x5bd   :  { %4559 = vmatpush1.bf16.msra.mxu0 %v13552_v4  ;;  %v13563_v4 = vld [vmem:[#allocation11 + $0x94c] ss:$16 sps:$4 sm:$0xff]  }
 0x5be   :  { %5218 = vmatpush1.bf16.msra.mxu1 %v16514_v8  ;;  %4560 = vmatprep.subr.bf16.mxu0 %v13557_v33  ;;  %v13561_v8 = vld [vmem:[#allocation11 + $0x948] ss:$16 sps:$4 sm:$0xff]   ;;  %v14946_v33 = vld [vmem:[#allocation2 + $0x9] sm:$0x1] }
 0x5bf   :  { %5219 = vmatprep.subr.bf16.mxu1 %v16517_v22 }
 0x5c1   :  { %4561 = vmatpush1.bf16.msra.mxu0 %v13555_v51  ;;  %v13564_v51 = vld [vmem:[#allocation11 + $0x968] ss:$16 sps:$4 sm:$0xff]  }
 0x5c2   :  { %5220 = vmatpush1.bf16.msra.mxu1 %v16520_v45  ;;  %4562 = vmatprep.subr.bf16.mxu0 %v13560_v20  ;;  %v13569_v20 = vld [vmem:[#allocation11 + $0x98c] ss:$16 sps:$4 sm:$0xff]  }
 0x5c3   :  { %5706 = vmatprep.subr.bf16.mxu1 %v16306_v63 }
 0x5c5   :  { %4563 = vmatpush1.bf16.msra.mxu0 %v13558_v54  ;;  %5222 = vmatmul.mubr.bf16.vlgmr.msra.gmra.mrb[84].mxu1 %v16267_v25  ;;  %v13567_v54 = vld [vmem:[#allocation11 + $0x988] ss:$16 sps:$4 sm:$0xff]   ;;  %v13572_v25 = vld [vmem:[#allocation11 + $0x9ac] ss:$16 sps:$4 sm:$0xff]  }
 0x5c6   :  { %5707 = vmatpush1.bf16.msra.mxu1 %v16310_v42  ;;  %5738 = vmatprep.mubr.bf16.mxu1 %v14946_v33  ;;  %v13578_v33 = vld [vmem:[#allocation11 + $0x9ec] ss:$16 sps:$4 sm:$0xff]  }
 0x5c7   :  { %4564 = vmatprep.subr.bf16.mxu0 %v13563_v4  ;;  %5708 = vmatprep.subr.bf16.mxu1 %v16316_v28  ;;  %v13570_v4 = vld [vmem:[#allocation11 + $0x9a8] ss:$16 sps:$4 sm:$0xff]  }
 0x5c9   :  { %4565 = vmatpush1.bf16.msra.mxu0 %v13561_v8  ;;  %v13575_v8 = vld [vmem:[#allocation11 + $0x9cc] ss:$16 sps:$4 sm:$0xff]  }
 0x5ca   :  { %5709 = vmatpush1.bf16.msra.mxu1 %v16319_v24  ;;  %4566 = vmatprep.subr.bf16.mxu0 %v13566_v62  ;;  %v13573_v62 = vld [vmem:[#allocation11 + $0x9c8] ss:$16 sps:$4 sm:$0xff]  }
 0x5cb   :  { %5710 = vmatprep.subr.bf16.mxu1 %v16322_v61 }
 0x5cd   :  { %4567 = vmatpush1.bf16.msra.mxu0 %v13564_v51  ;;  %v13576_v51 = vld [vmem:[#allocation11 + $0x9e8] ss:$16 sps:$4 sm:$0xff]  }
 0x5ce   :  { %5711 = vmatpush1.bf16.msra.mxu1 %v16325_v26  ;;  %4568 = vmatprep.subr.bf16.mxu0 %v13569_v20  ;;  %v13581_v20 = vld [vmem:[#allocation11 + $0xa04] ss:$16 sps:$4 sm:$0xff]  }
 0x5cf   :  { %5712 = vmatprep.subr.bf16.mxu1 %v16328_v38 }
 0x5d1   :  { %4569 = vmatpush1.bf16.msra.mxu0 %v13567_v54  ;;  %v13579_v54 = vld [vmem:[#allocation11 + $0xa00] ss:$16 sps:$4 sm:$0xff]  }
 0x5d2   :  { %5713 = vmatpush1.bf16.msra.mxu1 %v16331_v60  ;;  %4570 = vmatprep.subr.bf16.mxu0 %v13572_v25  ;;  %v13584_v25 = vld [vmem:[#allocation11 + $0xa24] ss:$16 sps:$4 sm:$0xff]  }
 0x5d3   :  { %5714 = vmatprep.subr.bf16.mxu1 %v16334_v40 }
 0x5d5   :  { %4571 = vmatpush1.bf16.msra.mxu0 %v13570_v4  ;;  %v13582_v4 = vld [vmem:[#allocation11 + $0xa20] ss:$16 sps:$4 sm:$0xff]  }
 0x5d6   :  { %5715 = vmatpush1.bf16.msra.mxu1 %v16337_v3  ;;  %4572 = vmatprep.subr.bf16.mxu0 %v13575_v8  ;;  %v13587_v8 = vld [vmem:[#allocation11 + $0xa44] ss:$16 sps:$4 sm:$0xff]  }
 0x5d7   :  { %5716 = vmatprep.subr.bf16.mxu1 %v16340_v0 }
 0x5d9   :  { %4573 = vmatpush1.bf16.msra.mxu0 %v13573_v62  ;;  %v13585_v62 = vld [vmem:[#allocation11 + $0xa40] ss:$16 sps:$4 sm:$0xff]  }
 0x5da   :  { %5717 = vmatpush1.bf16.msra.mxu1 %v16343_v29  ;;  %4574 = vmatprep.subr.bf16.mxu0 %v13578_v33  ;;  %v13590_v33 = vld [vmem:[#allocation11 + $0xa64] ss:$16 sps:$4 sm:$0xff]  }
 0x5db   :  { %5718 = vmatprep.subr.bf16.mxu1 %v16346_v6 }
 0x5dd   :  { %4575 = vmatpush1.bf16.msra.mxu0 %v13576_v51  ;;  %v13588_v51 = vld [vmem:[#allocation11 + $0xa60] ss:$16 sps:$4 sm:$0xff]  }
 0x5de   :  { %5719 = vmatpush1.bf16.msra.mxu1 %v16349_v9  ;;  %5061 = vmatprep.subr.bf16.mxu0 %v13581_v20  ;;  %v13591_v20 = vld [vmem:[#allocation11 + $0xa80] ss:$16 sps:$4 sm:$0xff]  }
 0x5df   :  { %5720 = vmatprep.subr.bf16.mxu1 %v16352_v11 }
 0x5e0   :  { %4577 = vmatmul.mubr.bf16.vlgmr.msra.gmra.mrb[80].mxu0 %v16460_v17  ;;  %v13593_v17 = vld [vmem:[#allocation11 + $0xa84] ss:$16 sps:$4 sm:$0xff]  }
 0x5e1   :  { %5062 = vmatpush1.bf16.msra.mxu0 %v13579_v54  ;;  %v13596_v54 = vld [vmem:[#allocation11 + $0xaa4] ss:$16 sps:$4 sm:$0xff]  }
 0x5e2   :  { %5721 = vmatpush1.bf16.msra.mxu1 %v16356_v12  ;;  %5063 = vmatprep.subr.bf16.mxu0 %v13584_v25  ;;  %v13594_v25 = vld [vmem:[#allocation11 + $0xaa0] ss:$16 sps:$4 sm:$0xff]  }
 0x5e3   :  { %5722 = vmatprep.subr.bf16.mxu1 %v16359_v14 }
 0x5e5   :  { %5064 = vmatpush1.bf16.msra.mxu0 %v13582_v4 }
 0x5e6   :  { %5723 = vmatpush1.bf16.msra.mxu1 %v16362_v16  ;;  %5065 = vmatprep.subr.bf16.mxu0 %v13587_v8  ;;  %v13599_v8 = vld [vmem:[#allocation11 + $0xac4] ss:$16 sps:$4 sm:$0xff]  }
 0x5e7   :  { %5724 = vmatprep.subr.bf16.mxu1 %v16365_v18 }
 0x5e9   :  { %5066 = vmatpush1.bf16.msra.mxu0 %v13585_v62 }
 0x5ea   :  { %5725 = vmatpush1.bf16.msra.mxu1 %v16368_v30  ;;  %5067 = vmatprep.subr.bf16.mxu0 %v13590_v33 }
 0x5eb   :  { %5726 = vmatprep.subr.bf16.mxu1 %v16371_v44 }
 0x5ed   :  { %5068 = vmatpush1.bf16.msra.mxu0 %v13588_v51 }
 0x5ee   :  { %5727 = vmatpush1.bf16.msra.mxu1 %v16374_v48  ;;  %5069 = vmatprep.subr.bf16.mxu0 %v13593_v17 }
 0x5ef   :  { %5728 = vmatprep.subr.bf16.mxu1 %v16377_v49  ;;  %v13597_v49 = vld [vmem:[#allocation11 + $0xac0] ss:$16 sps:$4 sm:$0xff]  }
 0x5f1   :  { %5070 = vmatpush1.bf16.msra.mxu0 %v13591_v20  ;;  %v13602_v20 = vld [vmem:[#allocation11 + $0xae4] ss:$16 sps:$4 sm:$0xff]  }
 0x5f2   :  { %5729 = vmatpush1.bf16.msra.mxu1 %v16380_v41  ;;  %v3978_v4 = vpop.f32.mrb[68].mxu0  ;;  %5071 = vmatprep.subr.bf16.mxu0 %v13596_v54  ;;  %v13600_v54 = vld [vmem:[#allocation11 + $0xae0] ss:$16 sps:$4 sm:$0xff]  }
 0x5f3   :  { %v16550_v62 = vadd.f32 %v3978_v4, %v16387_v55  ;;  %v3980_v33 = vpop.f32.mrb[69].mxu0  ;;  %5730 = vmatprep.subr.bf16.mxu1 %v16383_v53  ;;  %v13605_v55 = vld [vmem:[#allocation11 + $0xb04] ss:$16 sps:$4 sm:$0xff]   ;;  %v5705_v4 = vld [vmem:[#allocation2 + $0xe] sm:$0x1] }
 0x5f4   :  { %v16554_v51 = vadd.f32 %v3980_v33, %v16390_v58  ;;  %v3982_v17 = vpop.f32.mrb[70].mxu0  ;;  %v13603_v58 = vld [vmem:[#allocation11 + $0xb00] ss:$16 sps:$4 sm:$0xff]   ;;  %v13614_v33 = vld [vmem:[#allocation11 + $0xb64] ss:$16 sps:$4 sm:$0xff]  }
 0x5f5   :  { %5072 = vmatpush1.bf16.msra.mxu0 %v13594_v25  ;;  %v3983_v48 = vpop.f32.mrb[71].mxu0  ;;  %v13606_v25 = vld [vmem:[#allocation11 + $0xb20] ss:$16 sps:$4 sm:$0xff]  }
 0x5f6   :  { %5731 = vmatpush1.bf16.msra.mxu1 %v16392_v37  ;;  %5073 = vmatprep.subr.bf16.mxu0 %v13599_v8  ;;  %v13608_v48 = vld [vmem:[#allocation11 + $0xb24] ss:$16 sps:$4 sm:$0xff]   ;;  %v13609_v8 = vld [vmem:[#allocation11 + $0xb40] ss:$16 sps:$4 sm:$0xff]  }
 0x5f7   :  { %5732 = vmatprep.subr.bf16.mxu1 %v16395_v21  ;;  %v13612_v17 = vld [vmem:[#allocation11 + $0xb60] ss:$16 sps:$4 sm:$0xff]  }
 0x5f9   :  { %5074 = vmatpush1.bf16.msra.mxu0 %v13597_v49  ;;  %v13611_v49 = vld [vmem:[#allocation11 + $0xb44] ss:$16 sps:$4 sm:$0xff]  }
 0x5fa   :  { %5733 = vmatpush1.bf16.msra.mxu1 %v16398_v23  ;;  %5075 = vmatprep.subr.bf16.mxu0 %v13602_v20  ;;  %v13617_v20 = vld [vmem:[#allocation11 + $0xb84] ss:$16 sps:$4 sm:$0xff]  }
 0x5fb   :  { %5734 = vmatprep.subr.bf16.mxu1 %v16401_v36 }
 0x5fd   :  { %5076 = vmatpush1.bf16.msra.mxu0 %v13600_v54  ;;  %v13615_v54 = vld [vmem:[#allocation11 + $0xb80] ss:$16 sps:$4 sm:$0xff]  }
 0x5fe   :  { %5735 = vmatpush1.bf16.msra.mxu1 %v16404_v39  ;;  %5077 = vmatprep.subr.bf16.mxu0 %v13605_v55  ;;  %v13618_v55 = vld [vmem:[#allocation11 + $0xba0] ss:$16 sps:$4 sm:$0xff]  }
 0x5ff   :  { %5736 = vmatprep.subr.bf16.mxu1 %v16407_v2 }
 0x601   :  { %5078 = vmatpush1.bf16.msra.mxu0 %v13603_v58  ;;  %v13623_v58 = vld [vmem:[#allocation11 + $0xbc4] ss:$16 sps:$4 sm:$0xff]  }
 0x602   :  { %5737 = vmatpush1.bf16.msra.mxu1 %v16410_v31  ;;  %5079 = vmatprep.subr.bf16.mxu0 %v13608_v48  ;;  %v13621_v48 = vld [vmem:[#allocation11 + $0xbc0] ss:$16 sps:$4 sm:$0xff]  }
 0x603   :  { %5747 = vmatprep.subr.bf16.mxu1 %v16413_v1 }
 0x605   :  { %5080 = vmatpush1.bf16.msra.mxu0 %v13606_v25  ;;  %5739 = vmatmul.mubr.bf16.vlgmr.msra.gmra.mrb[88].mxu1 %v16313_v32  ;;  %v13620_v32 = vld [vmem:[#allocation11 + $0xba4] ss:$16 sps:$4 sm:$0xff]  }
 0x606   :  { %5748 = vmatpush1.bf16.msra.mxu1 %v16418_v15  ;;  %5779 = vmatprep.mubr.bf16.mxu1 %v5705_v4  ;;  %v13626_v25 = vld [vmem:[#allocation11 + $0xbe4] ss:$16 sps:$4 sm:$0xff]  }
 0x607   :  { %5081 = vmatprep.subr.bf16.mxu0 %v13611_v49  ;;  %5749 = vmatprep.subr.bf16.mxu1 %v16422_v19 }
 0x609   :  { %5082 = vmatpush1.bf16.msra.mxu0 %v13609_v8 }
 0x60a   :  { %5750 = vmatpush1.bf16.msra.mxu1 %v16425_v47  ;;  %5083 = vmatprep.subr.bf16.mxu0 %v13614_v33  ;;  %v17871_v33 = vld [vmem:[#allocation32_spill] sm:$0xff] }
 0x60b   :  { %5751 = vmatprep.subr.bf16.mxu1 %v16428_v50 }
 0x60d   :  { %5084 = vmatpush1.bf16.msra.mxu0 %v13612_v17 }
 0x60e   :  { %5752 = vmatpush1.bf16.msra.mxu1 %v16431_v52  ;;  %5085 = vmatprep.subr.bf16.mxu0 %v13617_v20 }
 0x60f   :  { %5753 = vmatprep.subr.bf16.mxu1 %v16434_v56 }
 0x611   :  { %5086 = vmatpush1.bf16.msra.mxu0 %v13615_v54  ;;  %v13624_v54 = vld [vmem:[#allocation11 + $0xbe0] ss:$16 sps:$4 sm:$0xff]  }
 0x612   :  { %5754 = vmatpush1.bf16.msra.mxu1 %v16437_v59  ;;  %5087 = vmatprep.subr.bf16.mxu0 %v13620_v32  ;;  %v17872_v59 = vld [vmem:[#allocation40_spill] sm:$0xff] }
 0x613   :  { %5755 = vmatprep.subr.bf16.mxu1 %v16440_v43  ;;  %v13629_v43 = vld [vmem:[#allocation11 + $0xa0c] ss:$16 sps:$4 sm:$0xff]  }
 0x615   :  { %5088 = vmatpush1.bf16.msra.mxu0 %v13618_v55 }
 0x616   :  { %5756 = vmatpush1.bf16.msra.mxu1 %v16443_v35  ;;  %5089 = vmatprep.subr.bf16.mxu0 %v13623_v58  ;;  %v17873_v58 = vld [vmem:[#allocation41_spill] sm:$0xff] }
 0x617   :  { %v4665_v49 = vpop.f32.mrb[80].mxu1  ;;  %5757 = vmatprep.subr.bf16.mxu1 %v16446_v27  ;;  %v13627_v27 = vld [vmem:[#allocation11 + $0xa08] ss:$16 sps:$4 sm:$0xff]  }
 0x618   :  { %v12895_v4 = vadd.f32 %v4665_v49, %v17825_v5  ;;  %v4667_v8 = vpop.f32.mrb[81].mxu1  ;;  %v17874_v49 = vld [vmem:[#allocation42_spill] sm:$0xff] }
 0x619   :  { %v12896_v17 = vadd.f32 %v4667_v8, %v17871_v33  ;;  %5090 = vmatpush1.bf16.msra.mxu0 %v13621_v48  ;;  %v4669_v20 = vpop.f32.mrb[82].mxu1  ;;  %v13632_v48 = vld [vmem:[#allocation11 + $0xa2c] ss:$16 sps:$4 sm:$0xff]   ;;  %v17875_v8 = vld [vmem:[#allocation57_spill] sm:$0xff] }
 0x61a   :  { %v4672_v32 = vmax.f32 %v12895_v4, 0.0  ;;  %5758 = vmatpush1.bf16.msra.mxu1 %v17872_v59  ;;  %v4670_v55 = vpop.f32.mrb[83].mxu1  ;;  %5091 = vmatprep.subr.bf16.mxu0 %v13626_v25  ;;  %v13630_v25 = vld [vmem:[#allocation11 + $0xa28] ss:$16 sps:$4 sm:$0xff]  }
 0x61b   :  { %v4673_v35 = vmax.f32 %v12896_v17, 0.0  ;;  %5759 = vmatprep.subr.bf16.mxu1 %v17873_v58  ;;  %v17876_v4 = vld [vmem:[#allocation61_spill] sm:$0xff]  ;;  %v17877_v17 = vld [vmem:[#allocation43_spill] sm:$0xff] }
 0x61c   :  { %v16579_v52 = vpack.c.bf16 %v4672_v32, %v4672_v32  ;;  %v13633_v20 = vld [vmem:[#allocation11 + $0xa48] ss:$16 sps:$4 sm:$0xff]  }
 0x61d   :  { %v4675_v56 = vpack.c.bf16 %v4673_v35, %v4673_v35  ;;  %5092 = vmatpush1.bf16.msra.mxu0 %v13624_v54  ;;  %v13635_v35 = vld [vmem:[#allocation11 + $0xa4c] ss:$16 sps:$4 sm:$0xff]   ;;  %v17879_v32 = vld [vmem:[#allocation45_spill] sm:$0xff] }
 0x61e   :  { %5760 = vmatpush1.bf16.msra.mxu1 %v17874_v49  ;;  %5102 = vmatprep.subr.bf16.mxu0 %v13629_v43  ;;  %v17878_v54 = vld [vmem:[#allocation44_spill] sm:$0xff] }
 0x61f   :  { %5093 = vmatprep.mubr.bf16.mxu0 %v4675_v56  ;;  %5761 = vmatprep.subr.bf16.mxu1 %v17875_v8  ;;  %v13638_v43 = vld [vmem:[#allocation11 + $0xa6c] ss:$16 sps:$4 sm:$0xff]   ;;  %v13636_v55 = vld [vmem:[#allocation11 + $0xa68] ss:$16 sps:$4 sm:$0xff]  }
 0x620   :  { %5094 = vmatmul.mubr.bf16.vlgmr.msra.gmra.mrb[84].mxu0 %v16579_v52  ;;  %v17880_v8 = vld [vmem:[#allocation46_spill] sm:$0xff] }
 0x621   :  { %5103 = vmatpush1.bf16.msra.mxu0 %v13627_v27  ;;  %5134 = vmatprep.mubr.bf16.mxu0 %v4675_v56  ;;  %v13641_v56 = vld [vmem:[#allocation11 + $0xa8c] ss:$16 sps:$4 sm:$0xff]  }
 0x622   :  { %5762 = vmatpush1.bf16.msra.mxu1 %v17876_v4  ;;  %5104 = vmatprep.subr.bf16.mxu0 %v13632_v48  ;;  %v17881_v27 = vld [vmem:[#allocation58_spill] sm:$0xff]  ;;  %v17882_v4 = vld [vmem:[#allocation48_spill] sm:$0xff] }
 0x623   :  { %5763 = vmatprep.subr.bf16.mxu1 %v17877_v17  ;;  %v13639_v48 = vld [vmem:[#allocation11 + $0xa88] ss:$16 sps:$4 sm:$0xff]  }
 0x624   :  { %v17883_v17 = vld [vmem:[#allocation49_spill] sm:$0xff] }
 0x625   :  { %5105 = vmatpush1.bf16.msra.mxu0 %v13630_v25  ;;  %v13644_v25 = vld [vmem:[#allocation11 + $0xaac] ss:$16 sps:$4 sm:$0xff]  }
 0x626   :  { %5764 = vmatpush1.bf16.msra.mxu1 %v17878_v54  ;;  %5106 = vmatprep.subr.bf16.mxu0 %v13635_v35  ;;  %v13642_v35 = vld [vmem:[#allocation11 + $0xaa8] ss:$16 sps:$4 sm:$0xff]  }
 0x627   :  { %5765 = vmatprep.subr.bf16.mxu1 %v17879_v32  ;;  %v13647_v32 = vld [vmem:[#allocation11 + $0xacc] ss:$16 sps:$4 sm:$0xff]  }
 0x629   :  { %5107 = vmatpush1.bf16.msra.mxu0 %v13633_v20 }
 0x62a   :  { %5766 = vmatpush1.bf16.msra.mxu1 %v17880_v8  ;;  %5108 = vmatprep.subr.bf16.mxu0 %v13638_v43 }
 0x62b   :  { %5767 = vmatprep.subr.bf16.mxu1 %v17881_v27  ;;  %v17884_v27 = vld [vmem:[#allocation50_spill] sm:$0xff] }
 0x62d   :  { %5109 = vmatpush1.bf16.msra.mxu0 %v13636_v55 }
 0x62e   :  { %5768 = vmatpush1.bf16.msra.mxu1 %v17882_v4  ;;  %5110 = vmatprep.subr.bf16.mxu0 %v13641_v56 }
 0x62f   :  { %5769 = vmatprep.subr.bf16.mxu1 %v17883_v17  ;;  %v13645_v17 = vld [vmem:[#allocation11 + $0xac8] ss:$16 sps:$4 sm:$0xff]  }
 0x631   :  { %5111 = vmatpush1.bf16.msra.mxu0 %v13639_v48  ;;  %v13650_v48 = vld [vmem:[#allocation11 + $0xaec] ss:$16 sps:$4 sm:$0xff]  }
 0x632   :  { %5770 = vmatpush1.bf16.msra.mxu1 %v16490_v34  ;;  %v4019_v20 = vpop.f32.mrb[72].mxu0  ;;  %5112 = vmatprep.subr.bf16.mxu0 %v13644_v25  ;;  %v13648_v25 = vld [vmem:[#allocation11 + $0xae8] ss:$16 sps:$4 sm:$0xff]  }
 0x633   :  { %v16594_v43 = vadd.f32 %v4019_v20, %v16494_v46  ;;  %v4021_v8 = vpop.f32.mrb[73].mxu0  ;;  %5771 = vmatprep.subr.bf16.mxu1 %v17884_v27  ;;  %v13653_v46 = vld [vmem:[#allocation11 + $0xb0c] ss:$16 sps:$4 sm:$0xff]   ;;  %v17885_v20 = vld [vmem:[#allocation51_spill] sm:$0xff] }
 0x634   :  { %v16598_v55 = vadd.f32 %v4021_v8, %v16500_v57  ;;  %v4023_v56 = vpop.f32.mrb[74].mxu0  ;;  %v13651_v57 = vld [vmem:[#allocation11 + $0xb08] ss:$16 sps:$4 sm:$0xff]  }
 0x635   :  { %5113 = vmatpush1.bf16.msra.mxu0 %v13642_v35  ;;  %v4024_v4 = vpop.f32.mrb[75].mxu0  ;;  %v17886_v8 = vld [vmem:[#allocation52_spill] sm:$0xff]  ;;  %v17887_v35 = vld [vmem:[#allocation33_spill] sm:$0xff] }
 0x636   :  { %5772 = vmatpush1.bf16.msra.mxu1 %v16502_v7  ;;  %5114 = vmatprep.subr.bf16.mxu0 %v13647_v32  ;;  %v13656_v4 = vld [vmem:[#allocation11 + $0xb2c] ss:$16 sps:$4 sm:$0xff]   ;;  %v13654_v32 = vld [vmem:[#allocation11 + $0xb28] ss:$16 sps:$4 sm:$0xff]  }
 0x637   :  { %5773 = vmatprep.subr.bf16.mxu1 %v16505_v10  ;;  %v13657_v56 = vld [vmem:[#allocation11 + $0xb48] ss:$16 sps:$4 sm:$0xff]  }
 0x639   :  { %5115 = vmatpush1.bf16.msra.mxu0 %v13645_v17  ;;  %v13659_v17 = vld [vmem:[#allocation11 + $0xb4c] ss:$16 sps:$4 sm:$0xff]  }
 0x63a   :  { %5774 = vmatpush1.bf16.msra.mxu1 %v16508_v13  ;;  %5116 = vmatprep.subr.bf16.mxu0 %v13650_v48  ;;  %v16610_v48 = vld [vmem:[#allocation2 + $0xb] sm:$0x1] }
 0x63b   :  { %5775 = vmatprep.subr.bf16.mxu1 %v17885_v20 }
 0x63d   :  { %5117 = vmatpush1.bf16.msra.mxu0 %v13648_v25  ;;  %v13662_v25 = vld [vmem:[#allocation11 + $0xb6c] ss:$16 sps:$4 sm:$0xff]  }
 0x63e   :  { %5776 = vmatpush1.bf16.msra.mxu1 %v17886_v8  ;;  %5118 = vmatprep.subr.bf16.mxu0 %v13653_v46  ;;  %v13660_v46 = vld [vmem:[#allocation11 + $0xb68] ss:$16 sps:$4 sm:$0xff]  }
 0x63f   :  { %5777 = vmatprep.subr.bf16.mxu1 %v16517_v22 }
 0x641   :  { %5119 = vmatpush1.bf16.msra.mxu0 %v13651_v57  ;;  %v13663_v57 = vld [vmem:[#allocation11 + $0xb88] ss:$16 sps:$4 sm:$0xff]  }
 0x642   :  { %5778 = vmatpush1.bf16.msra.mxu1 %v16520_v45  ;;  %5120 = vmatprep.subr.bf16.mxu0 %v13656_v4  ;;  %v13666_v4 = vld [vmem:[#allocation11 + $0xba8] ss:$16 sps:$4 sm:$0xff]  }
 0x643   :  { %6265 = vmatprep.subr.bf16.mxu1 %v16306_v63  ;;  %v13665_v63 = vld [vmem:[#allocation11 + $0xb8c] ss:$16 sps:$4 sm:$0xff]  }
 0x645   :  { %5121 = vmatpush1.bf16.msra.mxu0 %v13654_v32  ;;  %5780 = vmatmul.mubr.bf16.vlgmr.msra.gmra.mrb[88].mxu1 %v17887_v35  ;;  %v17889_v32 = vld [vmem:[#allocation47_spill] sm:$0xff] }
 0x646   :  { %6266 = vmatpush1.bf16.msra.mxu1 %v16310_v42  ;;  %6297 = vmatprep.mubr.bf16.mxu1 %v16610_v48  ;;  %v13668_v42 = vld [vmem:[#allocation11 + $0xbac] ss:$16 sps:$4 sm:$0xff]  }
 0x647   :  { %5122 = vmatprep.subr.bf16.mxu0 %v13659_v17  ;;  %6267 = vmatprep.subr.bf16.mxu1 %v16316_v28  ;;  %v13671_v28 = vld [vmem:[#allocation11 + $0xbcc] ss:$16 sps:$4 sm:$0xff]  }
 0x649   :  { %5123 = vmatpush1.bf16.msra.mxu0 %v13657_v56 }
 0x64a   :  { %6268 = vmatpush1.bf16.msra.mxu1 %v16319_v24  ;;  %5124 = vmatprep.subr.bf16.mxu0 %v13662_v25  ;;  %v13669_v24 = vld [vmem:[#allocation11 + $0xbc8] ss:$16 sps:$4 sm:$0xff]   ;;  %v13693_v25 = vld [vmem:[#allocation11 + $0xcc0] ss:$16 sps:$4 sm:$0xff]  }
 0x64b   :  { %6269 = vmatprep.subr.bf16.mxu1 %v16322_v61  ;;  %v13674_v61 = vld [vmem:[#allocation11 + $0xbec] ss:$16 sps:$4 sm:$0xff]  }
 0x64d   :  { %5125 = vmatpush1.bf16.msra.mxu0 %v13660_v46 }
 0x64e   :  { %6270 = vmatpush1.bf16.msra.mxu1 %v16325_v26  ;;  %5126 = vmatprep.subr.bf16.mxu0 %v13665_v63  ;;  %v13672_v26 = vld [vmem:[#allocation11 + $0xbe8] ss:$16 sps:$4 sm:$0xff]   ;;  %v13696_v63 = vld [vmem:[#allocation11 + $0xce0] ss:$16 sps:$4 sm:$0xff]  }
 0x64f   :  { %6271 = vmatprep.subr.bf16.mxu1 %v16328_v38  ;;  %v13677_v38 = vld [vmem:[#allocation11 + $0xc04] ss:$16 sps:$4 sm:$0xff]  }
 0x651   :  { %5127 = vmatpush1.bf16.msra.mxu0 %v13663_v57  ;;  %v13705_v57 = vld [vmem:[#allocation11 + $0xd40] ss:$16 sps:$4 sm:$0xff]  }
 0x652   :  { %6272 = vmatpush1.bf16.msra.mxu1 %v16331_v60  ;;  %5128 = vmatprep.subr.bf16.mxu0 %v13668_v42  ;;  %v13675_v60 = vld [vmem:[#allocation11 + $0xc00] ss:$16 sps:$4 sm:$0xff]  }
 0x653   :  { %6273 = vmatprep.subr.bf16.mxu1 %v16334_v40  ;;  %v13680_v40 = vld [vmem:[#allocation11 + $0xc24] ss:$16 sps:$4 sm:$0xff]   ;;  %v17890_v42 = vld [vmem:[#allocation34_spill] sm:$0xff] }
 0x655   :  { %5129 = vmatpush1.bf16.msra.mxu0 %v13666_v4  ;;  %v17891_v4 = vld [vmem:[#allocation35_spill] sm:$0xff] }
 0x656   :  { %6274 = vmatpush1.bf16.msra.mxu1 %v16337_v3  ;;  %5130 = vmatprep.subr.bf16.mxu0 %v13671_v28  ;;  %v13678_v3 = vld [vmem:[#allocation11 + $0xc20] ss:$16 sps:$4 sm:$0xff]  }
 0x657   :  { %6275 = vmatprep.subr.bf16.mxu1 %v16340_v0  ;;  %v13683_v0 = vld [vmem:[#allocation11 + $0xc44] ss:$16 sps:$4 sm:$0xff]   ;;  %v13714_v28 = vld [vmem:[#allocation11 + $0xda0] ss:$16 sps:$4 sm:$0xff]  }
 0x659   :  { %5131 = vmatpush1.bf16.msra.mxu0 %v13669_v24  ;;  %v17892_v24 = vld [vmem:[#allocation36_spill] sm:$0xff] }
 0x65a   :  { %6276 = vmatpush1.bf16.msra.mxu1 %v16343_v29  ;;  %5132 = vmatprep.subr.bf16.mxu0 %v13674_v61  ;;  %v13681_v29 = vld [vmem:[#allocation11 + $0xc40] ss:$16 sps:$4 sm:$0xff]  }
 0x65b   :  { %6277 = vmatprep.subr.bf16.mxu1 %v16346_v6  ;;  %v13686_v6 = vld [vmem:[#allocation11 + $0xc64] ss:$16 sps:$4 sm:$0xff]  }
 0x65c   :  { %v17893_v61 = vld [vmem:[#allocation37_spill] sm:$0xff] }
 0x65d   :  { %5133 = vmatpush1.bf16.msra.mxu0 %v13672_v26  ;;  %v17894_v26 = vld [vmem:[#allocation38_spill] sm:$0xff] }
 0x65e   :  { %6278 = vmatpush1.bf16.msra.mxu1 %v16349_v9  ;;  %5619 = vmatprep.subr.bf16.mxu0 %v13677_v38  ;;  %v13684_v9 = vld [vmem:[#allocation11 + $0xc60] ss:$16 sps:$4 sm:$0xff]  }
 0x65f   :  { %6279 = vmatprep.subr.bf16.mxu1 %v16352_v11  ;;  %v13689_v11 = vld [vmem:[#allocation11 + $0xc84] ss:$16 sps:$4 sm:$0xff]  }
 0x660   :  { %5135 = vmatmul.mubr.bf16.vlgmr.msra.gmra.mrb[88].mxu0 %v16579_v52  ;;  %v17888_v52 = vld [vmem:[#allocation60_spill] sm:$0xff]  ;;  %v17895_v38 = vld [vmem:[#allocation39_spill] sm:$0xff] }
 0x661   :  { %5620 = vmatpush1.bf16.msra.mxu0 %v13675_v60 }
 0x662   :  { %6280 = vmatpush1.bf16.msra.mxu1 %v16356_v12  ;;  %5621 = vmatprep.subr.bf16.mxu0 %v13680_v40  ;;  %v13687_v12 = vld [vmem:[#allocation11 + $0xc80] ss:$16 sps:$4 sm:$0xff]  }
 0x663   :  { %6281 = vmatprep.subr.bf16.mxu1 %v16359_v14  ;;  %v13692_v14 = vld [vmem:[#allocation11 + $0xca4] ss:$16 sps:$4 sm:$0xff]  }
 0x665   :  { %5622 = vmatpush1.bf16.msra.mxu0 %v13678_v3 }
 0x666   :  { %6282 = vmatpush1.bf16.msra.mxu1 %v16362_v16  ;;  %5623 = vmatprep.subr.bf16.mxu0 %v13683_v0  ;;  %v13690_v16 = vld [vmem:[#allocation11 + $0xca0] ss:$16 sps:$4 sm:$0xff]  }
 0x667   :  { %6283 = vmatprep.subr.bf16.mxu1 %v16365_v18  ;;  %v13695_v18 = vld [vmem:[#allocation11 + $0xcc4] ss:$16 sps:$4 sm:$0xff]   ;;  %v13720_v0 = vld [vmem:[#allocation11 + $0xde0] ss:$16 sps:$4 sm:$0xff]  }
 0x669   :  { %5624 = vmatpush1.bf16.msra.mxu0 %v13681_v29 }
 0x66a   :  { %6284 = vmatpush1.bf16.msra.mxu1 %v16368_v30  ;;  %5625 = vmatprep.subr.bf16.mxu0 %v13686_v6 }
 0x66b   :  { %6285 = vmatprep.subr.bf16.mxu1 %v16371_v44 }
 0x66d   :  { %5626 = vmatpush1.bf16.msra.mxu0 %v13684_v9  ;;  %v13725_v9 = vld [vmem:[#allocation11 + $0xc0c] ss:$16 sps:$4 sm:$0xff]  }
 0x66e   :  { %6286 = vmatpush1.bf16.msra.mxu1 %v17888_v52  ;;  %5627 = vmatprep.subr.bf16.mxu0 %v13689_v11 }
 0x66f   :  { %6287 = vmatprep.subr.bf16.mxu1 %v17889_v32  ;;  %v13723_v32 = vld [vmem:[#allocation11 + $0xc08] ss:$16 sps:$4 sm:$0xff]  }
 0x671   :  { %5628 = vmatpush1.bf16.msra.mxu0 %v13687_v12 }
 0x672   :  { %6288 = vmatpush1.bf16.msra.mxu1 %v16380_v41  ;;  %5629 = vmatprep.subr.bf16.mxu0 %v13692_v14  ;;  %v13698_v41 = vld [vmem:[#allocation11 + $0xce4] ss:$16 sps:$4 sm:$0xff]  }
 0x673   :  { %v4537_v17 = vpop.f32.mrb[76].mxu0  ;;  %6289 = vmatprep.subr.bf16.mxu1 %v16383_v53  ;;  %v13701_v53 = vld [vmem:[#allocation11 + $0xd04] ss:$16 sps:$4 sm:$0xff]  }
 0x674   :  { %v16638_v30 = vadd.f32 %v4537_v17, %v16550_v62  ;;  %v4539_v44 = vpop.f32.mrb[77].mxu0  ;;  %v13699_v62 = vld [vmem:[#allocation11 + $0xd00] ss:$16 sps:$4 sm:$0xff]   ;;  %v13728_v17 = vld [vmem:[#allocation11 + $0xc2c] ss:$16 sps:$4 sm:$0xff]  }
 0x675   :  { %v16641_v35 = vadd.f32 %v4539_v44, %v16554_v51  ;;  %5630 = vmatpush1.bf16.msra.mxu0 %v13690_v16  ;;  %v4541_v56 = vpop.f32.mrb[78].mxu0  ;;  %v13704_v51 = vld [vmem:[#allocation11 + $0xd24] ss:$16 sps:$4 sm:$0xff]  }
 0x676   :  { %6290 = vmatpush1.bf16.msra.mxu1 %v16392_v37  ;;  %v4542_v46 = vpop.f32.mrb[79].mxu0  ;;  %5631 = vmatprep.subr.bf16.mxu0 %v13695_v18  ;;  %v13702_v37 = vld [vmem:[#allocation11 + $0xd20] ss:$16 sps:$4 sm:$0xff]  }
 0x677   :  { %6291 = vmatprep.subr.bf16.mxu1 %v16395_v21  ;;  %v13707_v21 = vld [vmem:[#allocation11 + $0xd44] ss:$16 sps:$4 sm:$0xff]  }
 0x678   :  { %v17896_v18 = vld [vmem:[#allocation57_spill] sm:$0xff]  ;;  %v17898_v56 = vld [vmem:[#allocation43_spill] sm:$0xff] }
 0x679   :  { %5632 = vmatpush1.bf16.msra.mxu0 %v13693_v25  ;;  %v17897_v44 = vld [vmem:[#allocation61_spill] sm:$0xff]  ;;  %v13734_v25 = vld [vmem:[#allocation11 + $0xc6c] ss:$16 sps:$4 sm:$0xff]  }
 0x67a   :  { %6292 = vmatpush1.bf16.msra.mxu1 %v16398_v23  ;;  %5633 = vmatprep.subr.bf16.mxu0 %v13698_v41  ;;  %v14948_v23 = vld [vmem:[#allocation2 + $0xa] sm:$0x1]  ;;  %v17899_v46 = vld [vmem:[#allocation45_spill] sm:$0xff] }
 0x67b   :  { %6293 = vmatprep.subr.bf16.mxu1 %v16401_v36  ;;  %v16651_v36 = vld [vmem:[#allocation2 + $0x10] sm:$0x1] }
 0x67c   :  { %v13732_v41 = vld [vmem:[#allocation11 + $0xc68] ss:$16 sps:$4 sm:$0xff]  }
 0x67d   :  { %5634 = vmatpush1.bf16.msra.mxu0 %v13696_v63  ;;  %v17900_v63 = vld [vmem:[#allocation46_spill] sm:$0xff] }
 0x67e   :  { %6294 = vmatpush1.bf16.msra.mxu1 %v16404_v39  ;;  %5635 = vmatprep.subr.bf16.mxu0 %v13701_v53  ;;  %v13710_v39 = vld [vmem:[#allocation11 + $0xd64] ss:$16 sps:$4 sm:$0xff]   ;;  %v13737_v53 = vld [vmem:[#allocation11 + $0xc8c] ss:$16 sps:$4 sm:$0xff]  }
 0x67f   :  { %6295 = vmatprep.subr.bf16.mxu1 %v16407_v2  ;;  %v13708_v2 = vld [vmem:[#allocation11 + $0xd60] ss:$16 sps:$4 sm:$0xff]  }
 0x681   :  { %5636 = vmatpush1.bf16.msra.mxu0 %v13699_v62  ;;  %v17901_v62 = vld [vmem:[#allocation58_spill] sm:$0xff] }
 0x682   :  { %6296 = vmatpush1.bf16.msra.mxu1 %v16410_v31  ;;  %5637 = vmatprep.subr.bf16.mxu0 %v13704_v51  ;;  %v13713_v31 = vld [vmem:[#allocation11 + $0xd84] ss:$16 sps:$4 sm:$0xff]   ;;  %v13735_v51 = vld [vmem:[#allocation11 + $0xc88] ss:$16 sps:$4 sm:$0xff]  }
 0x683   :  { %6306 = vmatprep.subr.bf16.mxu1 %v16413_v1  ;;  %v13711_v1 = vld [vmem:[#allocation11 + $0xd80] ss:$16 sps:$4 sm:$0xff]  }
 0x685   :  { %5638 = vmatpush1.bf16.msra.mxu0 %v13702_v37  ;;  %6298 = vmatmul.mubr.bf16.vlgmr.msra.gmra.mrb[92].mxu1 %v14948_v23  ;;  %v17902_v37 = vld [vmem:[#allocation48_spill] sm:$0xff]  ;;  %v17903_v23 = vld [vmem:[#allocation49_spill] sm:$0xff] }
 0x686   :  { %6307 = vmatpush1.bf16.msra.mxu1 %v16418_v15  ;;  %6338 = vmatprep.mubr.bf16.mxu1 %v16651_v36  ;;  %v13716_v15 = vld [vmem:[#allocation11 + $0xda4] ss:$16 sps:$4 sm:$0xff]  }
 0x687   :  { %5639 = vmatprep.subr.bf16.mxu0 %v13707_v21  ;;  %6308 = vmatprep.subr.bf16.mxu1 %v16422_v19  ;;  %v13719_v19 = vld [vmem:[#allocation11 + $0xdc4] ss:$16 sps:$4 sm:$0xff]   ;;  %v13740_v21 = vld [vmem:[#allocation11 + $0xcac] ss:$16 sps:$4 sm:$0xff]  }
 0x689   :  { %5640 = vmatpush1.bf16.msra.mxu0 %v13705_v57 }
 0x68a   :  { %6309 = vmatpush1.bf16.msra.mxu1 %v16425_v47  ;;  %5641 = vmatprep.subr.bf16.mxu0 %v13710_v39  ;;  %v13717_v47 = vld [vmem:[#allocation11 + $0xdc0] ss:$16 sps:$4 sm:$0xff]   ;;  %v13743_v39 = vld [vmem:[#allocation11 + $0xccc] ss:$16 sps:$4 sm:$0xff]  }
 0x68b   :  { %6310 = vmatprep.subr.bf16.mxu1 %v16428_v50  ;;  %v13722_v50 = vld [vmem:[#allocation11 + $0xde4] ss:$16 sps:$4 sm:$0xff]  }
 0x68d   :  { %5642 = vmatpush1.bf16.msra.mxu0 %v13708_v2 }
 0x68e   :  { %6311 = vmatpush1.bf16.msra.mxu1 %v17890_v42  ;;  %5643 = vmatprep.subr.bf16.mxu0 %v13713_v31 }
 0x68f   :  { %6312 = vmatprep.subr.bf16.mxu1 %v17891_v4  ;;  %v13741_v4 = vld [vmem:[#allocation11 + $0xcc8] ss:$16 sps:$4 sm:$0xff]  }
 0x691   :  { %5644 = vmatpush1.bf16.msra.mxu0 %v13711_v1 }
 0x692   :  { %6313 = vmatpush1.bf16.msra.mxu1 %v17892_v24  ;;  %5645 = vmatprep.subr.bf16.mxu0 %v13716_v15  ;;  %v6263_v24 = vld [vmem:[#allocation2 + $0xf] sm:$0x1] }
 0x693   :  { %6314 = vmatprep.subr.bf16.mxu1 %v17893_v61  ;;  %v13756_v61 = vld [vmem:[#allocation11 + $0xd68] ss:$16 sps:$4 sm:$0xff]  }
 0x695   :  { %5646 = vmatpush1.bf16.msra.mxu0 %v13714_v28  ;;  %v13744_v28 = vld [vmem:[#allocation11 + $0xce8] ss:$16 sps:$4 sm:$0xff]  }
 0x696   :  { %6315 = vmatpush1.bf16.msra.mxu1 %v17894_v26  ;;  %5647 = vmatprep.subr.bf16.mxu0 %v13719_v19  ;;  %v16699_v19 = vld [vmem:[#allocation8] ss:$8 sps:$4 sm:$0xff]  }
 0x697   :  { %6316 = vmatprep.subr.bf16.mxu1 %v17895_v38  ;;  %v13761_v26 = vld [vmem:[#allocation11 + $0xd8c] ss:$16 sps:$4 sm:$0xff]   ;;  %v13759_v38 = vld [vmem:[#allocation11 + $0xd88] ss:$16 sps:$4 sm:$0xff]  }
 0x698   :  { %v5223_v60 = vpop.f32.mrb[84].mxu1 }
 0x699   :  { %v12897_v40 = vadd.f32 %v5223_v60, %v17825_v5  ;;  %v5225_v3 = vpop.f32.mrb[85].mxu1  ;;  %5648 = vmatpush1.bf16.msra.mxu0 %v13717_v47  ;;  %v16708_v47 = vld [vmem:[#allocation8 + $0x10] ss:$8 sps:$4 sm:$0xff]   ;;  %v16714_v60 = vld [vmem:[#allocation8 + $0x20] ss:$8 sps:$4 sm:$0xff]  }
 0x69a   :  { %v12898_v29 = vadd.f32 %v5225_v3, %v17871_v33  ;;  %v5227_v6 = vpop.f32.mrb[86].mxu1  ;;  %6317 = vmatpush1.bf16.msra.mxu1 %v17872_v59  ;;  %5649 = vmatprep.subr.bf16.mxu0 %v13722_v50  ;;  %v13726_v59 = vld [vmem:[#allocation11 + $0xc28] ss:$16 sps:$4 sm:$0xff]  }
 0x69b   :  { %v5230_v11 = vmax.f32 %v12897_v40, 0.0  ;;  %v5228_v12 = vpop.f32.mrb[87].mxu1  ;;  %6318 = vmatprep.subr.bf16.mxu1 %v17873_v58  ;;  %v13731_v58 = vld [vmem:[#allocation11 + $0xc4c] ss:$16 sps:$4 sm:$0xff]  }
 0x69c   :  { %v5231_v52 = vmax.f32 %v12898_v29, 0.0  ;;  %v16711_v50 = vld [vmem:[#allocation8 + $0x24] ss:$8 sps:$4 sm:$0xff]   ;;  %v16717_v3 = vld [vmem:[#allocation8 + $0x34] ss:$8 sps:$4 sm:$0xff]  }
 0x69d   :  { %5650 = vmatpush1.bf16.msra.mxu0 %v13720_v0  ;;  %v16669_v16 = vpack.c.bf16 %v5230_v11, %v5230_v11  ;;  %v13764_v40 = vld [vmem:[#allocation11 + $0xdac] ss:$16 sps:$4 sm:$0xff]   ;;  %v13762_v0 = vld [vmem:[#allocation11 + $0xda8] ss:$16 sps:$4 sm:$0xff]  }
 0x69e   :  { %v5233_v14 = vpack.c.bf16 %v5231_v52, %v5231_v52  ;;  %6319 = vmatpush1.bf16.msra.mxu1 %v17874_v49  ;;  %5660 = vmatprep.subr.bf16.mxu0 %v13725_v9  ;;  %v13729_v49 = vld [vmem:[#allocation11 + $0xc48] ss:$16 sps:$4 sm:$0xff]   ;;  %v13767_v6 = vld [vmem:[#allocation11 + $0xdcc] ss:$16 sps:$4 sm:$0xff]  }
 0x69f   :  { %6320 = vmatprep.subr.bf16.mxu1 %v17896_v18  ;;  %v16720_v29 = vld [vmem:[#allocation8 + $0x30] ss:$8 sps:$4 sm:$0xff]   ;;  %v16723_v9 = vld [vmem:[#allocation8 + $0x44] ss:$8 sps:$4 sm:$0xff]   ;;  %v16726_v12 = vld [vmem:[#allocation8 + $0x40] ss:$8 sps:$4 sm:$0xff]  }
 0x6a0   :  { %5651 = vmatprep.mubr.bf16.mxu0 %v5233_v14  ;;  %v13765_v11 = vld [vmem:[#allocation11 + $0xdc8] ss:$16 sps:$4 sm:$0xff]   ;;  %v13770_v52 = vld [vmem:[#allocation11 + $0xdec] ss:$16 sps:$4 sm:$0xff]  }
 0x6a1   :  { %5652 = vmatmul.mubr.bf16.vlgmr.msra.gmra.mrb[92].mxu0 %v16669_v16  ;;  %v16732_v18 = vld [vmem:[#allocation8 + $0x50] ss:$8 sps:$4 sm:$0xff]  }
 0x6a2   :  { %5661 = vmatpush1.bf16.msra.mxu0 %v13723_v32  ;;  %5692 = vmatprep.mubr.bf16.mxu0 %v5233_v14  ;;  %v16729_v14 = vld [vmem:[#allocation8 + $0x54] ss:$8 sps:$4 sm:$0xff]  }
 0x6a3   :  { %6321 = vmatpush1.bf16.msra.mxu1 %v17897_v44  ;;  %5662 = vmatprep.subr.bf16.mxu0 %v13728_v17  ;;  %v13768_v32 = vld [vmem:[#allocation11 + $0xde8] ss:$16 sps:$4 sm:$0xff]   ;;  %v13773_v17 = vld [vmem:[#allocation11 + $0xe04] ss:$16 sps:$4 sm:$0xff]   ;;  %v13771_v44 = vld [vmem:[#allocation11 + $0xe00] ss:$16 sps:$4 sm:$0xff]  }
 0x6a4   :  { %6322 = vmatprep.subr.bf16.mxu1 %v17898_v56  ;;  %v13776_v56 = vld [vmem:[#allocation11 + $0xe24] ss:$16 sps:$4 sm:$0xff]  }
 0x6a6   :  { %5663 = vmatpush1.bf16.msra.mxu0 %v13726_v59  ;;  %v16735_v59 = vld [vmem:[#allocation8 + $0x64] ss:$8 sps:$4 sm:$0xff]  }
 0x6a7   :  { %6323 = vmatpush1.bf16.msra.mxu1 %v17878_v54  ;;  %5664 = vmatprep.subr.bf16.mxu0 %v13731_v58  ;;  %v13738_v54 = vld [vmem:[#allocation11 + $0xca8] ss:$16 sps:$4 sm:$0xff]  }
 0x6a8   :  { %6324 = vmatprep.subr.bf16.mxu1 %v17899_v46  ;;  %v16738_v58 = vld [vmem:[#allocation8 + $0x60] ss:$8 sps:$4 sm:$0xff]   ;;  %v16745_v46 = vld [vmem:[#allocation8 + $0x70] ss:$8 sps:$4 sm:$0xff]  }
 0x6aa   :  { %5665 = vmatpush1.bf16.msra.mxu0 %v13729_v49  ;;  %v16741_v49 = vld [vmem:[#allocation8 + $0x74] ss:$8 sps:$4 sm:$0xff]  }
 0x6ab   :  { %6325 = vmatpush1.bf16.msra.mxu1 %v17900_v63  ;;  %5666 = vmatprep.subr.bf16.mxu0 %v13734_v25  ;;  %v13774_v25 = vld [vmem:[#allocation11 + $0xe20] ss:$16 sps:$4 sm:$0xff]  }
 0x6ac   :  { %6326 = vmatprep.subr.bf16.mxu1 %v17901_v62  ;;  %v16748_v63 = vld [vmem:[#allocation8 + $0x84] ss:$8 sps:$4 sm:$0xff]   ;;  %v16751_v62 = vld [vmem:[#allocation8 + $0x80] ss:$8 sps:$4 sm:$0xff]  }
 0x6ae   :  { %5667 = vmatpush1.bf16.msra.mxu0 %v13732_v41  ;;  %v13779_v41 = vld [vmem:[#allocation11 + $0xe44] ss:$16 sps:$4 sm:$0xff]  }
 0x6af   :  { %6327 = vmatpush1.bf16.msra.mxu1 %v17902_v37  ;;  %5668 = vmatprep.subr.bf16.mxu0 %v13737_v53  ;;  %v13777_v53 = vld [vmem:[#allocation11 + $0xe40] ss:$16 sps:$4 sm:$0xff]  }
 0x6b0   :  { %6328 = vmatprep.subr.bf16.mxu1 %v17903_v23  ;;  %v13780_v37 = vld [vmem:[#allocation11 + $0xe60] ss:$16 sps:$4 sm:$0xff]   ;;  %v13785_v23 = vld [vmem:[#allocation11 + $0xe84] ss:$16 sps:$4 sm:$0xff]  }
 0x6b2   :  { %5669 = vmatpush1.bf16.msra.mxu0 %v13735_v51  ;;  %v16754_v51 = vld [vmem:[#allocation8 + $0x94] ss:$8 sps:$4 sm:$0xff]  }
 0x6b3   :  { %6329 = vmatpush1.bf16.msra.mxu1 %v16490_v34  ;;  %v4578_v57 = vpop.f32.mrb[80].mxu0  ;;  %5670 = vmatprep.subr.bf16.mxu0 %v13740_v21  ;;  %v13746_v34 = vld [vmem:[#allocation11 + $0xcec] ss:$16 sps:$4 sm:$0xff]  }
 0x6b4   :  { %v16683_v2 = vadd.f32 %v4578_v57, %v16594_v43  ;;  %v4580_v31 = vpop.f32.mrb[81].mxu0  ;;  %6330 = vmatprep.subr.bf16.mxu1 %v17884_v27  ;;  %v13749_v43 = vld [vmem:[#allocation11 + $0xd0c] ss:$16 sps:$4 sm:$0xff]   ;;  %v13747_v27 = vld [vmem:[#allocation11 + $0xd08] ss:$16 sps:$4 sm:$0xff]  }
 0x6b5   :  { %v16687_v1 = vadd.f32 %v4580_v31, %v16598_v55  ;;  %v4582_v42 = vpop.f32.mrb[82].mxu0  ;;  %v13752_v55 = vld [vmem:[#allocation11 + $0xd2c] ss:$16 sps:$4 sm:$0xff]   ;;  %v13783_v57 = vld [vmem:[#allocation11 + $0xe80] ss:$16 sps:$4 sm:$0xff]  }
 0x6b6   :  { %5671 = vmatpush1.bf16.msra.mxu0 %v13738_v54  ;;  %v4583_v15 = vpop.f32.mrb[83].mxu0  ;;  %v16757_v21 = vld [vmem:[#allocation8 + $0x90] ss:$8 sps:$4 sm:$0xff]   ;;  %v16760_v54 = vld [vmem:[#allocation8 + $0xa4] ss:$8 sps:$4 sm:$0xff]  }
 0x6b7   :  { %6331 = vmatpush1.bf16.msra.mxu1 %v16502_v7  ;;  %5672 = vmatprep.subr.bf16.mxu0 %v13743_v39  ;;  %v13750_v7 = vld [vmem:[#allocation11 + $0xd28] ss:$16 sps:$4 sm:$0xff]   ;;  %v13788_v31 = vld [vmem:[#allocation11 + $0xea4] ss:$16 sps:$4 sm:$0xff]   ;;  %v13786_v15 = vld [vmem:[#allocation11 + $0xea0] ss:$16 sps:$4 sm:$0xff]  }
 0x6b8   :  { %6332 = vmatprep.subr.bf16.mxu1 %v16505_v10  ;;  %v16696_v10 = vld [vmem:[#allocation8 + $0x4] ss:$8 sps:$4 sm:$0xff]   ;;  %v16763_v39 = vld [vmem:[#allocation8 + $0xa0] ss:$8 sps:$4 sm:$0xff]   ;;  %v16766_v42 = vld [vmem:[#allocation8 + $0xb4] ss:$8 sps:$4 sm:$0xff]  }
 0x6b9   :  { %17904 = vst [vmem:[#allocation53_spill] sm:$0xff] %v16763_v39 }
 0x6ba   :  { %5673 = vmatpush1.bf16.msra.mxu0 %v13741_v4  ;;  %v16769_v4 = vld [vmem:[#allocation8 + $0xb0] ss:$8 sps:$4 sm:$0xff]  }
 0x6bb   :  { %6333 = vmatpush1.bf16.msra.mxu1 %v16508_v13  ;;  %5674 = vmatprep.subr.bf16.mxu0 %v13746_v34  ;;  %v13755_v13 = vld [vmem:[#allocation11 + $0xd4c] ss:$16 sps:$4 sm:$0xff]   ;;  %17905 = vst [vmem:[#allocation54_spill] sm:$0xff] %v16769_v4 }
 0x6bc   :  { %6334 = vmatprep.subr.bf16.mxu1 %v17885_v20  ;;  %v13753_v20 = vld [vmem:[#allocation11 + $0xd48] ss:$16 sps:$4 sm:$0xff]  }
 0x6be   :  { %5675 = vmatpush1.bf16.msra.mxu0 %v13744_v28  ;;  %v13791_v28 = vld [vmem:[#allocation11 + $0xec4] ss:$16 sps:$4 sm:$0xff]  }
 0x6bf   :  { %6335 = vmatpush1.bf16.msra.mxu1 %v17886_v8  ;;  %5676 = vmatprep.subr.bf16.mxu0 %v13749_v43  ;;  %v16702_v8 = vld [vmem:[#allocation2 + $0xc] sm:$0x1] }
 0x6c0   :  { %6336 = vmatprep.subr.bf16.mxu1 %v16517_v22  ;;  %v13758_v22 = vld [vmem:[#allocation11 + $0xd6c] ss:$16 sps:$4 sm:$0xff]  }
 0x6c2   :  { %5677 = vmatpush1.bf16.msra.mxu0 %v13747_v27 }
 0x6c3   :  { %6337 = vmatpush1.bf16.msra.mxu1 %v16520_v45  ;;  %5678 = vmatprep.subr.bf16.mxu0 %v13752_v55  ;;  %v16705_v45 = vld [vmem:[#allocation8 + $0x14] ss:$8 sps:$4 sm:$0xff]   ;;  %v16775_v55 = vld [vmem:[#allocation8 + $0xc4] ss:$8 sps:$4 sm:$0xff]  }
 0x6c4   :  { %6823 = vmatprep.subr.bf16.mxu1 %v16696_v10 }
 0x6c6   :  { %5679 = vmatpush1.bf16.msra.mxu0 %v13750_v7  ;;  %6339 = vmatmul.mubr.bf16.vlgmr.msra.gmra.mrb[92].mxu1 %v6263_v24 }
 0x6c7   :  { %6824 = vmatpush1.bf16.msra.mxu1 %v16699_v19  ;;  %6855 = vmatprep.mubr.bf16.mxu1 %v16702_v8 }
 0x6c8   :  { %5680 = vmatprep.subr.bf16.mxu0 %v13755_v13  ;;  %6825 = vmatprep.subr.bf16.mxu1 %v16705_v45 }
 0x6ca   :  { %5681 = vmatpush1.bf16.msra.mxu0 %v13753_v20  ;;  %v13789_v20 = vld [vmem:[#allocation11 + $0xec0] ss:$16 sps:$4 sm:$0xff]  }
 0x6cb   :  { %6826 = vmatpush1.bf16.msra.mxu1 %v16708_v47  ;;  %5682 = vmatprep.subr.bf16.mxu0 %v13758_v22  ;;  %v16781_v22 = vld [vmem:[#allocation8 + $0xc0] ss:$8 sps:$4 sm:$0xff]  }
 0x6cc   :  { %6827 = vmatprep.subr.bf16.mxu1 %v16711_v50 }
 0x6ce   :  { %5683 = vmatpush1.bf16.msra.mxu0 %v13756_v61  ;;  %v13794_v61 = vld [vmem:[#allocation11 + $0xee4] ss:$16 sps:$4 sm:$0xff]  }
 0x6cf   :  { %6828 = vmatpush1.bf16.msra.mxu1 %v16714_v60  ;;  %5684 = vmatprep.subr.bf16.mxu0 %v13761_v26  ;;  %v13792_v26 = vld [vmem:[#allocation11 + $0xee0] ss:$16 sps:$4 sm:$0xff]  }
 0x6d0   :  { %6829 = vmatprep.subr.bf16.mxu1 %v16717_v3 }
 0x6d2   :  { %5685 = vmatpush1.bf16.msra.mxu0 %v13759_v38  ;;  %v16787_v38 = vld [vmem:[#allocation8 + $0xd0] ss:$8 sps:$4 sm:$0xff]  }
 0x6d3   :  { %6830 = vmatpush1.bf16.msra.mxu1 %v16720_v29  ;;  %5686 = vmatprep.subr.bf16.mxu0 %v13764_v40  ;;  %v16790_v40 = vld [vmem:[#allocation8 + $0xe4] ss:$8 sps:$4 sm:$0xff]  }
 0x6d4   :  { %6831 = vmatprep.subr.bf16.mxu1 %v16723_v9 }
 0x6d6   :  { %5687 = vmatpush1.bf16.msra.mxu0 %v13762_v0  ;;  %v13795_v0 = vld [vmem:[#allocation11 + $0xf00] ss:$16 sps:$4 sm:$0xff]  }
 0x6d7   :  { %6832 = vmatpush1.bf16.msra.mxu1 %v16726_v12  ;;  %5688 = vmatprep.subr.bf16.mxu0 %v13767_v6  ;;  %v16793_v6 = vld [vmem:[#allocation8 + $0xe0] ss:$8 sps:$4 sm:$0xff]  }
 0x6d8   :  { %6833 = vmatprep.subr.bf16.mxu1 %v16729_v14 }
 0x6da   :  { %5689 = vmatpush1.bf16.msra.mxu0 %v13765_v11  ;;  %v13800_v11 = vld [vmem:[#allocation11 + $0xf24] ss:$16 sps:$4 sm:$0xff]  }
 0x6db   :  { %6834 = vmatpush1.bf16.msra.mxu1 %v16732_v18  ;;  %5690 = vmatprep.subr.bf16.mxu0 %v13770_v52  ;;  %v16796_v52 = vld [vmem:[#allocation8 + $0xf4] ss:$8 sps:$4 sm:$0xff]  }
 0x6dc   :  { %6835 = vmatprep.subr.bf16.mxu1 %v16735_v59 }
 0x6de   :  { %5691 = vmatpush1.bf16.msra.mxu0 %v13768_v32  ;;  %v13798_v32 = vld [vmem:[#allocation11 + $0xf20] ss:$16 sps:$4 sm:$0xff]  }
 0x6df   :  { %6836 = vmatpush1.bf16.msra.mxu1 %v16738_v58  ;;  %6177 = vmatprep.subr.bf16.mxu0 %v13773_v17  ;;  %v16799_v17 = vld [vmem:[#allocation8 + $0xf0] ss:$8 sps:$4 sm:$0xff]  }
 0x6e0   :  { %6837 = vmatprep.subr.bf16.mxu1 %v16741_v49 }
 0x6e1   :  { %5693 = vmatmul.mubr.bf16.vlgmr.msra.gmra.mrb[96].mxu0 %v16669_v16  ;;  %v13782_v16 = vld [vmem:[#allocation11 + $0xe64] ss:$16 sps:$4 sm:$0xff]  }
 0x6e2   :  { %6178 = vmatpush1.bf16.msra.mxu0 %v13771_v44  ;;  %v16802_v44 = vld [vmem:[#allocation8 + $0x104] ss:$8 sps:$4 sm:$0xff]  }
 0x6e3   :  { %6838 = vmatpush1.bf16.msra.mxu1 %v16745_v46  ;;  %6179 = vmatprep.subr.bf16.mxu0 %v13776_v56  ;;  %v13803_v56 = vld [vmem:[#allocation11 + $0xf44] ss:$16 sps:$4 sm:$0xff]  }
 0x6e4   :  { %6839 = vmatprep.subr.bf16.mxu1 %v16748_v63 }
 0x6e6   :  { %6180 = vmatpush1.bf16.msra.mxu0 %v13774_v25  ;;  %v16806_v25 = vld [vmem:[#allocation2 + $0x11] sm:$0x1] }
 0x6e7   :  { %6840 = vmatpush1.bf16.msra.mxu1 %v16751_v62  ;;  %6181 = vmatprep.subr.bf16.mxu0 %v13779_v41  ;;  %17906 = vst [vmem:[#allocation55_spill] sm:$0xff] %v16806_v25  ;;  %v13801_v41 = vld [vmem:[#allocation11 + $0xf40] ss:$16 sps:$4 sm:$0xff]  }
 0x6e8   :  { %6841 = vmatprep.subr.bf16.mxu1 %v16754_v51 }
 0x6ea   :  { %6182 = vmatpush1.bf16.msra.mxu0 %v13777_v53  ;;  %v16808_v53 = vld [vmem:[#allocation8 + $0x100] ss:$8 sps:$4 sm:$0xff]  }
 0x6eb   :  { %6842 = vmatpush1.bf16.msra.mxu1 %v16757_v21  ;;  %6183 = vmatprep.subr.bf16.mxu0 %v13782_v16  ;;  %v13806_v16 = vld [vmem:[#allocation11 + $0xf64] ss:$16 sps:$4 sm:$0xff]  }
 0x6ec   :  { %6843 = vmatprep.subr.bf16.mxu1 %v16760_v54 }
 0x6ee   :  { %6184 = vmatpush1.bf16.msra.mxu0 %v13780_v37  ;;  %v16812_v37 = vld [vmem:[#allocation8 + $0x114] ss:$8 sps:$4 sm:$0xff]  }
 0x6ef   :  { %6844 = vmatpush1.bf16.msra.mxu1 %v16763_v39  ;;  %6185 = vmatprep.subr.bf16.mxu0 %v13785_v23  ;;  %v13804_v23 = vld [vmem:[#allocation11 + $0xf60] ss:$16 sps:$4 sm:$0xff]  }
 0x6f0   :  { %6845 = vmatprep.subr.bf16.mxu1 %v16766_v42 }
 0x6f2   :  { %6186 = vmatpush1.bf16.msra.mxu0 %v13783_v57  ;;  %v16815_v57 = vld [vmem:[#allocation8 + $0x110] ss:$8 sps:$4 sm:$0xff]  }
 0x6f3   :  { %6846 = vmatpush1.bf16.msra.mxu1 %v16769_v4  ;;  %v5095_v34 = vpop.f32.mrb[84].mxu0  ;;  %6187 = vmatprep.subr.bf16.mxu0 %v13788_v31  ;;  %v16818_v31 = vld [vmem:[#allocation8 + $0x124] ss:$8 sps:$4 sm:$0xff]  }
 0x6f4   :  { %v16773_v43 = vadd.f32 %v5095_v34, %v16638_v30  ;;  %v5097_v27 = vpop.f32.mrb[85].mxu0  ;;  %6847 = vmatprep.subr.bf16.mxu1 %v16775_v55  ;;  %v16784_v30 = vld [vmem:[#allocation8 + $0xd4] ss:$8 sps:$4 sm:$0xff]   ;;  %v16821_v34 = vld [vmem:[#allocation8 + $0x120] ss:$8 sps:$4 sm:$0xff]  }
 0x6f5   :  { %v16779_v7 = vadd.f32 %v5097_v27, %v16641_v35  ;;  %v5099_v13 = vpop.f32.mrb[86].mxu0  ;;  %v13797_v35 = vld [vmem:[#allocation11 + $0xf04] ss:$16 sps:$4 sm:$0xff]  }
 0x6f6   :  { %6188 = vmatpush1.bf16.msra.mxu0 %v13786_v15  ;;  %v5100_v24 = vpop.f32.mrb[87].mxu0  ;;  %v13807_v15 = vld [vmem:[#allocation11 + $0xf80] ss:$16 sps:$4 sm:$0xff]  }
 0x6f7   :  { %6848 = vmatpush1.bf16.msra.mxu1 %v16781_v22  ;;  %6189 = vmatprep.subr.bf16.mxu0 %v13791_v28  ;;  %v13812_v28 = vld [vmem:[#allocation11 + $0xfa4] ss:$16 sps:$4 sm:$0xff]   ;;  %v13810_v13 = vld [vmem:[#allocation11 + $0xfa0] ss:$16 sps:$4 sm:$0xff]  }
 0x6f8   :  { %6849 = vmatprep.subr.bf16.mxu1 %v16784_v30  ;;  %v16824_v27 = vld [vmem:[#allocation8 + $0x134] ss:$8 sps:$4 sm:$0xff]   ;;  %v16827_v24 = vld [vmem:[#allocation8 + $0x130] ss:$8 sps:$4 sm:$0xff]  }
 0x6f9   :  { %17907 = vst [vmem:[#allocation56_spill] sm:$0xff] %v16824_v27  ;;  %17908 = vst [vmem:[#allocation59_spill] sm:$0xff] %v16827_v24 }
 0x6fa   :  { %6190 = vmatpush1.bf16.msra.mxu0 %v13789_v20  ;;  %v13815_v20 = vld [vmem:[#allocation11 + $0xfc4] ss:$16 sps:$4 sm:$0xff]  }
 0x6fb   :  { %6850 = vmatpush1.bf16.msra.mxu1 %v16787_v38  ;;  %6191 = vmatprep.subr.bf16.mxu0 %v13794_v61  ;;  %v16830_v61 = vld [vmem:[#allocation8 + $0x144] ss:$8 sps:$4 sm:$0xff]  }
 0x6fc   :  { %6851 = vmatprep.subr.bf16.mxu1 %v16790_v40  ;;  %17909 = vst [vmem:[#allocation62_spill] sm:$0xff] %v16830_v61 }
 0x6fe   :  { %6192 = vmatpush1.bf16.msra.mxu0 %v13792_v26  ;;  %v13813_v26 = vld [vmem:[#allocation11 + $0xfc0] ss:$16 sps:$4 sm:$0xff]  }
 0x6ff   :  { %6852 = vmatpush1.bf16.msra.mxu1 %v16793_v6  ;;  %6193 = vmatprep.subr.bf16.mxu0 %v13797_v35  ;;  %v16833_v35 = vld [vmem:[#allocation8 + $0x140] ss:$8 sps:$4 sm:$0xff]  }
 0x700   :  { %6853 = vmatprep.subr.bf16.mxu1 %v16796_v52  ;;  %17910 = vst [vmem:[#allocation64_spill] sm:$0xff] %v16833_v35 }
 0x702   :  { %6194 = vmatpush1.bf16.msra.mxu0 %v13795_v0  ;;  %v13818_v0 = vld [vmem:[#allocation11 + $0xfe4] ss:$16 sps:$4 sm:$0xff]  }
 0x703   :  { %6854 = vmatpush1.bf16.msra.mxu1 %v16799_v17  ;;  %6195 = vmatprep.subr.bf16.mxu0 %v13800_v11 }
 0x704   :  { %6864 = vmatprep.subr.bf16.mxu1 %v16802_v44 }
 0x706   :  { %6196 = vmatpush1.bf16.msra.mxu0 %v13798_v32  ;;  %6856 = vmatmul.mubr.bf16.vlgmr.msra.gmra.mrb[96].mxu1 %v16610_v48  ;;  %v13809_v48 = vld [vmem:[#allocation11 + $0xf84] ss:$16 sps:$4 sm:$0xff]  }
 0x707   :  { %6865 = vmatpush1.bf16.msra.mxu1 %v16808_v53  ;;  %6896 = vmatprep.mubr.bf16.mxu1 %v16806_v25  ;;  %v16836_v32 = vld [vmem:[#allocation8 + $0x154] ss:$8 sps:$4 sm:$0xff]  }
 0x708   :  { %6197 = vmatprep.subr.bf16.mxu0 %v13803_v56  ;;  %6866 = vmatprep.subr.bf16.mxu1 %v16812_v37  ;;  %17911 = vst [vmem:[#allocation63_spill] sm:$0xff] %v16836_v32 }
 0x70a   :  { %6198 = vmatpush1.bf16.msra.mxu0 %v13801_v41 }
 0x70b   :  { %6867 = vmatpush1.bf16.msra.mxu1 %v16815_v57  ;;  %6199 = vmatprep.subr.bf16.mxu0 %v13806_v16 }
 0x70c   :  { %6868 = vmatprep.subr.bf16.mxu1 %v16818_v31 }
 0x70e   :  { %6200 = vmatpush1.bf16.msra.mxu0 %v13804_v23 }
 0x70f   :  { %6869 = vmatpush1.bf16.msra.mxu1 %v16821_v34  ;;  %6201 = vmatprep.subr.bf16.mxu0 %v13809_v48  ;;  %v13816_v48 = vld [vmem:[#allocation11 + $0xfe0] ss:$16 sps:$4 sm:$0xff]  }
 0x710   :  { %6870 = vmatprep.subr.bf16.mxu1 %v16824_v27 }
 0x712   :  { %6202 = vmatpush1.bf16.msra.mxu0 %v13807_v15 }
 0x713   :  { %6871 = vmatpush1.bf16.msra.mxu1 %v16827_v24  ;;  %6203 = vmatprep.subr.bf16.mxu0 %v13812_v28  ;;  %v16841_v28 = vld [vmem:[#allocation8 + $0x150] ss:$8 sps:$4 sm:$0xff]  }
 0x714   :  { %6872 = vmatprep.subr.bf16.mxu1 %v16830_v61 }
 0x716   :  { %6204 = vmatpush1.bf16.msra.mxu0 %v13810_v13 }
 0x717   :  { %6873 = vmatpush1.bf16.msra.mxu1 %v16833_v35  ;;  %6205 = vmatprep.subr.bf16.mxu0 %v13815_v20  ;;  %v13821_v20 = vld [vmem:[#allocation11 + $0xe0c] ss:$16 sps:$4 sm:$0xff]  }
 0x718   :  { %v5781_v11 = vpop.f32.mrb[88].mxu1  ;;  %6874 = vmatprep.subr.bf16.mxu1 %v16836_v32  ;;  %v16844_v35 = vld [vmem:[#allocation8 + $0x164] ss:$8 sps:$4 sm:$0xff]  }
 0x719   :  { %v12899_v56 = vadd.f32 %v5781_v11, %v17825_v5  ;;  %v5783_v41 = vpop.f32.mrb[89].mxu1  ;;  %17912 = vst [vmem:[#allocation65_spill] sm:$0xff] %v16844_v35  ;;  %v13819_v5 = vld [vmem:[#allocation11 + $0xe08] ss:$16 sps:$4 sm:$0xff]  }
 0x71a   :  { %v12900_v16 = vadd.f32 %v5783_v41, %v17871_v33  ;;  %6206 = vmatpush1.bf16.msra.mxu0 %v13813_v26  ;;  %v5785_v23 = vpop.f32.mrb[90].mxu1  ;;  %v16849_v26 = vld [vmem:[#allocation8 + $0x160] ss:$8 sps:$4 sm:$0xff]  }
 0x71b   :  { %v5788_v15 = vmax.f32 %v12899_v56, 0.0  ;;  %6875 = vmatpush1.bf16.msra.mxu1 %v16841_v28  ;;  %v5786_v13 = vpop.f32.mrb[91].mxu1  ;;  %6207 = vmatprep.subr.bf16.mxu0 %v13818_v0  ;;  %17913 = vst [vmem:[#allocation32_spill] sm:$0xff] %v16849_v26  ;;  %v13824_v56 = vld [vmem:[#allocation11 + $0xe2c] ss:$16 sps:$4 sm:$0xff]  }
 0x71c   :  { %v5789_v25 = vmax.f32 %v12900_v16, 0.0  ;;  %6876 = vmatprep.subr.bf16.mxu1 %v16844_v35  ;;  %v16852_v23 = vld [vmem:[#allocation8 + $0x174] ss:$8 sps:$4 sm:$0xff]   ;;  %v16856_v0 = vld [vmem:[#allocation8 + $0x170] ss:$8 sps:$4 sm:$0xff]  }
 0x71d   :  { %v16847_v41 = vpack.c.bf16 %v5788_v15, %v5788_v15  ;;  %17914 = vst [vmem:[#allocation40_spill] sm:$0xff] %v16852_v23  ;;  %17915 = vst [vmem:[#allocation41_spill] sm:$0xff] %v16856_v0  ;;  %v13827_v16 = vld [vmem:[#allocation11 + $0xe4c] ss:$16 sps:$4 sm:$0xff]   ;;  %v13825_v15 = vld [vmem:[#allocation11 + $0xe48] ss:$16 sps:$4 sm:$0xff]  }
 0x71e   :  { %v5791_v11 = vpack.c.bf16 %v5789_v25, %v5789_v25  ;;  %6208 = vmatpush1.bf16.msra.mxu0 %v13816_v48  ;;  %v13822_v25 = vld [vmem:[#allocation11 + $0xe28] ss:$16 sps:$4 sm:$0xff]  }
 0x71f   :  { %6877 = vmatpush1.bf16.msra.mxu1 %v16849_v26  ;;  %6218 = vmatprep.subr.bf16.mxu0 %v13821_v20  ;;  %v16859_v48 = vld [vmem:[#allocation8 + $0x184] ss:$8 sps:$4 sm:$0xff]   ;;  %v16862_v13 = vld [vmem:[#allocation8 + $0x180] ss:$8 sps:$4 sm:$0xff]   ;;  %v16865_v20 = vld [vmem:[#allocation8 + $0x194] ss:$8 sps:$4 sm:$0xff]  }
 0x720   :  { %6209 = vmatprep.mubr.bf16.mxu0 %v5791_v11  ;;  %6878 = vmatprep.subr.bf16.mxu1 %v16852_v23  ;;  %17916 = vst [vmem:[#allocation42_spill] sm:$0xff] %v16859_v48  ;;  %17917 = vst [vmem:[#allocation44_spill] sm:$0xff] %v16862_v13  ;;  %v13837_v26 = vld [vmem:[#allocation11 + $0xec8] ss:$16 sps:$4 sm:$0xff]  }
 0x721   :  { %6210 = vmatmul.mubr.bf16.vlgmr.msra.gmra.mrb[100].mxu0 %v16847_v41  ;;  %17918 = vst [vmem:[#allocation50_spill] sm:$0xff] %v16865_v20  ;;  %v16892_v35 = vld [vmem:[#allocation8 + $0x1c0] ss:$8 sps:$4 sm:$0xff]  }
 0x722   :  { %6219 = vmatpush1.bf16.msra.mxu0 %v13819_v5  ;;  %6250 = vmatprep.mubr.bf16.mxu0 %v5791_v11  ;;  %v13830_v5 = vld [vmem:[#allocation11 + $0xe6c] ss:$16 sps:$4 sm:$0xff]   ;;  %v13828_v11 = vld [vmem:[#allocation11 + $0xe68] ss:$16 sps:$4 sm:$0xff]  }
 0x723   :  { %6879 = vmatpush1.bf16.msra.mxu1 %v16856_v0  ;;  %6220 = vmatprep.subr.bf16.mxu0 %v13824_v56  ;;  %v16868_v56 = vld [vmem:[#allocation8 + $0x190] ss:$8 sps:$4 sm:$0xff]  }
 0x724   :  { %6880 = vmatprep.subr.bf16.mxu1 %v16859_v48  ;;  %17919 = vst [vmem:[#allocation51_spill] sm:$0xff] %v16868_v56  ;;  %v13833_v48 = vld [vmem:[#allocation11 + $0xe8c] ss:$16 sps:$4 sm:$0xff]  }
 0x726   :  { %6221 = vmatpush1.bf16.msra.mxu0 %v13822_v25  ;;  %v16871_v25 = vld [vmem:[#allocation8 + $0x1a4] ss:$8 sps:$4 sm:$0xff]  }
 0x727   :  { %6881 = vmatpush1.bf16.msra.mxu1 %v16862_v13  ;;  %6222 = vmatprep.subr.bf16.mxu0 %v13827_v16  ;;  %17920 = vst [vmem:[#allocation52_spill] sm:$0xff] %v16871_v25  ;;  %v13831_v13 = vld [vmem:[#allocation11 + $0xe88] ss:$16 sps:$4 sm:$0xff]  }
 0x728   :  { %6882 = vmatprep.subr.bf16.mxu1 %v16865_v20  ;;  %v16874_v16 = vld [vmem:[#allocation8 + $0x1a0] ss:$8 sps:$4 sm:$0xff]  }
 0x729   :  { %17921 = vst [vmem:[#allocation33_spill] sm:$0xff] %v16874_v16  ;;  %v13836_v20 = vld [vmem:[#allocation11 + $0xeac] ss:$16 sps:$4 sm:$0xff]  }
 0x72a   :  { %6223 = vmatpush1.bf16.msra.mxu0 %v13825_v15  ;;  %v16877_v15 = vld [vmem:[#allocation8 + $0x1b4] ss:$8 sps:$4 sm:$0xff]  }
 0x72b   :  { %6883 = vmatpush1.bf16.msra.mxu1 %v16868_v56  ;;  %6224 = vmatprep.subr.bf16.mxu0 %v13830_v5  ;;  %17922 = vst [vmem:[#allocation60_spill] sm:$0xff] %v16877_v15  ;;  %v13834_v56 = vld [vmem:[#allocation11 + $0xea8] ss:$16 sps:$4 sm:$0xff]  }
 0x72c   :  { %6884 = vmatprep.subr.bf16.mxu1 %v16871_v25  ;;  %v16880_v5 = vld [vmem:[#allocation8 + $0x1b0] ss:$8 sps:$4 sm:$0xff]  }
 0x72e   :  { %6225 = vmatpush1.bf16.msra.mxu0 %v13828_v11  ;;  %v13839_v11 = vld [vmem:[#allocation11 + $0xecc] ss:$16 sps:$4 sm:$0xff]  }
 0x72f   :  { %6885 = vmatpush1.bf16.msra.mxu1 %v16874_v16  ;;  %6226 = vmatprep.subr.bf16.mxu0 %v13833_v48  ;;  %v16886_v16 = vld [vmem:[#allocation8 + $0x1c4] ss:$8 sps:$4 sm:$0xff]  }
 0x730   :  { %6886 = vmatprep.subr.bf16.mxu1 %v16877_v15  ;;  %17923 = vst [vmem:[#allocation47_spill] sm:$0xff] %v16886_v16 }
 0x732   :  { %6227 = vmatpush1.bf16.msra.mxu0 %v13831_v13 }
 0x733   :  { %6887 = vmatpush1.bf16.msra.mxu1 %v16880_v5  ;;  %v5136_v0 = vpop.f32.mrb[88].mxu0  ;;  %6228 = vmatprep.subr.bf16.mxu0 %v13836_v20  ;;  %v13842_v20 = vld [vmem:[#allocation11 + $0xeec] ss:$16 sps:$4 sm:$0xff]  }
 0x734   :  { %v16884_v25 = vadd.f32 %v5136_v0, %v16683_v2  ;;  %v5138_v23 = vpop.f32.mrb[89].mxu0  ;;  %6888 = vmatprep.subr.bf16.mxu1 %v16886_v16  ;;  %v16895_v2 = vld [vmem:[#allocation8 + $0x1d4] ss:$8 sps:$4 sm:$0xff]   ;;  %v16898_v16 = vld [vmem:[#allocation8 + $0x1d0] ss:$8 sps:$4 sm:$0xff]  }
 0x735   :  { %v16890_v48 = vadd.f32 %v5138_v23, %v16687_v1  ;;  %v5140_v13 = vpop.f32.mrb[90].mxu0  ;;  %v13840_v0 = vld [vmem:[#allocation11 + $0xee8] ss:$16 sps:$4 sm:$0xff]   ;;  %v13845_v1 = vld [vmem:[#allocation11 + $0xf0c] ss:$16 sps:$4 sm:$0xff]  }
 0x736   :  { %6229 = vmatpush1.bf16.msra.mxu0 %v13834_v56  ;;  %v5141_v15 = vpop.f32.mrb[91].mxu0  ;;  %v16901_v23 = vld [vmem:[#allocation8 + $0x1e4] ss:$8 sps:$4 sm:$0xff]  }
 0x737   :  { %6889 = vmatpush1.bf16.msra.mxu1 %v16892_v35  ;;  %6230 = vmatprep.subr.bf16.mxu0 %v13839_v11  ;;  %v13843_v56 = vld [vmem:[#allocation11 + $0xf08] ss:$16 sps:$4 sm:$0xff]   ;;  %v13848_v11 = vld [vmem:[#allocation11 + $0xf2c] ss:$16 sps:$4 sm:$0xff]  }
 0x738   :  { %6890 = vmatprep.subr.bf16.mxu1 %v16895_v2  ;;  %v16904_v15 = vld [vmem:[#allocation8 + $0x1e0] ss:$8 sps:$4 sm:$0xff]  }
 0x739   :  { %17924 = vst [vmem:[#allocation34_spill] sm:$0xff] %v16904_v15  ;;  %v13846_v13 = vld [vmem:[#allocation11 + $0xf28] ss:$16 sps:$4 sm:$0xff]  }
 0x73a   :  { %6231 = vmatpush1.bf16.msra.mxu0 %v13837_v26  ;;  %v16907_v26 = vld [vmem:[#allocation8 + $0x1f4] ss:$8 sps:$4 sm:$0xff]  }
 0x73b   :  { %6891 = vmatpush1.bf16.msra.mxu1 %v16898_v16  ;;  %6232 = vmatprep.subr.bf16.mxu0 %v13842_v20  ;;  %v16910_v20 = vld [vmem:[#allocation8 + $0x1f0] ss:$8 sps:$4 sm:$0xff]  }
 0x73c   :  { %6892 = vmatprep.subr.bf16.mxu1 %v16901_v23  ;;  %17925 = vst [vmem:[#allocation35_spill] sm:$0xff] %v16910_v20 }
 0x73e   :  { %6233 = vmatpush1.bf16.msra.mxu0 %v13840_v0  ;;  %v13851_v0 = vld [vmem:[#allocation11 + $0xf4c] ss:$16 sps:$4 sm:$0xff]  }
 0x73f   :  { %6893 = vmatpush1.bf16.msra.mxu1 %v16904_v15  ;;  %6234 = vmatprep.subr.bf16.mxu0 %v13845_v1  ;;  %v13849_v15 = vld [vmem:[#allocation11 + $0xf48] ss:$16 sps:$4 sm:$0xff]  }
 0x740   :  { %6894 = vmatprep.subr.bf16.mxu1 %v16907_v26  ;;  %v16916_v1 = vld [vmem:[#allocation2 + $0xd] sm:$0x1] }
 0x741   :  { %17926 = vst [vmem:[#allocation36_spill] sm:$0xff] %v16916_v1 }
 0x742   :  { %6235 = vmatpush1.bf16.msra.mxu0 %v13843_v56  ;;  %v13854_v56 = vld [vmem:[#allocation11 + $0xf6c] ss:$16 sps:$4 sm:$0xff]  }
 0x743   :  { %6895 = vmatpush1.bf16.msra.mxu1 %v16910_v20  ;;  %6236 = vmatprep.subr.bf16.mxu0 %v13848_v11  ;;  %v13852_v20 = vld [vmem:[#allocation11 + $0xf68] ss:$16 sps:$4 sm:$0xff]   ;;  %v13857_v11 = vld [vmem:[#allocation11 + $0xf8c] ss:$16 sps:$4 sm:$0xff]  }
 0x744   :  { %7381 = vmatprep.subr.bf16.mxu1 %v16696_v10 }
 0x746   :  { %6237 = vmatpush1.bf16.msra.mxu0 %v13846_v13  ;;  %6897 = vmatmul.mubr.bf16.vlgmr.msra.gmra.mrb[96].mxu1 %v16651_v36  ;;  %v13855_v36 = vld [vmem:[#allocation11 + $0xf88] ss:$16 sps:$4 sm:$0xff]   ;;  %v13860_v13 = vld [vmem:[#allocation11 + $0xfac] ss:$16 sps:$4 sm:$0xff]  }
 0x747   :  { %7382 = vmatpush1.bf16.msra.mxu1 %v16699_v19  ;;  %7413 = vmatprep.mubr.bf16.mxu1 %v16916_v1 }
 0x748   :  { %6238 = vmatprep.subr.bf16.mxu0 %v13851_v0  ;;  %7383 = vmatprep.subr.bf16.mxu1 %v16705_v45  ;;  %v13858_v0 = vld [vmem:[#allocation11 + $0xfa8] ss:$16 sps:$4 sm:$0xff]  }
 0x74a   :  { %6239 = vmatpush1.bf16.msra.mxu0 %v13849_v15  ;;  %v13863_v15 = vld [vmem:[#allocation11 + $0xfcc] ss:$16 sps:$4 sm:$0xff]  }
 0x74b   :  { %7384 = vmatpush1.bf16.msra.mxu1 %v16708_v47  ;;  %6240 = vmatprep.subr.bf16.mxu0 %v13854_v56  ;;  %v13861_v56 = vld [vmem:[#allocation11 + $0xfc8] ss:$16 sps:$4 sm:$0xff]  }
 0x74c   :  { %7385 = vmatprep.subr.bf16.mxu1 %v16711_v50 }
 0x74e   :  { %6241 = vmatpush1.bf16.msra.mxu0 %v13852_v20  ;;  %v13866_v20 = vld [vmem:[#allocation11 + $0xfec] ss:$16 sps:$4 sm:$0xff]  }
 0x74f   :  { %7386 = vmatpush1.bf16.msra.mxu1 %v16714_v60  ;;  %6242 = vmatprep.subr.bf16.mxu0 %v13857_v11  ;;  %v13864_v11 = vld [vmem:[#allocation11 + $0xfe8] ss:$16 sps:$4 sm:$0xff]  }
 0x750   :  { %7387 = vmatprep.subr.bf16.mxu1 %v16717_v3 }
 0x752   :  { %6243 = vmatpush1.bf16.msra.mxu0 %v13855_v36  ;;  %v13869_v36 = vld [vmem:[#allocation11 + $0x1004] ss:$16 sps:$4 sm:$0xff]  }
 0x753   :  { %7388 = vmatpush1.bf16.msra.mxu1 %v16720_v29  ;;  %6244 = vmatprep.subr.bf16.mxu0 %v13860_v13  ;;  %v13867_v13 = vld [vmem:[#allocation11 + $0x1000] ss:$16 sps:$4 sm:$0xff]  }
 0x754   :  { %7389 = vmatprep.subr.bf16.mxu1 %v16723_v9 }
 0x756   :  { %6245 = vmatpush1.bf16.msra.mxu0 %v13858_v0  ;;  %v13872_v0 = vld [vmem:[#allocation11 + $0x1024] ss:$16 sps:$4 sm:$0xff]  }
 0x757   :  { %7390 = vmatpush1.bf16.msra.mxu1 %v16726_v12  ;;  %6246 = vmatprep.subr.bf16.mxu0 %v13863_v15  ;;  %v13870_v15 = vld [vmem:[#allocation11 + $0x1020] ss:$16 sps:$4 sm:$0xff]  }
 0x758   :  { %7391 = vmatprep.subr.bf16.mxu1 %v16729_v14 }
 0x75a   :  { %6247 = vmatpush1.bf16.msra.mxu0 %v13861_v56  ;;  %v13875_v56 = vld [vmem:[#allocation11 + $0x1044] ss:$16 sps:$4 sm:$0xff]  }
 0x75b   :  { %7392 = vmatpush1.bf16.msra.mxu1 %v16732_v18  ;;  %6248 = vmatprep.subr.bf16.mxu0 %v13866_v20  ;;  %v13873_v20 = vld [vmem:[#allocation11 + $0x1040] ss:$16 sps:$4 sm:$0xff]  }
 0x75c   :  { %7393 = vmatprep.subr.bf16.mxu1 %v16735_v59 }
 0x75e   :  { %6249 = vmatpush1.bf16.msra.mxu0 %v13864_v11  ;;  %v13878_v11 = vld [vmem:[#allocation11 + $0x1064] ss:$16 sps:$4 sm:$0xff]  }
 0x75f   :  { %7394 = vmatpush1.bf16.msra.mxu1 %v16738_v58  ;;  %6736 = vmatprep.subr.bf16.mxu0 %v13869_v36  ;;  %v13876_v36 = vld [vmem:[#allocation11 + $0x1060] ss:$16 sps:$4 sm:$0xff]  }
 0x760   :  { %7395 = vmatprep.subr.bf16.mxu1 %v16741_v49 }
 0x761   :  { %6251 = vmatmul.mubr.bf16.vlgmr.msra.gmra.mrb[104].mxu0 %v16847_v41  ;;  %v13881_v41 = vld [vmem:[#allocation11 + $0x1084] ss:$16 sps:$4 sm:$0xff]  }
 0x762   :  { %6737 = vmatpush1.bf16.msra.mxu0 %v13867_v13  ;;  %v13879_v13 = vld [vmem:[#allocation11 + $0x1080] ss:$16 sps:$4 sm:$0xff]  }
 0x763   :  { %7396 = vmatpush1.bf16.msra.mxu1 %v16745_v46  ;;  %6738 = vmatprep.subr.bf16.mxu0 %v13872_v0  ;;  %v13884_v0 = vld [vmem:[#allocation11 + $0x10a4] ss:$16 sps:$4 sm:$0xff]  }
 0x764   :  { %7397 = vmatprep.subr.bf16.mxu1 %v16748_v63 }
 0x766   :  { %6739 = vmatpush1.bf16.msra.mxu0 %v13870_v15  ;;  %v13882_v15 = vld [vmem:[#allocation11 + $0x10a0] ss:$16 sps:$4 sm:$0xff]  }
 0x767   :  { %7398 = vmatpush1.bf16.msra.mxu1 %v16751_v62  ;;  %6740 = vmatprep.subr.bf16.mxu0 %v13875_v56  ;;  %v13887_v56 = vld [vmem:[#allocation11 + $0x10c4] ss:$16 sps:$4 sm:$0xff]  }
 0x768   :  { %7399 = vmatprep.subr.bf16.mxu1 %v16754_v51 }
 0x76a   :  { %6741 = vmatpush1.bf16.msra.mxu0 %v13873_v20 }
 0x76b   :  { %7400 = vmatpush1.bf16.msra.mxu1 %v16757_v21  ;;  %6742 = vmatprep.subr.bf16.mxu0 %v13878_v11 }
 0x76c   :  { %7401 = vmatprep.subr.bf16.mxu1 %v16760_v54 }
 0x76e   :  { %6743 = vmatpush1.bf16.msra.mxu0 %v13876_v36 }
 0x76f   :  { %7402 = vmatpush1.bf16.msra.mxu1 %v16763_v39  ;;  %6744 = vmatprep.subr.bf16.mxu0 %v13881_v41  ;;  %v13885_v39 = vld [vmem:[#allocation11 + $0x10c0] ss:$16 sps:$4 sm:$0xff]  }
 0x770   :  { %7403 = vmatprep.subr.bf16.mxu1 %v16766_v42 }
 0x772   :  { %6745 = vmatpush1.bf16.msra.mxu0 %v13879_v13 }
 0x773   :  { %7404 = vmatpush1.bf16.msra.mxu1 %v16769_v4  ;;  %6746 = vmatprep.subr.bf16.mxu0 %v13884_v0  ;;  %v13890_v4 = vld [vmem:[#allocation11 + $0x10e4] ss:$16 sps:$4 sm:$0xff]   ;;  %v13888_v0 = vld [vmem:[#allocation11 + $0x10e0] ss:$16 sps:$4 sm:$0xff]  }
 0x774   :  { %v5653_v20 = vpop.f32.mrb[92].mxu0  ;;  %7405 = vmatprep.subr.bf16.mxu1 %v16775_v55 }
 0x775   :  { %v16944_v11 = vadd.f32 %v5653_v20, %v16773_v43  ;;  %v5655_v36 = vpop.f32.mrb[93].mxu0  ;;  %v13893_v43 = vld [vmem:[#allocation11 + $0x1104] ss:$16 sps:$4 sm:$0xff]   ;;  %v13897_v20 = vld [vmem:[#allocation11 + $0x1140] ss:$16 sps:$4 sm:$0xff]  }
 0x776   :  { %v16947_v1 = vadd.f32 %v5655_v36, %v16779_v7  ;;  %6747 = vmatpush1.bf16.msra.mxu0 %v13882_v15  ;;  %v5657_v41 = vpop.f32.mrb[94].mxu0  ;;  %v13891_v7 = vld [vmem:[#allocation11 + $0x1100] ss:$16 sps:$4 sm:$0xff]   ;;  %v13896_v15 = vld [vmem:[#allocation11 + $0x1124] ss:$16 sps:$4 sm:$0xff]  }
 0x777   :  { %7406 = vmatpush1.bf16.msra.mxu1 %v16781_v22  ;;  %v5658_v13 = vpop.f32.mrb[95].mxu0  ;;  %6748 = vmatprep.subr.bf16.mxu0 %v13887_v56  ;;  %v13894_v56 = vld [vmem:[#allocation11 + $0x1120] ss:$16 sps:$4 sm:$0xff]   ;;  %v13902_v36 = vld [vmem:[#allocation11 + $0x1164] ss:$16 sps:$4 sm:$0xff]  }
 0x778   :  { %7407 = vmatprep.subr.bf16.mxu1 %v16784_v30  ;;  %v13900_v41 = vld [vmem:[#allocation11 + $0x1160] ss:$16 sps:$4 sm:$0xff]   ;;  %v13905_v13 = vld [vmem:[#allocation11 + $0x1184] ss:$16 sps:$4 sm:$0xff]  }
 0x77a   :  { %6749 = vmatpush1.bf16.msra.mxu0 %v13885_v39  ;;  %v13899_v39 = vld [vmem:[#allocation11 + $0x1144] ss:$16 sps:$4 sm:$0xff]  }
 0x77b   :  { %7408 = vmatpush1.bf16.msra.mxu1 %v16787_v38  ;;  %6750 = vmatprep.subr.bf16.mxu0 %v13890_v4  ;;  %v16958_v4 = vld [vmem:[#allocation2 + $0x12] sm:$0x1] }
 0x77c   :  { %7409 = vmatprep.subr.bf16.mxu1 %v16790_v40  ;;  %17927 = vst [vmem:[#allocation37_spill] sm:$0xff] %v16958_v4 }
 0x77e   :  { %6751 = vmatpush1.bf16.msra.mxu0 %v13888_v0  ;;  %v13908_v0 = vld [vmem:[#allocation11 + $0x11a4] ss:$16 sps:$4 sm:$0xff]  }
 0x77f   :  { %7410 = vmatpush1.bf16.msra.mxu1 %v16793_v6  ;;  %6752 = vmatprep.subr.bf16.mxu0 %v13893_v43  ;;  %v13906_v43 = vld [vmem:[#allocation11 + $0x11a0] ss:$16 sps:$4 sm:$0xff]  }
 0x780   :  { %7411 = vmatprep.subr.bf16.mxu1 %v16796_v52 }
 0x782   :  { %6753 = vmatpush1.bf16.msra.mxu0 %v13891_v7  ;;  %v13911_v7 = vld [vmem:[#allocation11 + $0x11c4] ss:$16 sps:$4 sm:$0xff]  }
 0x783   :  { %7412 = vmatpush1.bf16.msra.mxu1 %v16799_v17  ;;  %6754 = vmatprep.subr.bf16.mxu0 %v13896_v15  ;;  %v13909_v15 = vld [vmem:[#allocation11 + $0x11c0] ss:$16 sps:$4 sm:$0xff]  }
 0x784   :  { %7422 = vmatprep.subr.bf16.mxu1 %v16802_v44 }
 0x786   :  { %6755 = vmatpush1.bf16.msra.mxu0 %v13894_v56  ;;  %7414 = vmatmul.mubr.bf16.vlgmr.msra.gmra.mrb[100].mxu1 %v16702_v8  ;;  %v13903_v8 = vld [vmem:[#allocation11 + $0x1180] ss:$16 sps:$4 sm:$0xff]  }
 0x787   :  { %7423 = vmatpush1.bf16.msra.mxu1 %v16808_v53  ;;  %7454 = vmatprep.mubr.bf16.mxu1 %v16958_v4  ;;  %v17928_v56 = vld [vmem:[#allocation64_spill] sm:$0xff] }
 0x788   :  { %6756 = vmatprep.subr.bf16.mxu0 %v13899_v39  ;;  %7424 = vmatprep.subr.bf16.mxu1 %v16812_v37  ;;  %v13914_v39 = vld [vmem:[#allocation11 + $0x11e4] ss:$16 sps:$4 sm:$0xff]  }
 0x78a   :  { %6757 = vmatpush1.bf16.msra.mxu0 %v13897_v20 }
 0x78b   :  { %7425 = vmatpush1.bf16.msra.mxu1 %v16815_v57  ;;  %6758 = vmatprep.subr.bf16.mxu0 %v13902_v36  ;;  %v17929_v36 = vld [vmem:[#allocation31_spill] sm:$0xff] }
 0x78c   :  { %7426 = vmatprep.subr.bf16.mxu1 %v16818_v31 }
 0x78e   :  { %6759 = vmatpush1.bf16.msra.mxu0 %v13900_v41 }
 0x78f   :  { %7427 = vmatpush1.bf16.msra.mxu1 %v16821_v34  ;;  %6760 = vmatprep.subr.bf16.mxu0 %v13905_v13 }
 0x790   :  { %7428 = vmatprep.subr.bf16.mxu1 %v16824_v27  ;;  %v17931_v27 = vld [vmem:[#allocation32_spill] sm:$0xff] }
 0x792   :  { %6761 = vmatpush1.bf16.msra.mxu0 %v13903_v8  ;;  %v13912_v8 = vld [vmem:[#allocation11 + $0x11e0] ss:$16 sps:$4 sm:$0xff]  }
 0x793   :  { %7429 = vmatpush1.bf16.msra.mxu1 %v16827_v24  ;;  %6762 = vmatprep.subr.bf16.mxu0 %v13908_v0 }
 0x794   :  { %7430 = vmatprep.subr.bf16.mxu1 %v16830_v61 }
 0x796   :  { %6763 = vmatpush1.bf16.msra.mxu0 %v13906_v43  ;;  %v13917_v43 = vld [vmem:[#allocation11 + $0x100c] ss:$16 sps:$4 sm:$0xff]  }
 0x797   :  { %7431 = vmatpush1.bf16.msra.mxu1 %v17928_v56  ;;  %6764 = vmatprep.subr.bf16.mxu0 %v13911_v7  ;;  %v17930_v56 = vld [vmem:[#allocation65_spill] sm:$0xff] }
 0x798   :  { %7432 = vmatprep.subr.bf16.mxu1 %v16836_v32 }
 0x799   :  { %v6340_v20 = vpop.f32.mrb[92].mxu1 }
 0x79a   :  { %v12901_v41 = vadd.f32 %v6340_v20, %v17929_v36  ;;  %v6342_v13 = vpop.f32.mrb[93].mxu1  ;;  %6765 = vmatpush1.bf16.msra.mxu0 %v13909_v15  ;;  %v13915_v20 = vld [vmem:[#allocation11 + $0x1008] ss:$16 sps:$4 sm:$0xff]  }
 0x79b   :  { %v12902_v4 = vadd.f32 %v6342_v13, %v17871_v33  ;;  %v6344_v0 = vpop.f32.mrb[94].mxu1  ;;  %7433 = vmatpush1.bf16.msra.mxu1 %v16841_v28  ;;  %6766 = vmatprep.subr.bf16.mxu0 %v13914_v39  ;;  %v17932_v36 = vld [vmem:[#allocation40_spill] sm:$0xff]  ;;  %v17933_v39 = vld [vmem:[#allocation41_spill] sm:$0xff] }
 0x79c   :  { %v6347_v61 = vmax.f32 %v12901_v41, 0.0  ;;  %v6345_v24 = vpop.f32.mrb[95].mxu1  ;;  %7434 = vmatprep.subr.bf16.mxu1 %v17930_v56  ;;  %v13920_v13 = vld [vmem:[#allocation11 + $0x102c] ss:$16 sps:$4 sm:$0xff]  }
 0x79d   :  { %v6348_v7 = vmax.f32 %v12902_v4, 0.0  ;;  %v13918_v24 = vld [vmem:[#allocation11 + $0x1028] ss:$16 sps:$4 sm:$0xff]   ;;  %v13923_v4 = vld [vmem:[#allocation11 + $0x104c] ss:$16 sps:$4 sm:$0xff]  }
 0x79e   :  { %6767 = vmatpush1.bf16.msra.mxu0 %v13912_v8  ;;  %v16976_v15 = vpack.c.bf16 %v6347_v61, %v6347_v61  ;;  %v17934_v41 = vld [vmem:[#allocation42_spill] sm:$0xff]  ;;  %v17935_v0 = vld [vmem:[#allocation44_spill] sm:$0xff] }
 0x79f   :  { %v6350_v32 = vpack.c.bf16 %v6348_v7, %v6348_v7  ;;  %7435 = vmatpush1.bf16.msra.mxu1 %v17931_v27  ;;  %6777 = vmatprep.subr.bf16.mxu0 %v13917_v43  ;;  %v13921_v8 = vld [vmem:[#allocation11 + $0x1048] ss:$16 sps:$4 sm:$0xff]   ;;  %v13926_v61 = vld [vmem:[#allocation11 + $0x106c] ss:$16 sps:$4 sm:$0xff]  }
 0x7a0   :  { %7436 = vmatprep.subr.bf16.mxu1 %v17932_v36  ;;  %v17936_v43 = vld [vmem:[#allocation50_spill] sm:$0xff]  ;;  %v17937_v36 = vld [vmem:[#allocation51_spill] sm:$0xff] }
 0x7a1   :  { %6768 = vmatprep.mubr.bf16.mxu0 %v6350_v32  ;;  %v13924_v7 = vld [vmem:[#allocation11 + $0x1068] ss:$16 sps:$4 sm:$0xff]  }
 0x7a2   :  { %6769 = vmatmul.mubr.bf16.vlgmr.msra.gmra.mrb[108].mxu0 %v16976_v15 }
 0x7a3   :  { %6778 = vmatpush1.bf16.msra.mxu0 %v13915_v20  ;;  %6809 = vmatprep.mubr.bf16.mxu0 %v6350_v32  ;;  %v13929_v32 = vld [vmem:[#allocation11 + $0x108c] ss:$16 sps:$4 sm:$0xff]  }
 0x7a4   :  { %7437 = vmatpush1.bf16.msra.mxu1 %v17933_v39  ;;  %6779 = vmatprep.subr.bf16.mxu0 %v13920_v13  ;;  %v17938_v20 = vld [vmem:[#allocation52_spill] sm:$0xff]  ;;  %v17939_v39 = vld [vmem:[#allocation33_spill] sm:$0xff] }
 0x7a5   :  { %7438 = vmatprep.subr.bf16.mxu1 %v17934_v41  ;;  %v13927_v13 = vld [vmem:[#allocation11 + $0x1088] ss:$16 sps:$4 sm:$0xff]  }
 0x7a6   :  { %v17940_v41 = vld [vmem:[#allocation60_spill] sm:$0xff] }
 0x7a7   :  { %6780 = vmatpush1.bf16.msra.mxu0 %v13918_v24  ;;  %v13932_v24 = vld [vmem:[#allocation11 + $0x10ac] ss:$16 sps:$4 sm:$0xff]  }
 0x7a8   :  { %7439 = vmatpush1.bf16.msra.mxu1 %v17935_v0  ;;  %6781 = vmatprep.subr.bf16.mxu0 %v13923_v4  ;;  %v13930_v4 = vld [vmem:[#allocation11 + $0x10a8] ss:$16 sps:$4 sm:$0xff]  }
 0x7a9   :  { %7440 = vmatprep.subr.bf16.mxu1 %v17936_v43  ;;  %v13935_v43 = vld [vmem:[#allocation11 + $0x10cc] ss:$16 sps:$4 sm:$0xff]  }
 0x7ab   :  { %6782 = vmatpush1.bf16.msra.mxu0 %v13921_v8 }
 0x7ac   :  { %7441 = vmatpush1.bf16.msra.mxu1 %v17937_v36  ;;  %6783 = vmatprep.subr.bf16.mxu0 %v13926_v61 }
 0x7ad   :  { %7442 = vmatprep.subr.bf16.mxu1 %v17938_v20  ;;  %v17941_v20 = vld [vmem:[#allocation47_spill] sm:$0xff] }
 0x7af   :  { %6784 = vmatpush1.bf16.msra.mxu0 %v13924_v7 }
 0x7b0   :  { %7443 = vmatpush1.bf16.msra.mxu1 %v17939_v39  ;;  %6785 = vmatprep.subr.bf16.mxu0 %v13929_v32 }
 0x7b1   :  { %7444 = vmatprep.subr.bf16.mxu1 %v17940_v41  ;;  %v13933_v41 = vld [vmem:[#allocation11 + $0x10c8] ss:$16 sps:$4 sm:$0xff]  }
 0x7b3   :  { %6786 = vmatpush1.bf16.msra.mxu0 %v13927_v13  ;;  %v13938_v13 = vld [vmem:[#allocation11 + $0x10ec] ss:$16 sps:$4 sm:$0xff]  }
 0x7b4   :  { %7445 = vmatpush1.bf16.msra.mxu1 %v16880_v5  ;;  %v5694_v8 = vpop.f32.mrb[96].mxu0  ;;  %6787 = vmatprep.subr.bf16.mxu0 %v13932_v24  ;;  %v13936_v24 = vld [vmem:[#allocation11 + $0x10e8] ss:$16 sps:$4 sm:$0xff]  }
 0x7b5   :  { %v16990_v61 = vadd.f32 %v5694_v8, %v16884_v25  ;;  %v5696_v36 = vpop.f32.mrb[97].mxu0  ;;  %7446 = vmatprep.subr.bf16.mxu1 %v17941_v20  ;;  %v13941_v25 = vld [vmem:[#allocation11 + $0x110c] ss:$16 sps:$4 sm:$0xff]   ;;  %v17944_v8 = vld [vmem:[#allocation55_spill] sm:$0xff] }
 0x7b6   :  { %v16994_v7 = vadd.f32 %v5696_v36, %v16890_v48  ;;  %v5698_v32 = vpop.f32.mrb[98].mxu0  ;;  %v13939_v48 = vld [vmem:[#allocation11 + $0x1108] ss:$16 sps:$4 sm:$0xff]  }
 0x7b7   :  { %6788 = vmatpush1.bf16.msra.mxu0 %v13930_v4  ;;  %v5699_v39 = vpop.f32.mrb[99].mxu0  ;;  %v17942_v36 = vld [vmem:[#allocation34_spill] sm:$0xff]  ;;  %v17943_v4 = vld [vmem:[#allocation35_spill] sm:$0xff] }
 0x7b8   :  { %7447 = vmatpush1.bf16.msra.mxu1 %v16892_v35  ;;  %6789 = vmatprep.subr.bf16.mxu0 %v13935_v43  ;;  %v13944_v39 = vld [vmem:[#allocation11 + $0x112c] ss:$16 sps:$4 sm:$0xff]   ;;  %v13942_v43 = vld [vmem:[#allocation11 + $0x1128] ss:$16 sps:$4 sm:$0xff]  }
 0x7b9   :  { %7448 = vmatprep.subr.bf16.mxu1 %v16895_v2  ;;  %v13945_v32 = vld [vmem:[#allocation11 + $0x1148] ss:$16 sps:$4 sm:$0xff]  }
 0x7bb   :  { %6790 = vmatpush1.bf16.msra.mxu0 %v13933_v41  ;;  %v13947_v41 = vld [vmem:[#allocation11 + $0x114c] ss:$16 sps:$4 sm:$0xff]  }
 0x7bc   :  { %7449 = vmatpush1.bf16.msra.mxu1 %v16898_v16  ;;  %6791 = vmatprep.subr.bf16.mxu0 %v13938_v13  ;;  %v15015_v13 = vld [vmem:[#allocation2 + $0xe] sm:$0x1] }
 0x7bd   :  { %7450 = vmatprep.subr.bf16.mxu1 %v16901_v23 }
 0x7bf   :  { %6792 = vmatpush1.bf16.msra.mxu0 %v13936_v24  ;;  %v13950_v24 = vld [vmem:[#allocation11 + $0x116c] ss:$16 sps:$4 sm:$0xff]  }
 0x7c0   :  { %7451 = vmatpush1.bf16.msra.mxu1 %v17942_v36  ;;  %6793 = vmatprep.subr.bf16.mxu0 %v13941_v25  ;;  %v13948_v25 = vld [vmem:[#allocation11 + $0x1168] ss:$16 sps:$4 sm:$0xff]  }
 0x7c1   :  { %7452 = vmatprep.subr.bf16.mxu1 %v16907_v26 }
 0x7c3   :  { %6794 = vmatpush1.bf16.msra.mxu0 %v13939_v48  ;;  %v13953_v48 = vld [vmem:[#allocation11 + $0x118c] ss:$16 sps:$4 sm:$0xff]  }
 0x7c4   :  { %7453 = vmatpush1.bf16.msra.mxu1 %v17943_v4  ;;  %6795 = vmatprep.subr.bf16.mxu0 %v13944_v39  ;;  %v13954_v39 = vld [vmem:[#allocation11 + $0x11a8] ss:$16 sps:$4 sm:$0xff]  }
 0x7c5   :  { %7939 = vmatprep.subr.bf16.mxu1 %v16696_v10  ;;  %v13951_v10 = vld [vmem:[#allocation11 + $0x1188] ss:$16 sps:$4 sm:$0xff]  }
 0x7c7   :  { %6796 = vmatpush1.bf16.msra.mxu0 %v13942_v43  ;;  %7455 = vmatmul.mubr.bf16.vlgmr.msra.gmra.mrb[100].mxu1 %v17944_v8  ;;  %v17946_v43 = vld [vmem:[#allocation54_spill] sm:$0xff] }
 0x7c8   :  { %7940 = vmatpush1.bf16.msra.mxu1 %v16699_v19  ;;  %7971 = vmatprep.mubr.bf16.mxu1 %v15015_v13  ;;  %v13956_v19 = vld [vmem:[#allocation11 + $0x11ac] ss:$16 sps:$4 sm:$0xff]  }
 0x7c9   :  { %6797 = vmatprep.subr.bf16.mxu0 %v13947_v41  ;;  %7941 = vmatprep.subr.bf16.mxu1 %v16705_v45  ;;  %v13959_v45 = vld [vmem:[#allocation11 + $0x11cc] ss:$16 sps:$4 sm:$0xff]   ;;  %v13983_v41 = vld [vmem:[#allocation11 + $0x12c4] ss:$16 sps:$4 sm:$0xff]  }
 0x7cb   :  { %6798 = vmatpush1.bf16.msra.mxu0 %v13945_v32 }
 0x7cc   :  { %7942 = vmatpush1.bf16.msra.mxu1 %v16708_v47  ;;  %6799 = vmatprep.subr.bf16.mxu0 %v13950_v24  ;;  %v13957_v47 = vld [vmem:[#allocation11 + $0x11c8] ss:$16 sps:$4 sm:$0xff]   ;;  %v13986_v24 = vld [vmem:[#allocation11 + $0x12e4] ss:$16 sps:$4 sm:$0xff]  }
 0x7cd   :  { %7943 = vmatprep.subr.bf16.mxu1 %v16711_v50  ;;  %v13962_v50 = vld [vmem:[#allocation11 + $0x11ec] ss:$16 sps:$4 sm:$0xff]  }
 0x7cf   :  { %6800 = vmatpush1.bf16.msra.mxu0 %v13948_v25  ;;  %v13984_v25 = vld [vmem:[#allocation11 + $0x12e0] ss:$16 sps:$4 sm:$0xff]  }
 0x7d0   :  { %7944 = vmatpush1.bf16.msra.mxu1 %v16714_v60  ;;  %6801 = vmatprep.subr.bf16.mxu0 %v13953_v48  ;;  %v13960_v60 = vld [vmem:[#allocation11 + $0x11e8] ss:$16 sps:$4 sm:$0xff]   ;;  %v13993_v48 = vld [vmem:[#allocation11 + $0x1340] ss:$16 sps:$4 sm:$0xff]  }
 0x7d1   :  { %7945 = vmatprep.subr.bf16.mxu1 %v16717_v3  ;;  %v13965_v3 = vld [vmem:[#allocation11 + $0x1204] ss:$16 sps:$4 sm:$0xff]  }
 0x7d3   :  { %6802 = vmatpush1.bf16.msra.mxu0 %v13951_v10  ;;  %v14004_v10 = vld [vmem:[#allocation11 + $0x13a4] ss:$16 sps:$4 sm:$0xff]  }
 0x7d4   :  { %7946 = vmatpush1.bf16.msra.mxu1 %v16720_v29  ;;  %6803 = vmatprep.subr.bf16.mxu0 %v13956_v19  ;;  %v13963_v29 = vld [vmem:[#allocation11 + $0x1200] ss:$16 sps:$4 sm:$0xff]  }
 0x7d5   :  { %7947 = vmatprep.subr.bf16.mxu1 %v16723_v9  ;;  %v13968_v9 = vld [vmem:[#allocation11 + $0x1224] ss:$16 sps:$4 sm:$0xff]   ;;  %v14002_v19 = vld [vmem:[#allocation11 + $0x13a0] ss:$16 sps:$4 sm:$0xff]  }
 0x7d7   :  { %6804 = vmatpush1.bf16.msra.mxu0 %v13954_v39  ;;  %v17949_v39 = vld [vmem:[#allocation59_spill] sm:$0xff] }
 0x7d8   :  { %7948 = vmatpush1.bf16.msra.mxu1 %v16726_v12  ;;  %6805 = vmatprep.subr.bf16.mxu0 %v13959_v45  ;;  %v13966_v12 = vld [vmem:[#allocation11 + $0x1220] ss:$16 sps:$4 sm:$0xff]  }
 0x7d9   :  { %7949 = vmatprep.subr.bf16.mxu1 %v16729_v14  ;;  %v13971_v14 = vld [vmem:[#allocation11 + $0x1244] ss:$16 sps:$4 sm:$0xff]   ;;  %v17950_v45 = vld [vmem:[#allocation62_spill] sm:$0xff] }
 0x7db   :  { %6806 = vmatpush1.bf16.msra.mxu0 %v13957_v47  ;;  %v17951_v47 = vld [vmem:[#allocation64_spill] sm:$0xff] }
 0x7dc   :  { %7950 = vmatpush1.bf16.msra.mxu1 %v16732_v18  ;;  %6807 = vmatprep.subr.bf16.mxu0 %v13962_v50  ;;  %v13969_v18 = vld [vmem:[#allocation11 + $0x1240] ss:$16 sps:$4 sm:$0xff]  }
 0x7dd   :  { %7951 = vmatprep.subr.bf16.mxu1 %v16735_v59  ;;  %v13974_v59 = vld [vmem:[#allocation11 + $0x1264] ss:$16 sps:$4 sm:$0xff]  }
 0x7df   :  { %6808 = vmatpush1.bf16.msra.mxu0 %v13960_v60  ;;  %v17953_v60 = vld [vmem:[#allocation31_spill] sm:$0xff] }
 0x7e0   :  { %7952 = vmatpush1.bf16.msra.mxu1 %v16738_v58  ;;  %7294 = vmatprep.subr.bf16.mxu0 %v13965_v3  ;;  %v13972_v58 = vld [vmem:[#allocation11 + $0x1260] ss:$16 sps:$4 sm:$0xff]  }
 0x7e1   :  { %7953 = vmatprep.subr.bf16.mxu1 %v16741_v49  ;;  %v13977_v49 = vld [vmem:[#allocation11 + $0x1284] ss:$16 sps:$4 sm:$0xff]  }
 0x7e2   :  { %6810 = vmatmul.mubr.bf16.vlgmr.msra.gmra.mrb[112].mxu0 %v16976_v15  ;;  %v17945_v15 = vld [vmem:[#allocation53_spill] sm:$0xff] }
 0x7e3   :  { %7295 = vmatpush1.bf16.msra.mxu0 %v13963_v29 }
 0x7e4   :  { %7954 = vmatpush1.bf16.msra.mxu1 %v16745_v46  ;;  %7296 = vmatprep.subr.bf16.mxu0 %v13968_v9  ;;  %v13975_v46 = vld [vmem:[#allocation11 + $0x1280] ss:$16 sps:$4 sm:$0xff]  }
 0x7e5   :  { %7955 = vmatprep.subr.bf16.mxu1 %v16748_v63  ;;  %v13980_v63 = vld [vmem:[#allocation11 + $0x12a4] ss:$16 sps:$4 sm:$0xff]  }
 0x7e7   :  { %7297 = vmatpush1.bf16.msra.mxu0 %v13966_v12 }
 0x7e8   :  { %7956 = vmatpush1.bf16.msra.mxu1 %v16751_v62  ;;  %7298 = vmatprep.subr.bf16.mxu0 %v13971_v14  ;;  %v13978_v62 = vld [vmem:[#allocation11 + $0x12a0] ss:$16 sps:$4 sm:$0xff]  }
 0x7e9   :  { %7957 = vmatprep.subr.bf16.mxu1 %v16754_v51  ;;  %v14008_v14 = vld [vmem:[#allocation11 + $0x13e0] ss:$16 sps:$4 sm:$0xff]  }
 0x7eb   :  { %7299 = vmatpush1.bf16.msra.mxu0 %v13969_v18 }
 0x7ec   :  { %7958 = vmatpush1.bf16.msra.mxu1 %v16757_v21  ;;  %7300 = vmatprep.subr.bf16.mxu0 %v13974_v59 }
 0x7ed   :  { %7959 = vmatprep.subr.bf16.mxu1 %v16760_v54 }
 0x7ef   :  { %7301 = vmatpush1.bf16.msra.mxu0 %v13972_v58  ;;  %v14013_v58 = vld [vmem:[#allocation11 + $0x120c] ss:$16 sps:$4 sm:$0xff]  }
 0x7f0   :  { %7960 = vmatpush1.bf16.msra.mxu1 %v17945_v15  ;;  %7302 = vmatprep.subr.bf16.mxu0 %v13977_v49  ;;  %v14011_v15 = vld [vmem:[#allocation11 + $0x1208] ss:$16 sps:$4 sm:$0xff]  }
 0x7f1   :  { %7961 = vmatprep.subr.bf16.mxu1 %v16766_v42  ;;  %v13981_v42 = vld [vmem:[#allocation11 + $0x12c0] ss:$16 sps:$4 sm:$0xff]  }
 0x7f3   :  { %7303 = vmatpush1.bf16.msra.mxu0 %v13975_v46 }
 0x7f4   :  { %7962 = vmatpush1.bf16.msra.mxu1 %v17946_v43  ;;  %v6211_v51 = vpop.f32.mrb[100].mxu0  ;;  %7304 = vmatprep.subr.bf16.mxu0 %v13980_v63  ;;  %v17954_v43 = vld [vmem:[#allocation40_spill] sm:$0xff] }
 0x7f5   :  { %v17030_v21 = vadd.f32 %v6211_v51, %v16944_v11  ;;  %v6213_v8 = vpop.f32.mrb[101].mxu0  ;;  %7963 = vmatprep.subr.bf16.mxu1 %v16775_v55  ;;  %v13989_v11 = vld [vmem:[#allocation11 + $0x1304] ss:$16 sps:$4 sm:$0xff]   ;;  %v13987_v55 = vld [vmem:[#allocation11 + $0x1300] ss:$16 sps:$4 sm:$0xff]  }
 0x7f6   :  { %v17034_v54 = vadd.f32 %v6213_v8, %v16947_v1  ;;  %v6215_v32 = vpop.f32.mrb[102].mxu0  ;;  %v13992_v1 = vld [vmem:[#allocation11 + $0x1324] ss:$16 sps:$4 sm:$0xff]   ;;  %v14017_v8 = vld [vmem:[#allocation11 + $0x1248] ss:$16 sps:$4 sm:$0xff]  }
 0x7f7   :  { %7305 = vmatpush1.bf16.msra.mxu0 %v13978_v62  ;;  %v6216_v13 = vpop.f32.mrb[103].mxu0  ;;  %v14016_v62 = vld [vmem:[#allocation11 + $0x122c] ss:$16 sps:$4 sm:$0xff]   ;;  %v17955_v51 = vld [vmem:[#allocation41_spill] sm:$0xff] }
 0x7f8   :  { %7964 = vmatpush1.bf16.msra.mxu1 %v16781_v22  ;;  %7306 = vmatprep.subr.bf16.mxu0 %v13983_v41  ;;  %v13990_v22 = vld [vmem:[#allocation11 + $0x1320] ss:$16 sps:$4 sm:$0xff]   ;;  %v14020_v13 = vld [vmem:[#allocation11 + $0x1268] ss:$16 sps:$4 sm:$0xff]  }
 0x7f9   :  { %7965 = vmatprep.subr.bf16.mxu1 %v16784_v30  ;;  %v13995_v30 = vld [vmem:[#allocation11 + $0x1344] ss:$16 sps:$4 sm:$0xff]   ;;  %v17956_v41 = vld [vmem:[#allocation42_spill] sm:$0xff] }
 0x7fa   :  { %v17957_v32 = vld [vmem:[#allocation50_spill] sm:$0xff] }
 0x7fb   :  { %7307 = vmatpush1.bf16.msra.mxu0 %v13981_v42  ;;  %v17958_v42 = vld [vmem:[#allocation51_spill] sm:$0xff] }
 0x7fc   :  { %7966 = vmatpush1.bf16.msra.mxu1 %v16787_v38  ;;  %7308 = vmatprep.subr.bf16.mxu0 %v13986_v24  ;;  %v17947_v38 = vld [vmem:[#allocation36_spill] sm:$0xff] }
 0x7fd   :  { %7967 = vmatprep.subr.bf16.mxu1 %v16790_v40  ;;  %v7938_v40 = vld [vmem:[#allocation2 + $0x13] sm:$0x1] }
 0x7fe   :  { %v14025_v24 = vld [vmem:[#allocation11 + $0x128c] ss:$16 sps:$4 sm:$0xff]  }
 0x7ff   :  { %7309 = vmatpush1.bf16.msra.mxu0 %v13984_v25  ;;  %v17959_v25 = vld [vmem:[#allocation52_spill] sm:$0xff] }
 0x800   :  { %7968 = vmatpush1.bf16.msra.mxu1 %v16793_v6  ;;  %7310 = vmatprep.subr.bf16.mxu0 %v13989_v11  ;;  %v13998_v6 = vld [vmem:[#allocation11 + $0x1364] ss:$16 sps:$4 sm:$0xff]   ;;  %v14023_v11 = vld [vmem:[#allocation11 + $0x1288] ss:$16 sps:$4 sm:$0xff]  }
 0x801   :  { %7969 = vmatprep.subr.bf16.mxu1 %v16796_v52  ;;  %v13996_v52 = vld [vmem:[#allocation11 + $0x1360] ss:$16 sps:$4 sm:$0xff]  }
 0x803   :  { %7311 = vmatpush1.bf16.msra.mxu0 %v13987_v55  ;;  %v17960_v55 = vld [vmem:[#allocation33_spill] sm:$0xff] }
 0x804   :  { %7970 = vmatpush1.bf16.msra.mxu1 %v16799_v17  ;;  %7312 = vmatprep.subr.bf16.mxu0 %v13992_v1  ;;  %v14001_v17 = vld [vmem:[#allocation11 + $0x1384] ss:$16 sps:$4 sm:$0xff]   ;;  %v14028_v1 = vld [vmem:[#allocation11 + $0x12ac] ss:$16 sps:$4 sm:$0xff]  }
 0x805   :  { %7980 = vmatprep.subr.bf16.mxu1 %v16802_v44  ;;  %v13999_v44 = vld [vmem:[#allocation11 + $0x1380] ss:$16 sps:$4 sm:$0xff]  }
 0x807   :  { %7313 = vmatpush1.bf16.msra.mxu0 %v13990_v22  ;;  %7972 = vmatmul.mubr.bf16.vlgmr.msra.gmra.mrb[104].mxu1 %v17947_v38  ;;  %v17961_v22 = vld [vmem:[#allocation60_spill] sm:$0xff] }
 0x808   :  { %7981 = vmatpush1.bf16.msra.mxu1 %v16808_v53  ;;  %8012 = vmatprep.mubr.bf16.mxu1 %v7938_v40  ;;  %v17948_v53 = vld [vmem:[#allocation56_spill] sm:$0xff] }
 0x809   :  { %7314 = vmatprep.subr.bf16.mxu0 %v13995_v30  ;;  %7982 = vmatprep.subr.bf16.mxu1 %v16812_v37  ;;  %v14007_v37 = vld [vmem:[#allocation11 + $0x13c4] ss:$16 sps:$4 sm:$0xff]   ;;  %v14031_v38 = vld [vmem:[#allocation11 + $0x12cc] ss:$16 sps:$4 sm:$0xff]  }
 0x80b   :  { %7315 = vmatpush1.bf16.msra.mxu0 %v13993_v48 }
 0x80c   :  { %7983 = vmatpush1.bf16.msra.mxu1 %v16815_v57  ;;  %7316 = vmatprep.subr.bf16.mxu0 %v13998_v6  ;;  %v14005_v57 = vld [vmem:[#allocation11 + $0x13c0] ss:$16 sps:$4 sm:$0xff]  }
 0x80d   :  { %7984 = vmatprep.subr.bf16.mxu1 %v16818_v31  ;;  %v14010_v31 = vld [vmem:[#allocation11 + $0x13e4] ss:$16 sps:$4 sm:$0xff]  }
 0x80f   :  { %7317 = vmatpush1.bf16.msra.mxu0 %v13996_v52 }
 0x810   :  { %7985 = vmatpush1.bf16.msra.mxu1 %v16821_v34  ;;  %7318 = vmatprep.subr.bf16.mxu0 %v14001_v17  ;;  %v17952_v34 = vld [vmem:[#allocation63_spill] sm:$0xff] }
 0x811   :  { %7986 = vmatprep.subr.bf16.mxu1 %v17948_v53  ;;  %v14041_v53 = vld [vmem:[#allocation11 + $0x1348] ss:$16 sps:$4 sm:$0xff]  }
 0x813   :  { %7319 = vmatpush1.bf16.msra.mxu0 %v13999_v44  ;;  %v14029_v44 = vld [vmem:[#allocation11 + $0x12c8] ss:$16 sps:$4 sm:$0xff]  }
 0x814   :  { %7987 = vmatpush1.bf16.msra.mxu1 %v17949_v39  ;;  %7320 = vmatprep.subr.bf16.mxu0 %v14004_v10  ;;  %v14032_v10 = vld [vmem:[#allocation11 + $0x12e8] ss:$16 sps:$4 sm:$0xff]  }
 0x815   :  { %7988 = vmatprep.subr.bf16.mxu1 %v17950_v45  ;;  %v14044_v39 = vld [vmem:[#allocation11 + $0x1368] ss:$16 sps:$4 sm:$0xff]   ;;  %v14049_v45 = vld [vmem:[#allocation11 + $0x138c] ss:$16 sps:$4 sm:$0xff]  }
 0x817   :  { %7321 = vmatpush1.bf16.msra.mxu0 %v14002_v19  ;;  %v17091_v19 = vld [vmem:[#allocation8] ss:$8 sps:$4 sm:$0xff]  }
 0x818   :  { %7989 = vmatpush1.bf16.msra.mxu1 %v17951_v47  ;;  %7322 = vmatprep.subr.bf16.mxu0 %v14007_v37  ;;  %v17100_v37 = vld [vmem:[#allocation8 + $0x10] ss:$8 sps:$4 sm:$0xff]  }
 0x819   :  { %v6898_v50 = vpop.f32.mrb[96].mxu1  ;;  %7990 = vmatprep.subr.bf16.mxu1 %v17952_v34  ;;  %v14047_v47 = vld [vmem:[#allocation11 + $0x1388] ss:$16 sps:$4 sm:$0xff]  }
 0x81a   :  { %v12903_v3 = vadd.f32 %v6898_v50, %v17953_v60  ;;  %v6900_v29 = vpop.f32.mrb[97].mxu1  ;;  %v14052_v50 = vld [vmem:[#allocation11 + $0x13ac] ss:$16 sps:$4 sm:$0xff]  }
 0x81b   :  { %v12904_v9 = vadd.f32 %v6900_v29, %v17871_v33  ;;  %7323 = vmatpush1.bf16.msra.mxu0 %v14005_v57  ;;  %v6902_v12 = vpop.f32.mrb[98].mxu1  ;;  %v17103_v57 = vld [vmem:[#allocation8 + $0x24] ss:$8 sps:$4 sm:$0xff]   ;;  %v17109_v34 = vld [vmem:[#allocation8 + $0x34] ss:$8 sps:$4 sm:$0xff]  }
 0x81c   :  { %v6905_v18 = vmax.f32 %v12903_v3, 0.0  ;;  %7991 = vmatpush1.bf16.msra.mxu1 %v16841_v28  ;;  %v6903_v59 = vpop.f32.mrb[99].mxu1  ;;  %7324 = vmatprep.subr.bf16.mxu0 %v14010_v31  ;;  %v14014_v28 = vld [vmem:[#allocation11 + $0x1228] ss:$16 sps:$4 sm:$0xff]  }
 0x81d   :  { %v6906_v49 = vmax.f32 %v12904_v9, 0.0  ;;  %7992 = vmatprep.subr.bf16.mxu1 %v17930_v56  ;;  %v14019_v56 = vld [vmem:[#allocation11 + $0x124c] ss:$16 sps:$4 sm:$0xff]   ;;  %v14050_v3 = vld [vmem:[#allocation11 + $0x13a8] ss:$16 sps:$4 sm:$0xff]  }
 0x81e   :  { %v17059_v63 = vpack.c.bf16 %v6905_v18, %v6905_v18  ;;  %v17106_v31 = vld [vmem:[#allocation8 + $0x20] ss:$8 sps:$4 sm:$0xff]   ;;  %v17112_v29 = vld [vmem:[#allocation8 + $0x30] ss:$8 sps:$4 sm:$0xff]   ;;  %v17115_v12 = vld [vmem:[#allocation8 + $0x44] ss:$8 sps:$4 sm:$0xff]  }
 0x81f   :  { %v6908_v46 = vpack.c.bf16 %v6906_v49, %v6906_v49  ;;  %7325 = vmatpush1.bf16.msra.mxu0 %v14008_v14  ;;  %v14055_v9 = vld [vmem:[#allocation11 + $0x13cc] ss:$16 sps:$4 sm:$0xff]   ;;  %v14053_v14 = vld [vmem:[#allocation11 + $0x13c8] ss:$16 sps:$4 sm:$0xff]  }
 0x820   :  { %7993 = vmatpush1.bf16.msra.mxu1 %v17931_v27  ;;  %7335 = vmatprep.subr.bf16.mxu0 %v14013_v58  ;;  %v14022_v27 = vld [vmem:[#allocation11 + $0x126c] ss:$16 sps:$4 sm:$0xff]   ;;  %v14056_v49 = vld [vmem:[#allocation11 + $0x13e8] ss:$16 sps:$4 sm:$0xff]  }
 0x821   :  { %7326 = vmatprep.mubr.bf16.mxu0 %v6908_v46  ;;  %7994 = vmatprep.subr.bf16.mxu1 %v17954_v43  ;;  %v17118_v18 = vld [vmem:[#allocation8 + $0x40] ss:$8 sps:$4 sm:$0xff]   ;;  %v17121_v58 = vld [vmem:[#allocation8 + $0x54] ss:$8 sps:$4 sm:$0xff]  }
 0x822   :  { %7327 = vmatmul.mubr.bf16.vlgmr.msra.gmra.mrb[116].mxu0 %v17059_v63  ;;  %v14058_v59 = vld [vmem:[#allocation11 + $0x13ec] ss:$16 sps:$4 sm:$0xff]   ;;  %v14059_v43 = vld [vmem:[#allocation11 + $0x1400] ss:$16 sps:$4 sm:$0xff]  }
 0x823   :  { %7336 = vmatpush1.bf16.msra.mxu0 %v14011_v15  ;;  %7367 = vmatprep.mubr.bf16.mxu0 %v6908_v46  ;;  %v17124_v46 = vld [vmem:[#allocation8 + $0x50] ss:$8 sps:$4 sm:$0xff]  }
 0x824   :  { %7995 = vmatpush1.bf16.msra.mxu1 %v17955_v51  ;;  %7337 = vmatprep.subr.bf16.mxu0 %v14016_v62  ;;  %v14061_v15 = vld [vmem:[#allocation11 + $0x1404] ss:$16 sps:$4 sm:$0xff]  }
 0x825   :  { %7996 = vmatprep.subr.bf16.mxu1 %v17956_v41  ;;  %v17127_v62 = vld [vmem:[#allocation8 + $0x64] ss:$8 sps:$4 sm:$0xff]  }
 0x826   :  { %v14064_v51 = vld [vmem:[#allocation11 + $0x1424] ss:$16 sps:$4 sm:$0xff]   ;;  %v14062_v41 = vld [vmem:[#allocation11 + $0x1420] ss:$16 sps:$4 sm:$0xff]  }
 0x827   :  { %7338 = vmatpush1.bf16.msra.mxu0 %v14014_v28  ;;  %v17130_v28 = vld [vmem:[#allocation8 + $0x60] ss:$8 sps:$4 sm:$0xff]  }
 0x828   :  { %7997 = vmatpush1.bf16.msra.mxu1 %v17935_v0  ;;  %7339 = vmatprep.subr.bf16.mxu0 %v14019_v56  ;;  %v14026_v0 = vld [vmem:[#allocation11 + $0x12a8] ss:$16 sps:$4 sm:$0xff]  }
 0x829   :  { %7998 = vmatprep.subr.bf16.mxu1 %v17957_v32  ;;  %v17133_v56 = vld [vmem:[#allocation8 + $0x74] ss:$8 sps:$4 sm:$0xff]   ;;  %v17140_v32 = vld [vmem:[#allocation8 + $0x84] ss:$8 sps:$4 sm:$0xff]  }
 0x82b   :  { %7340 = vmatpush1.bf16.msra.mxu0 %v14017_v8  ;;  %v17137_v8 = vld [vmem:[#allocation8 + $0x70] ss:$8 sps:$4 sm:$0xff]  }
 0x82c   :  { %7999 = vmatpush1.bf16.msra.mxu1 %v17958_v42  ;;  %7341 = vmatprep.subr.bf16.mxu0 %v14022_v27  ;;  %v14067_v27 = vld [vmem:[#allocation11 + $0x1444] ss:$16 sps:$4 sm:$0xff]  }
 0x82d   :  { %8000 = vmatprep.subr.bf16.mxu1 %v17959_v25  ;;  %v17143_v42 = vld [vmem:[#allocation8 + $0x80] ss:$8 sps:$4 sm:$0xff]  }
 0x82e   :  { %v14068_v25 = vld [vmem:[#allocation11 + $0x1460] ss:$16 sps:$4 sm:$0xff]  }
 0x82f   :  { %7342 = vmatpush1.bf16.msra.mxu0 %v14020_v13  ;;  %v14065_v13 = vld [vmem:[#allocation11 + $0x1440] ss:$16 sps:$4 sm:$0xff]  }
 0x830   :  { %8001 = vmatpush1.bf16.msra.mxu1 %v17960_v55  ;;  %7343 = vmatprep.subr.bf16.mxu0 %v14025_v24  ;;  %v17146_v24 = vld [vmem:[#allocation8 + $0x94] ss:$8 sps:$4 sm:$0xff]  }
 0x831   :  { %8002 = vmatprep.subr.bf16.mxu1 %v17961_v22  ;;  %v14073_v55 = vld [vmem:[#allocation11 + $0x1484] ss:$16 sps:$4 sm:$0xff]   ;;  %v14071_v22 = vld [vmem:[#allocation11 + $0x1480] ss:$16 sps:$4 sm:$0xff]  }
 0x833   :  { %7344 = vmatpush1.bf16.msra.mxu0 %v14023_v11  ;;  %v17149_v11 = vld [vmem:[#allocation8 + $0x90] ss:$8 sps:$4 sm:$0xff]  }
 0x834   :  { %8003 = vmatpush1.bf16.msra.mxu1 %v16880_v5  ;;  %v6252_v30 = vpop.f32.mrb[104].mxu0  ;;  %7345 = vmatprep.subr.bf16.mxu0 %v14028_v1  ;;  %v14034_v5 = vld [vmem:[#allocation11 + $0x12ec] ss:$16 sps:$4 sm:$0xff]  }
 0x835   :  { %v17074_v40 = vadd.f32 %v6252_v30, %v16990_v61  ;;  %v6254_v48 = vpop.f32.mrb[105].mxu0  ;;  %8004 = vmatprep.subr.bf16.mxu1 %v17941_v20  ;;  %v14037_v61 = vld [vmem:[#allocation11 + $0x130c] ss:$16 sps:$4 sm:$0xff]   ;;  %v14035_v20 = vld [vmem:[#allocation11 + $0x1308] ss:$16 sps:$4 sm:$0xff]  }
 0x836   :  { %v17078_v6 = vadd.f32 %v6254_v48, %v16994_v7  ;;  %v6256_v52 = vpop.f32.mrb[106].mxu0  ;;  %v14040_v7 = vld [vmem:[#allocation11 + $0x132c] ss:$16 sps:$4 sm:$0xff]   ;;  %v14076_v30 = vld [vmem:[#allocation11 + $0x14a4] ss:$16 sps:$4 sm:$0xff]  }
 0x837   :  { %7346 = vmatpush1.bf16.msra.mxu0 %v14026_v0  ;;  %v6257_v17 = vpop.f32.mrb[107].mxu0  ;;  %v17152_v1 = vld [vmem:[#allocation8 + $0xa4] ss:$8 sps:$4 sm:$0xff]   ;;  %v17155_v0 = vld [vmem:[#allocation8 + $0xa0] ss:$8 sps:$4 sm:$0xff]  }
 0x838   :  { %8005 = vmatpush1.bf16.msra.mxu1 %v16892_v35  ;;  %7347 = vmatprep.subr.bf16.mxu0 %v14031_v38  ;;  %v14038_v35 = vld [vmem:[#allocation11 + $0x1328] ss:$16 sps:$4 sm:$0xff]   ;;  %17963 = vst [vmem:[#allocation38_spill] sm:$0xff] %v17155_v0  ;;  %v14074_v48 = vld [vmem:[#allocation11 + $0x14a0] ss:$16 sps:$4 sm:$0xff]  }
 0x839   :  { %8006 = vmatprep.subr.bf16.mxu1 %v16895_v2  ;;  %v17087_v2 = vld [vmem:[#allocation8 + $0x4] ss:$8 sps:$4 sm:$0xff]   ;;  %v17158_v38 = vld [vmem:[#allocation8 + $0xb4] ss:$8 sps:$4 sm:$0xff]   ;;  %v17161_v52 = vld [vmem:[#allocation8 + $0xb0] ss:$8 sps:$4 sm:$0xff]  }
 0x83a   :  { %17964 = vst [vmem:[#allocation39_spill] sm:$0xff] %v17158_v38  ;;  %v14079_v17 = vld [vmem:[#allocation11 + $0x14c4] ss:$16 sps:$4 sm:$0xff]  }
 0x83b   :  { %7348 = vmatpush1.bf16.msra.mxu0 %v14029_v44 }
 0x83c   :  { %8007 = vmatpush1.bf16.msra.mxu1 %v16898_v16  ;;  %7349 = vmatprep.subr.bf16.mxu0 %v14034_v5  ;;  %v14043_v16 = vld [vmem:[#allocation11 + $0x134c] ss:$16 sps:$4 sm:$0xff]  }
 0x83d   :  { %8008 = vmatprep.subr.bf16.mxu1 %v16901_v23  ;;  %v17962_v23 = vld [vmem:[#allocation37_spill] sm:$0xff]  ;;  %v17164_v5 = vld [vmem:[#allocation8 + $0xc4] ss:$8 sps:$4 sm:$0xff]  }
 0x83f   :  { %7350 = vmatpush1.bf16.msra.mxu0 %v14032_v10 }
 0x840   :  { %8009 = vmatpush1.bf16.msra.mxu1 %v17942_v36  ;;  %7351 = vmatprep.subr.bf16.mxu0 %v14037_v61  ;;  %v17094_v36 = vld [vmem:[#allocation2 + $0x10] sm:$0x1] }
 0x841   :  { %8010 = vmatprep.subr.bf16.mxu1 %v16907_v26  ;;  %v14046_v26 = vld [vmem:[#allocation11 + $0x136c] ss:$16 sps:$4 sm:$0xff]  }
 0x843   :  { %7352 = vmatpush1.bf16.msra.mxu0 %v14035_v20 }
 0x844   :  { %8011 = vmatpush1.bf16.msra.mxu1 %v17943_v4  ;;  %7353 = vmatprep.subr.bf16.mxu0 %v14040_v7  ;;  %v17097_v4 = vld [vmem:[#allocation8 + $0x14] ss:$8 sps:$4 sm:$0xff]  }
 0x845   :  { %8498 = vmatprep.subr.bf16.mxu1 %v17087_v2 }
 0x847   :  { %7354 = vmatpush1.bf16.msra.mxu0 %v14038_v35  ;;  %8013 = vmatmul.mubr.bf16.vlgmr.msra.gmra.mrb[104].mxu1 %v17962_v23  ;;  %v14077_v35 = vld [vmem:[#allocation11 + $0x14c0] ss:$16 sps:$4 sm:$0xff]  }
 0x848   :  { %8499 = vmatpush1.bf16.msra.mxu1 %v17091_v19  ;;  %8530 = vmatprep.mubr.bf16.mxu1 %v17094_v36 }
 0x849   :  { %7355 = vmatprep.subr.bf16.mxu0 %v14043_v16  ;;  %8500 = vmatprep.subr.bf16.mxu1 %v17097_v4  ;;  %v17173_v16 = vld [vmem:[#allocation8 + $0xc0] ss:$8 sps:$4 sm:$0xff]  }
 0x84b   :  { %7356 = vmatpush1.bf16.msra.mxu0 %v14041_v53  ;;  %v14082_v53 = vld [vmem:[#allocation11 + $0x14e4] ss:$16 sps:$4 sm:$0xff]  }
 0x84c   :  { %8501 = vmatpush1.bf16.msra.mxu1 %v17100_v37  ;;  %7357 = vmatprep.subr.bf16.mxu0 %v14046_v26  ;;  %v17176_v26 = vld [vmem:[#allocation8 + $0xd4] ss:$8 sps:$4 sm:$0xff]  }
 0x84d   :  { %8502 = vmatprep.subr.bf16.mxu1 %v17103_v57 }
 0x84f   :  { %7358 = vmatpush1.bf16.msra.mxu0 %v14044_v39  ;;  %v17179_v39 = vld [vmem:[#allocation8 + $0xd0] ss:$8 sps:$4 sm:$0xff]  }
 0x850   :  { %8503 = vmatpush1.bf16.msra.mxu1 %v17106_v31  ;;  %7359 = vmatprep.subr.bf16.mxu0 %v14049_v45  ;;  %v17182_v45 = vld [vmem:[#allocation8 + $0xe4] ss:$8 sps:$4 sm:$0xff]  }
 0x851   :  { %8504 = vmatprep.subr.bf16.mxu1 %v17109_v34 }
 0x853   :  { %7360 = vmatpush1.bf16.msra.mxu0 %v14047_v47  ;;  %v14083_v47 = vld [vmem:[#allocation11 + $0x1500] ss:$16 sps:$4 sm:$0xff]  }
 0x854   :  { %8505 = vmatpush1.bf16.msra.mxu1 %v17112_v29  ;;  %7361 = vmatprep.subr.bf16.mxu0 %v14052_v50  ;;  %v17185_v50 = vld [vmem:[#allocation8 + $0xe0] ss:$8 sps:$4 sm:$0xff]  }
 0x855   :  { %8506 = vmatprep.subr.bf16.mxu1 %v17115_v12 }
 0x857   :  { %7362 = vmatpush1.bf16.msra.mxu0 %v14050_v3  ;;  %v14088_v3 = vld [vmem:[#allocation11 + $0x1524] ss:$16 sps:$4 sm:$0xff]  }
 0x858   :  { %8507 = vmatpush1.bf16.msra.mxu1 %v17118_v18  ;;  %7363 = vmatprep.subr.bf16.mxu0 %v14055_v9  ;;  %v17188_v9 = vld [vmem:[#allocation8 + $0xf4] ss:$8 sps:$4 sm:$0xff]  }
 0x859   :  { %8508 = vmatprep.subr.bf16.mxu1 %v17121_v58 }
 0x85b   :  { %7364 = vmatpush1.bf16.msra.mxu0 %v14053_v14  ;;  %v14086_v14 = vld [vmem:[#allocation11 + $0x1520] ss:$16 sps:$4 sm:$0xff]  }
 0x85c   :  { %8509 = vmatpush1.bf16.msra.mxu1 %v17124_v46  ;;  %7365 = vmatprep.subr.bf16.mxu0 %v14058_v59  ;;  %v17191_v59 = vld [vmem:[#allocation8 + $0xf0] ss:$8 sps:$4 sm:$0xff]  }
 0x85d   :  { %8510 = vmatprep.subr.bf16.mxu1 %v17127_v62 }
 0x85f   :  { %7366 = vmatpush1.bf16.msra.mxu0 %v14056_v49  ;;  %v17194_v49 = vld [vmem:[#allocation8 + $0x104] ss:$8 sps:$4 sm:$0xff]  }
 0x860   :  { %8511 = vmatpush1.bf16.msra.mxu1 %v17130_v28  ;;  %7852 = vmatprep.subr.bf16.mxu0 %v14061_v15  ;;  %v14091_v15 = vld [vmem:[#allocation11 + $0x1544] ss:$16 sps:$4 sm:$0xff]  }
 0x861   :  { %8512 = vmatprep.subr.bf16.mxu1 %v17133_v56 }
 0x862   :  { %7368 = vmatmul.mubr.bf16.vlgmr.msra.gmra.mrb[120].mxu0 %v17059_v63  ;;  %v14070_v63 = vld [vmem:[#allocation11 + $0x1464] ss:$16 sps:$4 sm:$0xff]  }
 0x863   :  { %7853 = vmatpush1.bf16.msra.mxu0 %v14059_v43  ;;  %v15050_v43 = vld [vmem:[#allocation2 + $0xf] sm:$0x1] }
 0x864   :  { %8513 = vmatpush1.bf16.msra.mxu1 %v17137_v8  ;;  %7854 = vmatprep.subr.bf16.mxu0 %v14064_v51  ;;  %v17197_v51 = vld [vmem:[#allocation2 + $0x15] sm:$0x1] }
 0x865   :  { %8514 = vmatprep.subr.bf16.mxu1 %v17140_v32  ;;  %17965 = vst [vmem:[#allocation57_spill] sm:$0xff] %v17197_v51 }
 0x867   :  { %7855 = vmatpush1.bf16.msra.mxu0 %v14062_v41  ;;  %v14089_v41 = vld [vmem:[#allocation11 + $0x1540] ss:$16 sps:$4 sm:$0xff]  }
 0x868   :  { %8515 = vmatpush1.bf16.msra.mxu1 %v17143_v42  ;;  %7856 = vmatprep.subr.bf16.mxu0 %v14067_v27  ;;  %v17199_v27 = vld [vmem:[#allocation8 + $0x100] ss:$8 sps:$4 sm:$0xff]  }
 0x869   :  { %8516 = vmatprep.subr.bf16.mxu1 %v17146_v24 }
 0x86b   :  { %7857 = vmatpush1.bf16.msra.mxu0 %v14065_v13  ;;  %v14094_v13 = vld [vmem:[#allocation11 + $0x1564] ss:$16 sps:$4 sm:$0xff]  }
 0x86c   :  { %8517 = vmatpush1.bf16.msra.mxu1 %v17149_v11  ;;  %7858 = vmatprep.subr.bf16.mxu0 %v14070_v63  ;;  %v17203_v63 = vld [vmem:[#allocation8 + $0x114] ss:$8 sps:$4 sm:$0xff]  }
 0x86d   :  { %8518 = vmatprep.subr.bf16.mxu1 %v17152_v1 }
 0x86f   :  { %7859 = vmatpush1.bf16.msra.mxu0 %v14068_v25  ;;  %v14092_v25 = vld [vmem:[#allocation11 + $0x1560] ss:$16 sps:$4 sm:$0xff]  }
 0x870   :  { %8519 = vmatpush1.bf16.msra.mxu1 %v17155_v0  ;;  %7860 = vmatprep.subr.bf16.mxu0 %v14073_v55  ;;  %v17206_v55 = vld [vmem:[#allocation8 + $0x110] ss:$8 sps:$4 sm:$0xff]  }
 0x871   :  { %8520 = vmatprep.subr.bf16.mxu1 %v17158_v38 }
 0x873   :  { %7861 = vmatpush1.bf16.msra.mxu0 %v14071_v22  ;;  %v14097_v22 = vld [vmem:[#allocation11 + $0x1584] ss:$16 sps:$4 sm:$0xff]  }
 0x874   :  { %8521 = vmatpush1.bf16.msra.mxu1 %v17161_v52  ;;  %7862 = vmatprep.subr.bf16.mxu0 %v14076_v30  ;;  %v17209_v30 = vld [vmem:[#allocation8 + $0x124] ss:$8 sps:$4 sm:$0xff]  }
 0x875   :  { %v6770_v44 = vpop.f32.mrb[108].mxu0  ;;  %8522 = vmatprep.subr.bf16.mxu1 %v17164_v5 }
 0x876   :  { %v17168_v10 = vadd.f32 %v6770_v44, %v17030_v21  ;;  %v6772_v61 = vpop.f32.mrb[109].mxu0  ;;  %v14080_v21 = vld [vmem:[#allocation11 + $0x14e0] ss:$16 sps:$4 sm:$0xff]   ;;  %v14100_v44 = vld [vmem:[#allocation11 + $0x15a4] ss:$16 sps:$4 sm:$0xff]  }
 0x877   :  { %v17171_v20 = vadd.f32 %v6772_v61, %v17034_v54  ;;  %7863 = vmatpush1.bf16.msra.mxu0 %v14074_v48  ;;  %v6774_v7 = vpop.f32.mrb[110].mxu0  ;;  %v14085_v54 = vld [vmem:[#allocation11 + $0x1504] ss:$16 sps:$4 sm:$0xff]   ;;  %v14095_v48 = vld [vmem:[#allocation11 + $0x1580] ss:$16 sps:$4 sm:$0xff]  }
 0x878   :  { %8523 = vmatpush1.bf16.msra.mxu1 %v17173_v16  ;;  %v6775_v23 = vpop.f32.mrb[111].mxu0  ;;  %7864 = vmatprep.subr.bf16.mxu0 %v14079_v17  ;;  %v17212_v17 = vld [vmem:[#allocation8 + $0x120] ss:$8 sps:$4 sm:$0xff]   ;;  %v17215_v61 = vld [vmem:[#allocation8 + $0x134] ss:$8 sps:$4 sm:$0xff]  }
 0x879   :  { %8524 = vmatprep.subr.bf16.mxu1 %v17176_v26  ;;  %17966 = vst [vmem:[#allocation61_spill] sm:$0xff] %v17215_v61  ;;  %v14098_v7 = vld [vmem:[#allocation11 + $0x15a0] ss:$16 sps:$4 sm:$0xff]   ;;  %v14103_v23 = vld [vmem:[#allocation11 + $0x15c4] ss:$16 sps:$4 sm:$0xff]  }
 0x87b   :  { %7865 = vmatpush1.bf16.msra.mxu0 %v14077_v35  ;;  %v17218_v35 = vld [vmem:[#allocation8 + $0x130] ss:$8 sps:$4 sm:$0xff]  }
 0x87c   :  { %8525 = vmatpush1.bf16.msra.mxu1 %v17179_v39  ;;  %7866 = vmatprep.subr.bf16.mxu0 %v14082_v53  ;;  %17967 = vst [vmem:[#allocation43_spill] sm:$0xff] %v17218_v35  ;;  %v17221_v53 = vld [vmem:[#allocation8 + $0x144] ss:$8 sps:$4 sm:$0xff]  }
 0x87d   :  { %8526 = vmatprep.subr.bf16.mxu1 %v17182_v45  ;;  %17968 = vst [vmem:[#allocation45_spill] sm:$0xff] %v17221_v53 }
 0x87f   :  { %7867 = vmatpush1.bf16.msra.mxu0 %v14080_v21  ;;  %v14101_v21 = vld [vmem:[#allocation11 + $0x15c0] ss:$16 sps:$4 sm:$0xff]  }
 0x880   :  { %8527 = vmatpush1.bf16.msra.mxu1 %v17185_v50  ;;  %7868 = vmatprep.subr.bf16.mxu0 %v14085_v54  ;;  %v17224_v54 = vld [vmem:[#allocation8 + $0x140] ss:$8 sps:$4 sm:$0xff]  }
 0x881   :  { %8528 = vmatprep.subr.bf16.mxu1 %v17188_v9  ;;  %17969 = vst [vmem:[#allocation46_spill] sm:$0xff] %v17224_v54 }
 0x883   :  { %7869 = vmatpush1.bf16.msra.mxu0 %v14083_v47  ;;  %v14106_v47 = vld [vmem:[#allocation11 + $0x15e4] ss:$16 sps:$4 sm:$0xff]  }
 0x884   :  { %8529 = vmatpush1.bf16.msra.mxu1 %v17191_v59  ;;  %7870 = vmatprep.subr.bf16.mxu0 %v14088_v3  ;;  %v17227_v3 = vld [vmem:[#allocation8 + $0x154] ss:$8 sps:$4 sm:$0xff]  }
 0x885   :  { %8539 = vmatprep.subr.bf16.mxu1 %v17194_v49  ;;  %17970 = vst [vmem:[#allocation58_spill] sm:$0xff] %v17227_v3 }
 0x887   :  { %7871 = vmatpush1.bf16.msra.mxu0 %v14086_v14  ;;  %8531 = vmatmul.mubr.bf16.vlgmr.msra.gmra.mrb[108].mxu1 %v15050_v43 }
 0x888   :  { %8540 = vmatpush1.bf16.msra.mxu1 %v17199_v27  ;;  %8571 = vmatprep.mubr.bf16.mxu1 %v17197_v51 }
 0x889   :  { %7872 = vmatprep.subr.bf16.mxu0 %v14091_v15  ;;  %8541 = vmatprep.subr.bf16.mxu1 %v17203_v63 }
 0x88b   :  { %7873 = vmatpush1.bf16.msra.mxu0 %v14089_v41  ;;  %v14104_v41 = vld [vmem:[#allocation11 + $0x15e0] ss:$16 sps:$4 sm:$0xff]  }
 0x88c   :  { %8542 = vmatpush1.bf16.msra.mxu1 %v17206_v55  ;;  %7874 = vmatprep.subr.bf16.mxu0 %v14094_v13 }
 0x88d   :  { %8543 = vmatprep.subr.bf16.mxu1 %v17209_v30 }
 0x88f   :  { %7875 = vmatpush1.bf16.msra.mxu0 %v14092_v25 }
 0x890   :  { %8544 = vmatpush1.bf16.msra.mxu1 %v17212_v17  ;;  %7876 = vmatprep.subr.bf16.mxu0 %v14097_v22  ;;  %v17232_v22 = vld [vmem:[#allocation8 + $0x150] ss:$8 sps:$4 sm:$0xff]  }
 0x891   :  { %8545 = vmatprep.subr.bf16.mxu1 %v17215_v61  ;;  %17971 = vst [vmem:[#allocation48_spill] sm:$0xff] %v17232_v22 }
 0x893   :  { %7877 = vmatpush1.bf16.msra.mxu0 %v14095_v48  ;;  %v14109_v48 = vld [vmem:[#allocation11 + $0x140c] ss:$16 sps:$4 sm:$0xff]  }
 0x894   :  { %8546 = vmatpush1.bf16.msra.mxu1 %v17218_v35  ;;  %7878 = vmatprep.subr.bf16.mxu0 %v14100_v44 }
 0x895   :  { %8547 = vmatprep.subr.bf16.mxu1 %v17221_v53 }
 0x897   :  { %7879 = vmatpush1.bf16.msra.mxu0 %v14098_v7 }
 0x898   :  { %8548 = vmatpush1.bf16.msra.mxu1 %v17224_v54  ;;  %7880 = vmatprep.subr.bf16.mxu0 %v14103_v23  ;;  %v17235_v23 = vld [vmem:[#allocation8 + $0x164] ss:$8 sps:$4 sm:$0xff]  }
 0x899   :  { %8549 = vmatprep.subr.bf16.mxu1 %v17227_v3  ;;  %17972 = vst [vmem:[#allocation49_spill] sm:$0xff] %v17235_v23 }
 0x89a   :  { %v7456_v14 = vpop.f32.mrb[100].mxu1 }
 0x89b   :  { %v12905_v15 = vadd.f32 %v7456_v14, %v17953_v60  ;;  %v7458_v43 = vpop.f32.mrb[101].mxu1  ;;  %7881 = vmatpush1.bf16.msra.mxu0 %v14101_v21  ;;  %v17238_v21 = vld [vmem:[#allocation8 + $0x160] ss:$8 sps:$4 sm:$0xff]  }
 0x89c   :  { %v12906_v13 = vadd.f32 %v7458_v43, %v17871_v33  ;;  %v7460_v25 = vpop.f32.mrb[102].mxu1  ;;  %8550 = vmatpush1.bf16.msra.mxu1 %v17232_v22  ;;  %7882 = vmatprep.subr.bf16.mxu0 %v14106_v47  ;;  %17973 = vst [vmem:[#allocation65_spill] sm:$0xff] %v17238_v21  ;;  %v14107_v43 = vld [vmem:[#allocation11 + $0x1408] ss:$16 sps:$4 sm:$0xff]   ;;  %v14112_v47 = vld [vmem:[#allocation11 + $0x142c] ss:$16 sps:$4 sm:$0xff]  }
 0x89d   :  { %v7463_v44 = vmax.f32 %v12905_v15, 0.0  ;;  %v7461_v7 = vpop.f32.mrb[103].mxu1  ;;  %8551 = vmatprep.subr.bf16.mxu1 %v17235_v23  ;;  %v17243_v22 = vld [vmem:[#allocation8 + $0x174] ss:$8 sps:$4 sm:$0xff]   ;;  %v17283_v23 = vld [vmem:[#allocation8 + $0x1c0] ss:$8 sps:$4 sm:$0xff]  }
 0x89e   :  { %v7464_v51 = vmax.f32 %v12906_v13, 0.0  ;;  %17974 = vst [vmem:[#allocation32_spill] sm:$0xff] %v17243_v22  ;;  %v14110_v15 = vld [vmem:[#allocation11 + $0x1428] ss:$16 sps:$4 sm:$0xff]   ;;  %v14118_v7 = vld [vmem:[#allocation11 + $0x146c] ss:$16 sps:$4 sm:$0xff]  }
 0x89f   :  { %7883 = vmatpush1.bf16.msra.mxu0 %v14104_v41  ;;  %v17241_v25 = vpack.c.bf16 %v7463_v44, %v7463_v44  ;;  %v14115_v41 = vld [vmem:[#allocation11 + $0x144c] ss:$16 sps:$4 sm:$0xff]  }
 0x8a0   :  { %v7466_v14 = vpack.c.bf16 %v7464_v51, %v7464_v51  ;;  %8552 = vmatpush1.bf16.msra.mxu1 %v17238_v21  ;;  %7893 = vmatprep.subr.bf16.mxu0 %v14109_v48  ;;  %v17247_v51 = vld [vmem:[#allocation8 + $0x170] ss:$8 sps:$4 sm:$0xff]   ;;  %v17250_v13 = vld [vmem:[#allocation8 + $0x184] ss:$8 sps:$4 sm:$0xff]   ;;  %v17253_v44 = vld [vmem:[#allocation8 + $0x180] ss:$8 sps:$4 sm:$0xff]  }
 0x8a1   :  { %8553 = vmatprep.subr.bf16.mxu1 %v17243_v22  ;;  %17975 = vst [vmem:[#allocation44_spill] sm:$0xff] %v17247_v51  ;;  %17976 = vst [vmem:[#allocation47_spill] sm:$0xff] %v17250_v13  ;;  %v14113_v48 = vld [vmem:[#allocation11 + $0x1448] ss:$16 sps:$4 sm:$0xff]  }
 0x8a2   :  { %7884 = vmatprep.mubr.bf16.mxu0 %v7466_v14  ;;  %17977 = vst [vmem:[#allocation34_spill] sm:$0xff] %v17253_v44  ;;  %v14125_v21 = vld [vmem:[#allocation11 + $0x14c8] ss:$16 sps:$4 sm:$0xff]  }
 0x8a3   :  { %7885 = vmatmul.mubr.bf16.vlgmr.msra.gmra.mrb[124].mxu0 %v17241_v25 }
 0x8a4   :  { %7894 = vmatpush1.bf16.msra.mxu0 %v14107_v43  ;;  %7925 = vmatprep.mubr.bf16.mxu0 %v7466_v14  ;;  %v17256_v14 = vld [vmem:[#allocation8 + $0x194] ss:$8 sps:$4 sm:$0xff]  }
 0x8a5   :  { %8554 = vmatpush1.bf16.msra.mxu1 %v17247_v51  ;;  %7895 = vmatprep.subr.bf16.mxu0 %v14112_v47  ;;  %17978 = vst [vmem:[#allocation35_spill] sm:$0xff] %v17256_v14  ;;  %v14116_v43 = vld [vmem:[#allocation11 + $0x1468] ss:$16 sps:$4 sm:$0xff]  }
 0x8a6   :  { %8555 = vmatprep.subr.bf16.mxu1 %v17250_v13  ;;  %v17259_v47 = vld [vmem:[#allocation8 + $0x190] ss:$8 sps:$4 sm:$0xff]  }
 0x8a7   :  { %17979 = vst [vmem:[#allocation55_spill] sm:$0xff] %v17259_v47  ;;  %v14121_v13 = vld [vmem:[#allocation11 + $0x148c] ss:$16 sps:$4 sm:$0xff]  }
 0x8a8   :  { %7896 = vmatpush1.bf16.msra.mxu0 %v14110_v15  ;;  %v17262_v15 = vld [vmem:[#allocation8 + $0x1a4] ss:$8 sps:$4 sm:$0xff]  }
 0x8a9   :  { %8556 = vmatpush1.bf16.msra.mxu1 %v17253_v44  ;;  %7897 = vmatprep.subr.bf16.mxu0 %v14115_v41  ;;  %17980 = vst [vmem:[#allocation53_spill] sm:$0xff] %v17262_v15  ;;  %v14119_v44 = vld [vmem:[#allocation11 + $0x1488] ss:$16 sps:$4 sm:$0xff]  }
 0x8aa   :  { %8557 = vmatprep.subr.bf16.mxu1 %v17256_v14  ;;  %v17265_v41 = vld [vmem:[#allocation8 + $0x1a0] ss:$8 sps:$4 sm:$0xff]  }
 0x8ab   :  { %17981 = vst [vmem:[#allocation54_spill] sm:$0xff] %v17265_v41  ;;  %v14124_v14 = vld [vmem:[#allocation11 + $0x14ac] ss:$16 sps:$4 sm:$0xff]  }
 0x8ac   :  { %7898 = vmatpush1.bf16.msra.mxu0 %v14113_v48  ;;  %v17268_v48 = vld [vmem:[#allocation8 + $0x1b4] ss:$8 sps:$4 sm:$0xff]  }
 0x8ad   :  { %8558 = vmatpush1.bf16.msra.mxu1 %v17259_v47  ;;  %7899 = vmatprep.subr.bf16.mxu0 %v14118_v7  ;;  %17982 = vst [vmem:[#allocation36_spill] sm:$0xff] %v17268_v48  ;;  %v14122_v47 = vld [vmem:[#allocation11 + $0x14a8] ss:$16 sps:$4 sm:$0xff]  }
 0x8ae   :  { %8559 = vmatprep.subr.bf16.mxu1 %v17262_v15  ;;  %v17271_v7 = vld [vmem:[#allocation8 + $0x1b0] ss:$8 sps:$4 sm:$0xff]  }
 0x8b0   :  { %7900 = vmatpush1.bf16.msra.mxu0 %v14116_v43  ;;  %v14127_v43 = vld [vmem:[#allocation11 + $0x14cc] ss:$16 sps:$4 sm:$0xff]  }
 0x8b1   :  { %8560 = vmatpush1.bf16.msra.mxu1 %v17265_v41  ;;  %7901 = vmatprep.subr.bf16.mxu0 %v14121_v13  ;;  %v17277_v41 = vld [vmem:[#allocation8 + $0x1c4] ss:$8 sps:$4 sm:$0xff]  }
 0x8b2   :  { %8561 = vmatprep.subr.bf16.mxu1 %v17268_v48  ;;  %17983 = vst [vmem:[#allocation56_spill] sm:$0xff] %v17277_v41 }
 0x8b4   :  { %7902 = vmatpush1.bf16.msra.mxu0 %v14119_v44 }
 0x8b5   :  { %8562 = vmatpush1.bf16.msra.mxu1 %v17271_v7  ;;  %v6811_v51 = vpop.f32.mrb[112].mxu0  ;;  %7903 = vmatprep.subr.bf16.mxu0 %v14124_v14  ;;  %v14130_v14 = vld [vmem:[#allocation11 + $0x14ec] ss:$16 sps:$4 sm:$0xff]  }
 0x8b6   :  { %v17275_v15 = vadd.f32 %v6811_v51, %v17074_v40  ;;  %v6813_v22 = vpop.f32.mrb[113].mxu0  ;;  %8563 = vmatprep.subr.bf16.mxu1 %v17277_v41  ;;  %v17286_v40 = vld [vmem:[#allocation8 + $0x1d4] ss:$8 sps:$4 sm:$0xff]   ;;  %v17289_v41 = vld [vmem:[#allocation8 + $0x1d0] ss:$8 sps:$4 sm:$0xff]  }
 0x8b7   :  { %v17281_v13 = vadd.f32 %v6813_v22, %v17078_v6  ;;  %v6815_v44 = vpop.f32.mrb[114].mxu0  ;;  %v14128_v51 = vld [vmem:[#allocation11 + $0x14e8] ss:$16 sps:$4 sm:$0xff]   ;;  %v14133_v6 = vld [vmem:[#allocation11 + $0x150c] ss:$16 sps:$4 sm:$0xff]  }
 0x8b8   :  { %7904 = vmatpush1.bf16.msra.mxu0 %v14122_v47  ;;  %v6816_v48 = vpop.f32.mrb[115].mxu0  ;;  %v17292_v22 = vld [vmem:[#allocation8 + $0x1e4] ss:$8 sps:$4 sm:$0xff]  }
 0x8b9   :  { %8564 = vmatpush1.bf16.msra.mxu1 %v17283_v23  ;;  %7905 = vmatprep.subr.bf16.mxu0 %v14127_v43  ;;  %17984 = vst [vmem:[#allocation59_spill] sm:$0xff] %v17292_v22  ;;  %v14131_v47 = vld [vmem:[#allocation11 + $0x1508] ss:$16 sps:$4 sm:$0xff]   ;;  %v14136_v43 = vld [vmem:[#allocation11 + $0x152c] ss:$16 sps:$4 sm:$0xff]  }
 0x8ba   :  { %8565 = vmatprep.subr.bf16.mxu1 %v17286_v40  ;;  %v17295_v48 = vld [vmem:[#allocation8 + $0x1e0] ss:$8 sps:$4 sm:$0xff]  }
 0x8bb   :  { %17985 = vst [vmem:[#allocation62_spill] sm:$0xff] %v17295_v48  ;;  %v14134_v44 = vld [vmem:[#allocation11 + $0x1528] ss:$16 sps:$4 sm:$0xff]  }
 0x8bc   :  { %7906 = vmatpush1.bf16.msra.mxu0 %v14125_v21  ;;  %v17298_v21 = vld [vmem:[#allocation8 + $0x1f4] ss:$8 sps:$4 sm:$0xff]  }
 0x8bd   :  { %8566 = vmatpush1.bf16.msra.mxu1 %v17289_v41  ;;  %7907 = vmatprep.subr.bf16.mxu0 %v14130_v14  ;;  %v17301_v14 = vld [vmem:[#allocation8 + $0x1f0] ss:$8 sps:$4 sm:$0xff]  }
 0x8be   :  { %8567 = vmatprep.subr.bf16.mxu1 %v17292_v22  ;;  %17986 = vst [vmem:[#allocation64_spill] sm:$0xff] %v17301_v14  ;;  %v8496_v22 = vld [vmem:[#allocation2 + $0x14] sm:$0x1] }
 0x8c0   :  { %7908 = vmatpush1.bf16.msra.mxu0 %v14128_v51  ;;  %v14139_v51 = vld [vmem:[#allocation11 + $0x154c] ss:$16 sps:$4 sm:$0xff]  }
 0x8c1   :  { %8568 = vmatpush1.bf16.msra.mxu1 %v17295_v48  ;;  %7909 = vmatprep.subr.bf16.mxu0 %v14133_v6  ;;  %v14137_v48 = vld [vmem:[#allocation11 + $0x1548] ss:$16 sps:$4 sm:$0xff]   ;;  %v17306_v6 = vld [vmem:[#allocation2 + $0x11] sm:$0x1] }
 0x8c2   :  { %8569 = vmatprep.subr.bf16.mxu1 %v17298_v21  ;;  %17987 = vst [vmem:[#allocation63_spill] sm:$0xff] %v17306_v6 }
 0x8c4   :  { %7910 = vmatpush1.bf16.msra.mxu0 %v14131_v47  ;;  %v14142_v47 = vld [vmem:[#allocation11 + $0x156c] ss:$16 sps:$4 sm:$0xff]  }
 0x8c5   :  { %8570 = vmatpush1.bf16.msra.mxu1 %v17301_v14  ;;  %7911 = vmatprep.subr.bf16.mxu0 %v14136_v43  ;;  %v14140_v14 = vld [vmem:[#allocation11 + $0x1568] ss:$16 sps:$4 sm:$0xff]   ;;  %v14145_v43 = vld [vmem:[#allocation11 + $0x158c] ss:$16 sps:$4 sm:$0xff]  }
 0x8c6   :  { %9056 = vmatprep.subr.bf16.mxu1 %v17087_v2 }
 0x8c8   :  { %7912 = vmatpush1.bf16.msra.mxu0 %v14134_v44  ;;  %8572 = vmatmul.mubr.bf16.vlgmr.msra.gmra.mrb[108].mxu1 %v8496_v22  ;;  %v14143_v22 = vld [vmem:[#allocation11 + $0x1588] ss:$16 sps:$4 sm:$0xff]   ;;  %v14148_v44 = vld [vmem:[#allocation11 + $0x15ac] ss:$16 sps:$4 sm:$0xff]  }
 0x8c9   :  { %9057 = vmatpush1.bf16.msra.mxu1 %v17091_v19  ;;  %9088 = vmatprep.mubr.bf16.mxu1 %v17306_v6 }
 0x8ca   :  { %7913 = vmatprep.subr.bf16.mxu0 %v14139_v51  ;;  %9058 = vmatprep.subr.bf16.mxu1 %v17097_v4  ;;  %v14146_v51 = vld [vmem:[#allocation11 + $0x15a8] ss:$16 sps:$4 sm:$0xff]  }
 0x8cc   :  { %7914 = vmatpush1.bf16.msra.mxu0 %v14137_v48  ;;  %v14151_v48 = vld [vmem:[#allocation11 + $0x15cc] ss:$16 sps:$4 sm:$0xff]  }
 0x8cd   :  { %9059 = vmatpush1.bf16.msra.mxu1 %v17100_v37  ;;  %7915 = vmatprep.subr.bf16.mxu0 %v14142_v47  ;;  %v14149_v47 = vld [vmem:[#allocation11 + $0x15c8] ss:$16 sps:$4 sm:$0xff]  }
 0x8ce   :  { %9060 = vmatprep.subr.bf16.mxu1 %v17103_v57 }
 0x8d0   :  { %7916 = vmatpush1.bf16.msra.mxu0 %v14140_v14  ;;  %v14154_v14 = vld [vmem:[#allocation11 + $0x15ec] ss:$16 sps:$4 sm:$0xff]  }
 0x8d1   :  { %9061 = vmatpush1.bf16.msra.mxu1 %v17106_v31  ;;  %7917 = vmatprep.subr.bf16.mxu0 %v14145_v43  ;;  %v14152_v43 = vld [vmem:[#allocation11 + $0x15e8] ss:$16 sps:$4 sm:$0xff]  }
 0x8d2   :  { %9062 = vmatprep.subr.bf16.mxu1 %v17109_v34 }
 0x8d4   :  { %7918 = vmatpush1.bf16.msra.mxu0 %v14143_v22  ;;  %v14157_v22 = vld [vmem:[#allocation11 + $0x1604] ss:$16 sps:$4 sm:$0xff]  }
 0x8d5   :  { %9063 = vmatpush1.bf16.msra.mxu1 %v17112_v29  ;;  %7919 = vmatprep.subr.bf16.mxu0 %v14148_v44  ;;  %v14155_v44 = vld [vmem:[#allocation11 + $0x1600] ss:$16 sps:$4 sm:$0xff]  }
 0x8d6   :  { %9064 = vmatprep.subr.bf16.mxu1 %v17115_v12 }
 0x8d8   :  { %7920 = vmatpush1.bf16.msra.mxu0 %v14146_v51  ;;  %v14160_v51 = vld [vmem:[#allocation11 + $0x1624] ss:$16 sps:$4 sm:$0xff]  }
 0x8d9   :  { %9065 = vmatpush1.bf16.msra.mxu1 %v17118_v18  ;;  %7921 = vmatprep.subr.bf16.mxu0 %v14151_v48  ;;  %v14158_v48 = vld [vmem:[#allocation11 + $0x1620] ss:$16 sps:$4 sm:$0xff]  }
 0x8da   :  { %9066 = vmatprep.subr.bf16.mxu1 %v17121_v58 }
 0x8dc   :  { %7922 = vmatpush1.bf16.msra.mxu0 %v14149_v47  ;;  %v14163_v47 = vld [vmem:[#allocation11 + $0x1644] ss:$16 sps:$4 sm:$0xff]  }
 0x8dd   :  { %9067 = vmatpush1.bf16.msra.mxu1 %v17124_v46  ;;  %7923 = vmatprep.subr.bf16.mxu0 %v14154_v14  ;;  %v14161_v14 = vld [vmem:[#allocation11 + $0x1640] ss:$16 sps:$4 sm:$0xff]  }
 0x8de   :  { %9068 = vmatprep.subr.bf16.mxu1 %v17127_v62 }
 0x8e0   :  { %7924 = vmatpush1.bf16.msra.mxu0 %v14152_v43  ;;  %v14166_v43 = vld [vmem:[#allocation11 + $0x1664] ss:$16 sps:$4 sm:$0xff]  }
 0x8e1   :  { %9069 = vmatpush1.bf16.msra.mxu1 %v17130_v28  ;;  %8410 = vmatprep.subr.bf16.mxu0 %v14157_v22  ;;  %v14164_v22 = vld [vmem:[#allocation11 + $0x1660] ss:$16 sps:$4 sm:$0xff]  }
 0x8e2   :  { %9070 = vmatprep.subr.bf16.mxu1 %v17133_v56 }
 0x8e3   :  { %7926 = vmatmul.mubr.bf16.vlgmr.msra.gmra.mrb[128].mxu0 %v17241_v25  ;;  %v14169_v25 = vld [vmem:[#allocation11 + $0x1684] ss:$16 sps:$4 sm:$0xff]  }
 0x8e4   :  { %8411 = vmatpush1.bf16.msra.mxu0 %v14155_v44  ;;  %v14167_v44 = vld [vmem:[#allocation11 + $0x1680] ss:$16 sps:$4 sm:$0xff]  }
 0x8e5   :  { %9071 = vmatpush1.bf16.msra.mxu1 %v17137_v8  ;;  %8412 = vmatprep.subr.bf16.mxu0 %v14160_v51  ;;  %v14172_v51 = vld [vmem:[#allocation11 + $0x16a4] ss:$16 sps:$4 sm:$0xff]  }
 0x8e6   :  { %9072 = vmatprep.subr.bf16.mxu1 %v17140_v32 }
 0x8e8   :  { %8413 = vmatpush1.bf16.msra.mxu0 %v14158_v48  ;;  %v14170_v48 = vld [vmem:[#allocation11 + $0x16a0] ss:$16 sps:$4 sm:$0xff]  }
 0x8e9   :  { %9073 = vmatpush1.bf16.msra.mxu1 %v17143_v42  ;;  %8414 = vmatprep.subr.bf16.mxu0 %v14163_v47 }
 0x8ea   :  { %9074 = vmatprep.subr.bf16.mxu1 %v17146_v24 }
 0x8ec   :  { %8415 = vmatpush1.bf16.msra.mxu0 %v14161_v14  ;;  %v14175_v14 = vld [vmem:[#allocation11 + $0x16c4] ss:$16 sps:$4 sm:$0xff]  }
 0x8ed   :  { %9075 = vmatpush1.bf16.msra.mxu1 %v17149_v11  ;;  %8416 = vmatprep.subr.bf16.mxu0 %v14166_v43 }
 0x8ee   :  { %9076 = vmatprep.subr.bf16.mxu1 %v17152_v1 }
 0x8f0   :  { %8417 = vmatpush1.bf16.msra.mxu0 %v14164_v22 }
 0x8f1   :  { %9077 = vmatpush1.bf16.msra.mxu1 %v17155_v0  ;;  %8418 = vmatprep.subr.bf16.mxu0 %v14169_v25 }
 0x8f2   :  { %9078 = vmatprep.subr.bf16.mxu1 %v17158_v38  ;;  %v14173_v38 = vld [vmem:[#allocation11 + $0x16c0] ss:$16 sps:$4 sm:$0xff]  }
 0x8f4   :  { %8419 = vmatpush1.bf16.msra.mxu0 %v14167_v44  ;;  %v14178_v44 = vld [vmem:[#allocation11 + $0x16e4] ss:$16 sps:$4 sm:$0xff]  }
 0x8f5   :  { %9079 = vmatpush1.bf16.msra.mxu1 %v17161_v52  ;;  %v7328_v47 = vpop.f32.mrb[116].mxu0  ;;  %8420 = vmatprep.subr.bf16.mxu0 %v14172_v51  ;;  %v14176_v51 = vld [vmem:[#allocation11 + $0x16e0] ss:$16 sps:$4 sm:$0xff]  }
 0x8f6   :  { %v17333_v43 = vadd.f32 %v7328_v47, %v17168_v10  ;;  %v7330_v6 = vpop.f32.mrb[117].mxu0  ;;  %9080 = vmatprep.subr.bf16.mxu1 %v17164_v5  ;;  %v14181_v10 = vld [vmem:[#allocation11 + $0x1704] ss:$16 sps:$4 sm:$0xff]   ;;  %v14185_v47 = vld [vmem:[#allocation11 + $0x1740] ss:$16 sps:$4 sm:$0xff]  }
 0x8f7   :  { %v17337_v22 = vadd.f32 %v7330_v6, %v17171_v20  ;;  %v7332_v25 = vpop.f32.mrb[118].mxu0  ;;  %v14179_v20 = vld [vmem:[#allocation11 + $0x1700] ss:$16 sps:$4 sm:$0xff]  }
 0x8f8   :  { %8421 = vmatpush1.bf16.msra.mxu0 %v14170_v48  ;;  %v7333_v0 = vpop.f32.mrb[119].mxu0  ;;  %v14182_v6 = vld [vmem:[#allocation11 + $0x1720] ss:$16 sps:$4 sm:$0xff]  }
 0x8f9   :  { %9081 = vmatpush1.bf16.msra.mxu1 %v17173_v16  ;;  %8422 = vmatprep.subr.bf16.mxu0 %v14175_v14  ;;  %v14184_v0 = vld [vmem:[#allocation11 + $0x1724] ss:$16 sps:$4 sm:$0xff]   ;;  %v17348_v48 = vld [vmem:[#allocation2 + $0x16] sm:$0x1] }
 0x8fa   :  { %9082 = vmatprep.subr.bf16.mxu1 %v17176_v26  ;;  %17988 = vst [vmem:[#allocation31_spill] sm:$0xff] %v17348_v48  ;;  %v14190_v14 = vld [vmem:[#allocation11 + $0x1764] ss:$16 sps:$4 sm:$0xff]   ;;  %v14188_v25 = vld [vmem:[#allocation11 + $0x1760] ss:$16 sps:$4 sm:$0xff]  }
 0x8fc   :  { %8423 = vmatpush1.bf16.msra.mxu0 %v14173_v38  ;;  %v14187_v38 = vld [vmem:[#allocation11 + $0x1744] ss:$16 sps:$4 sm:$0xff]  }
 0x8fd   :  { %9083 = vmatpush1.bf16.msra.mxu1 %v17179_v39  ;;  %8424 = vmatprep.subr.bf16.mxu0 %v14178_v44  ;;  %v14193_v44 = vld [vmem:[#allocation11 + $0x1784] ss:$16 sps:$4 sm:$0xff]  }
 0x8fe   :  { %9084 = vmatprep.subr.bf16.mxu1 %v17182_v45 }
 0x900   :  { %8425 = vmatpush1.bf16.msra.mxu0 %v14176_v51  ;;  %v14196_v51 = vld [vmem:[#allocation11 + $0x17a4] ss:$16 sps:$4 sm:$0xff]  }
 0x901   :  { %9085 = vmatpush1.bf16.msra.mxu1 %v17185_v50  ;;  %8426 = vmatprep.subr.bf16.mxu0 %v14181_v10  ;;  %v14194_v10 = vld [vmem:[#allocation11 + $0x17a0] ss:$16 sps:$4 sm:$0xff]  }
 0x902   :  { %9086 = vmatprep.subr.bf16.mxu1 %v17188_v9 }
 0x904   :  { %8427 = vmatpush1.bf16.msra.mxu0 %v14179_v20  ;;  %v14199_v20 = vld [vmem:[#allocation11 + $0x17c4] ss:$16 sps:$4 sm:$0xff]  }
 0x905   :  { %9087 = vmatpush1.bf16.msra.mxu1 %v17191_v59  ;;  %8428 = vmatprep.subr.bf16.mxu0 %v14184_v0  ;;  %v14197_v0 = vld [vmem:[#allocation11 + $0x17c0] ss:$16 sps:$4 sm:$0xff]  }
 0x906   :  { %9097 = vmatprep.subr.bf16.mxu1 %v17194_v49 }
 0x908   :  { %8429 = vmatpush1.bf16.msra.mxu0 %v14182_v6  ;;  %9089 = vmatmul.mubr.bf16.vlgmr.msra.gmra.mrb[112].mxu1 %v17094_v36  ;;  %v14191_v36 = vld [vmem:[#allocation11 + $0x1780] ss:$16 sps:$4 sm:$0xff]   ;;  %v14202_v6 = vld [vmem:[#allocation11 + $0x17e4] ss:$16 sps:$4 sm:$0xff]  }
 0x909   :  { %9098 = vmatpush1.bf16.msra.mxu1 %v17199_v27  ;;  %9129 = vmatprep.mubr.bf16.mxu1 %v17348_v48  ;;  %v17989_v48 = vld [vmem:[#allocation48_spill] sm:$0xff] }
 0x90a   :  { %8430 = vmatprep.subr.bf16.mxu0 %v14187_v38  ;;  %9099 = vmatprep.subr.bf16.mxu1 %v17203_v63 }
 0x90c   :  { %8431 = vmatpush1.bf16.msra.mxu0 %v14185_v47 }
 0x90d   :  { %9100 = vmatpush1.bf16.msra.mxu1 %v17206_v55  ;;  %8432 = vmatprep.subr.bf16.mxu0 %v14190_v14 }
 0x90e   :  { %9101 = vmatprep.subr.bf16.mxu1 %v17209_v30 }
 0x910   :  { %8433 = vmatpush1.bf16.msra.mxu0 %v14188_v25 }
 0x911   :  { %9102 = vmatpush1.bf16.msra.mxu1 %v17212_v17  ;;  %8434 = vmatprep.subr.bf16.mxu0 %v14193_v44 }
 0x912   :  { %9103 = vmatprep.subr.bf16.mxu1 %v17215_v61 }
 0x914   :  { %8435 = vmatpush1.bf16.msra.mxu0 %v14191_v36  ;;  %v14200_v36 = vld [vmem:[#allocation11 + $0x17e0] ss:$16 sps:$4 sm:$0xff]  }
 0x915   :  { %9104 = vmatpush1.bf16.msra.mxu1 %v17218_v35  ;;  %8436 = vmatprep.subr.bf16.mxu0 %v14196_v51 }
 0x916   :  { %9105 = vmatprep.subr.bf16.mxu1 %v17221_v53  ;;  %v14205_v53 = vld [vmem:[#allocation11 + $0x160c] ss:$16 sps:$4 sm:$0xff]  }
 0x918   :  { %8437 = vmatpush1.bf16.msra.mxu0 %v14194_v10 }
 0x919   :  { %9106 = vmatpush1.bf16.msra.mxu1 %v17224_v54  ;;  %8438 = vmatprep.subr.bf16.mxu0 %v14199_v20  ;;  %v17990_v20 = vld [vmem:[#allocation49_spill] sm:$0xff] }
 0x91a   :  { %v8014_v38 = vpop.f32.mrb[104].mxu1  ;;  %9107 = vmatprep.subr.bf16.mxu1 %v17227_v3  ;;  %v14203_v3 = vld [vmem:[#allocation11 + $0x1608] ss:$16 sps:$4 sm:$0xff]  }
 0x91b   :  { %v12907_v47 = vadd.f32 %v8014_v38, %v17953_v60  ;;  %v8016_v14 = vpop.f32.mrb[105].mxu1  ;;  %v17991_v38 = vld [vmem:[#allocation65_spill] sm:$0xff] }
 0x91c   :  { %v12908_v25 = vadd.f32 %v8016_v14, %v17871_v33  ;;  %8439 = vmatpush1.bf16.msra.mxu0 %v14197_v0  ;;  %v8018_v44 = vpop.f32.mrb[106].mxu1  ;;  %v14208_v0 = vld [vmem:[#allocation11 + $0x162c] ss:$16 sps:$4 sm:$0xff]  }
 0x91d   :  { %v8021_v51 = vmax.f32 %v12907_v47, 0.0  ;;  %9108 = vmatpush1.bf16.msra.mxu1 %v17989_v48  ;;  %v8019_v10 = vpop.f32.mrb[107].mxu1  ;;  %8440 = vmatprep.subr.bf16.mxu0 %v14202_v6  ;;  %v17992_v14 = vld [vmem:[#allocation32_spill] sm:$0xff] }
 0x91e   :  { %v8022_v54 = vmax.f32 %v12908_v25, 0.0  ;;  %9109 = vmatprep.subr.bf16.mxu1 %v17990_v20  ;;  %v14206_v6 = vld [vmem:[#allocation11 + $0x1628] ss:$16 sps:$4 sm:$0xff]  }
 0x91f   :  { %v17365_v61 = vpack.c.bf16 %v8021_v51, %v8021_v51  ;;  %v17993_v47 = vld [vmem:[#allocation44_spill] sm:$0xff]  ;;  %v17994_v25 = vld [vmem:[#allocation47_spill] sm:$0xff] }
 0x920   :  { %v8024_v35 = vpack.c.bf16 %v8022_v54, %v8022_v54  ;;  %8441 = vmatpush1.bf16.msra.mxu0 %v14200_v36  ;;  %v14211_v54 = vld [vmem:[#allocation11 + $0x164c] ss:$16 sps:$4 sm:$0xff]   ;;  %v14209_v44 = vld [vmem:[#allocation11 + $0x1648] ss:$16 sps:$4 sm:$0xff]  }
 0x921   :  { %9110 = vmatpush1.bf16.msra.mxu1 %v17991_v38  ;;  %8451 = vmatprep.subr.bf16.mxu0 %v14205_v53  ;;  %v17995_v36 = vld [vmem:[#allocation34_spill] sm:$0xff]  ;;  %v17996_v51 = vld [vmem:[#allocation35_spill] sm:$0xff] }
 0x922   :  { %8442 = vmatprep.mubr.bf16.mxu0 %v8024_v35  ;;  %9111 = vmatprep.subr.bf16.mxu1 %v17992_v14  ;;  %v14214_v53 = vld [vmem:[#allocation11 + $0x166c] ss:$16 sps:$4 sm:$0xff]   ;;  %v14212_v10 = vld [vmem:[#allocation11 + $0x1668] ss:$16 sps:$4 sm:$0xff]  }
 0x923   :  { %8443 = vmatmul.mubr.bf16.vlgmr.msra.gmra.mrb[132].mxu0 %v17365_v61  ;;  %v17997_v14 = vld [vmem:[#allocation55_spill] sm:$0xff] }
 0x924   :  { %8452 = vmatpush1.bf16.msra.mxu0 %v14203_v3  ;;  %8483 = vmatprep.mubr.bf16.mxu0 %v8024_v35  ;;  %v14217_v35 = vld [vmem:[#allocation11 + $0x168c] ss:$16 sps:$4 sm:$0xff]   ;;  %v17998_v3 = vld [vmem:[#allocation53_spill] sm:$0xff] }
 0x925   :  { %9112 = vmatpush1.bf16.msra.mxu1 %v17993_v47  ;;  %8453 = vmatprep.subr.bf16.mxu0 %v14208_v0  ;;  %v14215_v0 = vld [vmem:[#allocation11 + $0x1688] ss:$16 sps:$4 sm:$0xff]  }
 0x926   :  { %9113 = vmatprep.subr.bf16.mxu1 %v17994_v25  ;;  %v17999_v47 = vld [vmem:[#allocation54_spill] sm:$0xff]  ;;  %v18000_v25 = vld [vmem:[#allocation36_spill] sm:$0xff] }
 0x928   :  { %8454 = vmatpush1.bf16.msra.mxu0 %v14206_v6  ;;  %v14220_v6 = vld [vmem:[#allocation11 + $0x16ac] ss:$16 sps:$4 sm:$0xff]  }
 0x929   :  { %9114 = vmatpush1.bf16.msra.mxu1 %v17995_v36  ;;  %8455 = vmatprep.subr.bf16.mxu0 %v14211_v54  ;;  %v14218_v54 = vld [vmem:[#allocation11 + $0x16a8] ss:$16 sps:$4 sm:$0xff]  }
 0x92a   :  { %9115 = vmatprep.subr.bf16.mxu1 %v17996_v51  ;;  %v14223_v51 = vld [vmem:[#allocation11 + $0x16cc] ss:$16 sps:$4 sm:$0xff]  }
 0x92c   :  { %8456 = vmatpush1.bf16.msra.mxu0 %v14209_v44 }
 0x92d   :  { %9116 = vmatpush1.bf16.msra.mxu1 %v17997_v14  ;;  %8457 = vmatprep.subr.bf16.mxu0 %v14214_v53 }
 0x92e   :  { %9117 = vmatprep.subr.bf16.mxu1 %v17998_v3  ;;  %v18001_v3 = vld [vmem:[#allocation56_spill] sm:$0xff] }
 0x930   :  { %8458 = vmatpush1.bf16.msra.mxu0 %v14212_v10 }
 0x931   :  { %9118 = vmatpush1.bf16.msra.mxu1 %v17999_v47  ;;  %8459 = vmatprep.subr.bf16.mxu0 %v14217_v35 }
 0x932   :  { %9119 = vmatprep.subr.bf16.mxu1 %v18000_v25  ;;  %v14221_v25 = vld [vmem:[#allocation11 + $0x16c8] ss:$16 sps:$4 sm:$0xff]  }
 0x934   :  { %8460 = vmatpush1.bf16.msra.mxu0 %v14215_v0  ;;  %v14226_v0 = vld [vmem:[#allocation11 + $0x16ec] ss:$16 sps:$4 sm:$0xff]  }
 0x935   :  { %9120 = vmatpush1.bf16.msra.mxu1 %v17271_v7  ;;  %v7369_v44 = vpop.f32.mrb[120].mxu0  ;;  %8461 = vmatprep.subr.bf16.mxu0 %v14220_v6  ;;  %v14224_v6 = vld [vmem:[#allocation11 + $0x16e8] ss:$16 sps:$4 sm:$0xff]  }
 0x936   :  { %v17380_v53 = vadd.f32 %v7369_v44, %v17275_v15  ;;  %v7371_v14 = vpop.f32.mrb[121].mxu0  ;;  %9121 = vmatprep.subr.bf16.mxu1 %v18001_v3  ;;  %v14229_v15 = vld [vmem:[#allocation11 + $0x170c] ss:$16 sps:$4 sm:$0xff]   ;;  %v18002_v44 = vld [vmem:[#allocation59_spill] sm:$0xff] }
 0x937   :  { %v17384_v10 = vadd.f32 %v7371_v14, %v17281_v13  ;;  %v7373_v35 = vpop.f32.mrb[122].mxu0  ;;  %v14227_v13 = vld [vmem:[#allocation11 + $0x1708] ss:$16 sps:$4 sm:$0xff]  }
 0x938   :  { %8462 = vmatpush1.bf16.msra.mxu0 %v14218_v54  ;;  %v7374_v47 = vpop.f32.mrb[123].mxu0  ;;  %v18003_v14 = vld [vmem:[#allocation62_spill] sm:$0xff]  ;;  %v18004_v54 = vld [vmem:[#allocation64_spill] sm:$0xff]  ;;  %v18005_v35 = vld [vmem:[#allocation57_spill] sm:$0xff] }
 0x939   :  { %9122 = vmatpush1.bf16.msra.mxu1 %v17283_v23  ;;  %8463 = vmatprep.subr.bf16.mxu0 %v14223_v51  ;;  %v14232_v47 = vld [vmem:[#allocation11 + $0x172c] ss:$16 sps:$4 sm:$0xff]   ;;  %v14230_v51 = vld [vmem:[#allocation11 + $0x1728] ss:$16 sps:$4 sm:$0xff]  }
 0x93a   :  { %9123 = vmatprep.subr.bf16.mxu1 %v17286_v40 }
 0x93c   :  { %8464 = vmatpush1.bf16.msra.mxu0 %v14221_v25  ;;  %v14235_v25 = vld [vmem:[#allocation11 + $0x174c] ss:$16 sps:$4 sm:$0xff]  }
 0x93d   :  { %9124 = vmatpush1.bf16.msra.mxu1 %v17289_v41  ;;  %8465 = vmatprep.subr.bf16.mxu0 %v14226_v0  ;;  %v14233_v0 = vld [vmem:[#allocation11 + $0x1748] ss:$16 sps:$4 sm:$0xff]  }
 0x93e   :  { %9125 = vmatprep.subr.bf16.mxu1 %v18002_v44 }
 0x940   :  { %8466 = vmatpush1.bf16.msra.mxu0 %v14224_v6  ;;  %v17396_v6 = vld [vmem:[#allocation2 + $0x12] sm:$0x1] }
 0x941   :  { %9126 = vmatpush1.bf16.msra.mxu1 %v18003_v14  ;;  %8467 = vmatprep.subr.bf16.mxu0 %v14229_v15  ;;  %v14238_v15 = vld [vmem:[#allocation11 + $0x176c] ss:$16 sps:$4 sm:$0xff]  }
 0x942   :  { %9127 = vmatprep.subr.bf16.mxu1 %v17298_v21 }
 0x944   :  { %8468 = vmatpush1.bf16.msra.mxu0 %v14227_v13  ;;  %v14236_v13 = vld [vmem:[#allocation11 + $0x1768] ss:$16 sps:$4 sm:$0xff]  }
 0x945   :  { %9128 = vmatpush1.bf16.msra.mxu1 %v18004_v54  ;;  %8469 = vmatprep.subr.bf16.mxu0 %v14232_v47  ;;  %v14239_v47 = vld [vmem:[#allocation11 + $0x1788] ss:$16 sps:$4 sm:$0xff]  }
 0x946   :  { %9614 = vmatprep.subr.bf16.mxu1 %v17087_v2  ;;  %v14241_v2 = vld [vmem:[#allocation11 + $0x178c] ss:$16 sps:$4 sm:$0xff]  }
 0x948   :  { %8470 = vmatpush1.bf16.msra.mxu0 %v14230_v51  ;;  %9130 = vmatmul.mubr.bf16.vlgmr.msra.gmra.mrb[112].mxu1 %v18005_v35  ;;  %v14242_v51 = vld [vmem:[#allocation11 + $0x17a8] ss:$16 sps:$4 sm:$0xff]  }
 0x949   :  { %9615 = vmatpush1.bf16.msra.mxu1 %v17091_v19  ;;  %9646 = vmatprep.mubr.bf16.mxu1 %v17396_v6  ;;  %v14244_v19 = vld [vmem:[#allocation11 + $0x17ac] ss:$16 sps:$4 sm:$0xff]  }
 0x94a   :  { %8471 = vmatprep.subr.bf16.mxu0 %v14235_v25  ;;  %9616 = vmatprep.subr.bf16.mxu1 %v17097_v4  ;;  %v14247_v4 = vld [vmem:[#allocation11 + $0x17cc] ss:$16 sps:$4 sm:$0xff]   ;;  %v18007_v25 = vld [vmem:[#allocation39_spill] sm:$0xff] }
 0x94c   :  { %8472 = vmatpush1.bf16.msra.mxu0 %v14233_v0 }
 0x94d   :  { %9617 = vmatpush1.bf16.msra.mxu1 %v17100_v37  ;;  %8473 = vmatprep.subr.bf16.mxu0 %v14238_v15  ;;  %v14245_v37 = vld [vmem:[#allocation11 + $0x17c8] ss:$16 sps:$4 sm:$0xff]  }
 0x94e   :  { %9618 = vmatprep.subr.bf16.mxu1 %v17103_v57  ;;  %v14250_v57 = vld [vmem:[#allocation11 + $0x17ec] ss:$16 sps:$4 sm:$0xff]  }
 0x950   :  { %8474 = vmatpush1.bf16.msra.mxu0 %v14236_v13  ;;  %v14269_v13 = vld [vmem:[#allocation11 + $0x18c0] ss:$16 sps:$4 sm:$0xff]  }
 0x951   :  { %9619 = vmatpush1.bf16.msra.mxu1 %v17106_v31  ;;  %8475 = vmatprep.subr.bf16.mxu0 %v14241_v2  ;;  %v14248_v31 = vld [vmem:[#allocation11 + $0x17e8] ss:$16 sps:$4 sm:$0xff]  }
 0x952   :  { %9620 = vmatprep.subr.bf16.mxu1 %v17109_v34  ;;  %v14253_v34 = vld [vmem:[#allocation11 + $0x1804] ss:$16 sps:$4 sm:$0xff]  }
 0x954   :  { %8476 = vmatpush1.bf16.msra.mxu0 %v14239_v47  ;;  %v14272_v47 = vld [vmem:[#allocation11 + $0x18e0] ss:$16 sps:$4 sm:$0xff]  }
 0x955   :  { %9621 = vmatpush1.bf16.msra.mxu1 %v17112_v29  ;;  %8477 = vmatprep.subr.bf16.mxu0 %v14244_v19  ;;  %v14251_v29 = vld [vmem:[#allocation11 + $0x1800] ss:$16 sps:$4 sm:$0xff]  }
 0x956   :  { %9622 = vmatprep.subr.bf16.mxu1 %v17115_v12  ;;  %v14256_v12 = vld [vmem:[#allocation11 + $0x1824] ss:$16 sps:$4 sm:$0xff]   ;;  %v14281_v19 = vld [vmem:[#allocation11 + $0x1940] ss:$16 sps:$4 sm:$0xff]  }
 0x958   :  { %8478 = vmatpush1.bf16.msra.mxu0 %v14242_v51  ;;  %v18009_v51 = vld [vmem:[#allocation61_spill] sm:$0xff] }
 0x959   :  { %9623 = vmatpush1.bf16.msra.mxu1 %v17118_v18  ;;  %8479 = vmatprep.subr.bf16.mxu0 %v14247_v4  ;;  %v14254_v18 = vld [vmem:[#allocation11 + $0x1820] ss:$16 sps:$4 sm:$0xff]  }
 0x95a   :  { %9624 = vmatprep.subr.bf16.mxu1 %v17121_v58  ;;  %v14259_v58 = vld [vmem:[#allocation11 + $0x1844] ss:$16 sps:$4 sm:$0xff]   ;;  %v14290_v4 = vld [vmem:[#allocation11 + $0x19a0] ss:$16 sps:$4 sm:$0xff]  }
 0x95c   :  { %8480 = vmatpush1.bf16.msra.mxu0 %v14245_v37  ;;  %v18010_v37 = vld [vmem:[#allocation43_spill] sm:$0xff] }
 0x95d   :  { %9625 = vmatpush1.bf16.msra.mxu1 %v17124_v46  ;;  %8481 = vmatprep.subr.bf16.mxu0 %v14250_v57  ;;  %v14257_v46 = vld [vmem:[#allocation11 + $0x1840] ss:$16 sps:$4 sm:$0xff]  }
 0x95e   :  { %9626 = vmatprep.subr.bf16.mxu1 %v17127_v62  ;;  %v14262_v62 = vld [vmem:[#allocation11 + $0x1864] ss:$16 sps:$4 sm:$0xff]  }
 0x95f   :  { %v18011_v57 = vld [vmem:[#allocation45_spill] sm:$0xff] }
 0x960   :  { %8482 = vmatpush1.bf16.msra.mxu0 %v14248_v31  ;;  %v18012_v31 = vld [vmem:[#allocation46_spill] sm:$0xff] }
 0x961   :  { %9627 = vmatpush1.bf16.msra.mxu1 %v17130_v28  ;;  %8969 = vmatprep.subr.bf16.mxu0 %v14253_v34  ;;  %v14260_v28 = vld [vmem:[#allocation11 + $0x1860] ss:$16 sps:$4 sm:$0xff]  }
 0x962   :  { %9628 = vmatprep.subr.bf16.mxu1 %v17133_v56  ;;  %v14265_v56 = vld [vmem:[#allocation11 + $0x1884] ss:$16 sps:$4 sm:$0xff]   ;;  %v18013_v34 = vld [vmem:[#allocation58_spill] sm:$0xff] }
 0x963   :  { %8484 = vmatmul.mubr.bf16.vlgmr.msra.gmra.mrb[136].mxu0 %v17365_v61  ;;  %v18006_v61 = vld [vmem:[#allocation38_spill] sm:$0xff] }
 0x964   :  { %8970 = vmatpush1.bf16.msra.mxu0 %v14251_v29 }
 0x965   :  { %9629 = vmatpush1.bf16.msra.mxu1 %v17137_v8  ;;  %8971 = vmatprep.subr.bf16.mxu0 %v14256_v12  ;;  %v14263_v8 = vld [vmem:[#allocation11 + $0x1880] ss:$16 sps:$4 sm:$0xff]  }
 0x966   :  { %9630 = vmatprep.subr.bf16.mxu1 %v17140_v32  ;;  %v14268_v32 = vld [vmem:[#allocation11 + $0x18a4] ss:$16 sps:$4 sm:$0xff]  }
 0x968   :  { %8972 = vmatpush1.bf16.msra.mxu0 %v14254_v18  ;;  %v14296_v18 = vld [vmem:[#allocation11 + $0x19e0] ss:$16 sps:$4 sm:$0xff]  }
 0x969   :  { %9631 = vmatpush1.bf16.msra.mxu1 %v17143_v42  ;;  %8973 = vmatprep.subr.bf16.mxu0 %v14259_v58  ;;  %v14266_v42 = vld [vmem:[#allocation11 + $0x18a0] ss:$16 sps:$4 sm:$0xff]  }
 0x96a   :  { %9632 = vmatprep.subr.bf16.mxu1 %v17146_v24  ;;  %v14271_v24 = vld [vmem:[#allocation11 + $0x18c4] ss:$16 sps:$4 sm:$0xff]  }
 0x96c   :  { %8974 = vmatpush1.bf16.msra.mxu0 %v14257_v46 }
 0x96d   :  { %9633 = vmatpush1.bf16.msra.mxu1 %v17149_v11  ;;  %8975 = vmatprep.subr.bf16.mxu0 %v14262_v62  ;;  %v14301_v62 = vld [vmem:[#allocation11 + $0x180c] ss:$16 sps:$4 sm:$0xff]  }
 0x96e   :  { %9634 = vmatprep.subr.bf16.mxu1 %v17152_v1 }
 0x970   :  { %8976 = vmatpush1.bf16.msra.mxu0 %v14260_v28 }
 0x971   :  { %9635 = vmatpush1.bf16.msra.mxu1 %v18006_v61  ;;  %8977 = vmatprep.subr.bf16.mxu0 %v14265_v56 }
 0x972   :  { %9636 = vmatprep.subr.bf16.mxu1 %v18007_v25 }
 0x974   :  { %8978 = vmatpush1.bf16.msra.mxu0 %v14263_v8 }
 0x975   :  { %9637 = vmatpush1.bf16.msra.mxu1 %v17161_v52  ;;  %8979 = vmatprep.subr.bf16.mxu0 %v14268_v32  ;;  %v14274_v52 = vld [vmem:[#allocation11 + $0x18e4] ss:$16 sps:$4 sm:$0xff]   ;;  %v14299_v32 = vld [vmem:[#allocation11 + $0x1808] ss:$16 sps:$4 sm:$0xff]  }
 0x976   :  { %v7886_v35 = vpop.f32.mrb[124].mxu0  ;;  %9638 = vmatprep.subr.bf16.mxu1 %v17164_v5  ;;  %v14277_v5 = vld [vmem:[#allocation11 + $0x1904] ss:$16 sps:$4 sm:$0xff]  }
 0x977   :  { %v17424_v11 = vadd.f32 %v7886_v35, %v17333_v43  ;;  %v7888_v1 = vpop.f32.mrb[125].mxu0  ;;  %v14275_v43 = vld [vmem:[#allocation11 + $0x1900] ss:$16 sps:$4 sm:$0xff]  }
 0x978   :  { %v17427_v0 = vadd.f32 %v7888_v1, %v17337_v22  ;;  %8980 = vmatpush1.bf16.msra.mxu0 %v14266_v42  ;;  %v7890_v15 = vpop.f32.mrb[126].mxu0  ;;  %v14280_v22 = vld [vmem:[#allocation11 + $0x1924] ss:$16 sps:$4 sm:$0xff]   ;;  %v18014_v42 = vld [vmem:[#allocation32_spill] sm:$0xff] }
 0x979   :  { %9639 = vmatpush1.bf16.msra.mxu1 %v17173_v16  ;;  %v7891_v2 = vpop.f32.mrb[127].mxu0  ;;  %8981 = vmatprep.subr.bf16.mxu0 %v14271_v24  ;;  %v14278_v16 = vld [vmem:[#allocation11 + $0x1920] ss:$16 sps:$4 sm:$0xff]   ;;  %v14304_v24 = vld [vmem:[#allocation11 + $0x182c] ss:$16 sps:$4 sm:$0xff]  }
 0x97a   :  { %9640 = vmatprep.subr.bf16.mxu1 %v17176_v26  ;;  %v14283_v26 = vld [vmem:[#allocation11 + $0x1944] ss:$16 sps:$4 sm:$0xff]   ;;  %v18015_v35 = vld [vmem:[#allocation44_spill] sm:$0xff] }
 0x97b   :  { %v18016_v1 = vld [vmem:[#allocation47_spill] sm:$0xff]  ;;  %v14310_v15 = vld [vmem:[#allocation11 + $0x186c] ss:$16 sps:$4 sm:$0xff]  }
 0x97c   :  { %8982 = vmatpush1.bf16.msra.mxu0 %v14269_v13  ;;  %v18017_v13 = vld [vmem:[#allocation35_spill] sm:$0xff] }
 0x97d   :  { %9641 = vmatpush1.bf16.msra.mxu1 %v17179_v39  ;;  %8983 = vmatprep.subr.bf16.mxu0 %v14274_v52  ;;  %v18008_v39 = vld [vmem:[#allocation63_spill] sm:$0xff] }
 0x97e   :  { %9642 = vmatprep.subr.bf16.mxu1 %v17182_v45  ;;  %v17438_v45 = vld [vmem:[#allocation2 + $0x17] sm:$0x1]  ;;  %v14308_v2 = vld [vmem:[#allocation11 + $0x1868] ss:$16 sps:$4 sm:$0xff]  }
 0x97f   :  { %v18018_v52 = vld [vmem:[#allocation55_spill] sm:$0xff] }
 0x980   :  { %8984 = vmatpush1.bf16.msra.mxu0 %v14272_v47  ;;  %v14313_v47 = vld [vmem:[#allocation11 + $0x188c] ss:$16 sps:$4 sm:$0xff]  }
 0x981   :  { %9643 = vmatpush1.bf16.msra.mxu1 %v17185_v50  ;;  %8985 = vmatprep.subr.bf16.mxu0 %v14277_v5  ;;  %v14286_v50 = vld [vmem:[#allocation11 + $0x1964] ss:$16 sps:$4 sm:$0xff]  }
 0x982   :  { %9644 = vmatprep.subr.bf16.mxu1 %v17188_v9  ;;  %v14284_v9 = vld [vmem:[#allocation11 + $0x1960] ss:$16 sps:$4 sm:$0xff]  }
 0x983   :  { %v18019_v5 = vld [vmem:[#allocation53_spill] sm:$0xff] }
 0x984   :  { %8986 = vmatpush1.bf16.msra.mxu0 %v14275_v43  ;;  %v14311_v43 = vld [vmem:[#allocation11 + $0x1888] ss:$16 sps:$4 sm:$0xff]  }
 0x985   :  { %9645 = vmatpush1.bf16.msra.mxu1 %v17191_v59  ;;  %8987 = vmatprep.subr.bf16.mxu0 %v14280_v22  ;;  %v14289_v59 = vld [vmem:[#allocation11 + $0x1984] ss:$16 sps:$4 sm:$0xff]   ;;  %v18020_v22 = vld [vmem:[#allocation54_spill] sm:$0xff] }
 0x986   :  { %9655 = vmatprep.subr.bf16.mxu1 %v17194_v49  ;;  %v14287_v49 = vld [vmem:[#allocation11 + $0x1980] ss:$16 sps:$4 sm:$0xff]  }
 0x988   :  { %8988 = vmatpush1.bf16.msra.mxu0 %v14278_v16  ;;  %9647 = vmatmul.mubr.bf16.vlgmr.msra.gmra.mrb[116].mxu1 %v18008_v39  ;;  %v14316_v16 = vld [vmem:[#allocation11 + $0x18ac] ss:$16 sps:$4 sm:$0xff]  }
 0x989   :  { %9656 = vmatpush1.bf16.msra.mxu1 %v17199_v27  ;;  %9687 = vmatprep.mubr.bf16.mxu1 %v17438_v45  ;;  %v14292_v27 = vld [vmem:[#allocation11 + $0x19a4] ss:$16 sps:$4 sm:$0xff]  }
 0x98a   :  { %8989 = vmatprep.subr.bf16.mxu0 %v14283_v26  ;;  %9657 = vmatprep.subr.bf16.mxu1 %v17203_v63  ;;  %v14295_v63 = vld [vmem:[#allocation11 + $0x19c4] ss:$16 sps:$4 sm:$0xff]   ;;  %v18021_v26 = vld [vmem:[#allocation36_spill] sm:$0xff] }
 0x98c   :  { %8990 = vmatpush1.bf16.msra.mxu0 %v14281_v19  ;;  %v14319_v19 = vld [vmem:[#allocation11 + $0x18cc] ss:$16 sps:$4 sm:$0xff]  }
 0x98d   :  { %9658 = vmatpush1.bf16.msra.mxu1 %v17206_v55  ;;  %8991 = vmatprep.subr.bf16.mxu0 %v14286_v50  ;;  %v14293_v55 = vld [vmem:[#allocation11 + $0x19c0] ss:$16 sps:$4 sm:$0xff]  }
 0x98e   :  { %9659 = vmatprep.subr.bf16.mxu1 %v17209_v30  ;;  %v14298_v30 = vld [vmem:[#allocation11 + $0x19e4] ss:$16 sps:$4 sm:$0xff]  }
 0x990   :  { %8992 = vmatpush1.bf16.msra.mxu0 %v14284_v9 }
 0x991   :  { %9660 = vmatpush1.bf16.msra.mxu1 %v17212_v17  ;;  %8993 = vmatprep.subr.bf16.mxu0 %v14289_v59 }
 0x992   :  { %9661 = vmatprep.subr.bf16.mxu1 %v18009_v51  ;;  %v14317_v51 = vld [vmem:[#allocation11 + $0x18c8] ss:$16 sps:$4 sm:$0xff]  }
 0x994   :  { %8994 = vmatpush1.bf16.msra.mxu0 %v14287_v49 }
 0x995   :  { %9662 = vmatpush1.bf16.msra.mxu1 %v18010_v37  ;;  %8995 = vmatprep.subr.bf16.mxu0 %v14292_v27  ;;  %v18022_v37 = vld [vmem:[#allocation31_spill] sm:$0xff] }
 0x996   :  { %9663 = vmatprep.subr.bf16.mxu1 %v18011_v57  ;;  %v15086_v57 = vld [vmem:[#allocation2 + $0x13] sm:$0x1] }
 0x998   :  { %8996 = vmatpush1.bf16.msra.mxu0 %v14290_v4  ;;  %v14320_v4 = vld [vmem:[#allocation11 + $0x18e8] ss:$16 sps:$4 sm:$0xff]  }
 0x999   :  { %9664 = vmatpush1.bf16.msra.mxu1 %v18012_v31  ;;  %8997 = vmatprep.subr.bf16.mxu0 %v14295_v63  ;;  %v15085_v63 = vld [vmem:[#allocation8] ss:$8 sps:$4 sm:$0xff]   ;;  %v15088_v31 = vld [vmem:[#allocation8 + $0x10] ss:$8 sps:$4 sm:$0xff]  }
 0x99a   :  { %9665 = vmatprep.subr.bf16.mxu1 %v18013_v34  ;;  %v14335_v34 = vld [vmem:[#allocation11 + $0x1988] ss:$16 sps:$4 sm:$0xff]  }
 0x99b   :  { %v8573_v17 = vpop.f32.mrb[108].mxu1 }
 0x99c   :  { %v12909_v29 = vadd.f32 %v8573_v17, %v17953_v60  ;;  %v8575_v12 = vpop.f32.mrb[109].mxu1  ;;  %8998 = vmatpush1.bf16.msra.mxu0 %v14293_v55  ;;  %v15087_v55 = vld [vmem:[#allocation8 + $0x14] ss:$8 sps:$4 sm:$0xff]   ;;  %v15090_v17 = vld [vmem:[#allocation8 + $0x20] ss:$8 sps:$4 sm:$0xff]  }
 0x99d   :  { %v12910_v58 = vadd.f32 %v8575_v12, %v17871_v33  ;;  %v8577_v46 = vpop.f32.mrb[110].mxu1  ;;  %9666 = vmatpush1.bf16.msra.mxu1 %v17989_v48  ;;  %8999 = vmatprep.subr.bf16.mxu0 %v14298_v30  ;;  %v14302_v48 = vld [vmem:[#allocation11 + $0x1828] ss:$16 sps:$4 sm:$0xff]  }
 0x99e   :  { %v8580_v28 = vmax.f32 %v12909_v29, 0.0  ;;  %v8578_v56 = vpop.f32.mrb[111].mxu1  ;;  %9667 = vmatprep.subr.bf16.mxu1 %v17990_v20  ;;  %v14307_v20 = vld [vmem:[#allocation11 + $0x184c] ss:$16 sps:$4 sm:$0xff]  }
 0x99f   :  { %v8581_v8 = vmax.f32 %v12910_v58, 0.0  ;;  %v15089_v30 = vld [vmem:[#allocation8 + $0x24] ss:$8 sps:$4 sm:$0xff]   ;;  %v15091_v12 = vld [vmem:[#allocation8 + $0x34] ss:$8 sps:$4 sm:$0xff]  }
 0x9a0   :  { %9000 = vmatpush1.bf16.msra.mxu0 %v14296_v18  ;;  %v17456_v25 = vpack.c.bf16 %v8580_v28, %v8580_v28  ;;  %v14340_v29 = vld [vmem:[#allocation11 + $0x19ac] ss:$16 sps:$4 sm:$0xff]   ;;  %v14338_v18 = vld [vmem:[#allocation11 + $0x19a8] ss:$16 sps:$4 sm:$0xff]  }
 0x9a1   :  { %v8583_v61 = vpack.c.bf16 %v8581_v8, %v8581_v8  ;;  %9668 = vmatpush1.bf16.msra.mxu1 %v17991_v38  ;;  %9010 = vmatprep.subr.bf16.mxu0 %v14301_v62  ;;  %v14305_v38 = vld [vmem:[#allocation11 + $0x1848] ss:$16 sps:$4 sm:$0xff]   ;;  %v14343_v46 = vld [vmem:[#allocation11 + $0x19cc] ss:$16 sps:$4 sm:$0xff]  }
 0x9a2   :  { %9669 = vmatprep.subr.bf16.mxu1 %v18014_v42  ;;  %v15092_v58 = vld [vmem:[#allocation8 + $0x30] ss:$8 sps:$4 sm:$0xff]   ;;  %v15093_v62 = vld [vmem:[#allocation8 + $0x44] ss:$8 sps:$4 sm:$0xff]   ;;  %v15094_v56 = vld [vmem:[#allocation8 + $0x40] ss:$8 sps:$4 sm:$0xff]  }
 0x9a3   :  { %9001 = vmatprep.mubr.bf16.mxu0 %v8583_v61  ;;  %v14341_v28 = vld [vmem:[#allocation11 + $0x19c8] ss:$16 sps:$4 sm:$0xff]   ;;  %v14346_v8 = vld [vmem:[#allocation11 + $0x19ec] ss:$16 sps:$4 sm:$0xff]  }
 0x9a4   :  { %9002 = vmatmul.mubr.bf16.vlgmr.msra.gmra.mrb[140].mxu0 %v17456_v25  ;;  %v15096_v42 = vld [vmem:[#allocation8 + $0x50] ss:$8 sps:$4 sm:$0xff]  }
 0x9a5   :  { %9011 = vmatpush1.bf16.msra.mxu0 %v14299_v32  ;;  %9042 = vmatprep.mubr.bf16.mxu0 %v8583_v61  ;;  %v15095_v61 = vld [vmem:[#allocation8 + $0x54] ss:$8 sps:$4 sm:$0xff]  }
 0x9a6   :  { %9670 = vmatpush1.bf16.msra.mxu1 %v18015_v35  ;;  %9012 = vmatprep.subr.bf16.mxu0 %v14304_v24  ;;  %v14344_v32 = vld [vmem:[#allocation11 + $0x19e8] ss:$16 sps:$4 sm:$0xff]   ;;  %v14349_v24 = vld [vmem:[#allocation11 + $0x1a04] ss:$16 sps:$4 sm:$0xff]   ;;  %v14347_v35 = vld [vmem:[#allocation11 + $0x1a00] ss:$16 sps:$4 sm:$0xff]  }
 0x9a7   :  { %9671 = vmatprep.subr.bf16.mxu1 %v18016_v1  ;;  %v14352_v1 = vld [vmem:[#allocation11 + $0x1a24] ss:$16 sps:$4 sm:$0xff]  }
 0x9a9   :  { %9013 = vmatpush1.bf16.msra.mxu0 %v14302_v48  ;;  %v15097_v48 = vld [vmem:[#allocation8 + $0x64] ss:$8 sps:$4 sm:$0xff]  }
 0x9aa   :  { %9672 = vmatpush1.bf16.msra.mxu1 %v17995_v36  ;;  %9014 = vmatprep.subr.bf16.mxu0 %v14307_v20  ;;  %v14314_v36 = vld [vmem:[#allocation11 + $0x18a8] ss:$16 sps:$4 sm:$0xff]  }
 0x9ab   :  { %9673 = vmatprep.subr.bf16.mxu1 %v18017_v13  ;;  %v15098_v20 = vld [vmem:[#allocation8 + $0x60] ss:$8 sps:$4 sm:$0xff]   ;;  %v15100_v13 = vld [vmem:[#allocation8 + $0x70] ss:$8 sps:$4 sm:$0xff]  }
 0x9ad   :  { %9015 = vmatpush1.bf16.msra.mxu0 %v14305_v38  ;;  %v15099_v38 = vld [vmem:[#allocation8 + $0x74] ss:$8 sps:$4 sm:$0xff]  }
 0x9ae   :  { %9674 = vmatpush1.bf16.msra.mxu1 %v18018_v52  ;;  %9016 = vmatprep.subr.bf16.mxu0 %v14310_v15  ;;  %v14350_v15 = vld [vmem:[#allocation11 + $0x1a20] ss:$16 sps:$4 sm:$0xff]  }
 0x9af   :  { %9675 = vmatprep.subr.bf16.mxu1 %v18019_v5  ;;  %v15101_v52 = vld [vmem:[#allocation8 + $0x84] ss:$8 sps:$4 sm:$0xff]   ;;  %v15102_v5 = vld [vmem:[#allocation8 + $0x80] ss:$8 sps:$4 sm:$0xff]  }
 0x9b1   :  { %9017 = vmatpush1.bf16.msra.mxu0 %v14308_v2  ;;  %v14355_v2 = vld [vmem:[#allocation11 + $0x1a44] ss:$16 sps:$4 sm:$0xff]  }
 0x9b2   :  { %9676 = vmatpush1.bf16.msra.mxu1 %v18020_v22  ;;  %9018 = vmatprep.subr.bf16.mxu0 %v14313_v47  ;;  %v14353_v47 = vld [vmem:[#allocation11 + $0x1a40] ss:$16 sps:$4 sm:$0xff]  }
 0x9b3   :  { %9677 = vmatprep.subr.bf16.mxu1 %v18021_v26  ;;  %v15103_v22 = vld [vmem:[#allocation8 + $0x94] ss:$8 sps:$4 sm:$0xff]   ;;  %v15104_v26 = vld [vmem:[#allocation8 + $0x90] ss:$8 sps:$4 sm:$0xff]  }
 0x9b5   :  { %9019 = vmatpush1.bf16.msra.mxu0 %v14311_v43  ;;  %v14358_v43 = vld [vmem:[#allocation11 + $0x1a64] ss:$16 sps:$4 sm:$0xff]  }
 0x9b6   :  { %9678 = vmatpush1.bf16.msra.mxu1 %v17271_v7  ;;  %v7927_v39 = vpop.f32.mrb[128].mxu0  ;;  %9020 = vmatprep.subr.bf16.mxu0 %v14316_v16  ;;  %v14322_v7 = vld [vmem:[#allocation11 + $0x18ec] ss:$16 sps:$4 sm:$0xff]   ;;  %v14356_v16 = vld [vmem:[#allocation11 + $0x1a60] ss:$16 sps:$4 sm:$0xff]  }
 0x9b7   :  { %v17470_v50 = vadd.f32 %v7927_v39, %v17380_v53  ;;  %v7929_v9 = vpop.f32.mrb[129].mxu0  ;;  %9679 = vmatprep.subr.bf16.mxu1 %v18001_v3  ;;  %v14325_v53 = vld [vmem:[#allocation11 + $0x190c] ss:$16 sps:$4 sm:$0xff]   ;;  %v14323_v3 = vld [vmem:[#allocation11 + $0x1908] ss:$16 sps:$4 sm:$0xff]  }
 0x9b8   :  { %v17474_v59 = vadd.f32 %v7929_v9, %v17384_v10  ;;  %v7931_v49 = vpop.f32.mrb[130].mxu0  ;;  %v14328_v10 = vld [vmem:[#allocation11 + $0x192c] ss:$16 sps:$4 sm:$0xff]   ;;  %v14359_v39 = vld [vmem:[#allocation11 + $0x1a80] ss:$16 sps:$4 sm:$0xff]  }
 0x9b9   :  { %9021 = vmatpush1.bf16.msra.mxu0 %v14314_v36  ;;  %v7932_v27 = vpop.f32.mrb[131].mxu0  ;;  %v15105_v36 = vld [vmem:[#allocation8 + $0xa4] ss:$8 sps:$4 sm:$0xff]   ;;  %v15107_v49 = vld [vmem:[#allocation8 + $0xb4] ss:$8 sps:$4 sm:$0xff]  }
 0x9ba   :  { %9680 = vmatpush1.bf16.msra.mxu1 %v17283_v23  ;;  %9022 = vmatprep.subr.bf16.mxu0 %v14319_v19  ;;  %v14326_v23 = vld [vmem:[#allocation11 + $0x1928] ss:$16 sps:$4 sm:$0xff]   ;;  %v14364_v9 = vld [vmem:[#allocation11 + $0x1aa4] ss:$16 sps:$4 sm:$0xff]   ;;  %v14362_v27 = vld [vmem:[#allocation11 + $0x1aa0] ss:$16 sps:$4 sm:$0xff]  }
 0x9bb   :  { %9681 = vmatprep.subr.bf16.mxu1 %v17286_v40  ;;  %v15084_v40 = vld [vmem:[#allocation8 + $0x4] ss:$8 sps:$4 sm:$0xff]   ;;  %v15106_v19 = vld [vmem:[#allocation8 + $0xa0] ss:$8 sps:$4 sm:$0xff]  }
 0x9bd   :  { %9023 = vmatpush1.bf16.msra.mxu0 %v14317_v51  ;;  %v15108_v51 = vld [vmem:[#allocation8 + $0xb0] ss:$8 sps:$4 sm:$0xff]  }
 0x9be   :  { %9682 = vmatpush1.bf16.msra.mxu1 %v17289_v41  ;;  %9024 = vmatprep.subr.bf16.mxu0 %v14322_v7  ;;  %v14331_v41 = vld [vmem:[#allocation11 + $0x194c] ss:$16 sps:$4 sm:$0xff]  }
 0x9bf   :  { %9683 = vmatprep.subr.bf16.mxu1 %v18002_v44  ;;  %v14329_v44 = vld [vmem:[#allocation11 + $0x1948] ss:$16 sps:$4 sm:$0xff]  }
 0x9c1   :  { %9025 = vmatpush1.bf16.msra.mxu0 %v14320_v4  ;;  %v14367_v4 = vld [vmem:[#allocation11 + $0x1ac4] ss:$16 sps:$4 sm:$0xff]  }
 0x9c2   :  { %9684 = vmatpush1.bf16.msra.mxu1 %v18003_v14  ;;  %9026 = vmatprep.subr.bf16.mxu0 %v14325_v53  ;;  %v14334_v14 = vld [vmem:[#allocation11 + $0x196c] ss:$16 sps:$4 sm:$0xff]  }
 0x9c3   :  { %9685 = vmatprep.subr.bf16.mxu1 %v17298_v21  ;;  %v14332_v21 = vld [vmem:[#allocation11 + $0x1968] ss:$16 sps:$4 sm:$0xff]  }
 0x9c5   :  { %9027 = vmatpush1.bf16.msra.mxu0 %v14323_v3 }
 0x9c6   :  { %9686 = vmatpush1.bf16.msra.mxu1 %v18004_v54  ;;  %9028 = vmatprep.subr.bf16.mxu0 %v14328_v10  ;;  %v14337_v54 = vld [vmem:[#allocation11 + $0x198c] ss:$16 sps:$4 sm:$0xff]  }
 0x9c7   :  { %10172 = vmatprep.subr.bf16.mxu1 %v15084_v40  ;;  %v15109_v10 = vld [vmem:[#allocation8 + $0xc4] ss:$8 sps:$4 sm:$0xff]  }
 0x9c9   :  { %9029 = vmatpush1.bf16.msra.mxu0 %v14326_v23  ;;  %9688 = vmatmul.mubr.bf16.vlgmr.msra.gmra.mrb[116].mxu1 %v18022_v37  ;;  %v14365_v37 = vld [vmem:[#allocation11 + $0x1ac0] ss:$16 sps:$4 sm:$0xff]  }
 0x9ca   :  { %10173 = vmatpush1.bf16.msra.mxu1 %v15085_v63  ;;  %10204 = vmatprep.mubr.bf16.mxu1 %v15086_v57  ;;  %v14370_v63 = vld [vmem:[#allocation11 + $0x1ae4] ss:$16 sps:$4 sm:$0xff]  }
 0x9cb   :  { %9030 = vmatprep.subr.bf16.mxu0 %v14331_v41  ;;  %10174 = vmatprep.subr.bf16.mxu1 %v15087_v55  ;;  %v15111_v57 = vld [vmem:[#allocation8 + $0xd4] ss:$8 sps:$4 sm:$0xff]  }
 0x9cc   :  { %v14373_v55 = vld [vmem:[#allocation11 + $0x1b04] ss:$16 sps:$4 sm:$0xff]  }
 0x9cd   :  { %9031 = vmatpush1.bf16.msra.mxu0 %v14329_v44  ;;  %v15110_v44 = vld [vmem:[#allocation8 + $0xc0] ss:$8 sps:$4 sm:$0xff]  }
 0x9ce   :  { %10175 = vmatpush1.bf16.msra.mxu1 %v15088_v31  ;;  %9032 = vmatprep.subr.bf16.mxu0 %v14334_v14  ;;  %v14368_v14 = vld [vmem:[#allocation11 + $0x1ae0] ss:$16 sps:$4 sm:$0xff]  }
 0x9cf   :  { %10176 = vmatprep.subr.bf16.mxu1 %v15089_v30  ;;  %v15114_v31 = vld [vmem:[#allocation8 + $0xe0] ss:$8 sps:$4 sm:$0xff]   ;;  %v15115_v30 = vld [vmem:[#allocation8 + $0xf4] ss:$8 sps:$4 sm:$0xff]  }
 0x9d1   :  { %9033 = vmatpush1.bf16.msra.mxu0 %v14332_v21  ;;  %v15113_v21 = vld [vmem:[#allocation8 + $0xe4] ss:$8 sps:$4 sm:$0xff]  }
 0x9d2   :  { %10177 = vmatpush1.bf16.msra.mxu1 %v15090_v17  ;;  %9034 = vmatprep.subr.bf16.mxu0 %v14337_v54  ;;  %v14376_v54 = vld [vmem:[#allocation11 + $0x1b24] ss:$16 sps:$4 sm:$0xff]  }
 0x9d3   :  { %10178 = vmatprep.subr.bf16.mxu1 %v15091_v12  ;;  %v15116_v17 = vld [vmem:[#allocation8 + $0xf0] ss:$8 sps:$4 sm:$0xff]  }
 0x9d4   :  { %v14379_v12 = vld [vmem:[#allocation11 + $0x1b44] ss:$16 sps:$4 sm:$0xff]  }
 0x9d5   :  { %9035 = vmatpush1.bf16.msra.mxu0 %v14335_v34  ;;  %v14374_v34 = vld [vmem:[#allocation11 + $0x1b20] ss:$16 sps:$4 sm:$0xff]  }
 0x9d6   :  { %10179 = vmatpush1.bf16.msra.mxu1 %v15092_v58  ;;  %9036 = vmatprep.subr.bf16.mxu0 %v14340_v29  ;;  %v15117_v29 = vld [vmem:[#allocation8 + $0x104] ss:$8 sps:$4 sm:$0xff]  }
 0x9d7   :  { %10180 = vmatprep.subr.bf16.mxu1 %v15093_v62  ;;  %v14377_v58 = vld [vmem:[#allocation11 + $0x1b40] ss:$16 sps:$4 sm:$0xff]   ;;  %v14382_v62 = vld [vmem:[#allocation11 + $0x1b64] ss:$16 sps:$4 sm:$0xff]  }
 0x9d9   :  { %9037 = vmatpush1.bf16.msra.mxu0 %v14338_v18  ;;  %v10171_v18 = vld [vmem:[#allocation2 + $0x18] sm:$0x1] }
 0x9da   :  { %10181 = vmatpush1.bf16.msra.mxu1 %v15094_v56  ;;  %9038 = vmatprep.subr.bf16.mxu0 %v14343_v46  ;;  %v15118_v46 = vld [vmem:[#allocation8 + $0x100] ss:$8 sps:$4 sm:$0xff]  }
 0x9db   :  { %10182 = vmatprep.subr.bf16.mxu1 %v15095_v61  ;;  %v14380_v56 = vld [vmem:[#allocation11 + $0x1b60] ss:$16 sps:$4 sm:$0xff]   ;;  %v14385_v61 = vld [vmem:[#allocation11 + $0x1b84] ss:$16 sps:$4 sm:$0xff]  }
 0x9dd   :  { %9039 = vmatpush1.bf16.msra.mxu0 %v14341_v28  ;;  %v15119_v28 = vld [vmem:[#allocation8 + $0x114] ss:$8 sps:$4 sm:$0xff]  }
 0x9de   :  { %10183 = vmatpush1.bf16.msra.mxu1 %v15096_v42  ;;  %9040 = vmatprep.subr.bf16.mxu0 %v14346_v8  ;;  %v15120_v8 = vld [vmem:[#allocation8 + $0x110] ss:$8 sps:$4 sm:$0xff]  }
 0x9df   :  { %10184 = vmatprep.subr.bf16.mxu1 %v15097_v48  ;;  %v14383_v42 = vld [vmem:[#allocation11 + $0x1b80] ss:$16 sps:$4 sm:$0xff]  }
 0x9e0   :  { %v15123_v48 = vld [vmem:[#allocation8 + $0x134] ss:$8 sps:$4 sm:$0xff]  }
 0x9e1   :  { %9041 = vmatpush1.bf16.msra.mxu0 %v14344_v32  ;;  %v15121_v32 = vld [vmem:[#allocation8 + $0x124] ss:$8 sps:$4 sm:$0xff]  }
 0x9e2   :  { %10185 = vmatpush1.bf16.msra.mxu1 %v15098_v20  ;;  %9527 = vmatprep.subr.bf16.mxu0 %v14349_v24  ;;  %v14388_v24 = vld [vmem:[#allocation11 + $0x1ba4] ss:$16 sps:$4 sm:$0xff]  }
 0x9e3   :  { %10186 = vmatprep.subr.bf16.mxu1 %v15099_v38  ;;  %v15124_v20 = vld [vmem:[#allocation8 + $0x130] ss:$8 sps:$4 sm:$0xff]   ;;  %v15125_v38 = vld [vmem:[#allocation8 + $0x144] ss:$8 sps:$4 sm:$0xff]  }
 0x9e4   :  { %9043 = vmatmul.mubr.bf16.vlgmr.msra.gmra.mrb[144].mxu0 %v17456_v25  ;;  %v14361_v25 = vld [vmem:[#allocation11 + $0x1a84] ss:$16 sps:$4 sm:$0xff]  }
 0x9e5   :  { %9528 = vmatpush1.bf16.msra.mxu0 %v14347_v35  ;;  %v14386_v35 = vld [vmem:[#allocation11 + $0x1ba0] ss:$16 sps:$4 sm:$0xff]  }
 0x9e6   :  { %10187 = vmatpush1.bf16.msra.mxu1 %v15100_v13  ;;  %9529 = vmatprep.subr.bf16.mxu0 %v14352_v1  ;;  %v14391_v1 = vld [vmem:[#allocation11 + $0x1bc4] ss:$16 sps:$4 sm:$0xff]  }
 0x9e7   :  { %10188 = vmatprep.subr.bf16.mxu1 %v15101_v52  ;;  %v15126_v13 = vld [vmem:[#allocation8 + $0x140] ss:$8 sps:$4 sm:$0xff]  }
 0x9e9   :  { %9530 = vmatpush1.bf16.msra.mxu0 %v14350_v15  ;;  %v14389_v15 = vld [vmem:[#allocation11 + $0x1bc0] ss:$16 sps:$4 sm:$0xff]  }
 0x9ea   :  { %10189 = vmatpush1.bf16.msra.mxu1 %v15102_v5  ;;  %9531 = vmatprep.subr.bf16.mxu0 %v14355_v2  ;;  %v14394_v2 = vld [vmem:[#allocation11 + $0x1be4] ss:$16 sps:$4 sm:$0xff]  }
 0x9eb   :  { %10190 = vmatprep.subr.bf16.mxu1 %v15103_v22 }
 0x9ed   :  { %9532 = vmatpush1.bf16.msra.mxu0 %v14353_v47  ;;  %v15127_v47 = vld [vmem:[#allocation8 + $0x154] ss:$8 sps:$4 sm:$0xff]  }
 0x9ee   :  { %10191 = vmatpush1.bf16.msra.mxu1 %v15104_v26  ;;  %9533 = vmatprep.subr.bf16.mxu0 %v14358_v43  ;;  %v14392_v26 = vld [vmem:[#allocation11 + $0x1be0] ss:$16 sps:$4 sm:$0xff]  }
 0x9ef   :  { %10192 = vmatprep.subr.bf16.mxu1 %v15105_v36  ;;  %v15128_v36 = vld [vmem:[#allocation8 + $0x150] ss:$8 sps:$4 sm:$0xff]  }
 0x9f1   :  { %9534 = vmatpush1.bf16.msra.mxu0 %v14356_v16 }
 0x9f2   :  { %10193 = vmatpush1.bf16.msra.mxu1 %v15106_v19  ;;  %9535 = vmatprep.subr.bf16.mxu0 %v14361_v25  ;;  %v14397_v19 = vld [vmem:[#allocation11 + $0x1a0c] ss:$16 sps:$4 sm:$0xff]  }
 0x9f3   :  { %10194 = vmatprep.subr.bf16.mxu1 %v15107_v49  ;;  %v15129_v49 = vld [vmem:[#allocation8 + $0x164] ss:$8 sps:$4 sm:$0xff]  }
 0x9f5   :  { %9536 = vmatpush1.bf16.msra.mxu0 %v14359_v39 }
 0x9f6   :  { %10195 = vmatpush1.bf16.msra.mxu1 %v15108_v51  ;;  %v8444_v7 = vpop.f32.mrb[132].mxu0  ;;  %9537 = vmatprep.subr.bf16.mxu0 %v14364_v9  ;;  %v14395_v51 = vld [vmem:[#allocation11 + $0x1a08] ss:$16 sps:$4 sm:$0xff]  }
 0x9f7   :  { %v17486_v53 = vadd.f32 %v8444_v7, %v17424_v11  ;;  %v8446_v3 = vpop.f32.mrb[133].mxu0  ;;  %10196 = vmatprep.subr.bf16.mxu1 %v15109_v10  ;;  %v15112_v11 = vld [vmem:[#allocation8 + $0xd0] ss:$8 sps:$4 sm:$0xff]   ;;  %v15131_v10 = vld [vmem:[#allocation8 + $0x174] ss:$8 sps:$4 sm:$0xff]  }
 0x9f8   :  { %v17489_v23 = vadd.f32 %v8446_v3, %v17427_v0  ;;  %v8448_v40 = vpop.f32.mrb[134].mxu0  ;;  %v14371_v0 = vld [vmem:[#allocation11 + $0x1b00] ss:$16 sps:$4 sm:$0xff]   ;;  %v14400_v3 = vld [vmem:[#allocation11 + $0x1a2c] ss:$16 sps:$4 sm:$0xff]  }
 0x9f9   :  { %9538 = vmatpush1.bf16.msra.mxu0 %v14362_v27  ;;  %v8449_v41 = vpop.f32.mrb[135].mxu0  ;;  %v14398_v40 = vld [vmem:[#allocation11 + $0x1a28] ss:$16 sps:$4 sm:$0xff]  }
 0x9fa   :  { %10197 = vmatpush1.bf16.msra.mxu1 %v15110_v44  ;;  %9539 = vmatprep.subr.bf16.mxu0 %v14367_v4  ;;  %v15130_v4 = vld [vmem:[#allocation8 + $0x160] ss:$8 sps:$4 sm:$0xff]   ;;  %v15132_v41 = vld [vmem:[#allocation8 + $0x170] ss:$8 sps:$4 sm:$0xff]   ;;  %v15133_v44 = vld [vmem:[#allocation8 + $0x184] ss:$8 sps:$4 sm:$0xff]  }
 0x9fb   :  { %10198 = vmatprep.subr.bf16.mxu1 %v15111_v57  ;;  %v15134_v57 = vld [vmem:[#allocation8 + $0x180] ss:$8 sps:$4 sm:$0xff]  }
 0x9fd   :  { %9540 = vmatpush1.bf16.msra.mxu0 %v14365_v37  ;;  %v14403_v37 = vld [vmem:[#allocation11 + $0x1a4c] ss:$16 sps:$4 sm:$0xff]  }
 0x9fe   :  { %10199 = vmatpush1.bf16.msra.mxu1 %v15112_v11  ;;  %9541 = vmatprep.subr.bf16.mxu0 %v14370_v63  ;;  %v14401_v63 = vld [vmem:[#allocation11 + $0x1a48] ss:$16 sps:$4 sm:$0xff]  }
 0x9ff   :  { %10200 = vmatprep.subr.bf16.mxu1 %v15113_v21  ;;  %v15135_v11 = vld [vmem:[#allocation8 + $0x194] ss:$8 sps:$4 sm:$0xff]   ;;  %v15136_v21 = vld [vmem:[#allocation8 + $0x190] ss:$8 sps:$4 sm:$0xff]  }
 0xa01   :  { %9542 = vmatpush1.bf16.msra.mxu0 %v14368_v14  ;;  %v14406_v14 = vld [vmem:[#allocation11 + $0x1a6c] ss:$16 sps:$4 sm:$0xff]  }
 0xa02   :  { %10201 = vmatpush1.bf16.msra.mxu1 %v15114_v31  ;;  %9543 = vmatprep.subr.bf16.mxu0 %v14373_v55  ;;  %v14404_v55 = vld [vmem:[#allocation11 + $0x1a68] ss:$16 sps:$4 sm:$0xff]  }
 0xa03   :  { %10202 = vmatprep.subr.bf16.mxu1 %v15115_v30  ;;  %v15137_v31 = vld [vmem:[#allocation8 + $0x1a4] ss:$8 sps:$4 sm:$0xff]   ;;  %v15138_v30 = vld [vmem:[#allocation8 + $0x1a0] ss:$8 sps:$4 sm:$0xff]  }
 0xa05   :  { %9544 = vmatpush1.bf16.msra.mxu0 %v14371_v0  ;;  %v14409_v0 = vld [vmem:[#allocation11 + $0x1a8c] ss:$16 sps:$4 sm:$0xff]  }
 0xa06   :  { %10203 = vmatpush1.bf16.msra.mxu1 %v15116_v17  ;;  %9545 = vmatprep.subr.bf16.mxu0 %v14376_v54  ;;  %v14407_v54 = vld [vmem:[#allocation11 + $0x1a88] ss:$16 sps:$4 sm:$0xff]  }
 0xa07   :  { %10213 = vmatprep.subr.bf16.mxu1 %v15117_v29  ;;  %v15139_v17 = vld [vmem:[#allocation8 + $0x1b4] ss:$8 sps:$4 sm:$0xff]  }
 0xa08   :  { %v14410_v29 = vld [vmem:[#allocation11 + $0x1aa8] ss:$16 sps:$4 sm:$0xff]  }
 0xa09   :  { %9546 = vmatpush1.bf16.msra.mxu0 %v14374_v34  ;;  %10205 = vmatmul.mubr.bf16.vlgmr.msra.gmra.mrb[120].mxu1 %v17396_v6  ;;  %v15122_v6 = vld [vmem:[#allocation8 + $0x120] ss:$8 sps:$4 sm:$0xff]  }
 0xa0a   :  { %10214 = vmatpush1.bf16.msra.mxu1 %v15118_v46  ;;  %10245 = vmatprep.mubr.bf16.mxu1 %v10171_v18  ;;  %v14412_v34 = vld [vmem:[#allocation11 + $0x1aac] ss:$16 sps:$4 sm:$0xff]  }
 0xa0b   :  { %9547 = vmatprep.subr.bf16.mxu0 %v14379_v12  ;;  %10215 = vmatprep.subr.bf16.mxu1 %v15119_v28  ;;  %v15140_v12 = vld [vmem:[#allocation8 + $0x1b0] ss:$8 sps:$4 sm:$0xff]   ;;  %v15141_v28 = vld [vmem:[#allocation8 + $0x1c4] ss:$8 sps:$4 sm:$0xff]  }
 0xa0d   :  { %9548 = vmatpush1.bf16.msra.mxu0 %v14377_v58  ;;  %v14415_v58 = vld [vmem:[#allocation11 + $0x1acc] ss:$16 sps:$4 sm:$0xff]  }
 0xa0e   :  { %10216 = vmatpush1.bf16.msra.mxu1 %v15120_v8  ;;  %9549 = vmatprep.subr.bf16.mxu0 %v14382_v62 }
 0xa0f   :  { %10217 = vmatprep.subr.bf16.mxu1 %v15121_v32  ;;  %v14413_v32 = vld [vmem:[#allocation11 + $0x1ac8] ss:$16 sps:$4 sm:$0xff]  }
 0xa11   :  { %9550 = vmatpush1.bf16.msra.mxu0 %v14380_v56 }
 0xa12   :  { %10218 = vmatpush1.bf16.msra.mxu1 %v15122_v6  ;;  %9551 = vmatprep.subr.bf16.mxu0 %v14385_v61  ;;  %v14418_v6 = vld [vmem:[#allocation11 + $0x1aec] ss:$16 sps:$4 sm:$0xff]  }
 0xa13   :  { %10219 = vmatprep.subr.bf16.mxu1 %v15123_v48  ;;  %v14416_v48 = vld [vmem:[#allocation11 + $0x1ae8] ss:$16 sps:$4 sm:$0xff]  }
 0xa15   :  { %9552 = vmatpush1.bf16.msra.mxu0 %v14383_v42  ;;  %v15142_v42 = vld [vmem:[#allocation8 + $0x1c0] ss:$8 sps:$4 sm:$0xff]  }
 0xa16   :  { %10220 = vmatpush1.bf16.msra.mxu1 %v15124_v20  ;;  %9553 = vmatprep.subr.bf16.mxu0 %v14388_v24  ;;  %v15143_v24 = vld [vmem:[#allocation8 + $0x1d4] ss:$8 sps:$4 sm:$0xff]   ;;  %v15145_v20 = vld [vmem:[#allocation8 + $0x1e4] ss:$8 sps:$4 sm:$0xff]  }
 0xa17   :  { %10221 = vmatprep.subr.bf16.mxu1 %v15125_v38  ;;  %v14424_v38 = vld [vmem:[#allocation11 + $0x1b2c] ss:$16 sps:$4 sm:$0xff]  }
 0xa19   :  { %9554 = vmatpush1.bf16.msra.mxu0 %v14386_v35  ;;  %v14421_v35 = vld [vmem:[#allocation11 + $0x1b0c] ss:$16 sps:$4 sm:$0xff]  }
 0xa1a   :  { %10222 = vmatpush1.bf16.msra.mxu1 %v15126_v13  ;;  %9555 = vmatprep.subr.bf16.mxu0 %v14391_v1  ;;  %v15146_v1 = vld [vmem:[#allocation8 + $0x1e0] ss:$8 sps:$4 sm:$0xff]  }
 0xa1b   :  { %v9131_v52 = vpop.f32.mrb[112].mxu1  ;;  %10223 = vmatprep.subr.bf16.mxu1 %v15127_v47  ;;  %v14422_v13 = vld [vmem:[#allocation11 + $0x1b28] ss:$16 sps:$4 sm:$0xff]  }
 0xa1c   :  { %v12911_v5 = vadd.f32 %v9131_v52, %v17953_v60  ;;  %v9133_v43 = vpop.f32.mrb[113].mxu1  ;;  %v14427_v52 = vld [vmem:[#allocation11 + $0x1b4c] ss:$16 sps:$4 sm:$0xff]   ;;  %v14425_v47 = vld [vmem:[#allocation11 + $0x1b48] ss:$16 sps:$4 sm:$0xff]  }
 0xa1d   :  { %v12912_v22 = vadd.f32 %v9133_v43, %v17871_v33  ;;  %9556 = vmatpush1.bf16.msra.mxu0 %v14389_v15  ;;  %v9135_v16 = vpop.f32.mrb[114].mxu1  ;;  %v15147_v15 = vld [vmem:[#allocation8 + $0x1f4] ss:$8 sps:$4 sm:$0xff]  }
 0xa1e   :  { %v9138_v25 = vmax.f32 %v12911_v5, 0.0  ;;  %10224 = vmatpush1.bf16.msra.mxu1 %v15128_v36  ;;  %v9136_v39 = vpop.f32.mrb[115].mxu1  ;;  %9557 = vmatprep.subr.bf16.mxu0 %v14394_v2  ;;  %v15148_v2 = vld [vmem:[#allocation8 + $0x1f0] ss:$8 sps:$4 sm:$0xff]  }
 0xa1f   :  { %v9139_v9 = vmax.f32 %v12912_v22, 0.0  ;;  %10225 = vmatprep.subr.bf16.mxu1 %v15129_v49  ;;  %v14430_v5 = vld [vmem:[#allocation11 + $0x1b6c] ss:$16 sps:$4 sm:$0xff]   ;;  %v14428_v43 = vld [vmem:[#allocation11 + $0x1b68] ss:$16 sps:$4 sm:$0xff]  }
 0xa20   :  { %v17494_v7 = vpack.c.bf16 %v9138_v25, %v9138_v25  ;;  %v14433_v22 = vld [vmem:[#allocation11 + $0x1b8c] ss:$16 sps:$4 sm:$0xff]   ;;  %v14431_v16 = vld [vmem:[#allocation11 + $0x1b88] ss:$16 sps:$4 sm:$0xff]   ;;  %v14443_v49 = vld [vmem:[#allocation11 + $0x1c00] ss:$16 sps:$4 sm:$0xff]  }
 0xa21   :  { %v9141_v27 = vpack.c.bf16 %v9139_v9, %v9139_v9  ;;  %9558 = vmatpush1.bf16.msra.mxu0 %v14392_v26  ;;  %v14436_v26 = vld [vmem:[#allocation11 + $0x1bac] ss:$16 sps:$4 sm:$0xff]   ;;  %v14434_v25 = vld [vmem:[#allocation11 + $0x1ba8] ss:$16 sps:$4 sm:$0xff]   ;;  %v14445_v9 = vld [vmem:[#allocation11 + $0x1c04] ss:$16 sps:$4 sm:$0xff]  }
 0xa22   :  { %10226 = vmatpush1.bf16.msra.mxu1 %v15130_v4  ;;  %9568 = vmatprep.subr.bf16.mxu0 %v14397_v19  ;;  %v14439_v36 = vld [vmem:[#allocation11 + $0x1bcc] ss:$16 sps:$4 sm:$0xff]   ;;  %v14437_v39 = vld [vmem:[#allocation11 + $0x1bc8] ss:$16 sps:$4 sm:$0xff]   ;;  %v14451_v4 = vld [vmem:[#allocation11 + $0x1c44] ss:$16 sps:$4 sm:$0xff]  }
 0xa23   :  { %9559 = vmatprep.mubr.bf16.mxu0 %v9141_v27  ;;  %10227 = vmatprep.subr.bf16.mxu1 %v15131_v10  ;;  %v14442_v19 = vld [vmem:[#allocation11 + $0x1bec] ss:$16 sps:$4 sm:$0xff]   ;;  %v14454_v10 = vld [vmem:[#allocation11 + $0x1c64] ss:$16 sps:$4 sm:$0xff]  }
 0xa24   :  { %9560 = vmatmul.mubr.bf16.vlgmr.msra.gmra.mrb[148].mxu0 %v17494_v7 }
 0xa25   :  { %9569 = vmatpush1.bf16.msra.mxu0 %v14395_v51  ;;  %9600 = vmatprep.mubr.bf16.mxu0 %v9141_v27  ;;  %v14448_v27 = vld [vmem:[#allocation11 + $0x1c24] ss:$16 sps:$4 sm:$0xff]   ;;  %v14446_v51 = vld [vmem:[#allocation11 + $0x1c20] ss:$16 sps:$4 sm:$0xff]  }
 0xa26   :  { %10228 = vmatpush1.bf16.msra.mxu1 %v15132_v41  ;;  %9570 = vmatprep.subr.bf16.mxu0 %v14400_v3  ;;  %v14449_v3 = vld [vmem:[#allocation11 + $0x1c40] ss:$16 sps:$4 sm:$0xff]   ;;  %v14457_v41 = vld [vmem:[#allocation11 + $0x1c84] ss:$16 sps:$4 sm:$0xff]  }
 0xa27   :  { %10229 = vmatprep.subr.bf16.mxu1 %v15133_v44  ;;  %v14460_v44 = vld [vmem:[#allocation11 + $0x1ca4] ss:$16 sps:$4 sm:$0xff]  }
 0xa29   :  { %9571 = vmatpush1.bf16.msra.mxu0 %v14398_v40  ;;  %v14452_v40 = vld [vmem:[#allocation11 + $0x1c60] ss:$16 sps:$4 sm:$0xff]  }
 0xa2a   :  { %10230 = vmatpush1.bf16.msra.mxu1 %v15134_v57  ;;  %9572 = vmatprep.subr.bf16.mxu0 %v14403_v37  ;;  %v14455_v37 = vld [vmem:[#allocation11 + $0x1c80] ss:$16 sps:$4 sm:$0xff]  }
 0xa2b   :  { %10231 = vmatprep.subr.bf16.mxu1 %v15135_v11 }
 0xa2d   :  { %9573 = vmatpush1.bf16.msra.mxu0 %v14401_v63  ;;  %v14458_v63 = vld [vmem:[#allocation11 + $0x1ca0] ss:$16 sps:$4 sm:$0xff]  }
 0xa2e   :  { %10232 = vmatpush1.bf16.msra.mxu1 %v15136_v21  ;;  %9574 = vmatprep.subr.bf16.mxu0 %v14406_v14 }
 0xa2f   :  { %10233 = vmatprep.subr.bf16.mxu1 %v15137_v31 }
 0xa31   :  { %9575 = vmatpush1.bf16.msra.mxu0 %v14404_v55 }
 0xa32   :  { %10234 = vmatpush1.bf16.msra.mxu1 %v15138_v30  ;;  %9576 = vmatprep.subr.bf16.mxu0 %v14409_v0  ;;  %v14461_v0 = vld [vmem:[#allocation11 + $0x1cc0] ss:$16 sps:$4 sm:$0xff]  }
 0xa33   :  { %10235 = vmatprep.subr.bf16.mxu1 %v15139_v17  ;;  %v14464_v30 = vld [vmem:[#allocation11 + $0x1ce0] ss:$16 sps:$4 sm:$0xff]  }
 0xa34   :  { %v14467_v17 = vld [vmem:[#allocation11 + $0x1d00] ss:$16 sps:$4 sm:$0xff]  }
 0xa35   :  { %9577 = vmatpush1.bf16.msra.mxu0 %v14407_v54  ;;  %v14466_v54 = vld [vmem:[#allocation11 + $0x1ce4] ss:$16 sps:$4 sm:$0xff]  }
 0xa36   :  { %10236 = vmatpush1.bf16.msra.mxu1 %v15140_v12  ;;  %v8485_v18 = vpop.f32.mrb[136].mxu0  ;;  %9578 = vmatprep.subr.bf16.mxu0 %v14412_v34  ;;  %v14469_v34 = vld [vmem:[#allocation11 + $0x1d04] ss:$16 sps:$4 sm:$0xff]  }
 0xa37   :  { %v17498_v46 = vadd.f32 %v8485_v18, %v17470_v50  ;;  %v8487_v62 = vpop.f32.mrb[137].mxu0  ;;  %10237 = vmatprep.subr.bf16.mxu1 %v15141_v28  ;;  %v15144_v50 = vld [vmem:[#allocation8 + $0x1d0] ss:$8 sps:$4 sm:$0xff]  }
 0xa38   :  { %v17501_v56 = vadd.f32 %v8487_v62, %v17474_v59  ;;  %v8489_v8 = vpop.f32.mrb[138].mxu0  ;;  %v14419_v59 = vld [vmem:[#allocation11 + $0x1b08] ss:$16 sps:$4 sm:$0xff]   ;;  %v14475_v12 = vld [vmem:[#allocation11 + $0x1d44] ss:$16 sps:$4 sm:$0xff]  }
 0xa39   :  { %9579 = vmatpush1.bf16.msra.mxu0 %v14410_v29  ;;  %v8490_v61 = vpop.f32.mrb[139].mxu0  ;;  %v14472_v29 = vld [vmem:[#allocation11 + $0x1d24] ss:$16 sps:$4 sm:$0xff]   ;;  %v14479_v28 = vld [vmem:[#allocation11 + $0x1d80] ss:$16 sps:$4 sm:$0xff]  }
 0xa3a   :  { %10238 = vmatpush1.bf16.msra.mxu1 %v15142_v42  ;;  %9580 = vmatprep.subr.bf16.mxu0 %v14415_v58  ;;  %v14478_v18 = vld [vmem:[#allocation11 + $0x1d64] ss:$16 sps:$4 sm:$0xff]   ;;  %v14476_v58 = vld [vmem:[#allocation11 + $0x1d60] ss:$16 sps:$4 sm:$0xff]  }
 0xa3b   :  { %10239 = vmatprep.subr.bf16.mxu1 %v15143_v24  ;;  %v14481_v62 = vld [vmem:[#allocation11 + $0x1d84] ss:$16 sps:$4 sm:$0xff]   ;;  %v14482_v61 = vld [vmem:[#allocation11 + $0x1da0] ss:$16 sps:$4 sm:$0xff]  }
 0xa3c   :  { %v14484_v8 = vld [vmem:[#allocation11 + $0x1da4] ss:$16 sps:$4 sm:$0xff]   ;;  %v14485_v42 = vld [vmem:[#allocation11 + $0x1dc0] ss:$16 sps:$4 sm:$0xff]  }
 0xa3d   :  { %9581 = vmatpush1.bf16.msra.mxu0 %v14413_v32  ;;  %v14487_v32 = vld [vmem:[#allocation11 + $0x1dc4] ss:$16 sps:$4 sm:$0xff]  }
 0xa3e   :  { %10240 = vmatpush1.bf16.msra.mxu1 %v15144_v50  ;;  %9582 = vmatprep.subr.bf16.mxu0 %v14418_v6  ;;  %v14490_v6 = vld [vmem:[#allocation11 + $0x1de4] ss:$16 sps:$4 sm:$0xff]  }
 0xa3f   :  { %10241 = vmatprep.subr.bf16.mxu1 %v15145_v20 }
 0xa41   :  { %9583 = vmatpush1.bf16.msra.mxu0 %v14416_v48 }
 0xa42   :  { %10242 = vmatpush1.bf16.msra.mxu1 %v15146_v1  ;;  %9584 = vmatprep.subr.bf16.mxu0 %v14421_v35  ;;  %v14488_v35 = vld [vmem:[#allocation11 + $0x1de0] ss:$16 sps:$4 sm:$0xff]   ;;  %v14493_v1 = vld [vmem:[#allocation11 + $0x1c0c] ss:$16 sps:$4 sm:$0xff]  }
 0xa43   :  { %10243 = vmatprep.subr.bf16.mxu1 %v15147_v15 }
 0xa45   :  { %9585 = vmatpush1.bf16.msra.mxu0 %v14419_v59 }
 0xa46   :  { %10244 = vmatpush1.bf16.msra.mxu1 %v15148_v2  ;;  %9586 = vmatprep.subr.bf16.mxu0 %v14424_v38 }
 0xa49   :  { %9587 = vmatpush1.bf16.msra.mxu0 %v14422_v13  ;;  %10246 = vmatmul.mubr.bf16.vlgmr.msra.gmra.mrb[120].mxu1 %v17438_v45  ;;  %v14440_v45 = vld [vmem:[#allocation11 + $0x1be8] ss:$16 sps:$4 sm:$0xff]  }
 0xa4a   :  { %9588 = vmatprep.subr.bf16.mxu0 %v14427_v52  ;;  %v14491_v52 = vld [vmem:[#allocation11 + $0x1c08] ss:$16 sps:$4 sm:$0xff]  }
 0xa4d   :  { %9589 = vmatpush1.bf16.msra.mxu0 %v14425_v47 }
 0xa4e   :  { %9590 = vmatprep.subr.bf16.mxu0 %v14430_v5  ;;  %v14496_v5 = vld [vmem:[#allocation11 + $0x1c2c] ss:$16 sps:$4 sm:$0xff]  }
 0xa51   :  { %9591 = vmatpush1.bf16.msra.mxu0 %v14428_v43  ;;  %v14494_v43 = vld [vmem:[#allocation11 + $0x1c28] ss:$16 sps:$4 sm:$0xff]  }
 0xa52   :  { %9592 = vmatprep.subr.bf16.mxu0 %v14433_v22  ;;  %v14499_v22 = vld [vmem:[#allocation11 + $0x1c4c] ss:$16 sps:$4 sm:$0xff]  }
 0xa55   :  { %9593 = vmatpush1.bf16.msra.mxu0 %v14431_v16  ;;  %v14497_v16 = vld [vmem:[#allocation11 + $0x1c48] ss:$16 sps:$4 sm:$0xff]  }
 0xa56   :  { %9594 = vmatprep.subr.bf16.mxu0 %v14436_v26  ;;  %v14502_v26 = vld [vmem:[#allocation11 + $0x1c6c] ss:$16 sps:$4 sm:$0xff]  }
 0xa59   :  { %9595 = vmatpush1.bf16.msra.mxu0 %v14434_v25  ;;  %v14500_v25 = vld [vmem:[#allocation11 + $0x1c68] ss:$16 sps:$4 sm:$0xff]  }
 0xa5a   :  { %9596 = vmatprep.subr.bf16.mxu0 %v14439_v36  ;;  %v14505_v36 = vld [vmem:[#allocation11 + $0x1c8c] ss:$16 sps:$4 sm:$0xff]  }
 0xa5d   :  { %9597 = vmatpush1.bf16.msra.mxu0 %v14437_v39  ;;  %v14503_v39 = vld [vmem:[#allocation11 + $0x1c88] ss:$16 sps:$4 sm:$0xff]  }
 0xa5e   :  { %9598 = vmatprep.subr.bf16.mxu0 %v14442_v19  ;;  %v14508_v19 = vld [vmem:[#allocation11 + $0x1cac] ss:$16 sps:$4 sm:$0xff]  }
 0xa61   :  { %9599 = vmatpush1.bf16.msra.mxu0 %v14440_v45  ;;  %v14506_v45 = vld [vmem:[#allocation11 + $0x1ca8] ss:$16 sps:$4 sm:$0xff]  }
 0xa62   :  { %10085 = vmatprep.subr.bf16.mxu0 %v14445_v9 }
 0xa64   :  { %9601 = vmatmul.mubr.bf16.vlgmr.msra.gmra.mrb[152].mxu0 %v17494_v7  ;;  %v14463_v7 = vld [vmem:[#allocation11 + $0x1cc4] ss:$16 sps:$4 sm:$0xff]  }
 0xa65   :  { %10086 = vmatpush1.bf16.msra.mxu0 %v14443_v49  ;;  %v14511_v49 = vld [vmem:[#allocation11 + $0x1ccc] ss:$16 sps:$4 sm:$0xff]  }
 0xa66   :  { %10087 = vmatprep.subr.bf16.mxu0 %v14448_v27 }
 0xa69   :  { %10088 = vmatpush1.bf16.msra.mxu0 %v14446_v51 }
 0xa6a   :  { %10089 = vmatprep.subr.bf16.mxu0 %v14451_v4 }
 0xa6d   :  { %10090 = vmatpush1.bf16.msra.mxu0 %v14449_v3 }
 0xa6e   :  { %10091 = vmatprep.subr.bf16.mxu0 %v14454_v10 }
 0xa71   :  { %10092 = vmatpush1.bf16.msra.mxu0 %v14452_v40  ;;  %v14509_v40 = vld [vmem:[#allocation11 + $0x1cc8] ss:$16 sps:$4 sm:$0xff]  }
 0xa72   :  { %10093 = vmatprep.subr.bf16.mxu0 %v14457_v41  ;;  %v14514_v41 = vld [vmem:[#allocation11 + $0x1cec] ss:$16 sps:$4 sm:$0xff]  }
 0xa75   :  { %10094 = vmatpush1.bf16.msra.mxu0 %v14455_v37  ;;  %v14512_v37 = vld [vmem:[#allocation11 + $0x1ce8] ss:$16 sps:$4 sm:$0xff]  }
 0xa76   :  { %10095 = vmatprep.subr.bf16.mxu0 %v14460_v44  ;;  %v14517_v44 = vld [vmem:[#allocation11 + $0x1d0c] ss:$16 sps:$4 sm:$0xff]  }
 0xa77   :  { %v9003_v57 = vpop.f32.mrb[140].mxu0 }
 0xa78   :  { %v17506_v14 = vadd.f32 %v9003_v57, %v17486_v53  ;;  %v9005_v11 = vpop.f32.mrb[141].mxu0  ;;  %v14470_v53 = vld [vmem:[#allocation11 + $0x1d20] ss:$16 sps:$4 sm:$0xff]   ;;  %v14523_v57 = vld [vmem:[#allocation11 + $0x1d4c] ss:$16 sps:$4 sm:$0xff]  }
 0xa79   :  { %v17509_v55 = vadd.f32 %v9005_v11, %v17489_v23  ;;  %10096 = vmatpush1.bf16.msra.mxu0 %v14458_v63  ;;  %v9007_v21 = vpop.f32.mrb[142].mxu0  ;;  %v14473_v23 = vld [vmem:[#allocation11 + $0x1d40] ss:$16 sps:$4 sm:$0xff]   ;;  %v14515_v63 = vld [vmem:[#allocation11 + $0x1d08] ss:$16 sps:$4 sm:$0xff]  }
 0xa7a   :  { %v9008_v31 = vpop.f32.mrb[143].mxu0  ;;  %10097 = vmatprep.subr.bf16.mxu0 %v14463_v7  ;;  %v14520_v7 = vld [vmem:[#allocation11 + $0x1d2c] ss:$16 sps:$4 sm:$0xff]   ;;  %v14524_v21 = vld [vmem:[#allocation11 + $0x1d68] ss:$16 sps:$4 sm:$0xff]  }
 0xa7b   :  { %v14526_v11 = vld [vmem:[#allocation11 + $0x1d6c] ss:$16 sps:$4 sm:$0xff]   ;;  %v14527_v31 = vld [vmem:[#allocation11 + $0x1d88] ss:$16 sps:$4 sm:$0xff]  }
 0xa7d   :  { %10098 = vmatpush1.bf16.msra.mxu0 %v14461_v0  ;;  %v14529_v0 = vld [vmem:[#allocation11 + $0x1d8c] ss:$16 sps:$4 sm:$0xff]  }
 0xa7e   :  { %10099 = vmatprep.subr.bf16.mxu0 %v14466_v54  ;;  %v14532_v54 = vld [vmem:[#allocation11 + $0x1dac] ss:$16 sps:$4 sm:$0xff]  }
 0xa81   :  { %10100 = vmatpush1.bf16.msra.mxu0 %v14464_v30  ;;  %v14530_v30 = vld [vmem:[#allocation11 + $0x1da8] ss:$16 sps:$4 sm:$0xff]  }
 0xa82   :  { %10101 = vmatprep.subr.bf16.mxu0 %v14469_v34  ;;  %v14535_v34 = vld [vmem:[#allocation11 + $0x1dcc] ss:$16 sps:$4 sm:$0xff]  }
 0xa85   :  { %10102 = vmatpush1.bf16.msra.mxu0 %v14467_v17  ;;  %v14533_v17 = vld [vmem:[#allocation11 + $0x1dc8] ss:$16 sps:$4 sm:$0xff]  }
 0xa86   :  { %10103 = vmatprep.subr.bf16.mxu0 %v14472_v29  ;;  %v14538_v29 = vld [vmem:[#allocation11 + $0x1dec] ss:$16 sps:$4 sm:$0xff]  }
 0xa89   :  { %10104 = vmatpush1.bf16.msra.mxu0 %v14470_v53  ;;  %v14536_v53 = vld [vmem:[#allocation11 + $0x1de8] ss:$16 sps:$4 sm:$0xff]  }
 0xa8a   :  { %10105 = vmatprep.subr.bf16.mxu0 %v14475_v12  ;;  %v14541_v12 = vld [vmem:[#allocation11 + $0x1e04] ss:$16 sps:$4 sm:$0xff]  }
 0xa8d   :  { %10106 = vmatpush1.bf16.msra.mxu0 %v14473_v23  ;;  %v14539_v23 = vld [vmem:[#allocation11 + $0x1e00] ss:$16 sps:$4 sm:$0xff]  }
 0xa8e   :  { %10107 = vmatprep.subr.bf16.mxu0 %v14478_v18  ;;  %v14544_v18 = vld [vmem:[#allocation11 + $0x1e24] ss:$16 sps:$4 sm:$0xff]  }
 0xa91   :  { %10108 = vmatpush1.bf16.msra.mxu0 %v14476_v58  ;;  %v14542_v58 = vld [vmem:[#allocation11 + $0x1e20] ss:$16 sps:$4 sm:$0xff]  }
 0xa92   :  { %10109 = vmatprep.subr.bf16.mxu0 %v14481_v62  ;;  %v14547_v62 = vld [vmem:[#allocation11 + $0x1e44] ss:$16 sps:$4 sm:$0xff]  }
 0xa95   :  { %10110 = vmatpush1.bf16.msra.mxu0 %v14479_v28  ;;  %v14545_v28 = vld [vmem:[#allocation11 + $0x1e40] ss:$16 sps:$4 sm:$0xff]  }
 0xa96   :  { %10111 = vmatprep.subr.bf16.mxu0 %v14484_v8  ;;  %v14550_v8 = vld [vmem:[#allocation11 + $0x1e64] ss:$16 sps:$4 sm:$0xff]  }
 0xa99   :  { %10112 = vmatpush1.bf16.msra.mxu0 %v14482_v61  ;;  %v14548_v61 = vld [vmem:[#allocation11 + $0x1e60] ss:$16 sps:$4 sm:$0xff]  }
 0xa9a   :  { %10113 = vmatprep.subr.bf16.mxu0 %v14487_v32  ;;  %v14553_v32 = vld [vmem:[#allocation11 + $0x1e84] ss:$16 sps:$4 sm:$0xff]  }
 0xa9c   :  { %v9689_v24 = vpop.f32.mrb[116].mxu1 }
 0xa9d   :  { %v12913_v48 = vadd.f32 %v9689_v24, %v17953_v60  ;;  %v9691_v50 = vpop.f32.mrb[117].mxu1  ;;  %10114 = vmatpush1.bf16.msra.mxu0 %v14485_v42  ;;  %v14551_v42 = vld [vmem:[#allocation11 + $0x1e80] ss:$16 sps:$4 sm:$0xff]  }
 0xa9e   :  { %v12914_v20 = vadd.f32 %v9691_v50, %v17871_v33  ;;  %v9693_v59 = vpop.f32.mrb[118].mxu1  ;;  %10115 = vmatprep.subr.bf16.mxu0 %v14490_v6  ;;  %v14556_v6 = vld [vmem:[#allocation11 + $0x1ea4] ss:$16 sps:$4 sm:$0xff]   ;;  %v14554_v24 = vld [vmem:[#allocation11 + $0x1ea0] ss:$16 sps:$4 sm:$0xff]  }
 0xa9f   :  { %v9696_v38 = vmax.f32 %v12913_v48, 0.0  ;;  %v9694_v15 = vpop.f32.mrb[119].mxu1  ;;  %v14559_v50 = vld [vmem:[#allocation11 + $0x1ec4] ss:$16 sps:$4 sm:$0xff]  }
 0xaa0   :  { %v9697_v13 = vmax.f32 %v12914_v20, 0.0  ;;  %v14557_v15 = vld [vmem:[#allocation11 + $0x1ec0] ss:$16 sps:$4 sm:$0xff]  }
 0xaa1   :  { %10116 = vmatpush1.bf16.msra.mxu0 %v14488_v35  ;;  %v17513_v47 = vpack.c.bf16 %v9696_v38, %v9696_v38 }
 0xaa2   :  { %v9699_v2 = vpack.c.bf16 %v9697_v13, %v9697_v13  ;;  %10126 = vmatprep.subr.bf16.mxu0 %v14493_v1  ;;  %v14562_v13 = vld [vmem:[#allocation11 + $0x1ee4] ss:$16 sps:$4 sm:$0xff]  }
 0xaa4   :  { %10117 = vmatprep.mubr.bf16.mxu0 %v9699_v2 }
 0xaa5   :  { %10118 = vmatmul.mubr.bf16.vlgmr.msra.gmra.mrb[156].mxu0 %v17513_v47 }
 0xaa6   :  { %10127 = vmatpush1.bf16.msra.mxu0 %v14491_v52  ;;  %10158 = vmatprep.mubr.bf16.mxu0 %v9699_v2  ;;  %v14560_v2 = vld [vmem:[#allocation11 + $0x1ee0] ss:$16 sps:$4 sm:$0xff]   ;;  %v14565_v52 = vld [vmem:[#allocation11 + $0x1f04] ss:$16 sps:$4 sm:$0xff]  }
 0xaa7   :  { %10128 = vmatprep.subr.bf16.mxu0 %v14496_v5  ;;  %v14568_v5 = vld [vmem:[#allocation11 + $0x1f24] ss:$16 sps:$4 sm:$0xff]  }
 0xaaa   :  { %10129 = vmatpush1.bf16.msra.mxu0 %v14494_v43  ;;  %v14571_v43 = vld [vmem:[#allocation11 + $0x1f44] ss:$16 sps:$4 sm:$0xff]  }
 0xaab   :  { %10130 = vmatprep.subr.bf16.mxu0 %v14499_v22  ;;  %v14574_v22 = vld [vmem:[#allocation11 + $0x1f64] ss:$16 sps:$4 sm:$0xff]  }
 0xaae   :  { %10131 = vmatpush1.bf16.msra.mxu0 %v14497_v16  ;;  %v14572_v16 = vld [vmem:[#allocation11 + $0x1f60] ss:$16 sps:$4 sm:$0xff]  }
 0xaaf   :  { %10132 = vmatprep.subr.bf16.mxu0 %v14502_v26  ;;  %v14577_v26 = vld [vmem:[#allocation11 + $0x1f84] ss:$16 sps:$4 sm:$0xff]  }
 0xab2   :  { %10133 = vmatpush1.bf16.msra.mxu0 %v14500_v25  ;;  %v14575_v25 = vld [vmem:[#allocation11 + $0x1f80] ss:$16 sps:$4 sm:$0xff]  }
 0xab3   :  { %10134 = vmatprep.subr.bf16.mxu0 %v14505_v36  ;;  %v14580_v36 = vld [vmem:[#allocation11 + $0x1fa4] ss:$16 sps:$4 sm:$0xff]  }
 0xab6   :  { %10135 = vmatpush1.bf16.msra.mxu0 %v14503_v39  ;;  %v14578_v39 = vld [vmem:[#allocation11 + $0x1fa0] ss:$16 sps:$4 sm:$0xff]  }
 0xab7   :  { %v9044_v9 = vpop.f32.mrb[144].mxu0  ;;  %10136 = vmatprep.subr.bf16.mxu0 %v14508_v19  ;;  %v14583_v19 = vld [vmem:[#allocation11 + $0x1fc4] ss:$16 sps:$4 sm:$0xff]  }
 0xab8   :  { %v17517_v27 = vadd.f32 %v9044_v9, %v17498_v46  ;;  %v9046_v51 = vpop.f32.mrb[145].mxu0  ;;  %v14518_v46 = vld [vmem:[#allocation11 + $0x1d28] ss:$16 sps:$4 sm:$0xff]   ;;  %v14586_v9 = vld [vmem:[#allocation11 + $0x1fe4] ss:$16 sps:$4 sm:$0xff]  }
 0xab9   :  { %v17520_v4 = vadd.f32 %v9046_v51, %v17501_v56  ;;  %v9048_v3 = vpop.f32.mrb[146].mxu0  ;;  %v14521_v56 = vld [vmem:[#allocation11 + $0x1d48] ss:$16 sps:$4 sm:$0xff]  }
 0xaba   :  { %10137 = vmatpush1.bf16.msra.mxu0 %v14506_v45  ;;  %v9049_v10 = vpop.f32.mrb[147].mxu0  ;;  %v14581_v45 = vld [vmem:[#allocation11 + $0x1fc0] ss:$16 sps:$4 sm:$0xff]  }
 0xabb   :  { %10138 = vmatprep.subr.bf16.mxu0 %v14511_v49 }
 0xabe   :  { %10139 = vmatpush1.bf16.msra.mxu0 %v14509_v40 }
 0xabf   :  { %10140 = vmatprep.subr.bf16.mxu0 %v14514_v41  ;;  %v14584_v41 = vld [vmem:[#allocation11 + $0x1fe0] ss:$16 sps:$4 sm:$0xff]  }
 0xac2   :  { %10141 = vmatpush1.bf16.msra.mxu0 %v14512_v37 }
 0xac3   :  { %10142 = vmatprep.subr.bf16.mxu0 %v14517_v44 }
 0xac6   :  { %10143 = vmatpush1.bf16.msra.mxu0 %v14515_v63  ;;  %v14589_v63 = vld [vmem:[#allocation11 + $0x1e0c] ss:$16 sps:$4 sm:$0xff]  }
 0xac7   :  { %10144 = vmatprep.subr.bf16.mxu0 %v14520_v7 }
 0xaca   :  { %10145 = vmatpush1.bf16.msra.mxu0 %v14518_v46 }
 0xacb   :  { %10146 = vmatprep.subr.bf16.mxu0 %v14523_v57  ;;  %v14587_v57 = vld [vmem:[#allocation11 + $0x1e08] ss:$16 sps:$4 sm:$0xff]  }
 0xace   :  { %10147 = vmatpush1.bf16.msra.mxu0 %v14521_v56 }
 0xacf   :  { %10148 = vmatprep.subr.bf16.mxu0 %v14526_v11  ;;  %v14592_v11 = vld [vmem:[#allocation11 + $0x1e2c] ss:$16 sps:$4 sm:$0xff]  }
 0xad2   :  { %10149 = vmatpush1.bf16.msra.mxu0 %v14524_v21  ;;  %v14593_v21 = vld [vmem:[#allocation11 + $0x1e48] ss:$16 sps:$4 sm:$0xff]  }
 0xad3   :  { %10150 = vmatprep.subr.bf16.mxu0 %v14529_v0  ;;  %v14598_v0 = vld [vmem:[#allocation11 + $0x1e6c] ss:$16 sps:$4 sm:$0xff]  }
 0xad6   :  { %10151 = vmatpush1.bf16.msra.mxu0 %v14527_v31  ;;  %v14596_v31 = vld [vmem:[#allocation11 + $0x1e68] ss:$16 sps:$4 sm:$0xff]  }
 0xad7   :  { %10152 = vmatprep.subr.bf16.mxu0 %v14532_v54  ;;  %v14601_v54 = vld [vmem:[#allocation11 + $0x1e8c] ss:$16 sps:$4 sm:$0xff]  }
 0xada   :  { %10153 = vmatpush1.bf16.msra.mxu0 %v14530_v30  ;;  %v14599_v30 = vld [vmem:[#allocation11 + $0x1e88] ss:$16 sps:$4 sm:$0xff]  }
 0xadb   :  { %10154 = vmatprep.subr.bf16.mxu0 %v14535_v34  ;;  %v14604_v34 = vld [vmem:[#allocation11 + $0x1eac] ss:$16 sps:$4 sm:$0xff]  }
 0xade   :  { %10155 = vmatpush1.bf16.msra.mxu0 %v14533_v17  ;;  %v14602_v17 = vld [vmem:[#allocation11 + $0x1ea8] ss:$16 sps:$4 sm:$0xff]  }
 0xadf   :  { %10156 = vmatprep.subr.bf16.mxu0 %v14538_v29 }
 0xae2   :  { %10157 = vmatpush1.bf16.msra.mxu0 %v14536_v53  ;;  %v14607_v53 = vld [vmem:[#allocation11 + $0x1ecc] ss:$16 sps:$4 sm:$0xff]  }
 0xae3   :  { %10643 = vmatprep.subr.bf16.mxu0 %v14541_v12 }
 0xae5   :  { %10159 = vmatmul.mubr.bf16.vlgmr.msra.gmra.mrb[160].mxu0 %v17513_v47  ;;  %v14563_v47 = vld [vmem:[#allocation11 + $0x1f00] ss:$16 sps:$4 sm:$0xff]  }
 0xae6   :  { %10644 = vmatpush1.bf16.msra.mxu0 %v14539_v23 }
 0xae7   :  { %10645 = vmatprep.subr.bf16.mxu0 %v14544_v18 }
 0xaea   :  { %10646 = vmatpush1.bf16.msra.mxu0 %v14542_v58 }
 0xaeb   :  { %10647 = vmatprep.subr.bf16.mxu0 %v14547_v62 }
 0xaee   :  { %10648 = vmatpush1.bf16.msra.mxu0 %v14545_v28  ;;  %v14605_v28 = vld [vmem:[#allocation11 + $0x1ec8] ss:$16 sps:$4 sm:$0xff]  }
 0xaef   :  { %10649 = vmatprep.subr.bf16.mxu0 %v14550_v8  ;;  %v14610_v8 = vld [vmem:[#allocation11 + $0x1eec] ss:$16 sps:$4 sm:$0xff]  }
 0xaf2   :  { %10650 = vmatpush1.bf16.msra.mxu0 %v14548_v61  ;;  %v14635_v61 = vld [vmem:[#allocation14] ss:$8 sps:$4 sm:$0xff]  }
 0xaf3   :  { %10651 = vmatprep.subr.bf16.mxu0 %v14553_v32  ;;  %v14637_v32 = vld [vmem:[#allocation14 + $0x4] ss:$8 sps:$4 sm:$0xff]  }
 0xaf4   :  { %11159 = vmatprep.subr.bf16.mxu1 %v14637_v32  ;;  %v14732_v32 = vld [vmem:[#allocation17] sm:$0xff]  }
 0xaf5   :  { %11160 = vmatpush1.bf16.msra.mxu1 %v14635_v61  ;;  %v14731_v61 = vld [vmem:[#allocation17 + $0x40] sm:$0xff]  }
 0xaf6   :  { %10652 = vmatpush1.bf16.msra.mxu0 %v14551_v42  ;;  %v14640_v42 = vld [vmem:[#allocation14 + $0x14] ss:$8 sps:$4 sm:$0xff]  }
 0xaf7   :  { %v9561_v48 = vpop.f32.mrb[148].mxu0  ;;  %10653 = vmatprep.subr.bf16.mxu0 %v14556_v6  ;;  %v14608_v6 = vld [vmem:[#allocation11 + $0x1ee8] ss:$16 sps:$4 sm:$0xff]   ;;  %11161 = vmatprep.subr.bf16.mxu1 %v14640_v42  ;;  %v14733_v42 = vld [vmem:[#allocation17 + $0x48] sm:$0xff]  }
 0xaf8   :  { %v17524_v35 = vadd.f32 %v9561_v48, %v17506_v14  ;;  %v9563_v20 = vpop.f32.mrb[149].mxu0  ;;  %v14566_v14 = vld [vmem:[#allocation11 + $0x1f20] ss:$16 sps:$4 sm:$0xff]  }
 0xaf9   :  { %v17527_v59 = vadd.f32 %v9563_v20, %v17509_v55  ;;  %v9565_v1 = vpop.f32.mrb[150].mxu0  ;;  %v14569_v55 = vld [vmem:[#allocation11 + $0x1f40] ss:$16 sps:$4 sm:$0xff]   ;;  %v14616_v20 = vld [vmem:[#allocation11 + $0x1f2c] ss:$16 sps:$4 sm:$0xff]  }
 0xafa   :  { %10654 = vmatpush1.bf16.msra.mxu0 %v14554_v24  ;;  %v9566_v38 = vpop.f32.mrb[151].mxu0  ;;  %v14638_v24 = vld [vmem:[#allocation14 + $0x10] ss:$8 sps:$4 sm:$0xff]   ;;  %v14643_v48 = vld [vmem:[#allocation14 + $0x24] ss:$8 sps:$4 sm:$0xff]  }
 0xafb   :  { %10655 = vmatprep.subr.bf16.mxu0 %v14559_v50  ;;  %11162 = vmatpush1.bf16.msra.mxu1 %v14638_v24  ;;  %v14641_v50 = vld [vmem:[#allocation14 + $0x20] ss:$8 sps:$4 sm:$0xff]   ;;  %v14646_v1 = vld [vmem:[#allocation14 + $0x34] ss:$8 sps:$4 sm:$0xff]  }
 0xafc   :  { %11163 = vmatprep.subr.bf16.mxu1 %v14643_v48  ;;  %v14614_v38 = vld [vmem:[#allocation11 + $0x1f28] ss:$16 sps:$4 sm:$0xff]   ;;  %v14737_v48 = vld [vmem:[#allocation17 + $0x58] sm:$0xff]  }
 0xafd   :  { %v14735_v24 = vld [vmem:[#allocation17 + $0x50] sm:$0xff]  }
 0xafe   :  { %10656 = vmatpush1.bf16.msra.mxu0 %v14557_v15  ;;  %v14644_v15 = vld [vmem:[#allocation14 + $0x30] ss:$8 sps:$4 sm:$0xff]  }
 0xaff   :  { %10657 = vmatprep.subr.bf16.mxu0 %v14562_v13  ;;  %11164 = vmatpush1.bf16.msra.mxu1 %v14641_v50  ;;  %v14619_v13 = vld [vmem:[#allocation11 + $0x1f4c] ss:$16 sps:$4 sm:$0xff]  }
 0xb00   :  { %11165 = vmatprep.subr.bf16.mxu1 %v14646_v1  ;;  %v14741_v50 = vld [vmem:[#allocation17 + $0x68] sm:$0xff]   ;;  %v17549_v1 = vld [vmem:[#allocation12] sm:$0xf] }
 0xb02   :  { %10658 = vmatpush1.bf16.msra.mxu0 %v14560_v2  ;;  %v14649_v2 = vld [vmem:[#allocation14 + $0x44] ss:$8 sps:$4 sm:$0xff]  }
 0xb03   :  { %10659 = vmatprep.subr.bf16.mxu0 %v14565_v52  ;;  %v14617_v52 = vld [vmem:[#allocation11 + $0x1f48] ss:$16 sps:$4 sm:$0xff]   ;;  %11166 = vmatpush1.bf16.msra.mxu1 %v14644_v15 }
 0xb04   :  { %11167 = vmatprep.subr.bf16.mxu1 %v14649_v2  ;;  %v18024_v2 = vld [vmem:[#allocation30_spill] sm:$0xff] }
 0xb06   :  { %10660 = vmatpush1.bf16.msra.mxu0 %v14563_v47  ;;  %v14647_v47 = vld [vmem:[#allocation14 + $0x40] ss:$8 sps:$4 sm:$0xff]  }
 0xb07   :  { %10661 = vmatprep.subr.bf16.mxu0 %v14568_v5  ;;  %v14622_v5 = vld [vmem:[#allocation11 + $0x1f6c] ss:$16 sps:$4 sm:$0xff]   ;;  %11168 = vmatpush1.bf16.msra.mxu1 %v14647_v47 }
 0xb0a   :  { %10662 = vmatpush1.bf16.msra.mxu0 %v14566_v14  ;;  %v14652_v14 = vld [vmem:[#allocation14 + $0x54] ss:$8 sps:$4 sm:$0xff]  }
 0xb0b   :  { %10663 = vmatprep.subr.bf16.mxu0 %v14571_v43  ;;  %v14620_v43 = vld [vmem:[#allocation11 + $0x1f68] ss:$16 sps:$4 sm:$0xff]   ;;  %11169 = vmatprep.subr.bf16.mxu1 %v14652_v14 }
 0xb0e   :  { %10664 = vmatpush1.bf16.msra.mxu0 %v14569_v55  ;;  %v14650_v55 = vld [vmem:[#allocation14 + $0x50] ss:$8 sps:$4 sm:$0xff]  }
 0xb0f   :  { %10665 = vmatprep.subr.bf16.mxu0 %v14574_v22  ;;  %v14625_v22 = vld [vmem:[#allocation11 + $0x1f8c] ss:$16 sps:$4 sm:$0xff]   ;;  %11170 = vmatpush1.bf16.msra.mxu1 %v14650_v55 }
 0xb12   :  { %10666 = vmatpush1.bf16.msra.mxu0 %v14572_v16  ;;  %v14655_v16 = vld [vmem:[#allocation14 + $0x64] ss:$8 sps:$4 sm:$0xff]  }
 0xb13   :  { %10667 = vmatprep.subr.bf16.mxu0 %v14577_v26  ;;  %v14623_v26 = vld [vmem:[#allocation11 + $0x1f88] ss:$16 sps:$4 sm:$0xff]   ;;  %11171 = vmatprep.subr.bf16.mxu1 %v14655_v16 }
 0xb16   :  { %10668 = vmatpush1.bf16.msra.mxu0 %v14575_v25  ;;  %v14653_v25 = vld [vmem:[#allocation14 + $0x60] ss:$8 sps:$4 sm:$0xff]  }
 0xb17   :  { %10669 = vmatprep.subr.bf16.mxu0 %v14580_v36  ;;  %v14628_v36 = vld [vmem:[#allocation11 + $0x1fac] ss:$16 sps:$4 sm:$0xff]   ;;  %11172 = vmatpush1.bf16.msra.mxu1 %v14653_v25 }
 0xb1a   :  { %10670 = vmatpush1.bf16.msra.mxu0 %v14578_v39  ;;  %v14658_v39 = vld [vmem:[#allocation14 + $0x74] ss:$8 sps:$4 sm:$0xff]  }
 0xb1b   :  { %10671 = vmatprep.subr.bf16.mxu0 %v14583_v19  ;;  %v14626_v19 = vld [vmem:[#allocation11 + $0x1fa8] ss:$16 sps:$4 sm:$0xff]   ;;  %11173 = vmatprep.subr.bf16.mxu1 %v14658_v39  ;;  %v14683_v39 = vld [vmem:[#allocation14 + $0x100] ss:$8 sps:$4 sm:$0xff]  }
 0xb1c   :  { %v10247_v49 = vpop.f32.mrb[120].mxu1 }
 0xb1d   :  { %v12915_v51 = vadd.f32 %v10247_v49, %v17953_v60  ;;  %v10249_v3 = vpop.f32.mrb[121].mxu1  ;;  %v14595_v60 = vld [vmem:[#allocation11 + $0x1e4c] ss:$16 sps:$4 sm:$0xff]   ;;  %v14661_v49 = vld [vmem:[#allocation14 + $0x84] ss:$8 sps:$4 sm:$0xff]  }
 0xb1e   :  { %v12916_v10 = vadd.f32 %v10249_v3, %v17871_v33  ;;  %10672 = vmatpush1.bf16.msra.mxu0 %v14581_v45  ;;  %v10251_v40 = vpop.f32.mrb[122].mxu1  ;;  %v14590_v33 = vld [vmem:[#allocation11 + $0x1e28] ss:$16 sps:$4 sm:$0xff]   ;;  %v14656_v45 = vld [vmem:[#allocation14 + $0x70] ss:$8 sps:$4 sm:$0xff]  }
 0xb1f   :  { %v10254_v37 = vmax.f32 %v12915_v51, 0.0  ;;  %v10252_v44 = vpop.f32.mrb[123].mxu1  ;;  %10673 = vmatprep.subr.bf16.mxu0 %v14586_v9  ;;  %v14631_v9 = vld [vmem:[#allocation11 + $0x1fcc] ss:$16 sps:$4 sm:$0xff]   ;;  %v14629_v51 = vld [vmem:[#allocation11 + $0x1fc8] ss:$16 sps:$4 sm:$0xff]   ;;  %11174 = vmatpush1.bf16.msra.mxu1 %v14656_v45 }
 0xb20   :  { %v10255_v7 = vmax.f32 %v12916_v10, 0.0  ;;  %v14659_v3 = vld [vmem:[#allocation14 + $0x80] ss:$8 sps:$4 sm:$0xff]   ;;  %11175 = vmatprep.subr.bf16.mxu1 %v14661_v49  ;;  %v14664_v40 = vld [vmem:[#allocation14 + $0x94] ss:$8 sps:$4 sm:$0xff]  }
 0xb21   :  { %v17531_v56 = vpack.c.bf16 %v10254_v37, %v10254_v37  ;;  %v14634_v10 = vld [vmem:[#allocation11 + $0x1fec] ss:$16 sps:$4 sm:$0xff]   ;;  %v14667_v44 = vld [vmem:[#allocation14 + $0xa4] ss:$8 sps:$4 sm:$0xff]   ;;  %v14688_v45 = vld [vmem:[#allocation14 + $0x114] ss:$8 sps:$4 sm:$0xff]  }
 0xb22   :  { %v10257_v46 = vpack.c.bf16 %v10255_v7, %v10255_v7  ;;  %10674 = vmatpush1.bf16.msra.mxu0 %v14584_v41  ;;  %v14632_v41 = vld [vmem:[#allocation11 + $0x1fe8] ss:$16 sps:$4 sm:$0xff]   ;;  %v14662_v37 = vld [vmem:[#allocation14 + $0x90] ss:$8 sps:$4 sm:$0xff]  }
 0xb23   :  { %10684 = vmatprep.subr.bf16.mxu0 %v14589_v63  ;;  %11176 = vmatpush1.bf16.msra.mxu1 %v14659_v3  ;;  %v14665_v63 = vld [vmem:[#allocation14 + $0xa0] ss:$8 sps:$4 sm:$0xff]   ;;  %v14670_v7 = vld [vmem:[#allocation14 + $0xb4] ss:$8 sps:$4 sm:$0xff]   ;;  %v14691_v49 = vld [vmem:[#allocation14 + $0x124] ss:$8 sps:$4 sm:$0xff]  }
 0xb24   :  { %10675 = vmatprep.mubr.bf16.mxu0 %v10257_v46  ;;  %11177 = vmatprep.subr.bf16.mxu1 %v14664_v40  ;;  %v14694_v3 = vld [vmem:[#allocation14 + $0x134] ss:$8 sps:$4 sm:$0xff]   ;;  %v14697_v40 = vld [vmem:[#allocation14 + $0x144] ss:$8 sps:$4 sm:$0xff]  }
 0xb25   :  { %10676 = vmatmul.mubr.bf16.vlgmr.msra.gmra.mrb[164].mxu0 %v17531_v56 }
 0xb26   :  { %10685 = vmatpush1.bf16.msra.mxu0 %v14587_v57  ;;  %10716 = vmatprep.mubr.bf16.mxu0 %v10257_v46  ;;  %v14668_v46 = vld [vmem:[#allocation14 + $0xb0] ss:$8 sps:$4 sm:$0xff]   ;;  %v14673_v57 = vld [vmem:[#allocation14 + $0xc4] ss:$8 sps:$4 sm:$0xff]  }
 0xb27   :  { %10686 = vmatprep.subr.bf16.mxu0 %v14592_v11  ;;  %11178 = vmatpush1.bf16.msra.mxu1 %v14662_v37  ;;  %v14671_v11 = vld [vmem:[#allocation14 + $0xc0] ss:$8 sps:$4 sm:$0xff]   ;;  %v14700_v37 = vld [vmem:[#allocation14 + $0x154] ss:$8 sps:$4 sm:$0xff]  }
 0xb28   :  { %11179 = vmatprep.subr.bf16.mxu1 %v14667_v44  ;;  %v14698_v44 = vld [vmem:[#allocation14 + $0x150] ss:$8 sps:$4 sm:$0xff]  }
 0xb2a   :  { %10687 = vmatpush1.bf16.msra.mxu0 %v14590_v33  ;;  %v14676_v33 = vld [vmem:[#allocation14 + $0xd4] ss:$8 sps:$4 sm:$0xff]  }
 0xb2b   :  { %10688 = vmatprep.subr.bf16.mxu0 %v14595_v60  ;;  %11180 = vmatpush1.bf16.msra.mxu1 %v14665_v63  ;;  %v14674_v60 = vld [vmem:[#allocation14 + $0xd0] ss:$8 sps:$4 sm:$0xff]   ;;  %v14703_v63 = vld [vmem:[#allocation14 + $0x164] ss:$8 sps:$4 sm:$0xff]  }
 0xb2c   :  { %11181 = vmatprep.subr.bf16.mxu1 %v14670_v7  ;;  %v14701_v7 = vld [vmem:[#allocation14 + $0x160] ss:$8 sps:$4 sm:$0xff]  }
 0xb2e   :  { %10689 = vmatpush1.bf16.msra.mxu0 %v14593_v21 }
 0xb2f   :  { %10690 = vmatprep.subr.bf16.mxu0 %v14598_v0  ;;  %11182 = vmatpush1.bf16.msra.mxu1 %v14668_v46  ;;  %v14706_v46 = vld [vmem:[#allocation14 + $0x174] ss:$8 sps:$4 sm:$0xff]  }
 0xb30   :  { %11183 = vmatprep.subr.bf16.mxu1 %v14673_v57  ;;  %v14704_v57 = vld [vmem:[#allocation14 + $0x170] ss:$8 sps:$4 sm:$0xff]  }
 0xb32   :  { %10691 = vmatpush1.bf16.msra.mxu0 %v14596_v31 }
 0xb33   :  { %10692 = vmatprep.subr.bf16.mxu0 %v14601_v54  ;;  %11184 = vmatpush1.bf16.msra.mxu1 %v14671_v11  ;;  %v14679_v54 = vld [vmem:[#allocation14 + $0xe4] ss:$8 sps:$4 sm:$0xff]  }
 0xb34   :  { %11185 = vmatprep.subr.bf16.mxu1 %v14676_v33  ;;  %v14709_v11 = vld [vmem:[#allocation14 + $0x184] ss:$8 sps:$4 sm:$0xff]   ;;  %v14707_v33 = vld [vmem:[#allocation14 + $0x180] ss:$8 sps:$4 sm:$0xff]  }
 0xb36   :  { %10693 = vmatpush1.bf16.msra.mxu0 %v14599_v30 }
 0xb37   :  { %v9602_v29 = vpop.f32.mrb[152].mxu0  ;;  %10694 = vmatprep.subr.bf16.mxu0 %v14604_v34  ;;  %11186 = vmatpush1.bf16.msra.mxu1 %v14674_v60  ;;  %v14677_v34 = vld [vmem:[#allocation14 + $0xe0] ss:$8 sps:$4 sm:$0xff]   ;;  %v14712_v60 = vld [vmem:[#allocation14 + $0x194] ss:$8 sps:$4 sm:$0xff]  }
 0xb38   :  { %v17535_v12 = vadd.f32 %v9602_v29, %v17517_v27  ;;  %v9604_v23 = vpop.f32.mrb[153].mxu0  ;;  %v14613_v27 = vld [vmem:[#allocation11 + $0x1f0c] ss:$16 sps:$4 sm:$0xff]   ;;  %11187 = vmatprep.subr.bf16.mxu1 %v14679_v54  ;;  %v14682_v29 = vld [vmem:[#allocation14 + $0xf4] ss:$8 sps:$4 sm:$0xff]  }
 0xb39   :  { %v17538_v18 = vadd.f32 %v9604_v23, %v17520_v4  ;;  %v9606_v58 = vpop.f32.mrb[154].mxu0  ;;  %v14611_v4 = vld [vmem:[#allocation11 + $0x1f08] ss:$16 sps:$4 sm:$0xff]  }
 0xb3a   :  { %10695 = vmatpush1.bf16.msra.mxu0 %v14602_v17  ;;  %v9607_v62 = vpop.f32.mrb[155].mxu0  ;;  %v14685_v23 = vld [vmem:[#allocation14 + $0x104] ss:$8 sps:$4 sm:$0xff]   ;;  %v14718_v54 = vld [vmem:[#allocation14 + $0x1b4] ss:$8 sps:$4 sm:$0xff]  }
 0xb3b   :  { %10696 = vmatprep.subr.bf16.mxu0 %v14607_v53  ;;  %11188 = vmatpush1.bf16.msra.mxu1 %v14677_v34  ;;  %v14680_v53 = vld [vmem:[#allocation14 + $0xf0] ss:$8 sps:$4 sm:$0xff]   ;;  %v14719_v34 = vld [vmem:[#allocation14 + $0x1c0] ss:$8 sps:$4 sm:$0xff]  }
 0xb3c   :  { %11189 = vmatprep.subr.bf16.mxu1 %v14682_v29  ;;  %v18025_v29 = vld [vmem:[#allocation28_spill] sm:$0xff] }
 0xb3e   :  { %10697 = vmatpush1.bf16.msra.mxu0 %v14605_v28 }
 0xb3f   :  { %10698 = vmatprep.subr.bf16.mxu0 %v14610_v8  ;;  %11190 = vmatpush1.bf16.msra.mxu1 %v14680_v53  ;;  %v10741_v53 = vsub.s32 2, %v18025_v29 }
 0xb40   :  { %11200 = vmatprep.subr.bf16.mxu1 %v14685_v23  ;;  %v14722_v23 = vld [vmem:[#allocation14 + $0x1d0] ss:$8 sps:$4 sm:$0xff]  }
 0xb42   :  { %10699 = vmatpush1.bf16.msra.mxu0 %v14608_v6  ;;  %v14734_v6 = vld [vmem:[#allocation17 + $0x8] sm:$0xff]  }
 0xb43   :  { %10700 = vmatprep.subr.bf16.mxu0 %v14613_v27  ;;  %v14736_v27 = vld [vmem:[#allocation17 + $0x10] sm:$0xff]  }
 0xb46   :  { %10701 = vmatpush1.bf16.msra.mxu0 %v14611_v4  ;;  %v14739_v4 = vld [vmem:[#allocation17 + $0x60] sm:$0xff]  }
 0xb47   :  { %10702 = vmatprep.subr.bf16.mxu0 %v14616_v20  ;;  %v14742_v20 = vld [vmem:[#allocation17 + $0x28] sm:$0xff]  }
 0xb4a   :  { %10703 = vmatpush1.bf16.msra.mxu0 %v14614_v38  ;;  %v18023_v38 = vld [vmem:[#allocation29_spill] sm:$0xff] }
 0xb4b   :  { %10704 = vmatprep.subr.bf16.mxu0 %v14619_v13  ;;  %v10734_v15 = vrot.slane %v17549_v1, %v18023_v38 }
 0xb4e   :  { %10705 = vmatpush1.bf16.msra.mxu0 %v14617_v52  ;;  %v10738_v52 = vrot.slane %v17549_v1, %v18024_v2 }
 0xb4f   :  { %10706 = vmatprep.subr.bf16.mxu0 %v14622_v5 }
 0xb52   :  { %10707 = vmatpush1.bf16.msra.mxu0 %v14620_v43 }
 0xb53   :  { %10708 = vmatprep.subr.bf16.mxu0 %v14625_v22 }
 0xb56   :  { %10709 = vmatpush1.bf16.msra.mxu0 %v14623_v26 }
 0xb57   :  { %10710 = vmatprep.subr.bf16.mxu0 %v14628_v36 }
 0xb5a   :  { %10711 = vmatpush1.bf16.msra.mxu0 %v14626_v19 }
 0xb5b   :  { %10712 = vmatprep.subr.bf16.mxu0 %v14631_v9  ;;  %v14686_v9 = vld [vmem:[#allocation14 + $0x110] ss:$8 sps:$4 sm:$0xff]  }
 0xb5e   :  { %10713 = vmatpush1.bf16.msra.mxu0 %v14629_v51  ;;  %v14689_v51 = vld [vmem:[#allocation14 + $0x120] ss:$8 sps:$4 sm:$0xff]  }
 0xb5f   :  { %10714 = vmatprep.subr.bf16.mxu0 %v14634_v10  ;;  %v14692_v10 = vld [vmem:[#allocation14 + $0x130] ss:$8 sps:$4 sm:$0xff]  }
 0xb62   :  { %10715 = vmatpush1.bf16.msra.mxu0 %v14632_v41  ;;  %v14695_v41 = vld [vmem:[#allocation14 + $0x140] ss:$8 sps:$4 sm:$0xff]  }
 0xb63   :  { %12711 = vmatprep.subr.bf16.mxu0 %v14731_v61 }
 0xb65   :  { %10717 = vmatmul.mubr.bf16.vlgmr.msra.gmra.mrb[168].mxu0 %v17531_v56 }
 0xb66   :  { %12712 = vmatpush3.bf16.msra.mxu0 %v14732_v32  ;;  %v14725_v32 = vld [vmem:[#allocation14 + $0x1e0] ss:$8 sps:$4 sm:$0xff]  }
 0xb67   :  { %12713 = vmatprep.subr.bf16.mxu0 %v14733_v42 }
 0xb6a   :  { %12714 = vmatpush3.bf16.msra.mxu0 %v14734_v6 }
 0xb6b   :  { %12715 = vmatprep.subr.bf16.mxu0 %v14735_v24  ;;  %v14730_v24 = vld [vmem:[#allocation14 + $0x1f4] ss:$8 sps:$4 sm:$0xff]  }
 0xb6e   :  { %12716 = vmatpush3.bf16.msra.mxu0 %v14736_v27 }
 0xb6f   :  { %12717 = vmatprep.subr.bf16.mxu0 %v14737_v48 }
 0xb78   :  { %v10119_v21 = vpop.f32.mrb[156].mxu0 }
 0xb79   :  { %v10167_v0 = vadd.f32 %v10119_v21, %v17524_v35  ;;  %v10121_v31 = vpop.f32.mrb[157].mxu0  ;;  %v14710_v21 = vld [vmem:[#allocation14 + $0x190] ss:$8 sps:$4 sm:$0xff]  }
 0xb7a   :  { %v10168_v30 = vadd.f32 %v10121_v31, %v17527_v59  ;;  %v10123_v56 = vpop.f32.mrb[158].mxu0  ;;  %v14713_v31 = vld [vmem:[#allocation14 + $0x1a0] ss:$8 sps:$4 sm:$0xff]  }
 0xb7b   :  { %v10124_v17 = vpop.f32.mrb[159].mxu0  ;;  %v14721_v56 = vld [vmem:[#allocation14 + $0x1c4] ss:$8 sps:$4 sm:$0xff]  }
 0xb7c   :  { %v14724_v17 = vld [vmem:[#allocation14 + $0x1d4] ss:$8 sps:$4 sm:$0xff]  }
 0xbb8   :  { %v10160_v58 = vpop.f32.mrb[160].mxu0 }
 0xbb9   :  { %v17544_v62 = vadd.f32 %v10160_v58, %v17535_v12  ;;  %v10162_v35 = vpop.f32.mrb[161].mxu0  ;;  %v14738_v12 = vld [vmem:[#allocation17 + $0x18] sm:$0xff]   ;;  %v10745_v58 = vsub.s32 3, %v18025_v29 }
 0xbba   :  { %v17547_v28 = vadd.f32 %v10162_v35, %v17538_v18  ;;  %v10164_v59 = vpop.f32.mrb[162].mxu0  ;;  %12718 = vmatpush3.bf16.msra.mxu0 %v14738_v12  ;;  %v14740_v18 = vld [vmem:[#allocation17 + $0x20] sm:$0xff]  }
 0xbbb   :  { %v10165_v8 = vpop.f32.mrb[163].mxu0  ;;  %12719 = vmatprep.subr.bf16.mxu0 %v14739_v4  ;;  %v14727_v35 = vld [vmem:[#allocation14 + $0x1e4] ss:$8 sps:$4 sm:$0xff]   ;;  %v10742_v59 = vrot.slane %v17549_v1, %v10741_v53  ;;  %v10746_v61 = vrot.slane %v17549_v1, %v10745_v58 }
 0xbbe   :  { %12720 = vmatpush3.bf16.msra.mxu0 %v14740_v18 }
 0xbbf   :  { %12721 = vmatprep.subr.bf16.mxu0 %v14741_v50  ;;  %v14728_v50 = vld [vmem:[#allocation14 + $0x1f0] ss:$8 sps:$4 sm:$0xff]  }
 0xbc2   :  { %12722 = vmatpush3.bf16.msra.mxu0 %v14742_v20 }
 0xbf8   :  { %v10677_v13 = vpop.f32.mrb[164].mxu0 }
 0xbf9   :  { %v10725_v47 = vadd.f32 %v10677_v13, %v10167_v0  ;;  %v10679_v5 = vpop.f32.mrb[165].mxu0  ;;  %v14715_v0 = vld [vmem:[#allocation14 + $0x1a4] ss:$8 sps:$4 sm:$0xff]  }
 0xbfa   :  { %v10726_v14 = vadd.f32 %v10679_v5, %v10168_v30  ;;  %v10681_v43 = vpop.f32.mrb[166].mxu0  ;;  %v14716_v30 = vld [vmem:[#allocation14 + $0x1b0] ss:$8 sps:$4 sm:$0xff]   ;;  %v10827_v5 = vld [vmem:[#allocation15] sm:$0x3] }
 0xbfb   :  { %v10751_v55 = vadd.f32 %v10734_v15, %v10725_v47  ;;  %v10682_v22 = vpop.f32.mrb[167].mxu0  ;;  %v14745_v47 = vld [vmem:[#allocation17 + $0x78] sm:$0xff]   ;;  %v10836_v43 = vrot.slane %v10827_v5, %v18024_v2 }
 0xbfc   :  { %v10752_v16 = vadd.f32 %v10738_v52, %v10726_v14  ;;  %v14744_v52 = vld [vmem:[#allocation17 + $0x30] sm:$0xff]   ;;  %v10832_v14 = vrot.slane %v10827_v5, %v18023_v38 }
 0xbfd   :  { %v10755_v26 = vmax.f32 %v10751_v55, 0.0 }
 0xbfe   :  { %v10756_v25 = vmax.f32 %v10752_v16, 0.0 }
 0xbff   :  { %v10759_v19 = vpack.c.bf16 %v10755_v26, %v10755_v26 }
 0xc00   :  { %v10760_v36 = vpack.c.bf16 %v10756_v25, %v10756_v25 }
 0xc02   :  { %11191 = vmatprep.mubr.bf16.mxu1 %v10760_v36 }
 0xc03   :  { %11192 = vmatmul.mubr.bf16.vlgmr.msra.gmra.mrb[124].mxu1 %v10759_v19 }
 0xc04   :  { %11201 = vmatpush1.bf16.msra.mxu1 %v14683_v39 }
 0xc05   :  { %11202 = vmatprep.subr.bf16.mxu1 %v14688_v45 }
 0xc08   :  { %11203 = vmatpush1.bf16.msra.mxu1 %v14686_v9 }
 0xc09   :  { %11204 = vmatprep.subr.bf16.mxu1 %v14691_v49 }
 0xc0c   :  { %11205 = vmatpush1.bf16.msra.mxu1 %v14689_v51  ;;  %v12644_v51 = vld [vmem:[#allocation18] ss:$0 sm:$0xff] }
 0xc0d   :  { %11206 = vmatprep.subr.bf16.mxu1 %v14694_v3 }
 0xc10   :  { %11207 = vmatpush1.bf16.msra.mxu1 %v14692_v10 }
 0xc11   :  { %11208 = vmatprep.subr.bf16.mxu1 %v14697_v40 }
 0xc14   :  { %11209 = vmatpush1.bf16.msra.mxu1 %v14695_v41 }
 0xc15   :  { %11210 = vmatprep.subr.bf16.mxu1 %v14700_v37 }
 0xc18   :  { %11211 = vmatpush1.bf16.msra.mxu1 %v14698_v44 }
 0xc19   :  { %11212 = vmatprep.subr.bf16.mxu1 %v14703_v63 }
 0xc1c   :  { %11213 = vmatpush1.bf16.msra.mxu1 %v14701_v7 }
 0xc1d   :  { %11214 = vmatprep.subr.bf16.mxu1 %v14706_v46 }
 0xc20   :  { %11215 = vmatpush1.bf16.msra.mxu1 %v14704_v57 }
 0xc21   :  { %11216 = vmatprep.subr.bf16.mxu1 %v14709_v11 }
 0xc24   :  { %11217 = vmatpush1.bf16.msra.mxu1 %v14707_v33 }
 0xc25   :  { %11218 = vmatprep.subr.bf16.mxu1 %v14712_v60 }
 0xc28   :  { %11219 = vmatpush1.bf16.msra.mxu1 %v14710_v21 }
 0xc29   :  { %11220 = vmatprep.subr.bf16.mxu1 %v14715_v0 }
 0xc2c   :  { %11221 = vmatpush1.bf16.msra.mxu1 %v14713_v31 }
 0xc2d   :  { %11222 = vmatprep.subr.bf16.mxu1 %v14718_v54 }
 0xc30   :  { %11223 = vmatpush1.bf16.msra.mxu1 %v14716_v30 }
 0xc31   :  { %11224 = vmatprep.subr.bf16.mxu1 %v14721_v56 }
 0xc34   :  { %11225 = vmatpush1.bf16.msra.mxu1 %v14719_v34 }
 0xc35   :  { %11226 = vmatprep.subr.bf16.mxu1 %v14724_v17 }
 0xc38   :  { %v10718_v8 = vpop.f32.mrb[168].mxu0  ;;  %11227 = vmatpush1.bf16.msra.mxu1 %v14722_v23 }
 0xc39   :  { %v10727_v42 = vadd.f32 %v10718_v8, %v17544_v62  ;;  %v10720_v6 = vpop.f32.mrb[169].mxu0  ;;  %11228 = vmatprep.subr.bf16.mxu1 %v14727_v35  ;;  %v14743_v62 = vld [vmem:[#allocation17 + $0x70] sm:$0xff]  }
 0xc3a   :  { %v10728_v27 = vadd.f32 %v10720_v6, %v17547_v28  ;;  %v10722_v48 = vpop.f32.mrb[170].mxu0  ;;  %12723 = vmatprep.subr.bf16.mxu0 %v14743_v62  ;;  %v14746_v28 = vld [vmem:[#allocation17 + $0x38] sm:$0xff]  }
 0xc3b   :  { %v10753_v12 = vadd.f32 %v10742_v59, %v10727_v42  ;;  %v10723_v4 = vpop.f32.mrb[171].mxu0  ;;  %12724 = vmatpush3.bf16.msra.mxu0 %v14744_v52 }
 0xc3c   :  { %v10754_v18 = vadd.f32 %v10746_v61, %v10728_v27  ;;  %11229 = vmatpush1.bf16.msra.mxu1 %v14725_v32  ;;  %12725 = vmatprep.subr.bf16.mxu0 %v14745_v47 }
 0xc3d   :  { %v10757_v20 = vmax.f32 %v10753_v12, 0.0  ;;  %11230 = vmatprep.subr.bf16.mxu1 %v14730_v24 }
 0xc3e   :  { %v10758_v15 = vmax.f32 %v10754_v18, 0.0 }
 0xc3f   :  { %v10761_v1 = vpack.c.bf16 %v10757_v20, %v10757_v20  ;;  %12726 = vmatpush3.bf16.msra.mxu0 %v14746_v28 }
 0xc40   :  { %v10762_v13 = vpack.c.bf16 %v10758_v15, %v10758_v15  ;;  %11231 = vmatpush1.bf16.msra.mxu1 %v14728_v50 }
 0xc42   :  { %11232 = vmatprep.mubr.bf16.mxu1 %v10762_v13 }
 0xc43   :  { %11233 = vmatmul.mubr.bf16.vlgmr.msra.gmra.mrb[124].mxu1 %v10761_v1 }
 0xd16   :  { %v11234_v55 = vpop.f32.mrb[124].mxu1 }
 0xd17   :  { %v12917_v22 = vadd.f32 %v11234_v55, %v10832_v14  ;;  %v11236_v16 = vpop.f32.mrb[125].mxu1 }
 0xd18   :  { %v12918_v26 = vadd.f32 %v11236_v16, %v10836_v43  ;;  %v11238_v25 = vpop.f32.mrb[126].mxu1 }
 0xd19   :  { %v11241_v36 = vmax.f32 %v12917_v22, 0.0  ;;  %v11239_v39 = vpop.f32.mrb[127].mxu1 }
 0xd1a   :  { %v11242_v19 = vmax.f32 %v12918_v26, 0.0 }
 0xd1b   :  { %v11243_v9 = vpack.c.bf16 %v11241_v36, %v11241_v36 }
 0xd1c   :  { %v11244_v45 = vpack.c.bf16 %v11242_v19, %v11242_v19 }
 0xd1e   :  { %11412 = vmatprep.mubr.bf16.mxu0 %v11244_v45 }
 0xd1f   :  { %11413 = vmatmul.mubr.bf16.vlgmr.msra.gmra.mrb[172].mxu0 %v11243_v9 }
 0xdf2   :  { %v12727_v49 = vpop.f32.mrb[172].mxu0 }
 0xdf3   :  { %v12728_v3 = vpop.f32.mrb[173].mxu0 }
 0xdf4   :  { %v12729_v38 = vadd.f32 %v12728_v3, %v12727_v49  ;;  %v12730_v10 = vpop.f32.mrb[174].mxu0 }
 0xdf5   :  { %v12731_v2 = vpop.f32.mrb[175].mxu0 }
 0xdf6   :  { %v11415_v40 = vadd.f32 %v12729_v38, %v12644_v51 }
 0xdf8   :  { %11420 = vst [vmem:[#allocation20] sm:$0x3] %v11415_v40 }
 0xdf9   :  { %15380 = shalt.err (!%p15377_p0)
}
 0xdfa   :  { %s15381_s14 = scalar_lea.hbm %s17586_s11, 32 }
 0xdfb   :  { %p15382_p1 = scmp.ne.s32.totalorder %s17586_s11, %s15381_s14  ;;  %p15385_p2 = scmp.lt.u32.totalorder %s15381_s14, %s17586_s11 }
 0xdfd   :  { %p15387_p3 = pnand %p15385_p2, %p15382_p1 }
 0xdff   :  { %15390 = shalt.err (!%p15387_p3)
}
 0xe00   :  { %11430 = dma.vmem_to_hbm [thread:$0]  %s11428_s28, 32, %s17586_s11, [#allocation5]  }
 0xe01   :  { %15403 = dma.done.wait [#allocation5], 32  }
 0xe02   :  { %15404 = vsyncadd [#allocation5], 4294967264 }
 0xe03   :  { %11434 = vsyncpa [#allocation4], 1 }
 0xe04   :  { %11435 = vsyncpa [#allocation7], 1 }
 0xe05   :  { %11436 = vsyncpa [#allocation10], 1 }
 0xe06   :  { %11437 = vsyncpa [#allocation13], 1 }
 0xe07   :  { %11438 = vsyncpa [#allocation16], 1 }
 0xe08   :  { %11439 = vsyncpa [#allocation19], 1 }
 0xe09   :  { %11440 = vsyncpa [#allocation5], 1 }

</bundles_post_ra>
